<compile_context>
chip_gen: v6e
topology: v6e:2x2x1
jax: 0.10.0
libtpu: 0.0.40
codegen_flags: <defaults>
</compile_context>

<pallas_src>
import functools

import jax
import jax.numpy as jnp
from jax.experimental import pallas as pl
from jax.experimental.pallas import tpu as pltpu

# ------------------------- model hyper-parameters ---------------------------
C = 128            # feature_dim (h_dim_1d)
TOPIC = 16         # topic_dim
CONV_G = 4         # conv_groups
GCN_G = 8          # gcn_groups
WIDTH_GROUP = 4    # GCNeXt width_group
WIDTH = WIDTH_GROUP * GCN_G   # 32 (real GCN hidden width)
WPAD = 128         # GCN hidden zero-padded to full lane width
K_NN = 4           # k nearest topic neighbours
EPS = 1e-5         # BatchNorm eps


# ------------------------------ fused kernel --------------------------------
def _fused_forward_kernel(x_ref, temb_ref,
                          bb1w_ref, bb1b_ref, bbtw_ref, bbtb_ref,
                          t1w_ref, t1b_ref, t2w_ref, t2b_ref, t3w_ref, t3b_ref,
                          s1tw_ref, s1xw_ref, s1b_ref,
                          s2w_ref, s2b_ref, s3w_ref, s3b_ref,
                          o_ref, *, bt, t_len, s_tok, k):
    rows = bt * t_len          # folded activation rows in this grid step
    srows = bt * s_tok         # folded topic rows
    c_dim = x_ref.shape[-1]
    neg_big = jnp.float32(-1e30)

    # ---- hoisted index machinery (opt #4): built once per grid step --------
    t_idx = jax.lax.broadcasted_iota(jnp.int32, (t_len, 1), 0)        # 0..T-1
    t_idx_fold = jnp.concatenate([t_idx] * bt, axis=0)                # (rows, 1)
    mask_prev = t_idx_fold != 0              # row has a valid t-1 in its batch
    mask_next = t_idx_fold != (t_len - 1)    # row has a valid t+1 in its batch
    col_idx = jax.lax.broadcasted_iota(jnp.int32, (t_len, s_tok), 1)  # (T, S)

    # One-hot selector that broadcasts topic token s of batch b to batch-b's
    # T rows, for every s, with a single MXU push per layer:
    #   sel[s*rows + b*T + t, b*S + s] = 1
    b_idx = jnp.concatenate(
        [jnp.full((t_len, 1), b, jnp.int32) for b in range(bt)], axis=0)   # (rows, 1)
    c_iota = jax.lax.broadcasted_iota(jnp.int32, (rows, srows), 1)
    sel_bf = jnp.concatenate(
        [(c_iota == (b_idx * s_tok + s)).astype(jnp.bfloat16)
         for s in range(s_tok)], axis=0)                                    # (S*rows, srows)

    # ---------------------------- helpers ------------------------------------
    def mm(x, w_bf, b, relu=False):
        # bf16 MXU operands, f32 accumulation, f32 bias / relu epilogue.
        acc = jnp.dot(x.astype(jnp.bfloat16), w_bf,
                      preferred_element_type=jnp.float32) + b
        return jnp.maximum(acc, 0.0) if relu else acc

    def shift_prev(h):    # row r <- h[r-1] inside its own batch, else 0
        return jnp.where(mask_prev, pltpu.roll(h, shift=1, axis=0), 0.0)

    def shift_next(h):    # row r <- h[r+1] inside its own batch, else 0
        return jnp.where(mask_next, pltpu.roll(h, shift=rows - 1, axis=0), 0.0)

    def conv3(h, w_stacked, b, relu):
        # k=3, pad=1 temporal conv as three accumulated dots (opt #6);
        # boundary masks stop leakage across folded batch boundaries.
        cin = h.shape[-1]
        acc = jnp.dot(shift_prev(h).astype(jnp.bfloat16), w_stacked[0:cin],
                      preferred_element_type=jnp.float32)
        acc = acc + jnp.dot(h.astype(jnp.bfloat16), w_stacked[cin:2 * cin],
                            preferred_element_type=jnp.float32)
        acc = acc + jnp.dot(shift_next(h).astype(jnp.bfloat16),
                            w_stacked[2 * cin:3 * cin],
                            preferred_element_type=jnp.float32)
        acc = acc + b
        return jnp.maximum(acc, 0.0) if relu else acc

    # ------------------ backbones (all batches folded in M) ------------------
    xin = x_ref[...]                                                   # (rows, C)
    base = conv3(xin, bb1w_ref[...], bb1b_ref[...], relu=True)         # (rows, C)
    topicf = mm(temb_ref[...], bbtw_ref[...], bbtb_ref[...], relu=True)  # (srows, C)

    # ||t||^2 per topic token, exact f32, lane-major row vector (opt #5).
    topic_sq = topicf * topicf
    tt_row = jax.lax.dot_general(
        jnp.ones((8, c_dim), jnp.float32), topic_sq,
        dimension_numbers=(((1,), (1,)), ((), ())),
        preferred_element_type=jnp.float32)[0:1, :]                    # (1, srows)

    def topk_membership(score):
        # score (T, S) f32 -> (T, S) f32 {0,1}, exactly k ones per row.
        # Rank-based: no serial argmax chain (opt #3); ties -> lowest index.
        member = jnp.zeros((t_len, s_tok), jnp.float32)
        for j in range(s_tok):
            sj = score[:, j:j + 1]
            beat = (score > sj) | ((score == sj) & (col_idx < j))
            rank_j = jnp.sum(beat.astype(jnp.float32), axis=-1, keepdims=True)
            member = member + jnp.where((col_idx == j) & (rank_j < k), 1.0, 0.0)
        return member

    def semantic_max(g, layer):
        # opt #2: s1(concat([topic, x])) == topic @ W_t + x @ W_x + b.
        x_proj = mm(g, s1xw_ref[layer], s1b_ref[layer], relu=False)     # (rows, WPAD)
        topic_proj = jnp.dot(topicf.astype(jnp.bfloat16), s1tw_ref[layer],
                             preferred_element_type=jnp.float32)        # (srows, WPAD)
        topic_rows = jnp.dot(sel_bf, topic_proj.astype(jnp.bfloat16),
                             preferred_element_type=jnp.float32)        # (S*rows, WPAD)
        h = jnp.maximum(topic_rows + jnp.concatenate([x_proj] * s_tok, axis=0), 0.0)
        h = mm(h, s2w_ref[layer], s2b_ref[layer], relu=True)            # (S*rows, WPAD)
        h = mm(h, s3w_ref[layer], s3b_ref[layer], relu=False)           # (S*rows, C)

        # Per-batch (T, S) scores in f32 (ranking parity with the reference);
        # only this tiny part loops over the folded batches.
        members = []
        for b in range(bt):
            g_b = g[b * t_len:(b + 1) * t_len]                          # (T, C)
            topic_b = topicf[b * s_tok:(b + 1) * s_tok]                 # (S, C)
            inner = jax.lax.dot_general(
                g_b, topic_b, dimension_numbers=(((1,), (1,)), ((), ())),
                preferred_element_type=jnp.float32)                     # (T, S)
            # -||x-t||^2 ranking-equivalent score (||x||^2 dropped: row-const).
            score = 2.0 * inner - tt_row[:, b * s_tok:(b + 1) * s_tok]
            members.append(topk_membership(score))
        member = jnp.concatenate(members, axis=0)                       # (rows, S)

        # Masked max over the k selected topic tokens (== gather-then-max).
        smax = jnp.full((rows, c_dim), neg_big, jnp.float32)
        for s in range(s_tok):
            h_s = h[s * rows:(s + 1) * rows]
            smax = jnp.maximum(smax,
                               jnp.where(member[:, s:s + 1] > 0.5, h_s, neg_big))
        return smax

    # -------- two GCN layers, unrolled; activations stay in VMEM/vregs -------
    g = base
    for layer in range(2):
        hh = mm(g, t1w_ref[layer], t1b_ref[layer], relu=True)           # (rows, WPAD)
        hh = conv3(hh, t2w_ref[layer], t2b_ref[layer], relu=True)       # (rows, WPAD)
        tout = mm(hh, t3w_ref[layer], t3b_ref[layer], relu=False)       # (rows, C)
        smax = semantic_max(g, layer)
        g = jnp.maximum(tout + g + smax, 0.0)

    o_ref[...] = g + xin       # residual with the raw (pre-backbone) input


# ------------------------------ parameter setup -----------------------------
def grouped_to_dense(w, groups):
    # (Cout, Cin/groups, K) -> dense block-diagonal (Cout, Cin, K)
    cout, cin_pg, kt = w.shape
    cin = cin_pg * groups
    out_pg = cout // groups
    dense = jnp.zeros((cout, cin, kt), w.dtype)
    for g in range(groups):
        dense = dense.at[g * out_pg:(g + 1) * out_pg,
                         g * cin_pg:(g + 1) * cin_pg, :].set(
                             w[g * out_pg:(g + 1) * out_pg])
    return dense


def conv_w_to_mats(w_dense):
    # (Cout, Cin, K) -> list of K channels-last matrices (Cin, Cout)
    return [jnp.transpose(w_dense[:, :, j]) for j in range(w_dense.shape[2])]


def fold_bn(w_dense, b, gamma, beta, mean, var):
    scale = gamma / jnp.sqrt(var + EPS)
    return w_dense * scale[:, None, None], (b - mean) * scale + beta


def init_params(key):
    keys = iter(jax.random.split(key, 128))

    def nrm(shape, s=0.05):
        return jax.random.normal(next(keys), shape, jnp.float32) * s

    p = {}
    # backbone1: Conv1d(C, C, 3, groups=4) + BN + ReLU
    w = nrm((C, C // CONV_G, 3))
    b = nrm((C,))
    gamma, beta = 1.0 + nrm((C,)), nrm((C,))
    mean, var = nrm((C,)), jnp.abs(nrm((C,))) + 1.0
    wf, bf = fold_bn(grouped_to_dense(w, CONV_G), b, gamma, beta, mean, var)
    p['bb1_w'], p['bb1_b'] = conv_w_to_mats(wf), bf

    # backbone_topic: Conv1d(TOPIC, C, 1, groups=4) + BN + ReLU
    w = nrm((C, TOPIC // CONV_G, 1))
    b = nrm((C,))
    gamma, beta = 1.0 + nrm((C,)), nrm((C,))
    mean, var = nrm((C,)), jnp.abs(nrm((C,))) + 1.0
    wf, bf = fold_bn(grouped_to_dense(w, CONV_G), b, gamma, beta, mean, var)
    p['bbt_w'], p['bbt_b'] = conv_w_to_mats(wf)[0], bf

    def gcn_params():
        g = {}
        g['t1_w'] = jnp.transpose(nrm((WIDTH, C, 1))[:, :, 0])        # (C, W)
        g['t1_b'] = nrm((WIDTH,))
        g['t2_w'] = conv_w_to_mats(
            grouped_to_dense(nrm((WIDTH, WIDTH // GCN_G, 3)), GCN_G))  # 3x(W, W)
        g['t2_b'] = nrm((WIDTH,))
        g['t3_w'] = jnp.transpose(nrm((C, WIDTH, 1))[:, :, 0])        # (W, C)
        g['t3_b'] = nrm((C,))
        g['s1_w'] = jnp.transpose(nrm((WIDTH, 2 * C, 1))[:, :, 0])    # (2C, W)
        g['s1_b'] = nrm((WIDTH,))
        g['s2_w'] = jnp.transpose(
            grouped_to_dense(nrm((WIDTH, WIDTH // GCN_G, 1)), GCN_G)[:, :, 0])
        g['s2_b'] = nrm((WIDTH,))
        g['s3_w'] = jnp.transpose(nrm((C, WIDTH, 1))[:, :, 0])        # (W, C)
        g['s3_b'] = nrm((C,))
        return g

    p['gcn1'] = gcn_params()
    p['gcn2'] = gcn_params()
    return p


def _pad2(w, rows, cols):
    out = jnp.zeros((rows, cols), jnp.float32)
    return out.at[:w.shape[0], :w.shape[1]].set(w)


def _padb(b, cols):
    out = jnp.zeros((cols,), jnp.float32)
    return out.at[:b.shape[0]].set(b)


def pack_params(p):
    """Pack params into the fused-kernel layout: bf16 weights, stacked conv
    taps along K, s1 split into topic/x halves, 32->128 zero-padded GCN hidden,
    GCN layers stacked on axis 0."""
    kp = {}
    kp['bb1_w'] = jnp.concatenate(p['bb1_w'], axis=0).astype(jnp.bfloat16)  # (3C, C)
    kp['bb1_b'] = p['bb1_b'].reshape(1, C).astype(jnp.float32)
    kp['bbt_w'] = p['bbt_w'].astype(jnp.bfloat16)                           # (16, C)
    kp['bbt_b'] = p['bbt_b'].reshape(1, C).astype(jnp.float32)

    def per_layer(g):
        t2 = jnp.concatenate([_pad2(m, WPAD, WPAD) for m in g['t2_w']], axis=0)
        return dict(
            t1_w=_pad2(g['t1_w'], C, WPAD), t1_b=_padb(g['t1_b'], WPAD),
            t2_w=t2, t2_b=_padb(g['t2_b'], WPAD),
            t3_w=_pad2(g['t3_w'], WPAD, C), t3_b=g['t3_b'],
            s1t_w=_pad2(g['s1_w'][:C], C, WPAD),      # topic half of s1
            s1x_w=_pad2(g['s1_w'][C:], C, WPAD),      # x half of s1
            s1_b=_padb(g['s1_b'], WPAD),
            s2_w=_pad2(g['s2_w'], WPAD, WPAD), s2_b=_padb(g['s2_b'], WPAD),
            s3_w=_pad2(g['s3_w'], WPAD, C), s3_b=g['s3_b'],
        )

    l0, l1 = per_layer(p['gcn1']), per_layer(p['gcn2'])
    for name in l0:
        stacked = jnp.stack([l0[name], l1[name]], axis=0)
        if name.endswith('_b'):
            kp[name] = stacked.reshape(2, 1, -1).astype(jnp.float32)   # (2, 1, N)
        else:
            kp[name] = stacked.astype(jnp.bfloat16)                    # (2, K, N)
    return kp


_WEIGHT_ORDER = ['bb1_w', 'bb1_b', 'bbt_w', 'bbt_b',
                 't1_w', 't1_b', 't2_w', 't2_b', 't3_w', 't3_b',
                 's1t_w', 's1x_w', 's1_b', 's2_w', 's2_b', 's3_w', 's3_b']


def _zero_index(g, ndim):
    return (0,) * ndim


def _pick_batch_fold(bsz, max_fold=8):
    # Fatten the MXU M dim by folding batches, but keep >= 2 grid steps when
    # possible so v7x's two TensorCores both get work.
    target_steps = 2 if bsz >= 2 else 1
    best = 1
    for bt in range(1, min(bsz, max_fold) + 1):
        if bsz % bt == 0 and bsz // bt >= target_steps:
            best = bt
    return best


# --------------------------------- forward ----------------------------------
def snippet_shot_query_gcn(snip_features, topic_embedding, kp, k=K_NN,
                           batch_fold=None):
    """snip_features: (B, C, T) (PyTorch NCT); topic_embedding: (B, S, TOPIC)."""
    bsz, c, t = snip_features.shape
    s_tok, tdim = topic_embedding.shape[1], topic_embedding.shape[2]
    bt = _pick_batch_fold(bsz) if batch_fold is None else batch_fold
    assert bsz % bt == 0

    # NCT -> channels-last, then fold batch into the row axis (free reshape).
    # TODO(synk): at production sizes keep the surrounding model channels-last
    #   so these two transposes (full HBM round trips) disappear (review #12).
    x = jnp.transpose(snip_features, (0, 2, 1)).astype(jnp.float32)
    x = x.reshape(bsz * t, c)                                       # (B*T, C)
    temb = topic_embedding.astype(jnp.float32).reshape(bsz * s_tok, tdim)

    weights = [kp[n] for n in _WEIGHT_ORDER]
    in_specs = [
        pl.BlockSpec((bt * t, c), lambda g: (g, 0)),
        pl.BlockSpec((bt * s_tok, tdim), lambda g: (g, 0)),
    ] + [pl.BlockSpec(w.shape, functools.partial(_zero_index, ndim=w.ndim))
         for w in weights]

    out = pl.pallas_call(
        functools.partial(_fused_forward_kernel,
                          bt=bt, t_len=t, s_tok=s_tok, k=k),
        out_shape=jax.ShapeDtypeStruct((bsz * t, c), jnp.float32),
        grid=(bsz // bt,),
        in_specs=in_specs,
        out_specs=pl.BlockSpec((bt * t, c), lambda g: (g, 0)),
        compiler_params=pltpu.CompilerParams(
            dimension_semantics=("parallel",),        # shard grid over TCs (v7x)
            vmem_limit_bytes=48 * 1024 * 1024),       # explicit, safe on v7x 64MiB
    )(x, temb, *weights)

    return jnp.transpose(out.reshape(bsz, t, c), (0, 2, 1))   # back to (B, C, T)


# ----------------------------------- main ------------------------------------
if __name__ == "__main__":
    B, T, S = 4, 16, 8
    key = jax.random.PRNGKey(0)
    kparam, kx, ktop = jax.random.split(key, 3)
    params = pack_params(init_params(kparam))
    snip = jax.random.normal(kx, (B, C, T), jnp.float32)
    topic = jax.random.normal(ktop, (B, S, TOPIC), jnp.float32)

    fwd = jax.jit(functools.partial(snippet_shot_query_gcn, kp=params))
    out = fwd(snip, topic)
    jax.block_until_ready(out)
    assert out.shape == (B, C, T) and out.dtype == jnp.float32
    assert bool(jnp.all(jnp.isfinite(out)))
    print("KERNEL_OK")
</pallas_src>

<mosaic_0001>
module attributes {stable_mosaic.version = 11 : i64} {
  func.func @_fused_forward_kernel(%arg0: i32, %arg1: memref<32x128xf32, #tpu.memory_space<vmem>>, %arg2: memref<16x16xf32, #tpu.memory_space<vmem>>, %arg3: memref<384x128xbf16, #tpu.memory_space<vmem>>, %arg4: memref<1x128xf32, #tpu.memory_space<vmem>>, %arg5: memref<16x128xbf16, #tpu.memory_space<vmem>>, %arg6: memref<1x128xf32, #tpu.memory_space<vmem>>, %arg7: memref<2x128x128xbf16, #tpu.memory_space<vmem>>, %arg8: memref<2x1x128xf32, #tpu.memory_space<vmem>>, %arg9: memref<2x384x128xbf16, #tpu.memory_space<vmem>>, %arg10: memref<2x1x128xf32, #tpu.memory_space<vmem>>, %arg11: memref<2x128x128xbf16, #tpu.memory_space<vmem>>, %arg12: memref<2x1x128xf32, #tpu.memory_space<vmem>>, %arg13: memref<2x128x128xbf16, #tpu.memory_space<vmem>>, %arg14: memref<2x128x128xbf16, #tpu.memory_space<vmem>>, %arg15: memref<2x1x128xf32, #tpu.memory_space<vmem>>, %arg16: memref<2x128x128xbf16, #tpu.memory_space<vmem>>, %arg17: memref<2x1x128xf32, #tpu.memory_space<vmem>>, %arg18: memref<2x128x128xbf16, #tpu.memory_space<vmem>>, %arg19: memref<2x1x128xf32, #tpu.memory_space<vmem>>, %arg20: memref<32x128xf32, #tpu.memory_space<vmem>>) attributes {dimension_semantics = [#tpu.dimension_semantics<parallel>], iteration_bounds = array<i64: 2>, scalar_prefetch = 0 : i64, scratch_operands = 0 : i64, tpu.core_type = #tpu.core_type<tc>, window_params = [{transform_indices = @transform_0, window_bounds = array<i64: 32, 128>}, {transform_indices = @transform_1, window_bounds = array<i64: 16, 16>}, {pipeline_mode = #tpu.pipeline_mode<synchronous>, transform_indices = @transform_2, window_bounds = array<i64: 384, 128>}, {pipeline_mode = #tpu.pipeline_mode<synchronous>, transform_indices = @transform_3, window_bounds = array<i64: 1, 128>}, {pipeline_mode = #tpu.pipeline_mode<synchronous>, transform_indices = @transform_4, window_bounds = array<i64: 16, 128>}, {pipeline_mode = #tpu.pipeline_mode<synchronous>, transform_indices = @transform_5, window_bounds = array<i64: 1, 128>}, {pipeline_mode = #tpu.pipeline_mode<synchronous>, transform_indices = @transform_6, window_bounds = array<i64: 2, 128, 128>}, {pipeline_mode = #tpu.pipeline_mode<synchronous>, transform_indices = @transform_7, window_bounds = array<i64: 2, 1, 128>}, {pipeline_mode = #tpu.pipeline_mode<synchronous>, transform_indices = @transform_8, window_bounds = array<i64: 2, 384, 128>}, {pipeline_mode = #tpu.pipeline_mode<synchronous>, transform_indices = @transform_9, window_bounds = array<i64: 2, 1, 128>}, {pipeline_mode = #tpu.pipeline_mode<synchronous>, transform_indices = @transform_10, window_bounds = array<i64: 2, 128, 128>}, {pipeline_mode = #tpu.pipeline_mode<synchronous>, transform_indices = @transform_11, window_bounds = array<i64: 2, 1, 128>}, {pipeline_mode = #tpu.pipeline_mode<synchronous>, transform_indices = @transform_12, window_bounds = array<i64: 2, 128, 128>}, {pipeline_mode = #tpu.pipeline_mode<synchronous>, transform_indices = @transform_13, window_bounds = array<i64: 2, 128, 128>}, {pipeline_mode = #tpu.pipeline_mode<synchronous>, transform_indices = @transform_14, window_bounds = array<i64: 2, 1, 128>}, {pipeline_mode = #tpu.pipeline_mode<synchronous>, transform_indices = @transform_15, window_bounds = array<i64: 2, 128, 128>}, {pipeline_mode = #tpu.pipeline_mode<synchronous>, transform_indices = @transform_16, window_bounds = array<i64: 2, 1, 128>}, {pipeline_mode = #tpu.pipeline_mode<synchronous>, transform_indices = @transform_17, window_bounds = array<i64: 2, 128, 128>}, {pipeline_mode = #tpu.pipeline_mode<synchronous>, transform_indices = @transform_18, window_bounds = array<i64: 2, 1, 128>}, {transform_indices = @transform_19, window_bounds = array<i64: 32, 128>}]} {
    %0 = tpu.iota {dimensions = array<i32: 0>} : vector<16x1xi32>
    %1 = tpu.concatenate %0, %0 in 0 : vector<16x1xi32>, vector<16x1xi32> -> vector<32x1xi32>
    %c0_i32 = arith.constant 0 : i32
    %2 = vector.broadcast %c0_i32 : i32 to vector<32x1xi32>
    %3 = arith.cmpi ne, %1, %2 : vector<32x1xi32>
    %c15_i32 = arith.constant 15 : i32
    %4 = vector.broadcast %c15_i32 : i32 to vector<32x1xi32>
    %5 = arith.cmpi ne, %1, %4 : vector<32x1xi32>
    %6 = tpu.iota {dimensions = array<i32: 1>} : vector<16x8xi32>
    %c0_i32_0 = arith.constant 0 : i32
    %7 = vector.broadcast %c0_i32_0 : i32 to vector<16x1xi32>
    %c1_i32 = arith.constant 1 : i32
    %8 = vector.broadcast %c1_i32 : i32 to vector<16x1xi32>
    %9 = tpu.concatenate %7, %8 in 0 : vector<16x1xi32>, vector<16x1xi32> -> vector<32x1xi32>
    %10 = tpu.iota {dimensions = array<i32: 1>} : vector<32x16xi32>
    %c8_i32 = arith.constant 8 : i32
    %11 = vector.broadcast %c8_i32 : i32 to vector<32x1xi32>
    %12 = arith.muli %9, %11 : vector<32x1xi32>
    %c0_i32_1 = arith.constant 0 : i32
    %13 = vector.broadcast %c0_i32_1 : i32 to vector<32x1xi32>
    %14 = arith.addi %12, %13 : vector<32x1xi32>
    %15 = vector.broadcast %14 : vector<32x1xi32> to vector<32x16xi32>
    %16 = arith.cmpi eq, %10, %15 : vector<32x16xi32>
    %17 = arith.extui %16 : vector<32x16xi1> to vector<32x16xi32>
    %18 = arith.sitofp %17 : vector<32x16xi32> to vector<32x16xf32>
    %19 = arith.truncf %18 : vector<32x16xf32> to vector<32x16xbf16>
    %c8_i32_2 = arith.constant 8 : i32
    %20 = vector.broadcast %c8_i32_2 : i32 to vector<32x1xi32>
    %21 = arith.muli %9, %20 : vector<32x1xi32>
    %c1_i32_3 = arith.constant 1 : i32
    %22 = vector.broadcast %c1_i32_3 : i32 to vector<32x1xi32>
    %23 = arith.addi %21, %22 : vector<32x1xi32>
    %24 = vector.broadcast %23 : vector<32x1xi32> to vector<32x16xi32>
    %25 = arith.cmpi eq, %10, %24 : vector<32x16xi32>
    %26 = arith.extui %25 : vector<32x16xi1> to vector<32x16xi32>
    %27 = arith.sitofp %26 : vector<32x16xi32> to vector<32x16xf32>
    %28 = arith.truncf %27 : vector<32x16xf32> to vector<32x16xbf16>
    %c8_i32_4 = arith.constant 8 : i32
    %29 = vector.broadcast %c8_i32_4 : i32 to vector<32x1xi32>
    %30 = arith.muli %9, %29 : vector<32x1xi32>
    %c2_i32 = arith.constant 2 : i32
    %31 = vector.broadcast %c2_i32 : i32 to vector<32x1xi32>
    %32 = arith.addi %30, %31 : vector<32x1xi32>
    %33 = vector.broadcast %32 : vector<32x1xi32> to vector<32x16xi32>
    %34 = arith.cmpi eq, %10, %33 : vector<32x16xi32>
    %35 = arith.extui %34 : vector<32x16xi1> to vector<32x16xi32>
    %36 = arith.sitofp %35 : vector<32x16xi32> to vector<32x16xf32>
    %37 = arith.truncf %36 : vector<32x16xf32> to vector<32x16xbf16>
    %c8_i32_5 = arith.constant 8 : i32
    %38 = vector.broadcast %c8_i32_5 : i32 to vector<32x1xi32>
    %39 = arith.muli %9, %38 : vector<32x1xi32>
    %c3_i32 = arith.constant 3 : i32
    %40 = vector.broadcast %c3_i32 : i32 to vector<32x1xi32>
    %41 = arith.addi %39, %40 : vector<32x1xi32>
    %42 = vector.broadcast %41 : vector<32x1xi32> to vector<32x16xi32>
    %43 = arith.cmpi eq, %10, %42 : vector<32x16xi32>
    %44 = arith.extui %43 : vector<32x16xi1> to vector<32x16xi32>
    %45 = arith.sitofp %44 : vector<32x16xi32> to vector<32x16xf32>
    %46 = arith.truncf %45 : vector<32x16xf32> to vector<32x16xbf16>
    %c8_i32_6 = arith.constant 8 : i32
    %47 = vector.broadcast %c8_i32_6 : i32 to vector<32x1xi32>
    %48 = arith.muli %9, %47 : vector<32x1xi32>
    %c4_i32 = arith.constant 4 : i32
    %49 = vector.broadcast %c4_i32 : i32 to vector<32x1xi32>
    %50 = arith.addi %48, %49 : vector<32x1xi32>
    %51 = vector.broadcast %50 : vector<32x1xi32> to vector<32x16xi32>
    %52 = arith.cmpi eq, %10, %51 : vector<32x16xi32>
    %53 = arith.extui %52 : vector<32x16xi1> to vector<32x16xi32>
    %54 = arith.sitofp %53 : vector<32x16xi32> to vector<32x16xf32>
    %55 = arith.truncf %54 : vector<32x16xf32> to vector<32x16xbf16>
    %c8_i32_7 = arith.constant 8 : i32
    %56 = vector.broadcast %c8_i32_7 : i32 to vector<32x1xi32>
    %57 = arith.muli %9, %56 : vector<32x1xi32>
    %c5_i32 = arith.constant 5 : i32
    %58 = vector.broadcast %c5_i32 : i32 to vector<32x1xi32>
    %59 = arith.addi %57, %58 : vector<32x1xi32>
    %60 = vector.broadcast %59 : vector<32x1xi32> to vector<32x16xi32>
    %61 = arith.cmpi eq, %10, %60 : vector<32x16xi32>
    %62 = arith.extui %61 : vector<32x16xi1> to vector<32x16xi32>
    %63 = arith.sitofp %62 : vector<32x16xi32> to vector<32x16xf32>
    %64 = arith.truncf %63 : vector<32x16xf32> to vector<32x16xbf16>
    %c8_i32_8 = arith.constant 8 : i32
    %65 = vector.broadcast %c8_i32_8 : i32 to vector<32x1xi32>
    %66 = arith.muli %9, %65 : vector<32x1xi32>
    %c6_i32 = arith.constant 6 : i32
    %67 = vector.broadcast %c6_i32 : i32 to vector<32x1xi32>
    %68 = arith.addi %66, %67 : vector<32x1xi32>
    %69 = vector.broadcast %68 : vector<32x1xi32> to vector<32x16xi32>
    %70 = arith.cmpi eq, %10, %69 : vector<32x16xi32>
    %71 = arith.extui %70 : vector<32x16xi1> to vector<32x16xi32>
    %72 = arith.sitofp %71 : vector<32x16xi32> to vector<32x16xf32>
    %73 = arith.truncf %72 : vector<32x16xf32> to vector<32x16xbf16>
    %c8_i32_9 = arith.constant 8 : i32
    %74 = vector.broadcast %c8_i32_9 : i32 to vector<32x1xi32>
    %75 = arith.muli %9, %74 : vector<32x1xi32>
    %c7_i32 = arith.constant 7 : i32
    %76 = vector.broadcast %c7_i32 : i32 to vector<32x1xi32>
    %77 = arith.addi %75, %76 : vector<32x1xi32>
    %78 = vector.broadcast %77 : vector<32x1xi32> to vector<32x16xi32>
    %79 = arith.cmpi eq, %10, %78 : vector<32x16xi32>
    %80 = arith.extui %79 : vector<32x16xi1> to vector<32x16xi32>
    %81 = arith.sitofp %80 : vector<32x16xi32> to vector<32x16xf32>
    %82 = arith.truncf %81 : vector<32x16xf32> to vector<32x16xbf16>
    %83 = tpu.concatenate %19, %28, %37, %46, %55, %64, %73, %82 in 0 : vector<32x16xbf16>, vector<32x16xbf16>, vector<32x16xbf16>, vector<32x16xbf16>, vector<32x16xbf16>, vector<32x16xbf16>, vector<32x16xbf16>, vector<32x16xbf16> -> vector<256x16xbf16>
    %c0 = arith.constant 0 : index
    %c0_10 = arith.constant 0 : index
    %84 = vector.load %arg1[%c0, %c0_10] : memref<32x128xf32, #tpu.memory_space<vmem>>, vector<32x128xf32>
    %c0_11 = arith.constant 0 : index
    %c0_12 = arith.constant 0 : index
    %85 = vector.load %arg3[%c0_11, %c0_12] : memref<384x128xbf16, #tpu.memory_space<vmem>>, vector<384x128xbf16>
    %c0_13 = arith.constant 0 : index
    %c0_14 = arith.constant 0 : index
    %86 = vector.load %arg4[%c0_13, %c0_14] : memref<1x128xf32, #tpu.memory_space<vmem>>, vector<1x128xf32>
    %c1_i32_15 = arith.constant 1 : i32
    %87 = tpu.dynamic_rotate %84 by %c1_i32_15 dim 0 : vector<32x128xf32>, i32 -> vector<32x128xf32>
    %cst = arith.constant 0.000000e+00 : f32
    %88 = vector.shape_cast %3 : vector<32x1xi1> to vector<32x1xi1>
    %89 = vector.broadcast %88 : vector<32x1xi1> to vector<32x128xi1>
    %90 = vector.broadcast %cst : f32 to vector<32x128xf32>
    %91 = arith.select %89, %87, %90 : vector<32x128xi1>, vector<32x128xf32>
    %92 = arith.truncf %91 : vector<32x128xf32> to vector<32x128xbf16>
    %93 = vector.extract_strided_slice %85 {offsets = [0, 0], sizes = [128, 128], strides = [1, 1]} : vector<384x128xbf16> to vector<128x128xbf16>
    %cst_16 = arith.constant dense<0.000000e+00> : vector<32x128xf32>
    %94 = tpu.matmul %92, %93, %cst_16 {dimension_numbers = #tpu.dot_dimension_numbers<[1], [0], [0], [1], [0, 0, 1, 1], [], []>} : vector<32x128xbf16>, vector<128x128xbf16>, vector<32x128xf32> -> vector<32x128xf32>
    %95 = arith.truncf %84 : vector<32x128xf32> to vector<32x128xbf16>
    %96 = vector.extract_strided_slice %85 {offsets = [128, 0], sizes = [128, 128], strides = [1, 1]} : vector<384x128xbf16> to vector<128x128xbf16>
    %cst_17 = arith.constant dense<0.000000e+00> : vector<32x128xf32>
    %97 = tpu.matmul %95, %96, %cst_17 {dimension_numbers = #tpu.dot_dimension_numbers<[1], [0], [0], [1], [0, 0, 1, 1], [], []>} : vector<32x128xbf16>, vector<128x128xbf16>, vector<32x128xf32> -> vector<32x128xf32>
    %98 = arith.addf %94, %97 : vector<32x128xf32>
    %c31_i32 = arith.constant 31 : i32
    %99 = tpu.dynamic_rotate %84 by %c31_i32 dim 0 : vector<32x128xf32>, i32 -> vector<32x128xf32>
    %cst_18 = arith.constant 0.000000e+00 : f32
    %100 = vector.shape_cast %5 : vector<32x1xi1> to vector<32x1xi1>
    %101 = vector.broadcast %100 : vector<32x1xi1> to vector<32x128xi1>
    %102 = vector.broadcast %cst_18 : f32 to vector<32x128xf32>
    %103 = arith.select %101, %99, %102 : vector<32x128xi1>, vector<32x128xf32>
    %104 = arith.truncf %103 : vector<32x128xf32> to vector<32x128xbf16>
    %105 = vector.extract_strided_slice %85 {offsets = [256, 0], sizes = [128, 128], strides = [1, 1]} : vector<384x128xbf16> to vector<128x128xbf16>
    %cst_19 = arith.constant dense<0.000000e+00> : vector<32x128xf32>
    %106 = tpu.matmul %104, %105, %cst_19 {dimension_numbers = #tpu.dot_dimension_numbers<[1], [0], [0], [1], [0, 0, 1, 1], [], []>} : vector<32x128xbf16>, vector<128x128xbf16>, vector<32x128xf32> -> vector<32x128xf32>
    %107 = arith.addf %98, %106 : vector<32x128xf32>
    %108 = vector.broadcast %86 : vector<1x128xf32> to vector<32x128xf32>
    %109 = arith.addf %107, %108 : vector<32x128xf32>
    %cst_20 = arith.constant 0.000000e+00 : f32
    %110 = vector.broadcast %cst_20 : f32 to vector<32x128xf32>
    %111 = arith.maximumf %109, %110 : vector<32x128xf32>
    %c0_21 = arith.constant 0 : index
    %c0_22 = arith.constant 0 : index
    %112 = vector.load %arg2[%c0_21, %c0_22] : memref<16x16xf32, #tpu.memory_space<vmem>>, vector<16x16xf32>
    %c0_23 = arith.constant 0 : index
    %c0_24 = arith.constant 0 : index
    %113 = vector.load %arg5[%c0_23, %c0_24] : memref<16x128xbf16, #tpu.memory_space<vmem>>, vector<16x128xbf16>
    %c0_25 = arith.constant 0 : index
    %c0_26 = arith.constant 0 : index
    %114 = vector.load %arg6[%c0_25, %c0_26] : memref<1x128xf32, #tpu.memory_space<vmem>>, vector<1x128xf32>
    %115 = arith.truncf %112 : vector<16x16xf32> to vector<16x16xbf16>
    %cst_27 = arith.constant dense<0.000000e+00> : vector<16x128xf32>
    %116 = tpu.matmul %115, %113, %cst_27 {dimension_numbers = #tpu.dot_dimension_numbers<[1], [0], [0], [1], [0, 0, 1, 1], [], []>} : vector<16x16xbf16>, vector<16x128xbf16>, vector<16x128xf32> -> vector<16x128xf32>
    %117 = vector.broadcast %114 : vector<1x128xf32> to vector<16x128xf32>
    %118 = arith.addf %116, %117 : vector<16x128xf32>
    %cst_28 = arith.constant 0.000000e+00 : f32
    %119 = vector.broadcast %cst_28 : f32 to vector<16x128xf32>
    %120 = arith.maximumf %118, %119 : vector<16x128xf32>
    %121 = arith.mulf %120, %120 : vector<16x128xf32>
    %cst_29 = arith.constant 1.000000e+00 : f32
    %122 = vector.broadcast %cst_29 : f32 to vector<8x128xf32>
    %cst_30 = arith.constant dense<0.000000e+00> : vector<8x16xf32>
    %123 = tpu.matmul %122, %121, %cst_30 {dimension_numbers = #tpu.dot_dimension_numbers<[1], [1], [0], [0], [0, 0, 1, 0], [], []>} : vector<8x128xf32>, vector<16x128xf32>, vector<8x16xf32> -> vector<8x16xf32>
    %124 = vector.extract_strided_slice %123 {offsets = [0, 0], sizes = [1, 16], strides = [1, 1]} : vector<8x16xf32> to vector<1x16xf32>
    %c0_31 = arith.constant 0 : index
    %c0_32 = arith.constant 0 : index
    %c0_33 = arith.constant 0 : index
    %125 = vector.load %arg7[%c0_31, %c0_32, %c0_33] : memref<2x128x128xbf16, #tpu.memory_space<vmem>>, vector<1x128x128xbf16>
    %126 = vector.shape_cast %125 : vector<1x128x128xbf16> to vector<128x128xbf16>
    %c0_34 = arith.constant 0 : index
    %c0_35 = arith.constant 0 : index
    %c0_36 = arith.constant 0 : index
    %127 = vector.load %arg8[%c0_34, %c0_35, %c0_36] : memref<2x1x128xf32, #tpu.memory_space<vmem>>, vector<1x1x128xf32>
    %128 = vector.shape_cast %127 : vector<1x1x128xf32> to vector<1x128xf32>
    %129 = arith.truncf %111 : vector<32x128xf32> to vector<32x128xbf16>
    %cst_37 = arith.constant dense<0.000000e+00> : vector<32x128xf32>
    %130 = tpu.matmul %129, %126, %cst_37 {dimension_numbers = #tpu.dot_dimension_numbers<[1], [0], [0], [1], [0, 0, 1, 1], [], []>} : vector<32x128xbf16>, vector<128x128xbf16>, vector<32x128xf32> -> vector<32x128xf32>
    %131 = vector.broadcast %128 : vector<1x128xf32> to vector<32x128xf32>
    %132 = arith.addf %130, %131 : vector<32x128xf32>
    %cst_38 = arith.constant 0.000000e+00 : f32
    %133 = vector.broadcast %cst_38 : f32 to vector<32x128xf32>
    %134 = arith.maximumf %132, %133 : vector<32x128xf32>
    %c0_39 = arith.constant 0 : index
    %c0_40 = arith.constant 0 : index
    %c0_41 = arith.constant 0 : index
    %135 = vector.load %arg9[%c0_39, %c0_40, %c0_41] : memref<2x384x128xbf16, #tpu.memory_space<vmem>>, vector<1x384x128xbf16>
    %136 = vector.shape_cast %135 : vector<1x384x128xbf16> to vector<384x128xbf16>
    %c0_42 = arith.constant 0 : index
    %c0_43 = arith.constant 0 : index
    %c0_44 = arith.constant 0 : index
    %137 = vector.load %arg10[%c0_42, %c0_43, %c0_44] : memref<2x1x128xf32, #tpu.memory_space<vmem>>, vector<1x1x128xf32>
    %138 = vector.shape_cast %137 : vector<1x1x128xf32> to vector<1x128xf32>
    %c1_i32_45 = arith.constant 1 : i32
    %139 = tpu.dynamic_rotate %134 by %c1_i32_45 dim 0 : vector<32x128xf32>, i32 -> vector<32x128xf32>
    %cst_46 = arith.constant 0.000000e+00 : f32
    %140 = vector.shape_cast %3 : vector<32x1xi1> to vector<32x1xi1>
    %141 = vector.broadcast %140 : vector<32x1xi1> to vector<32x128xi1>
    %142 = vector.broadcast %cst_46 : f32 to vector<32x128xf32>
    %143 = arith.select %141, %139, %142 : vector<32x128xi1>, vector<32x128xf32>
    %144 = arith.truncf %143 : vector<32x128xf32> to vector<32x128xbf16>
    %145 = vector.extract_strided_slice %136 {offsets = [0, 0], sizes = [128, 128], strides = [1, 1]} : vector<384x128xbf16> to vector<128x128xbf16>
    %cst_47 = arith.constant dense<0.000000e+00> : vector<32x128xf32>
    %146 = tpu.matmul %144, %145, %cst_47 {dimension_numbers = #tpu.dot_dimension_numbers<[1], [0], [0], [1], [0, 0, 1, 1], [], []>} : vector<32x128xbf16>, vector<128x128xbf16>, vector<32x128xf32> -> vector<32x128xf32>
    %147 = arith.truncf %134 : vector<32x128xf32> to vector<32x128xbf16>
    %148 = vector.extract_strided_slice %136 {offsets = [128, 0], sizes = [128, 128], strides = [1, 1]} : vector<384x128xbf16> to vector<128x128xbf16>
    %cst_48 = arith.constant dense<0.000000e+00> : vector<32x128xf32>
    %149 = tpu.matmul %147, %148, %cst_48 {dimension_numbers = #tpu.dot_dimension_numbers<[1], [0], [0], [1], [0, 0, 1, 1], [], []>} : vector<32x128xbf16>, vector<128x128xbf16>, vector<32x128xf32> -> vector<32x128xf32>
    %150 = arith.addf %146, %149 : vector<32x128xf32>
    %c31_i32_49 = arith.constant 31 : i32
    %151 = tpu.dynamic_rotate %134 by %c31_i32_49 dim 0 : vector<32x128xf32>, i32 -> vector<32x128xf32>
    %cst_50 = arith.constant 0.000000e+00 : f32
    %152 = vector.shape_cast %5 : vector<32x1xi1> to vector<32x1xi1>
    %153 = vector.broadcast %152 : vector<32x1xi1> to vector<32x128xi1>
    %154 = vector.broadcast %cst_50 : f32 to vector<32x128xf32>
    %155 = arith.select %153, %151, %154 : vector<32x128xi1>, vector<32x128xf32>
    %156 = arith.truncf %155 : vector<32x128xf32> to vector<32x128xbf16>
    %157 = vector.extract_strided_slice %136 {offsets = [256, 0], sizes = [128, 128], strides = [1, 1]} : vector<384x128xbf16> to vector<128x128xbf16>
    %cst_51 = arith.constant dense<0.000000e+00> : vector<32x128xf32>
    %158 = tpu.matmul %156, %157, %cst_51 {dimension_numbers = #tpu.dot_dimension_numbers<[1], [0], [0], [1], [0, 0, 1, 1], [], []>} : vector<32x128xbf16>, vector<128x128xbf16>, vector<32x128xf32> -> vector<32x128xf32>
    %159 = arith.addf %150, %158 : vector<32x128xf32>
    %160 = vector.broadcast %138 : vector<1x128xf32> to vector<32x128xf32>
    %161 = arith.addf %159, %160 : vector<32x128xf32>
    %cst_52 = arith.constant 0.000000e+00 : f32
    %162 = vector.broadcast %cst_52 : f32 to vector<32x128xf32>
    %163 = arith.maximumf %161, %162 : vector<32x128xf32>
    %c0_53 = arith.constant 0 : index
    %c0_54 = arith.constant 0 : index
    %c0_55 = arith.constant 0 : index
    %164 = vector.load %arg11[%c0_53, %c0_54, %c0_55] : memref<2x128x128xbf16, #tpu.memory_space<vmem>>, vector<1x128x128xbf16>
    %165 = vector.shape_cast %164 : vector<1x128x128xbf16> to vector<128x128xbf16>
    %c0_56 = arith.constant 0 : index
    %c0_57 = arith.constant 0 : index
    %c0_58 = arith.constant 0 : index
    %166 = vector.load %arg12[%c0_56, %c0_57, %c0_58] : memref<2x1x128xf32, #tpu.memory_space<vmem>>, vector<1x1x128xf32>
    %167 = vector.shape_cast %166 : vector<1x1x128xf32> to vector<1x128xf32>
    %168 = arith.truncf %163 : vector<32x128xf32> to vector<32x128xbf16>
    %cst_59 = arith.constant dense<0.000000e+00> : vector<32x128xf32>
    %169 = tpu.matmul %168, %165, %cst_59 {dimension_numbers = #tpu.dot_dimension_numbers<[1], [0], [0], [1], [0, 0, 1, 1], [], []>} : vector<32x128xbf16>, vector<128x128xbf16>, vector<32x128xf32> -> vector<32x128xf32>
    %170 = vector.broadcast %167 : vector<1x128xf32> to vector<32x128xf32>
    %171 = arith.addf %169, %170 : vector<32x128xf32>
    %c0_60 = arith.constant 0 : index
    %c0_61 = arith.constant 0 : index
    %c0_62 = arith.constant 0 : index
    %172 = vector.load %arg14[%c0_60, %c0_61, %c0_62] : memref<2x128x128xbf16, #tpu.memory_space<vmem>>, vector<1x128x128xbf16>
    %173 = vector.shape_cast %172 : vector<1x128x128xbf16> to vector<128x128xbf16>
    %c0_63 = arith.constant 0 : index
    %c0_64 = arith.constant 0 : index
    %c0_65 = arith.constant 0 : index
    %174 = vector.load %arg15[%c0_63, %c0_64, %c0_65] : memref<2x1x128xf32, #tpu.memory_space<vmem>>, vector<1x1x128xf32>
    %175 = vector.shape_cast %174 : vector<1x1x128xf32> to vector<1x128xf32>
    %176 = arith.truncf %111 : vector<32x128xf32> to vector<32x128xbf16>
    %cst_66 = arith.constant dense<0.000000e+00> : vector<32x128xf32>
    %177 = tpu.matmul %176, %173, %cst_66 {dimension_numbers = #tpu.dot_dimension_numbers<[1], [0], [0], [1], [0, 0, 1, 1], [], []>} : vector<32x128xbf16>, vector<128x128xbf16>, vector<32x128xf32> -> vector<32x128xf32>
    %178 = vector.broadcast %175 : vector<1x128xf32> to vector<32x128xf32>
    %179 = arith.addf %177, %178 : vector<32x128xf32>
    %180 = arith.truncf %120 : vector<16x128xf32> to vector<16x128xbf16>
    %c0_67 = arith.constant 0 : index
    %c0_68 = arith.constant 0 : index
    %c0_69 = arith.constant 0 : index
    %181 = vector.load %arg13[%c0_67, %c0_68, %c0_69] : memref<2x128x128xbf16, #tpu.memory_space<vmem>>, vector<1x128x128xbf16>
    %182 = vector.shape_cast %181 : vector<1x128x128xbf16> to vector<128x128xbf16>
    %cst_70 = arith.constant dense<0.000000e+00> : vector<16x128xf32>
    %183 = tpu.matmul %180, %182, %cst_70 {dimension_numbers = #tpu.dot_dimension_numbers<[1], [0], [0], [1], [0, 0, 1, 1], [], []>} : vector<16x128xbf16>, vector<128x128xbf16>, vector<16x128xf32> -> vector<16x128xf32>
    %184 = arith.truncf %183 : vector<16x128xf32> to vector<16x128xbf16>
    %cst_71 = arith.constant dense<0.000000e+00> : vector<256x128xf32>
    %185 = tpu.matmul %83, %184, %cst_71 {dimension_numbers = #tpu.dot_dimension_numbers<[1], [0], [0], [1], [0, 0, 1, 1], [], []>} : vector<256x16xbf16>, vector<16x128xbf16>, vector<256x128xf32> -> vector<256x128xf32>
    %186 = tpu.concatenate %179, %179, %179, %179, %179, %179, %179, %179 in 0 : vector<32x128xf32>, vector<32x128xf32>, vector<32x128xf32>, vector<32x128xf32>, vector<32x128xf32>, vector<32x128xf32>, vector<32x128xf32>, vector<32x128xf32> -> vector<256x128xf32>
    %187 = arith.addf %185, %186 : vector<256x128xf32>
    %cst_72 = arith.constant 0.000000e+00 : f32
    %188 = vector.broadcast %cst_72 : f32 to vector<256x128xf32>
    %189 = arith.maximumf %187, %188 : vector<256x128xf32>
    %c0_73 = arith.constant 0 : index
    %c0_74 = arith.constant 0 : index
    %c0_75 = arith.constant 0 : index
    %190 = vector.load %arg16[%c0_73, %c0_74, %c0_75] : memref<2x128x128xbf16, #tpu.memory_space<vmem>>, vector<1x128x128xbf16>
    %191 = vector.shape_cast %190 : vector<1x128x128xbf16> to vector<128x128xbf16>
    %c0_76 = arith.constant 0 : index
    %c0_77 = arith.constant 0 : index
    %c0_78 = arith.constant 0 : index
    %192 = vector.load %arg17[%c0_76, %c0_77, %c0_78] : memref<2x1x128xf32, #tpu.memory_space<vmem>>, vector<1x1x128xf32>
    %193 = vector.shape_cast %192 : vector<1x1x128xf32> to vector<1x128xf32>
    %194 = arith.truncf %189 : vector<256x128xf32> to vector<256x128xbf16>
    %cst_79 = arith.constant dense<0.000000e+00> : vector<256x128xf32>
    %195 = tpu.matmul %194, %191, %cst_79 {dimension_numbers = #tpu.dot_dimension_numbers<[1], [0], [0], [1], [0, 0, 1, 1], [], []>} : vector<256x128xbf16>, vector<128x128xbf16>, vector<256x128xf32> -> vector<256x128xf32>
    %196 = vector.broadcast %193 : vector<1x128xf32> to vector<256x128xf32>
    %197 = arith.addf %195, %196 : vector<256x128xf32>
    %cst_80 = arith.constant 0.000000e+00 : f32
    %198 = vector.broadcast %cst_80 : f32 to vector<256x128xf32>
    %199 = arith.maximumf %197, %198 : vector<256x128xf32>
    %c0_81 = arith.constant 0 : index
    %c0_82 = arith.constant 0 : index
    %c0_83 = arith.constant 0 : index
    %200 = vector.load %arg18[%c0_81, %c0_82, %c0_83] : memref<2x128x128xbf16, #tpu.memory_space<vmem>>, vector<1x128x128xbf16>
    %201 = vector.shape_cast %200 : vector<1x128x128xbf16> to vector<128x128xbf16>
    %c0_84 = arith.constant 0 : index
    %c0_85 = arith.constant 0 : index
    %c0_86 = arith.constant 0 : index
    %202 = vector.load %arg19[%c0_84, %c0_85, %c0_86] : memref<2x1x128xf32, #tpu.memory_space<vmem>>, vector<1x1x128xf32>
    %203 = vector.shape_cast %202 : vector<1x1x128xf32> to vector<1x128xf32>
    %204 = arith.truncf %199 : vector<256x128xf32> to vector<256x128xbf16>
    %cst_87 = arith.constant dense<0.000000e+00> : vector<256x128xf32>
    %205 = tpu.matmul %204, %201, %cst_87 {dimension_numbers = #tpu.dot_dimension_numbers<[1], [0], [0], [1], [0, 0, 1, 1], [], []>} : vector<256x128xbf16>, vector<128x128xbf16>, vector<256x128xf32> -> vector<256x128xf32>
    %206 = vector.broadcast %203 : vector<1x128xf32> to vector<256x128xf32>
    %207 = arith.addf %205, %206 : vector<256x128xf32>
    %208 = vector.extract_strided_slice %111 {offsets = [0, 0], sizes = [16, 128], strides = [1, 1]} : vector<32x128xf32> to vector<16x128xf32>
    %209 = vector.extract_strided_slice %120 {offsets = [0, 0], sizes = [8, 128], strides = [1, 1]} : vector<16x128xf32> to vector<8x128xf32>
    %cst_88 = arith.constant dense<0.000000e+00> : vector<16x8xf32>
    %210 = tpu.matmul %208, %209, %cst_88 {dimension_numbers = #tpu.dot_dimension_numbers<[1], [1], [0], [0], [0, 0, 1, 0], [], []>} : vector<16x128xf32>, vector<8x128xf32>, vector<16x8xf32> -> vector<16x8xf32>
    %cst_89 = arith.constant 2.000000e+00 : f32
    %211 = vector.broadcast %cst_89 : f32 to vector<16x8xf32>
    %212 = arith.mulf %211, %210 : vector<16x8xf32>
    %213 = vector.extract_strided_slice %124 {offsets = [0, 0], sizes = [1, 8], strides = [1, 1]} : vector<1x16xf32> to vector<1x8xf32>
    %214 = vector.broadcast %213 : vector<1x8xf32> to vector<16x8xf32>
    %215 = arith.subf %212, %214 : vector<16x8xf32>
    %cst_90 = arith.constant 0.000000e+00 : f32
    %216 = vector.broadcast %cst_90 : f32 to vector<16x8xf32>
    %217 = vector.extract_strided_slice %215 {offsets = [0, 0], sizes = [16, 1], strides = [1, 1]} : vector<16x8xf32> to vector<16x1xf32>
    %218 = vector.broadcast %217 : vector<16x1xf32> to vector<16x8xf32>
    %219 = arith.cmpf ogt, %215, %218 : vector<16x8xf32>
    %220 = vector.broadcast %217 : vector<16x1xf32> to vector<16x8xf32>
    %221 = arith.cmpf oeq, %215, %220 : vector<16x8xf32>
    %c0_i32_91 = arith.constant 0 : i32
    %222 = vector.broadcast %c0_i32_91 : i32 to vector<16x8xi32>
    %223 = arith.cmpi slt, %6, %222 : vector<16x8xi32>
    %224 = arith.andi %221, %223 : vector<16x8xi1>
    %225 = arith.ori %219, %224 : vector<16x8xi1>
    %226 = arith.extui %225 : vector<16x8xi1> to vector<16x8xi32>
    %227 = arith.sitofp %226 : vector<16x8xi32> to vector<16x8xf32>
    %cst_92 = arith.constant dense<0.000000e+00> : vector<16xf32>
    %228 = vector.multi_reduction <add>, %227, %cst_92 [1] : vector<16x8xf32> to vector<16xf32>
    %229 = vector.shape_cast %228 : vector<16xf32> to vector<16x1xf32>
    %c0_i32_93 = arith.constant 0 : i32
    %230 = vector.broadcast %c0_i32_93 : i32 to vector<16x8xi32>
    %231 = arith.cmpi eq, %6, %230 : vector<16x8xi32>
    %cst_94 = arith.constant 4.000000e+00 : f32
    %232 = vector.broadcast %cst_94 : f32 to vector<16x1xf32>
    %233 = arith.cmpf olt, %229, %232 : vector<16x1xf32>
    %234 = vector.broadcast %233 : vector<16x1xi1> to vector<16x8xi1>
    %235 = arith.andi %231, %234 : vector<16x8xi1>
    %cst_95 = arith.constant 1.000000e+00 : f32
    %cst_96 = arith.constant 0.000000e+00 : f32
    %236 = vector.broadcast %cst_95 : f32 to vector<16x8xf32>
    %237 = vector.broadcast %cst_96 : f32 to vector<16x8xf32>
    %238 = arith.select %235, %236, %237 : vector<16x8xi1>, vector<16x8xf32>
    %239 = arith.addf %216, %238 : vector<16x8xf32>
    %240 = vector.extract_strided_slice %215 {offsets = [0, 1], sizes = [16, 1], strides = [1, 1]} : vector<16x8xf32> to vector<16x1xf32>
    %241 = vector.broadcast %240 : vector<16x1xf32> to vector<16x8xf32>
    %242 = arith.cmpf ogt, %215, %241 : vector<16x8xf32>
    %243 = vector.broadcast %240 : vector<16x1xf32> to vector<16x8xf32>
    %244 = arith.cmpf oeq, %215, %243 : vector<16x8xf32>
    %c1_i32_97 = arith.constant 1 : i32
    %245 = vector.broadcast %c1_i32_97 : i32 to vector<16x8xi32>
    %246 = arith.cmpi slt, %6, %245 : vector<16x8xi32>
    %247 = arith.andi %244, %246 : vector<16x8xi1>
    %248 = arith.ori %242, %247 : vector<16x8xi1>
    %249 = arith.extui %248 : vector<16x8xi1> to vector<16x8xi32>
    %250 = arith.sitofp %249 : vector<16x8xi32> to vector<16x8xf32>
    %cst_98 = arith.constant dense<0.000000e+00> : vector<16xf32>
    %251 = vector.multi_reduction <add>, %250, %cst_98 [1] : vector<16x8xf32> to vector<16xf32>
    %252 = vector.shape_cast %251 : vector<16xf32> to vector<16x1xf32>
    %c1_i32_99 = arith.constant 1 : i32
    %253 = vector.broadcast %c1_i32_99 : i32 to vector<16x8xi32>
    %254 = arith.cmpi eq, %6, %253 : vector<16x8xi32>
    %cst_100 = arith.constant 4.000000e+00 : f32
    %255 = vector.broadcast %cst_100 : f32 to vector<16x1xf32>
    %256 = arith.cmpf olt, %252, %255 : vector<16x1xf32>
    %257 = vector.broadcast %256 : vector<16x1xi1> to vector<16x8xi1>
    %258 = arith.andi %254, %257 : vector<16x8xi1>
    %cst_101 = arith.constant 1.000000e+00 : f32
    %cst_102 = arith.constant 0.000000e+00 : f32
    %259 = vector.broadcast %cst_101 : f32 to vector<16x8xf32>
    %260 = vector.broadcast %cst_102 : f32 to vector<16x8xf32>
    %261 = arith.select %258, %259, %260 : vector<16x8xi1>, vector<16x8xf32>
    %262 = arith.addf %239, %261 : vector<16x8xf32>
    %263 = vector.extract_strided_slice %215 {offsets = [0, 2], sizes = [16, 1], strides = [1, 1]} : vector<16x8xf32> to vector<16x1xf32>
    %264 = vector.broadcast %263 : vector<16x1xf32> to vector<16x8xf32>
    %265 = arith.cmpf ogt, %215, %264 : vector<16x8xf32>
    %266 = vector.broadcast %263 : vector<16x1xf32> to vector<16x8xf32>
    %267 = arith.cmpf oeq, %215, %266 : vector<16x8xf32>
    %c2_i32_103 = arith.constant 2 : i32
    %268 = vector.broadcast %c2_i32_103 : i32 to vector<16x8xi32>
    %269 = arith.cmpi slt, %6, %268 : vector<16x8xi32>
    %270 = arith.andi %267, %269 : vector<16x8xi1>
    %271 = arith.ori %265, %270 : vector<16x8xi1>
    %272 = arith.extui %271 : vector<16x8xi1> to vector<16x8xi32>
    %273 = arith.sitofp %272 : vector<16x8xi32> to vector<16x8xf32>
    %cst_104 = arith.constant dense<0.000000e+00> : vector<16xf32>
    %274 = vector.multi_reduction <add>, %273, %cst_104 [1] : vector<16x8xf32> to vector<16xf32>
    %275 = vector.shape_cast %274 : vector<16xf32> to vector<16x1xf32>
    %c2_i32_105 = arith.constant 2 : i32
    %276 = vector.broadcast %c2_i32_105 : i32 to vector<16x8xi32>
    %277 = arith.cmpi eq, %6, %276 : vector<16x8xi32>
    %cst_106 = arith.constant 4.000000e+00 : f32
    %278 = vector.broadcast %cst_106 : f32 to vector<16x1xf32>
    %279 = arith.cmpf olt, %275, %278 : vector<16x1xf32>
    %280 = vector.broadcast %279 : vector<16x1xi1> to vector<16x8xi1>
    %281 = arith.andi %277, %280 : vector<16x8xi1>
    %cst_107 = arith.constant 1.000000e+00 : f32
    %cst_108 = arith.constant 0.000000e+00 : f32
    %282 = vector.broadcast %cst_107 : f32 to vector<16x8xf32>
    %283 = vector.broadcast %cst_108 : f32 to vector<16x8xf32>
    %284 = arith.select %281, %282, %283 : vector<16x8xi1>, vector<16x8xf32>
    %285 = arith.addf %262, %284 : vector<16x8xf32>
    %286 = vector.extract_strided_slice %215 {offsets = [0, 3], sizes = [16, 1], strides = [1, 1]} : vector<16x8xf32> to vector<16x1xf32>
    %287 = vector.broadcast %286 : vector<16x1xf32> to vector<16x8xf32>
    %288 = arith.cmpf ogt, %215, %287 : vector<16x8xf32>
    %289 = vector.broadcast %286 : vector<16x1xf32> to vector<16x8xf32>
    %290 = arith.cmpf oeq, %215, %289 : vector<16x8xf32>
    %c3_i32_109 = arith.constant 3 : i32
    %291 = vector.broadcast %c3_i32_109 : i32 to vector<16x8xi32>
    %292 = arith.cmpi slt, %6, %291 : vector<16x8xi32>
    %293 = arith.andi %290, %292 : vector<16x8xi1>
    %294 = arith.ori %288, %293 : vector<16x8xi1>
    %295 = arith.extui %294 : vector<16x8xi1> to vector<16x8xi32>
    %296 = arith.sitofp %295 : vector<16x8xi32> to vector<16x8xf32>
    %cst_110 = arith.constant dense<0.000000e+00> : vector<16xf32>
    %297 = vector.multi_reduction <add>, %296, %cst_110 [1] : vector<16x8xf32> to vector<16xf32>
    %298 = vector.shape_cast %297 : vector<16xf32> to vector<16x1xf32>
    %c3_i32_111 = arith.constant 3 : i32
    %299 = vector.broadcast %c3_i32_111 : i32 to vector<16x8xi32>
    %300 = arith.cmpi eq, %6, %299 : vector<16x8xi32>
    %cst_112 = arith.constant 4.000000e+00 : f32
    %301 = vector.broadcast %cst_112 : f32 to vector<16x1xf32>
    %302 = arith.cmpf olt, %298, %301 : vector<16x1xf32>
    %303 = vector.broadcast %302 : vector<16x1xi1> to vector<16x8xi1>
    %304 = arith.andi %300, %303 : vector<16x8xi1>
    %cst_113 = arith.constant 1.000000e+00 : f32
    %cst_114 = arith.constant 0.000000e+00 : f32
    %305 = vector.broadcast %cst_113 : f32 to vector<16x8xf32>
    %306 = vector.broadcast %cst_114 : f32 to vector<16x8xf32>
    %307 = arith.select %304, %305, %306 : vector<16x8xi1>, vector<16x8xf32>
    %308 = arith.addf %285, %307 : vector<16x8xf32>
    %309 = vector.extract_strided_slice %215 {offsets = [0, 4], sizes = [16, 1], strides = [1, 1]} : vector<16x8xf32> to vector<16x1xf32>
    %310 = vector.broadcast %309 : vector<16x1xf32> to vector<16x8xf32>
    %311 = arith.cmpf ogt, %215, %310 : vector<16x8xf32>
    %312 = vector.broadcast %309 : vector<16x1xf32> to vector<16x8xf32>
    %313 = arith.cmpf oeq, %215, %312 : vector<16x8xf32>
    %c4_i32_115 = arith.constant 4 : i32
    %314 = vector.broadcast %c4_i32_115 : i32 to vector<16x8xi32>
    %315 = arith.cmpi slt, %6, %314 : vector<16x8xi32>
    %316 = arith.andi %313, %315 : vector<16x8xi1>
    %317 = arith.ori %311, %316 : vector<16x8xi1>
    %318 = arith.extui %317 : vector<16x8xi1> to vector<16x8xi32>
    %319 = arith.sitofp %318 : vector<16x8xi32> to vector<16x8xf32>
    %cst_116 = arith.constant dense<0.000000e+00> : vector<16xf32>
    %320 = vector.multi_reduction <add>, %319, %cst_116 [1] : vector<16x8xf32> to vector<16xf32>
    %321 = vector.shape_cast %320 : vector<16xf32> to vector<16x1xf32>
    %c4_i32_117 = arith.constant 4 : i32
    %322 = vector.broadcast %c4_i32_117 : i32 to vector<16x8xi32>
    %323 = arith.cmpi eq, %6, %322 : vector<16x8xi32>
    %cst_118 = arith.constant 4.000000e+00 : f32
    %324 = vector.broadcast %cst_118 : f32 to vector<16x1xf32>
    %325 = arith.cmpf olt, %321, %324 : vector<16x1xf32>
    %326 = vector.broadcast %325 : vector<16x1xi1> to vector<16x8xi1>
    %327 = arith.andi %323, %326 : vector<16x8xi1>
    %cst_119 = arith.constant 1.000000e+00 : f32
    %cst_120 = arith.constant 0.000000e+00 : f32
    %328 = vector.broadcast %cst_119 : f32 to vector<16x8xf32>
    %329 = vector.broadcast %cst_120 : f32 to vector<16x8xf32>
    %330 = arith.select %327, %328, %329 : vector<16x8xi1>, vector<16x8xf32>
    %331 = arith.addf %308, %330 : vector<16x8xf32>
    %332 = vector.extract_strided_slice %215 {offsets = [0, 5], sizes = [16, 1], strides = [1, 1]} : vector<16x8xf32> to vector<16x1xf32>
    %333 = vector.broadcast %332 : vector<16x1xf32> to vector<16x8xf32>
    %334 = arith.cmpf ogt, %215, %333 : vector<16x8xf32>
    %335 = vector.broadcast %332 : vector<16x1xf32> to vector<16x8xf32>
    %336 = arith.cmpf oeq, %215, %335 : vector<16x8xf32>
    %c5_i32_121 = arith.constant 5 : i32
    %337 = vector.broadcast %c5_i32_121 : i32 to vector<16x8xi32>
    %338 = arith.cmpi slt, %6, %337 : vector<16x8xi32>
    %339 = arith.andi %336, %338 : vector<16x8xi1>
    %340 = arith.ori %334, %339 : vector<16x8xi1>
    %341 = arith.extui %340 : vector<16x8xi1> to vector<16x8xi32>
    %342 = arith.sitofp %341 : vector<16x8xi32> to vector<16x8xf32>
    %cst_122 = arith.constant dense<0.000000e+00> : vector<16xf32>
    %343 = vector.multi_reduction <add>, %342, %cst_122 [1] : vector<16x8xf32> to vector<16xf32>
    %344 = vector.shape_cast %343 : vector<16xf32> to vector<16x1xf32>
    %c5_i32_123 = arith.constant 5 : i32
    %345 = vector.broadcast %c5_i32_123 : i32 to vector<16x8xi32>
    %346 = arith.cmpi eq, %6, %345 : vector<16x8xi32>
    %cst_124 = arith.constant 4.000000e+00 : f32
    %347 = vector.broadcast %cst_124 : f32 to vector<16x1xf32>
    %348 = arith.cmpf olt, %344, %347 : vector<16x1xf32>
    %349 = vector.broadcast %348 : vector<16x1xi1> to vector<16x8xi1>
    %350 = arith.andi %346, %349 : vector<16x8xi1>
    %cst_125 = arith.constant 1.000000e+00 : f32
    %cst_126 = arith.constant 0.000000e+00 : f32
    %351 = vector.broadcast %cst_125 : f32 to vector<16x8xf32>
    %352 = vector.broadcast %cst_126 : f32 to vector<16x8xf32>
    %353 = arith.select %350, %351, %352 : vector<16x8xi1>, vector<16x8xf32>
    %354 = arith.addf %331, %353 : vector<16x8xf32>
    %355 = vector.extract_strided_slice %215 {offsets = [0, 6], sizes = [16, 1], strides = [1, 1]} : vector<16x8xf32> to vector<16x1xf32>
    %356 = vector.broadcast %355 : vector<16x1xf32> to vector<16x8xf32>
    %357 = arith.cmpf ogt, %215, %356 : vector<16x8xf32>
    %358 = vector.broadcast %355 : vector<16x1xf32> to vector<16x8xf32>
    %359 = arith.cmpf oeq, %215, %358 : vector<16x8xf32>
    %c6_i32_127 = arith.constant 6 : i32
    %360 = vector.broadcast %c6_i32_127 : i32 to vector<16x8xi32>
    %361 = arith.cmpi slt, %6, %360 : vector<16x8xi32>
    %362 = arith.andi %359, %361 : vector<16x8xi1>
    %363 = arith.ori %357, %362 : vector<16x8xi1>
    %364 = arith.extui %363 : vector<16x8xi1> to vector<16x8xi32>
    %365 = arith.sitofp %364 : vector<16x8xi32> to vector<16x8xf32>
    %cst_128 = arith.constant dense<0.000000e+00> : vector<16xf32>
    %366 = vector.multi_reduction <add>, %365, %cst_128 [1] : vector<16x8xf32> to vector<16xf32>
    %367 = vector.shape_cast %366 : vector<16xf32> to vector<16x1xf32>
    %c6_i32_129 = arith.constant 6 : i32
    %368 = vector.broadcast %c6_i32_129 : i32 to vector<16x8xi32>
    %369 = arith.cmpi eq, %6, %368 : vector<16x8xi32>
    %cst_130 = arith.constant 4.000000e+00 : f32
    %370 = vector.broadcast %cst_130 : f32 to vector<16x1xf32>
    %371 = arith.cmpf olt, %367, %370 : vector<16x1xf32>
    %372 = vector.broadcast %371 : vector<16x1xi1> to vector<16x8xi1>
    %373 = arith.andi %369, %372 : vector<16x8xi1>
    %cst_131 = arith.constant 1.000000e+00 : f32
    %cst_132 = arith.constant 0.000000e+00 : f32
    %374 = vector.broadcast %cst_131 : f32 to vector<16x8xf32>
    %375 = vector.broadcast %cst_132 : f32 to vector<16x8xf32>
    %376 = arith.select %373, %374, %375 : vector<16x8xi1>, vector<16x8xf32>
    %377 = arith.addf %354, %376 : vector<16x8xf32>
    %378 = vector.extract_strided_slice %215 {offsets = [0, 7], sizes = [16, 1], strides = [1, 1]} : vector<16x8xf32> to vector<16x1xf32>
    %379 = vector.broadcast %378 : vector<16x1xf32> to vector<16x8xf32>
    %380 = arith.cmpf ogt, %215, %379 : vector<16x8xf32>
    %381 = vector.broadcast %378 : vector<16x1xf32> to vector<16x8xf32>
    %382 = arith.cmpf oeq, %215, %381 : vector<16x8xf32>
    %c7_i32_133 = arith.constant 7 : i32
    %383 = vector.broadcast %c7_i32_133 : i32 to vector<16x8xi32>
    %384 = arith.cmpi slt, %6, %383 : vector<16x8xi32>
    %385 = arith.andi %382, %384 : vector<16x8xi1>
    %386 = arith.ori %380, %385 : vector<16x8xi1>
    %387 = arith.extui %386 : vector<16x8xi1> to vector<16x8xi32>
    %388 = arith.sitofp %387 : vector<16x8xi32> to vector<16x8xf32>
    %cst_134 = arith.constant dense<0.000000e+00> : vector<16xf32>
    %389 = vector.multi_reduction <add>, %388, %cst_134 [1] : vector<16x8xf32> to vector<16xf32>
    %390 = vector.shape_cast %389 : vector<16xf32> to vector<16x1xf32>
    %c7_i32_135 = arith.constant 7 : i32
    %391 = vector.broadcast %c7_i32_135 : i32 to vector<16x8xi32>
    %392 = arith.cmpi eq, %6, %391 : vector<16x8xi32>
    %cst_136 = arith.constant 4.000000e+00 : f32
    %393 = vector.broadcast %cst_136 : f32 to vector<16x1xf32>
    %394 = arith.cmpf olt, %390, %393 : vector<16x1xf32>
    %395 = vector.broadcast %394 : vector<16x1xi1> to vector<16x8xi1>
    %396 = arith.andi %392, %395 : vector<16x8xi1>
    %cst_137 = arith.constant 1.000000e+00 : f32
    %cst_138 = arith.constant 0.000000e+00 : f32
    %397 = vector.broadcast %cst_137 : f32 to vector<16x8xf32>
    %398 = vector.broadcast %cst_138 : f32 to vector<16x8xf32>
    %399 = arith.select %396, %397, %398 : vector<16x8xi1>, vector<16x8xf32>
    %400 = arith.addf %377, %399 : vector<16x8xf32>
    %401 = vector.extract_strided_slice %111 {offsets = [16, 0], sizes = [16, 128], strides = [1, 1]} : vector<32x128xf32> to vector<16x128xf32>
    %402 = vector.extract_strided_slice %120 {offsets = [8, 0], sizes = [8, 128], strides = [1, 1]} : vector<16x128xf32> to vector<8x128xf32>
    %cst_139 = arith.constant dense<0.000000e+00> : vector<16x8xf32>
    %403 = tpu.matmul %401, %402, %cst_139 {dimension_numbers = #tpu.dot_dimension_numbers<[1], [1], [0], [0], [0, 0, 1, 0], [], []>} : vector<16x128xf32>, vector<8x128xf32>, vector<16x8xf32> -> vector<16x8xf32>
    %cst_140 = arith.constant 2.000000e+00 : f32
    %404 = vector.broadcast %cst_140 : f32 to vector<16x8xf32>
    %405 = arith.mulf %404, %403 : vector<16x8xf32>
    %406 = vector.extract_strided_slice %124 {offsets = [0, 8], sizes = [1, 8], strides = [1, 1]} : vector<1x16xf32> to vector<1x8xf32>
    %407 = vector.broadcast %406 : vector<1x8xf32> to vector<16x8xf32>
    %408 = arith.subf %405, %407 : vector<16x8xf32>
    %cst_141 = arith.constant 0.000000e+00 : f32
    %409 = vector.broadcast %cst_141 : f32 to vector<16x8xf32>
    %410 = vector.extract_strided_slice %408 {offsets = [0, 0], sizes = [16, 1], strides = [1, 1]} : vector<16x8xf32> to vector<16x1xf32>
    %411 = vector.broadcast %410 : vector<16x1xf32> to vector<16x8xf32>
    %412 = arith.cmpf ogt, %408, %411 : vector<16x8xf32>
    %413 = vector.broadcast %410 : vector<16x1xf32> to vector<16x8xf32>
    %414 = arith.cmpf oeq, %408, %413 : vector<16x8xf32>
    %c0_i32_142 = arith.constant 0 : i32
    %415 = vector.broadcast %c0_i32_142 : i32 to vector<16x8xi32>
    %416 = arith.cmpi slt, %6, %415 : vector<16x8xi32>
    %417 = arith.andi %414, %416 : vector<16x8xi1>
    %418 = arith.ori %412, %417 : vector<16x8xi1>
    %419 = arith.extui %418 : vector<16x8xi1> to vector<16x8xi32>
    %420 = arith.sitofp %419 : vector<16x8xi32> to vector<16x8xf32>
    %cst_143 = arith.constant dense<0.000000e+00> : vector<16xf32>
    %421 = vector.multi_reduction <add>, %420, %cst_143 [1] : vector<16x8xf32> to vector<16xf32>
    %422 = vector.shape_cast %421 : vector<16xf32> to vector<16x1xf32>
    %c0_i32_144 = arith.constant 0 : i32
    %423 = vector.broadcast %c0_i32_144 : i32 to vector<16x8xi32>
    %424 = arith.cmpi eq, %6, %423 : vector<16x8xi32>
    %cst_145 = arith.constant 4.000000e+00 : f32
    %425 = vector.broadcast %cst_145 : f32 to vector<16x1xf32>
    %426 = arith.cmpf olt, %422, %425 : vector<16x1xf32>
    %427 = vector.broadcast %426 : vector<16x1xi1> to vector<16x8xi1>
    %428 = arith.andi %424, %427 : vector<16x8xi1>
    %cst_146 = arith.constant 1.000000e+00 : f32
    %cst_147 = arith.constant 0.000000e+00 : f32
    %429 = vector.broadcast %cst_146 : f32 to vector<16x8xf32>
    %430 = vector.broadcast %cst_147 : f32 to vector<16x8xf32>
    %431 = arith.select %428, %429, %430 : vector<16x8xi1>, vector<16x8xf32>
    %432 = arith.addf %409, %431 : vector<16x8xf32>
    %433 = vector.extract_strided_slice %408 {offsets = [0, 1], sizes = [16, 1], strides = [1, 1]} : vector<16x8xf32> to vector<16x1xf32>
    %434 = vector.broadcast %433 : vector<16x1xf32> to vector<16x8xf32>
    %435 = arith.cmpf ogt, %408, %434 : vector<16x8xf32>
    %436 = vector.broadcast %433 : vector<16x1xf32> to vector<16x8xf32>
    %437 = arith.cmpf oeq, %408, %436 : vector<16x8xf32>
    %c1_i32_148 = arith.constant 1 : i32
    %438 = vector.broadcast %c1_i32_148 : i32 to vector<16x8xi32>
    %439 = arith.cmpi slt, %6, %438 : vector<16x8xi32>
    %440 = arith.andi %437, %439 : vector<16x8xi1>
    %441 = arith.ori %435, %440 : vector<16x8xi1>
    %442 = arith.extui %441 : vector<16x8xi1> to vector<16x8xi32>
    %443 = arith.sitofp %442 : vector<16x8xi32> to vector<16x8xf32>
    %cst_149 = arith.constant dense<0.000000e+00> : vector<16xf32>
    %444 = vector.multi_reduction <add>, %443, %cst_149 [1] : vector<16x8xf32> to vector<16xf32>
    %445 = vector.shape_cast %444 : vector<16xf32> to vector<16x1xf32>
    %c1_i32_150 = arith.constant 1 : i32
    %446 = vector.broadcast %c1_i32_150 : i32 to vector<16x8xi32>
    %447 = arith.cmpi eq, %6, %446 : vector<16x8xi32>
    %cst_151 = arith.constant 4.000000e+00 : f32
    %448 = vector.broadcast %cst_151 : f32 to vector<16x1xf32>
    %449 = arith.cmpf olt, %445, %448 : vector<16x1xf32>
    %450 = vector.broadcast %449 : vector<16x1xi1> to vector<16x8xi1>
    %451 = arith.andi %447, %450 : vector<16x8xi1>
    %cst_152 = arith.constant 1.000000e+00 : f32
    %cst_153 = arith.constant 0.000000e+00 : f32
    %452 = vector.broadcast %cst_152 : f32 to vector<16x8xf32>
    %453 = vector.broadcast %cst_153 : f32 to vector<16x8xf32>
    %454 = arith.select %451, %452, %453 : vector<16x8xi1>, vector<16x8xf32>
    %455 = arith.addf %432, %454 : vector<16x8xf32>
    %456 = vector.extract_strided_slice %408 {offsets = [0, 2], sizes = [16, 1], strides = [1, 1]} : vector<16x8xf32> to vector<16x1xf32>
    %457 = vector.broadcast %456 : vector<16x1xf32> to vector<16x8xf32>
    %458 = arith.cmpf ogt, %408, %457 : vector<16x8xf32>
    %459 = vector.broadcast %456 : vector<16x1xf32> to vector<16x8xf32>
    %460 = arith.cmpf oeq, %408, %459 : vector<16x8xf32>
    %c2_i32_154 = arith.constant 2 : i32
    %461 = vector.broadcast %c2_i32_154 : i32 to vector<16x8xi32>
    %462 = arith.cmpi slt, %6, %461 : vector<16x8xi32>
    %463 = arith.andi %460, %462 : vector<16x8xi1>
    %464 = arith.ori %458, %463 : vector<16x8xi1>
    %465 = arith.extui %464 : vector<16x8xi1> to vector<16x8xi32>
    %466 = arith.sitofp %465 : vector<16x8xi32> to vector<16x8xf32>
    %cst_155 = arith.constant dense<0.000000e+00> : vector<16xf32>
    %467 = vector.multi_reduction <add>, %466, %cst_155 [1] : vector<16x8xf32> to vector<16xf32>
    %468 = vector.shape_cast %467 : vector<16xf32> to vector<16x1xf32>
    %c2_i32_156 = arith.constant 2 : i32
    %469 = vector.broadcast %c2_i32_156 : i32 to vector<16x8xi32>
    %470 = arith.cmpi eq, %6, %469 : vector<16x8xi32>
    %cst_157 = arith.constant 4.000000e+00 : f32
    %471 = vector.broadcast %cst_157 : f32 to vector<16x1xf32>
    %472 = arith.cmpf olt, %468, %471 : vector<16x1xf32>
    %473 = vector.broadcast %472 : vector<16x1xi1> to vector<16x8xi1>
    %474 = arith.andi %470, %473 : vector<16x8xi1>
    %cst_158 = arith.constant 1.000000e+00 : f32
    %cst_159 = arith.constant 0.000000e+00 : f32
    %475 = vector.broadcast %cst_158 : f32 to vector<16x8xf32>
    %476 = vector.broadcast %cst_159 : f32 to vector<16x8xf32>
    %477 = arith.select %474, %475, %476 : vector<16x8xi1>, vector<16x8xf32>
    %478 = arith.addf %455, %477 : vector<16x8xf32>
    %479 = vector.extract_strided_slice %408 {offsets = [0, 3], sizes = [16, 1], strides = [1, 1]} : vector<16x8xf32> to vector<16x1xf32>
    %480 = vector.broadcast %479 : vector<16x1xf32> to vector<16x8xf32>
    %481 = arith.cmpf ogt, %408, %480 : vector<16x8xf32>
    %482 = vector.broadcast %479 : vector<16x1xf32> to vector<16x8xf32>
    %483 = arith.cmpf oeq, %408, %482 : vector<16x8xf32>
    %c3_i32_160 = arith.constant 3 : i32
    %484 = vector.broadcast %c3_i32_160 : i32 to vector<16x8xi32>
    %485 = arith.cmpi slt, %6, %484 : vector<16x8xi32>
    %486 = arith.andi %483, %485 : vector<16x8xi1>
    %487 = arith.ori %481, %486 : vector<16x8xi1>
    %488 = arith.extui %487 : vector<16x8xi1> to vector<16x8xi32>
    %489 = arith.sitofp %488 : vector<16x8xi32> to vector<16x8xf32>
    %cst_161 = arith.constant dense<0.000000e+00> : vector<16xf32>
    %490 = vector.multi_reduction <add>, %489, %cst_161 [1] : vector<16x8xf32> to vector<16xf32>
    %491 = vector.shape_cast %490 : vector<16xf32> to vector<16x1xf32>
    %c3_i32_162 = arith.constant 3 : i32
    %492 = vector.broadcast %c3_i32_162 : i32 to vector<16x8xi32>
    %493 = arith.cmpi eq, %6, %492 : vector<16x8xi32>
    %cst_163 = arith.constant 4.000000e+00 : f32
    %494 = vector.broadcast %cst_163 : f32 to vector<16x1xf32>
    %495 = arith.cmpf olt, %491, %494 : vector<16x1xf32>
    %496 = vector.broadcast %495 : vector<16x1xi1> to vector<16x8xi1>
    %497 = arith.andi %493, %496 : vector<16x8xi1>
    %cst_164 = arith.constant 1.000000e+00 : f32
    %cst_165 = arith.constant 0.000000e+00 : f32
    %498 = vector.broadcast %cst_164 : f32 to vector<16x8xf32>
    %499 = vector.broadcast %cst_165 : f32 to vector<16x8xf32>
    %500 = arith.select %497, %498, %499 : vector<16x8xi1>, vector<16x8xf32>
    %501 = arith.addf %478, %500 : vector<16x8xf32>
    %502 = vector.extract_strided_slice %408 {offsets = [0, 4], sizes = [16, 1], strides = [1, 1]} : vector<16x8xf32> to vector<16x1xf32>
    %503 = vector.broadcast %502 : vector<16x1xf32> to vector<16x8xf32>
    %504 = arith.cmpf ogt, %408, %503 : vector<16x8xf32>
    %505 = vector.broadcast %502 : vector<16x1xf32> to vector<16x8xf32>
    %506 = arith.cmpf oeq, %408, %505 : vector<16x8xf32>
    %c4_i32_166 = arith.constant 4 : i32
    %507 = vector.broadcast %c4_i32_166 : i32 to vector<16x8xi32>
    %508 = arith.cmpi slt, %6, %507 : vector<16x8xi32>
    %509 = arith.andi %506, %508 : vector<16x8xi1>
    %510 = arith.ori %504, %509 : vector<16x8xi1>
    %511 = arith.extui %510 : vector<16x8xi1> to vector<16x8xi32>
    %512 = arith.sitofp %511 : vector<16x8xi32> to vector<16x8xf32>
    %cst_167 = arith.constant dense<0.000000e+00> : vector<16xf32>
    %513 = vector.multi_reduction <add>, %512, %cst_167 [1] : vector<16x8xf32> to vector<16xf32>
    %514 = vector.shape_cast %513 : vector<16xf32> to vector<16x1xf32>
    %c4_i32_168 = arith.constant 4 : i32
    %515 = vector.broadcast %c4_i32_168 : i32 to vector<16x8xi32>
    %516 = arith.cmpi eq, %6, %515 : vector<16x8xi32>
    %cst_169 = arith.constant 4.000000e+00 : f32
    %517 = vector.broadcast %cst_169 : f32 to vector<16x1xf32>
    %518 = arith.cmpf olt, %514, %517 : vector<16x1xf32>
    %519 = vector.broadcast %518 : vector<16x1xi1> to vector<16x8xi1>
    %520 = arith.andi %516, %519 : vector<16x8xi1>
    %cst_170 = arith.constant 1.000000e+00 : f32
    %cst_171 = arith.constant 0.000000e+00 : f32
    %521 = vector.broadcast %cst_170 : f32 to vector<16x8xf32>
    %522 = vector.broadcast %cst_171 : f32 to vector<16x8xf32>
    %523 = arith.select %520, %521, %522 : vector<16x8xi1>, vector<16x8xf32>
    %524 = arith.addf %501, %523 : vector<16x8xf32>
    %525 = vector.extract_strided_slice %408 {offsets = [0, 5], sizes = [16, 1], strides = [1, 1]} : vector<16x8xf32> to vector<16x1xf32>
    %526 = vector.broadcast %525 : vector<16x1xf32> to vector<16x8xf32>
    %527 = arith.cmpf ogt, %408, %526 : vector<16x8xf32>
    %528 = vector.broadcast %525 : vector<16x1xf32> to vector<16x8xf32>
    %529 = arith.cmpf oeq, %408, %528 : vector<16x8xf32>
    %c5_i32_172 = arith.constant 5 : i32
    %530 = vector.broadcast %c5_i32_172 : i32 to vector<16x8xi32>
    %531 = arith.cmpi slt, %6, %530 : vector<16x8xi32>
    %532 = arith.andi %529, %531 : vector<16x8xi1>
    %533 = arith.ori %527, %532 : vector<16x8xi1>
    %534 = arith.extui %533 : vector<16x8xi1> to vector<16x8xi32>
    %535 = arith.sitofp %534 : vector<16x8xi32> to vector<16x8xf32>
    %cst_173 = arith.constant dense<0.000000e+00> : vector<16xf32>
    %536 = vector.multi_reduction <add>, %535, %cst_173 [1] : vector<16x8xf32> to vector<16xf32>
    %537 = vector.shape_cast %536 : vector<16xf32> to vector<16x1xf32>
    %c5_i32_174 = arith.constant 5 : i32
    %538 = vector.broadcast %c5_i32_174 : i32 to vector<16x8xi32>
    %539 = arith.cmpi eq, %6, %538 : vector<16x8xi32>
    %cst_175 = arith.constant 4.000000e+00 : f32
    %540 = vector.broadcast %cst_175 : f32 to vector<16x1xf32>
    %541 = arith.cmpf olt, %537, %540 : vector<16x1xf32>
    %542 = vector.broadcast %541 : vector<16x1xi1> to vector<16x8xi1>
    %543 = arith.andi %539, %542 : vector<16x8xi1>
    %cst_176 = arith.constant 1.000000e+00 : f32
    %cst_177 = arith.constant 0.000000e+00 : f32
    %544 = vector.broadcast %cst_176 : f32 to vector<16x8xf32>
    %545 = vector.broadcast %cst_177 : f32 to vector<16x8xf32>
    %546 = arith.select %543, %544, %545 : vector<16x8xi1>, vector<16x8xf32>
    %547 = arith.addf %524, %546 : vector<16x8xf32>
    %548 = vector.extract_strided_slice %408 {offsets = [0, 6], sizes = [16, 1], strides = [1, 1]} : vector<16x8xf32> to vector<16x1xf32>
    %549 = vector.broadcast %548 : vector<16x1xf32> to vector<16x8xf32>
    %550 = arith.cmpf ogt, %408, %549 : vector<16x8xf32>
    %551 = vector.broadcast %548 : vector<16x1xf32> to vector<16x8xf32>
    %552 = arith.cmpf oeq, %408, %551 : vector<16x8xf32>
    %c6_i32_178 = arith.constant 6 : i32
    %553 = vector.broadcast %c6_i32_178 : i32 to vector<16x8xi32>
    %554 = arith.cmpi slt, %6, %553 : vector<16x8xi32>
    %555 = arith.andi %552, %554 : vector<16x8xi1>
    %556 = arith.ori %550, %555 : vector<16x8xi1>
    %557 = arith.extui %556 : vector<16x8xi1> to vector<16x8xi32>
    %558 = arith.sitofp %557 : vector<16x8xi32> to vector<16x8xf32>
    %cst_179 = arith.constant dense<0.000000e+00> : vector<16xf32>
    %559 = vector.multi_reduction <add>, %558, %cst_179 [1] : vector<16x8xf32> to vector<16xf32>
    %560 = vector.shape_cast %559 : vector<16xf32> to vector<16x1xf32>
    %c6_i32_180 = arith.constant 6 : i32
    %561 = vector.broadcast %c6_i32_180 : i32 to vector<16x8xi32>
    %562 = arith.cmpi eq, %6, %561 : vector<16x8xi32>
    %cst_181 = arith.constant 4.000000e+00 : f32
    %563 = vector.broadcast %cst_181 : f32 to vector<16x1xf32>
    %564 = arith.cmpf olt, %560, %563 : vector<16x1xf32>
    %565 = vector.broadcast %564 : vector<16x1xi1> to vector<16x8xi1>
    %566 = arith.andi %562, %565 : vector<16x8xi1>
    %cst_182 = arith.constant 1.000000e+00 : f32
    %cst_183 = arith.constant 0.000000e+00 : f32
    %567 = vector.broadcast %cst_182 : f32 to vector<16x8xf32>
    %568 = vector.broadcast %cst_183 : f32 to vector<16x8xf32>
    %569 = arith.select %566, %567, %568 : vector<16x8xi1>, vector<16x8xf32>
    %570 = arith.addf %547, %569 : vector<16x8xf32>
    %571 = vector.extract_strided_slice %408 {offsets = [0, 7], sizes = [16, 1], strides = [1, 1]} : vector<16x8xf32> to vector<16x1xf32>
    %572 = vector.broadcast %571 : vector<16x1xf32> to vector<16x8xf32>
    %573 = arith.cmpf ogt, %408, %572 : vector<16x8xf32>
    %574 = vector.broadcast %571 : vector<16x1xf32> to vector<16x8xf32>
    %575 = arith.cmpf oeq, %408, %574 : vector<16x8xf32>
    %c7_i32_184 = arith.constant 7 : i32
    %576 = vector.broadcast %c7_i32_184 : i32 to vector<16x8xi32>
    %577 = arith.cmpi slt, %6, %576 : vector<16x8xi32>
    %578 = arith.andi %575, %577 : vector<16x8xi1>
    %579 = arith.ori %573, %578 : vector<16x8xi1>
    %580 = arith.extui %579 : vector<16x8xi1> to vector<16x8xi32>
    %581 = arith.sitofp %580 : vector<16x8xi32> to vector<16x8xf32>
    %cst_185 = arith.constant dense<0.000000e+00> : vector<16xf32>
    %582 = vector.multi_reduction <add>, %581, %cst_185 [1] : vector<16x8xf32> to vector<16xf32>
    %583 = vector.shape_cast %582 : vector<16xf32> to vector<16x1xf32>
    %c7_i32_186 = arith.constant 7 : i32
    %584 = vector.broadcast %c7_i32_186 : i32 to vector<16x8xi32>
    %585 = arith.cmpi eq, %6, %584 : vector<16x8xi32>
    %cst_187 = arith.constant 4.000000e+00 : f32
    %586 = vector.broadcast %cst_187 : f32 to vector<16x1xf32>
    %587 = arith.cmpf olt, %583, %586 : vector<16x1xf32>
    %588 = vector.broadcast %587 : vector<16x1xi1> to vector<16x8xi1>
    %589 = arith.andi %585, %588 : vector<16x8xi1>
    %cst_188 = arith.constant 1.000000e+00 : f32
    %cst_189 = arith.constant 0.000000e+00 : f32
    %590 = vector.broadcast %cst_188 : f32 to vector<16x8xf32>
    %591 = vector.broadcast %cst_189 : f32 to vector<16x8xf32>
    %592 = arith.select %589, %590, %591 : vector<16x8xi1>, vector<16x8xf32>
    %593 = arith.addf %570, %592 : vector<16x8xf32>
    %594 = tpu.concatenate %400, %593 in 0 : vector<16x8xf32>, vector<16x8xf32> -> vector<32x8xf32>
    %cst_190 = arith.constant -1.000000e+30 : f32
    %595 = vector.broadcast %cst_190 : f32 to vector<32x128xf32>
    %596 = vector.extract_strided_slice %207 {offsets = [0, 0], sizes = [32, 128], strides = [1, 1]} : vector<256x128xf32> to vector<32x128xf32>
    %597 = vector.extract_strided_slice %594 {offsets = [0, 0], sizes = [32, 1], strides = [1, 1]} : vector<32x8xf32> to vector<32x1xf32>
    %cst_191 = arith.constant 5.000000e-01 : f32
    %598 = vector.broadcast %cst_191 : f32 to vector<32x1xf32>
    %599 = arith.cmpf ogt, %597, %598 : vector<32x1xf32>
    %cst_192 = arith.constant -1.000000e+30 : f32
    %600 = vector.shape_cast %599 : vector<32x1xi1> to vector<32x1xi1>
    %601 = vector.broadcast %600 : vector<32x1xi1> to vector<32x128xi1>
    %602 = vector.broadcast %cst_192 : f32 to vector<32x128xf32>
    %603 = arith.select %601, %596, %602 : vector<32x128xi1>, vector<32x128xf32>
    %604 = arith.maximumf %595, %603 : vector<32x128xf32>
    %605 = vector.extract_strided_slice %207 {offsets = [32, 0], sizes = [32, 128], strides = [1, 1]} : vector<256x128xf32> to vector<32x128xf32>
    %606 = vector.extract_strided_slice %594 {offsets = [0, 1], sizes = [32, 1], strides = [1, 1]} : vector<32x8xf32> to vector<32x1xf32>
    %cst_193 = arith.constant 5.000000e-01 : f32
    %607 = vector.broadcast %cst_193 : f32 to vector<32x1xf32>
    %608 = arith.cmpf ogt, %606, %607 : vector<32x1xf32>
    %cst_194 = arith.constant -1.000000e+30 : f32
    %609 = vector.shape_cast %608 : vector<32x1xi1> to vector<32x1xi1>
    %610 = vector.broadcast %609 : vector<32x1xi1> to vector<32x128xi1>
    %611 = vector.broadcast %cst_194 : f32 to vector<32x128xf32>
    %612 = arith.select %610, %605, %611 : vector<32x128xi1>, vector<32x128xf32>
    %613 = arith.maximumf %604, %612 : vector<32x128xf32>
    %614 = vector.extract_strided_slice %207 {offsets = [64, 0], sizes = [32, 128], strides = [1, 1]} : vector<256x128xf32> to vector<32x128xf32>
    %615 = vector.extract_strided_slice %594 {offsets = [0, 2], sizes = [32, 1], strides = [1, 1]} : vector<32x8xf32> to vector<32x1xf32>
    %cst_195 = arith.constant 5.000000e-01 : f32
    %616 = vector.broadcast %cst_195 : f32 to vector<32x1xf32>
    %617 = arith.cmpf ogt, %615, %616 : vector<32x1xf32>
    %cst_196 = arith.constant -1.000000e+30 : f32
    %618 = vector.shape_cast %617 : vector<32x1xi1> to vector<32x1xi1>
    %619 = vector.broadcast %618 : vector<32x1xi1> to vector<32x128xi1>
    %620 = vector.broadcast %cst_196 : f32 to vector<32x128xf32>
    %621 = arith.select %619, %614, %620 : vector<32x128xi1>, vector<32x128xf32>
    %622 = arith.maximumf %613, %621 : vector<32x128xf32>
    %623 = vector.extract_strided_slice %207 {offsets = [96, 0], sizes = [32, 128], strides = [1, 1]} : vector<256x128xf32> to vector<32x128xf32>
    %624 = vector.extract_strided_slice %594 {offsets = [0, 3], sizes = [32, 1], strides = [1, 1]} : vector<32x8xf32> to vector<32x1xf32>
    %cst_197 = arith.constant 5.000000e-01 : f32
    %625 = vector.broadcast %cst_197 : f32 to vector<32x1xf32>
    %626 = arith.cmpf ogt, %624, %625 : vector<32x1xf32>
    %cst_198 = arith.constant -1.000000e+30 : f32
    %627 = vector.shape_cast %626 : vector<32x1xi1> to vector<32x1xi1>
    %628 = vector.broadcast %627 : vector<32x1xi1> to vector<32x128xi1>
    %629 = vector.broadcast %cst_198 : f32 to vector<32x128xf32>
    %630 = arith.select %628, %623, %629 : vector<32x128xi1>, vector<32x128xf32>
    %631 = arith.maximumf %622, %630 : vector<32x128xf32>
    %632 = vector.extract_strided_slice %207 {offsets = [128, 0], sizes = [32, 128], strides = [1, 1]} : vector<256x128xf32> to vector<32x128xf32>
    %633 = vector.extract_strided_slice %594 {offsets = [0, 4], sizes = [32, 1], strides = [1, 1]} : vector<32x8xf32> to vector<32x1xf32>
    %cst_199 = arith.constant 5.000000e-01 : f32
    %634 = vector.broadcast %cst_199 : f32 to vector<32x1xf32>
    %635 = arith.cmpf ogt, %633, %634 : vector<32x1xf32>
    %cst_200 = arith.constant -1.000000e+30 : f32
    %636 = vector.shape_cast %635 : vector<32x1xi1> to vector<32x1xi1>
    %637 = vector.broadcast %636 : vector<32x1xi1> to vector<32x128xi1>
    %638 = vector.broadcast %cst_200 : f32 to vector<32x128xf32>
    %639 = arith.select %637, %632, %638 : vector<32x128xi1>, vector<32x128xf32>
    %640 = arith.maximumf %631, %639 : vector<32x128xf32>
    %641 = vector.extract_strided_slice %207 {offsets = [160, 0], sizes = [32, 128], strides = [1, 1]} : vector<256x128xf32> to vector<32x128xf32>
    %642 = vector.extract_strided_slice %594 {offsets = [0, 5], sizes = [32, 1], strides = [1, 1]} : vector<32x8xf32> to vector<32x1xf32>
    %cst_201 = arith.constant 5.000000e-01 : f32
    %643 = vector.broadcast %cst_201 : f32 to vector<32x1xf32>
    %644 = arith.cmpf ogt, %642, %643 : vector<32x1xf32>
    %cst_202 = arith.constant -1.000000e+30 : f32
    %645 = vector.shape_cast %644 : vector<32x1xi1> to vector<32x1xi1>
    %646 = vector.broadcast %645 : vector<32x1xi1> to vector<32x128xi1>
    %647 = vector.broadcast %cst_202 : f32 to vector<32x128xf32>
    %648 = arith.select %646, %641, %647 : vector<32x128xi1>, vector<32x128xf32>
    %649 = arith.maximumf %640, %648 : vector<32x128xf32>
    %650 = vector.extract_strided_slice %207 {offsets = [192, 0], sizes = [32, 128], strides = [1, 1]} : vector<256x128xf32> to vector<32x128xf32>
    %651 = vector.extract_strided_slice %594 {offsets = [0, 6], sizes = [32, 1], strides = [1, 1]} : vector<32x8xf32> to vector<32x1xf32>
    %cst_203 = arith.constant 5.000000e-01 : f32
    %652 = vector.broadcast %cst_203 : f32 to vector<32x1xf32>
    %653 = arith.cmpf ogt, %651, %652 : vector<32x1xf32>
    %cst_204 = arith.constant -1.000000e+30 : f32
    %654 = vector.shape_cast %653 : vector<32x1xi1> to vector<32x1xi1>
    %655 = vector.broadcast %654 : vector<32x1xi1> to vector<32x128xi1>
    %656 = vector.broadcast %cst_204 : f32 to vector<32x128xf32>
    %657 = arith.select %655, %650, %656 : vector<32x128xi1>, vector<32x128xf32>
    %658 = arith.maximumf %649, %657 : vector<32x128xf32>
    %659 = vector.extract_strided_slice %207 {offsets = [224, 0], sizes = [32, 128], strides = [1, 1]} : vector<256x128xf32> to vector<32x128xf32>
    %660 = vector.extract_strided_slice %594 {offsets = [0, 7], sizes = [32, 1], strides = [1, 1]} : vector<32x8xf32> to vector<32x1xf32>
    %cst_205 = arith.constant 5.000000e-01 : f32
    %661 = vector.broadcast %cst_205 : f32 to vector<32x1xf32>
    %662 = arith.cmpf ogt, %660, %661 : vector<32x1xf32>
    %cst_206 = arith.constant -1.000000e+30 : f32
    %663 = vector.shape_cast %662 : vector<32x1xi1> to vector<32x1xi1>
    %664 = vector.broadcast %663 : vector<32x1xi1> to vector<32x128xi1>
    %665 = vector.broadcast %cst_206 : f32 to vector<32x128xf32>
    %666 = arith.select %664, %659, %665 : vector<32x128xi1>, vector<32x128xf32>
    %667 = arith.maximumf %658, %666 : vector<32x128xf32>
    %668 = arith.addf %171, %111 : vector<32x128xf32>
    %669 = arith.addf %668, %667 : vector<32x128xf32>
    %cst_207 = arith.constant 0.000000e+00 : f32
    %670 = vector.broadcast %cst_207 : f32 to vector<32x128xf32>
    %671 = arith.maximumf %669, %670 : vector<32x128xf32>
    %c1 = arith.constant 1 : index
    %c0_208 = arith.constant 0 : index
    %c0_209 = arith.constant 0 : index
    %672 = vector.load %arg7[%c1, %c0_208, %c0_209] : memref<2x128x128xbf16, #tpu.memory_space<vmem>>, vector<1x128x128xbf16>
    %673 = vector.shape_cast %672 : vector<1x128x128xbf16> to vector<128x128xbf16>
    %c1_210 = arith.constant 1 : index
    %c0_211 = arith.constant 0 : index
    %c0_212 = arith.constant 0 : index
    %674 = vector.load %arg8[%c1_210, %c0_211, %c0_212] : memref<2x1x128xf32, #tpu.memory_space<vmem>>, vector<1x1x128xf32>
    %675 = vector.shape_cast %674 : vector<1x1x128xf32> to vector<1x128xf32>
    %676 = arith.truncf %671 : vector<32x128xf32> to vector<32x128xbf16>
    %cst_213 = arith.constant dense<0.000000e+00> : vector<32x128xf32>
    %677 = tpu.matmul %676, %673, %cst_213 {dimension_numbers = #tpu.dot_dimension_numbers<[1], [0], [0], [1], [0, 0, 1, 1], [], []>} : vector<32x128xbf16>, vector<128x128xbf16>, vector<32x128xf32> -> vector<32x128xf32>
    %678 = vector.broadcast %675 : vector<1x128xf32> to vector<32x128xf32>
    %679 = arith.addf %677, %678 : vector<32x128xf32>
    %cst_214 = arith.constant 0.000000e+00 : f32
    %680 = vector.broadcast %cst_214 : f32 to vector<32x128xf32>
    %681 = arith.maximumf %679, %680 : vector<32x128xf32>
    %c1_215 = arith.constant 1 : index
    %c0_216 = arith.constant 0 : index
    %c0_217 = arith.constant 0 : index
    %682 = vector.load %arg9[%c1_215, %c0_216, %c0_217] : memref<2x384x128xbf16, #tpu.memory_space<vmem>>, vector<1x384x128xbf16>
    %683 = vector.shape_cast %682 : vector<1x384x128xbf16> to vector<384x128xbf16>
    %c1_218 = arith.constant 1 : index
    %c0_219 = arith.constant 0 : index
    %c0_220 = arith.constant 0 : index
    %684 = vector.load %arg10[%c1_218, %c0_219, %c0_220] : memref<2x1x128xf32, #tpu.memory_space<vmem>>, vector<1x1x128xf32>
    %685 = vector.shape_cast %684 : vector<1x1x128xf32> to vector<1x128xf32>
    %c1_i32_221 = arith.constant 1 : i32
    %686 = tpu.dynamic_rotate %681 by %c1_i32_221 dim 0 : vector<32x128xf32>, i32 -> vector<32x128xf32>
    %cst_222 = arith.constant 0.000000e+00 : f32
    %687 = vector.shape_cast %3 : vector<32x1xi1> to vector<32x1xi1>
    %688 = vector.broadcast %687 : vector<32x1xi1> to vector<32x128xi1>
    %689 = vector.broadcast %cst_222 : f32 to vector<32x128xf32>
    %690 = arith.select %688, %686, %689 : vector<32x128xi1>, vector<32x128xf32>
    %691 = arith.truncf %690 : vector<32x128xf32> to vector<32x128xbf16>
    %692 = vector.extract_strided_slice %683 {offsets = [0, 0], sizes = [128, 128], strides = [1, 1]} : vector<384x128xbf16> to vector<128x128xbf16>
    %cst_223 = arith.constant dense<0.000000e+00> : vector<32x128xf32>
    %693 = tpu.matmul %691, %692, %cst_223 {dimension_numbers = #tpu.dot_dimension_numbers<[1], [0], [0], [1], [0, 0, 1, 1], [], []>} : vector<32x128xbf16>, vector<128x128xbf16>, vector<32x128xf32> -> vector<32x128xf32>
    %694 = arith.truncf %681 : vector<32x128xf32> to vector<32x128xbf16>
    %695 = vector.extract_strided_slice %683 {offsets = [128, 0], sizes = [128, 128], strides = [1, 1]} : vector<384x128xbf16> to vector<128x128xbf16>
    %cst_224 = arith.constant dense<0.000000e+00> : vector<32x128xf32>
    %696 = tpu.matmul %694, %695, %cst_224 {dimension_numbers = #tpu.dot_dimension_numbers<[1], [0], [0], [1], [0, 0, 1, 1], [], []>} : vector<32x128xbf16>, vector<128x128xbf16>, vector<32x128xf32> -> vector<32x128xf32>
    %697 = arith.addf %693, %696 : vector<32x128xf32>
    %c31_i32_225 = arith.constant 31 : i32
    %698 = tpu.dynamic_rotate %681 by %c31_i32_225 dim 0 : vector<32x128xf32>, i32 -> vector<32x128xf32>
    %cst_226 = arith.constant 0.000000e+00 : f32
    %699 = vector.shape_cast %5 : vector<32x1xi1> to vector<32x1xi1>
    %700 = vector.broadcast %699 : vector<32x1xi1> to vector<32x128xi1>
    %701 = vector.broadcast %cst_226 : f32 to vector<32x128xf32>
    %702 = arith.select %700, %698, %701 : vector<32x128xi1>, vector<32x128xf32>
    %703 = arith.truncf %702 : vector<32x128xf32> to vector<32x128xbf16>
    %704 = vector.extract_strided_slice %683 {offsets = [256, 0], sizes = [128, 128], strides = [1, 1]} : vector<384x128xbf16> to vector<128x128xbf16>
    %cst_227 = arith.constant dense<0.000000e+00> : vector<32x128xf32>
    %705 = tpu.matmul %703, %704, %cst_227 {dimension_numbers = #tpu.dot_dimension_numbers<[1], [0], [0], [1], [0, 0, 1, 1], [], []>} : vector<32x128xbf16>, vector<128x128xbf16>, vector<32x128xf32> -> vector<32x128xf32>
    %706 = arith.addf %697, %705 : vector<32x128xf32>
    %707 = vector.broadcast %685 : vector<1x128xf32> to vector<32x128xf32>
    %708 = arith.addf %706, %707 : vector<32x128xf32>
    %cst_228 = arith.constant 0.000000e+00 : f32
    %709 = vector.broadcast %cst_228 : f32 to vector<32x128xf32>
    %710 = arith.maximumf %708, %709 : vector<32x128xf32>
    %c1_229 = arith.constant 1 : index
    %c0_230 = arith.constant 0 : index
    %c0_231 = arith.constant 0 : index
    %711 = vector.load %arg11[%c1_229, %c0_230, %c0_231] : memref<2x128x128xbf16, #tpu.memory_space<vmem>>, vector<1x128x128xbf16>
    %712 = vector.shape_cast %711 : vector<1x128x128xbf16> to vector<128x128xbf16>
    %c1_232 = arith.constant 1 : index
    %c0_233 = arith.constant 0 : index
    %c0_234 = arith.constant 0 : index
    %713 = vector.load %arg12[%c1_232, %c0_233, %c0_234] : memref<2x1x128xf32, #tpu.memory_space<vmem>>, vector<1x1x128xf32>
    %714 = vector.shape_cast %713 : vector<1x1x128xf32> to vector<1x128xf32>
    %715 = arith.truncf %710 : vector<32x128xf32> to vector<32x128xbf16>
    %cst_235 = arith.constant dense<0.000000e+00> : vector<32x128xf32>
    %716 = tpu.matmul %715, %712, %cst_235 {dimension_numbers = #tpu.dot_dimension_numbers<[1], [0], [0], [1], [0, 0, 1, 1], [], []>} : vector<32x128xbf16>, vector<128x128xbf16>, vector<32x128xf32> -> vector<32x128xf32>
    %717 = vector.broadcast %714 : vector<1x128xf32> to vector<32x128xf32>
    %718 = arith.addf %716, %717 : vector<32x128xf32>
    %c1_236 = arith.constant 1 : index
    %c0_237 = arith.constant 0 : index
    %c0_238 = arith.constant 0 : index
    %719 = vector.load %arg14[%c1_236, %c0_237, %c0_238] : memref<2x128x128xbf16, #tpu.memory_space<vmem>>, vector<1x128x128xbf16>
    %720 = vector.shape_cast %719 : vector<1x128x128xbf16> to vector<128x128xbf16>
    %c1_239 = arith.constant 1 : index
    %c0_240 = arith.constant 0 : index
    %c0_241 = arith.constant 0 : index
    %721 = vector.load %arg15[%c1_239, %c0_240, %c0_241] : memref<2x1x128xf32, #tpu.memory_space<vmem>>, vector<1x1x128xf32>
    %722 = vector.shape_cast %721 : vector<1x1x128xf32> to vector<1x128xf32>
    %723 = arith.truncf %671 : vector<32x128xf32> to vector<32x128xbf16>
    %cst_242 = arith.constant dense<0.000000e+00> : vector<32x128xf32>
    %724 = tpu.matmul %723, %720, %cst_242 {dimension_numbers = #tpu.dot_dimension_numbers<[1], [0], [0], [1], [0, 0, 1, 1], [], []>} : vector<32x128xbf16>, vector<128x128xbf16>, vector<32x128xf32> -> vector<32x128xf32>
    %725 = vector.broadcast %722 : vector<1x128xf32> to vector<32x128xf32>
    %726 = arith.addf %724, %725 : vector<32x128xf32>
    %727 = arith.truncf %120 : vector<16x128xf32> to vector<16x128xbf16>
    %c1_243 = arith.constant 1 : index
    %c0_244 = arith.constant 0 : index
    %c0_245 = arith.constant 0 : index
    %728 = vector.load %arg13[%c1_243, %c0_244, %c0_245] : memref<2x128x128xbf16, #tpu.memory_space<vmem>>, vector<1x128x128xbf16>
    %729 = vector.shape_cast %728 : vector<1x128x128xbf16> to vector<128x128xbf16>
    %cst_246 = arith.constant dense<0.000000e+00> : vector<16x128xf32>
    %730 = tpu.matmul %727, %729, %cst_246 {dimension_numbers = #tpu.dot_dimension_numbers<[1], [0], [0], [1], [0, 0, 1, 1], [], []>} : vector<16x128xbf16>, vector<128x128xbf16>, vector<16x128xf32> -> vector<16x128xf32>
    %731 = arith.truncf %730 : vector<16x128xf32> to vector<16x128xbf16>
    %cst_247 = arith.constant dense<0.000000e+00> : vector<256x128xf32>
    %732 = tpu.matmul %83, %731, %cst_247 {dimension_numbers = #tpu.dot_dimension_numbers<[1], [0], [0], [1], [0, 0, 1, 1], [], []>} : vector<256x16xbf16>, vector<16x128xbf16>, vector<256x128xf32> -> vector<256x128xf32>
    %733 = tpu.concatenate %726, %726, %726, %726, %726, %726, %726, %726 in 0 : vector<32x128xf32>, vector<32x128xf32>, vector<32x128xf32>, vector<32x128xf32>, vector<32x128xf32>, vector<32x128xf32>, vector<32x128xf32>, vector<32x128xf32> -> vector<256x128xf32>
    %734 = arith.addf %732, %733 : vector<256x128xf32>
    %cst_248 = arith.constant 0.000000e+00 : f32
    %735 = vector.broadcast %cst_248 : f32 to vector<256x128xf32>
    %736 = arith.maximumf %734, %735 : vector<256x128xf32>
    %c1_249 = arith.constant 1 : index
    %c0_250 = arith.constant 0 : index
    %c0_251 = arith.constant 0 : index
    %737 = vector.load %arg16[%c1_249, %c0_250, %c0_251] : memref<2x128x128xbf16, #tpu.memory_space<vmem>>, vector<1x128x128xbf16>
    %738 = vector.shape_cast %737 : vector<1x128x128xbf16> to vector<128x128xbf16>
    %c1_252 = arith.constant 1 : index
    %c0_253 = arith.constant 0 : index
    %c0_254 = arith.constant 0 : index
    %739 = vector.load %arg17[%c1_252, %c0_253, %c0_254] : memref<2x1x128xf32, #tpu.memory_space<vmem>>, vector<1x1x128xf32>
    %740 = vector.shape_cast %739 : vector<1x1x128xf32> to vector<1x128xf32>
    %741 = arith.truncf %736 : vector<256x128xf32> to vector<256x128xbf16>
    %cst_255 = arith.constant dense<0.000000e+00> : vector<256x128xf32>
    %742 = tpu.matmul %741, %738, %cst_255 {dimension_numbers = #tpu.dot_dimension_numbers<[1], [0], [0], [1], [0, 0, 1, 1], [], []>} : vector<256x128xbf16>, vector<128x128xbf16>, vector<256x128xf32> -> vector<256x128xf32>
    %743 = vector.broadcast %740 : vector<1x128xf32> to vector<256x128xf32>
    %744 = arith.addf %742, %743 : vector<256x128xf32>
    %cst_256 = arith.constant 0.000000e+00 : f32
    %745 = vector.broadcast %cst_256 : f32 to vector<256x128xf32>
    %746 = arith.maximumf %744, %745 : vector<256x128xf32>
    %c1_257 = arith.constant 1 : index
    %c0_258 = arith.constant 0 : index
    %c0_259 = arith.constant 0 : index
    %747 = vector.load %arg18[%c1_257, %c0_258, %c0_259] : memref<2x128x128xbf16, #tpu.memory_space<vmem>>, vector<1x128x128xbf16>
    %748 = vector.shape_cast %747 : vector<1x128x128xbf16> to vector<128x128xbf16>
    %c1_260 = arith.constant 1 : index
    %c0_261 = arith.constant 0 : index
    %c0_262 = arith.constant 0 : index
    %749 = vector.load %arg19[%c1_260, %c0_261, %c0_262] : memref<2x1x128xf32, #tpu.memory_space<vmem>>, vector<1x1x128xf32>
    %750 = vector.shape_cast %749 : vector<1x1x128xf32> to vector<1x128xf32>
    %751 = arith.truncf %746 : vector<256x128xf32> to vector<256x128xbf16>
    %cst_263 = arith.constant dense<0.000000e+00> : vector<256x128xf32>
    %752 = tpu.matmul %751, %748, %cst_263 {dimension_numbers = #tpu.dot_dimension_numbers<[1], [0], [0], [1], [0, 0, 1, 1], [], []>} : vector<256x128xbf16>, vector<128x128xbf16>, vector<256x128xf32> -> vector<256x128xf32>
    %753 = vector.broadcast %750 : vector<1x128xf32> to vector<256x128xf32>
    %754 = arith.addf %752, %753 : vector<256x128xf32>
    %755 = vector.extract_strided_slice %671 {offsets = [0, 0], sizes = [16, 128], strides = [1, 1]} : vector<32x128xf32> to vector<16x128xf32>
    %756 = vector.extract_strided_slice %120 {offsets = [0, 0], sizes = [8, 128], strides = [1, 1]} : vector<16x128xf32> to vector<8x128xf32>
    %cst_264 = arith.constant dense<0.000000e+00> : vector<16x8xf32>
    %757 = tpu.matmul %755, %756, %cst_264 {dimension_numbers = #tpu.dot_dimension_numbers<[1], [1], [0], [0], [0, 0, 1, 0], [], []>} : vector<16x128xf32>, vector<8x128xf32>, vector<16x8xf32> -> vector<16x8xf32>
    %cst_265 = arith.constant 2.000000e+00 : f32
    %758 = vector.broadcast %cst_265 : f32 to vector<16x8xf32>
    %759 = arith.mulf %758, %757 : vector<16x8xf32>
    %760 = vector.extract_strided_slice %124 {offsets = [0, 0], sizes = [1, 8], strides = [1, 1]} : vector<1x16xf32> to vector<1x8xf32>
    %761 = vector.broadcast %760 : vector<1x8xf32> to vector<16x8xf32>
    %762 = arith.subf %759, %761 : vector<16x8xf32>
    %cst_266 = arith.constant 0.000000e+00 : f32
    %763 = vector.broadcast %cst_266 : f32 to vector<16x8xf32>
    %764 = vector.extract_strided_slice %762 {offsets = [0, 0], sizes = [16, 1], strides = [1, 1]} : vector<16x8xf32> to vector<16x1xf32>
    %765 = vector.broadcast %764 : vector<16x1xf32> to vector<16x8xf32>
    %766 = arith.cmpf ogt, %762, %765 : vector<16x8xf32>
    %767 = vector.broadcast %764 : vector<16x1xf32> to vector<16x8xf32>
    %768 = arith.cmpf oeq, %762, %767 : vector<16x8xf32>
    %c0_i32_267 = arith.constant 0 : i32
    %769 = vector.broadcast %c0_i32_267 : i32 to vector<16x8xi32>
    %770 = arith.cmpi slt, %6, %769 : vector<16x8xi32>
    %771 = arith.andi %768, %770 : vector<16x8xi1>
    %772 = arith.ori %766, %771 : vector<16x8xi1>
    %773 = arith.extui %772 : vector<16x8xi1> to vector<16x8xi32>
    %774 = arith.sitofp %773 : vector<16x8xi32> to vector<16x8xf32>
    %cst_268 = arith.constant dense<0.000000e+00> : vector<16xf32>
    %775 = vector.multi_reduction <add>, %774, %cst_268 [1] : vector<16x8xf32> to vector<16xf32>
    %776 = vector.shape_cast %775 : vector<16xf32> to vector<16x1xf32>
    %c0_i32_269 = arith.constant 0 : i32
    %777 = vector.broadcast %c0_i32_269 : i32 to vector<16x8xi32>
    %778 = arith.cmpi eq, %6, %777 : vector<16x8xi32>
    %cst_270 = arith.constant 4.000000e+00 : f32
    %779 = vector.broadcast %cst_270 : f32 to vector<16x1xf32>
    %780 = arith.cmpf olt, %776, %779 : vector<16x1xf32>
    %781 = vector.broadcast %780 : vector<16x1xi1> to vector<16x8xi1>
    %782 = arith.andi %778, %781 : vector<16x8xi1>
    %cst_271 = arith.constant 1.000000e+00 : f32
    %cst_272 = arith.constant 0.000000e+00 : f32
    %783 = vector.broadcast %cst_271 : f32 to vector<16x8xf32>
    %784 = vector.broadcast %cst_272 : f32 to vector<16x8xf32>
    %785 = arith.select %782, %783, %784 : vector<16x8xi1>, vector<16x8xf32>
    %786 = arith.addf %763, %785 : vector<16x8xf32>
    %787 = vector.extract_strided_slice %762 {offsets = [0, 1], sizes = [16, 1], strides = [1, 1]} : vector<16x8xf32> to vector<16x1xf32>
    %788 = vector.broadcast %787 : vector<16x1xf32> to vector<16x8xf32>
    %789 = arith.cmpf ogt, %762, %788 : vector<16x8xf32>
    %790 = vector.broadcast %787 : vector<16x1xf32> to vector<16x8xf32>
    %791 = arith.cmpf oeq, %762, %790 : vector<16x8xf32>
    %c1_i32_273 = arith.constant 1 : i32
    %792 = vector.broadcast %c1_i32_273 : i32 to vector<16x8xi32>
    %793 = arith.cmpi slt, %6, %792 : vector<16x8xi32>
    %794 = arith.andi %791, %793 : vector<16x8xi1>
    %795 = arith.ori %789, %794 : vector<16x8xi1>
    %796 = arith.extui %795 : vector<16x8xi1> to vector<16x8xi32>
    %797 = arith.sitofp %796 : vector<16x8xi32> to vector<16x8xf32>
    %cst_274 = arith.constant dense<0.000000e+00> : vector<16xf32>
    %798 = vector.multi_reduction <add>, %797, %cst_274 [1] : vector<16x8xf32> to vector<16xf32>
    %799 = vector.shape_cast %798 : vector<16xf32> to vector<16x1xf32>
    %c1_i32_275 = arith.constant 1 : i32
    %800 = vector.broadcast %c1_i32_275 : i32 to vector<16x8xi32>
    %801 = arith.cmpi eq, %6, %800 : vector<16x8xi32>
    %cst_276 = arith.constant 4.000000e+00 : f32
    %802 = vector.broadcast %cst_276 : f32 to vector<16x1xf32>
    %803 = arith.cmpf olt, %799, %802 : vector<16x1xf32>
    %804 = vector.broadcast %803 : vector<16x1xi1> to vector<16x8xi1>
    %805 = arith.andi %801, %804 : vector<16x8xi1>
    %cst_277 = arith.constant 1.000000e+00 : f32
    %cst_278 = arith.constant 0.000000e+00 : f32
    %806 = vector.broadcast %cst_277 : f32 to vector<16x8xf32>
    %807 = vector.broadcast %cst_278 : f32 to vector<16x8xf32>
    %808 = arith.select %805, %806, %807 : vector<16x8xi1>, vector<16x8xf32>
    %809 = arith.addf %786, %808 : vector<16x8xf32>
    %810 = vector.extract_strided_slice %762 {offsets = [0, 2], sizes = [16, 1], strides = [1, 1]} : vector<16x8xf32> to vector<16x1xf32>
    %811 = vector.broadcast %810 : vector<16x1xf32> to vector<16x8xf32>
    %812 = arith.cmpf ogt, %762, %811 : vector<16x8xf32>
    %813 = vector.broadcast %810 : vector<16x1xf32> to vector<16x8xf32>
    %814 = arith.cmpf oeq, %762, %813 : vector<16x8xf32>
    %c2_i32_279 = arith.constant 2 : i32
    %815 = vector.broadcast %c2_i32_279 : i32 to vector<16x8xi32>
    %816 = arith.cmpi slt, %6, %815 : vector<16x8xi32>
    %817 = arith.andi %814, %816 : vector<16x8xi1>
    %818 = arith.ori %812, %817 : vector<16x8xi1>
    %819 = arith.extui %818 : vector<16x8xi1> to vector<16x8xi32>
    %820 = arith.sitofp %819 : vector<16x8xi32> to vector<16x8xf32>
    %cst_280 = arith.constant dense<0.000000e+00> : vector<16xf32>
    %821 = vector.multi_reduction <add>, %820, %cst_280 [1] : vector<16x8xf32> to vector<16xf32>
    %822 = vector.shape_cast %821 : vector<16xf32> to vector<16x1xf32>
    %c2_i32_281 = arith.constant 2 : i32
    %823 = vector.broadcast %c2_i32_281 : i32 to vector<16x8xi32>
    %824 = arith.cmpi eq, %6, %823 : vector<16x8xi32>
    %cst_282 = arith.constant 4.000000e+00 : f32
    %825 = vector.broadcast %cst_282 : f32 to vector<16x1xf32>
    %826 = arith.cmpf olt, %822, %825 : vector<16x1xf32>
    %827 = vector.broadcast %826 : vector<16x1xi1> to vector<16x8xi1>
    %828 = arith.andi %824, %827 : vector<16x8xi1>
    %cst_283 = arith.constant 1.000000e+00 : f32
    %cst_284 = arith.constant 0.000000e+00 : f32
    %829 = vector.broadcast %cst_283 : f32 to vector<16x8xf32>
    %830 = vector.broadcast %cst_284 : f32 to vector<16x8xf32>
    %831 = arith.select %828, %829, %830 : vector<16x8xi1>, vector<16x8xf32>
    %832 = arith.addf %809, %831 : vector<16x8xf32>
    %833 = vector.extract_strided_slice %762 {offsets = [0, 3], sizes = [16, 1], strides = [1, 1]} : vector<16x8xf32> to vector<16x1xf32>
    %834 = vector.broadcast %833 : vector<16x1xf32> to vector<16x8xf32>
    %835 = arith.cmpf ogt, %762, %834 : vector<16x8xf32>
    %836 = vector.broadcast %833 : vector<16x1xf32> to vector<16x8xf32>
    %837 = arith.cmpf oeq, %762, %836 : vector<16x8xf32>
    %c3_i32_285 = arith.constant 3 : i32
    %838 = vector.broadcast %c3_i32_285 : i32 to vector<16x8xi32>
    %839 = arith.cmpi slt, %6, %838 : vector<16x8xi32>
    %840 = arith.andi %837, %839 : vector<16x8xi1>
    %841 = arith.ori %835, %840 : vector<16x8xi1>
    %842 = arith.extui %841 : vector<16x8xi1> to vector<16x8xi32>
    %843 = arith.sitofp %842 : vector<16x8xi32> to vector<16x8xf32>
    %cst_286 = arith.constant dense<0.000000e+00> : vector<16xf32>
    %844 = vector.multi_reduction <add>, %843, %cst_286 [1] : vector<16x8xf32> to vector<16xf32>
    %845 = vector.shape_cast %844 : vector<16xf32> to vector<16x1xf32>
    %c3_i32_287 = arith.constant 3 : i32
    %846 = vector.broadcast %c3_i32_287 : i32 to vector<16x8xi32>
    %847 = arith.cmpi eq, %6, %846 : vector<16x8xi32>
    %cst_288 = arith.constant 4.000000e+00 : f32
    %848 = vector.broadcast %cst_288 : f32 to vector<16x1xf32>
    %849 = arith.cmpf olt, %845, %848 : vector<16x1xf32>
    %850 = vector.broadcast %849 : vector<16x1xi1> to vector<16x8xi1>
    %851 = arith.andi %847, %850 : vector<16x8xi1>
    %cst_289 = arith.constant 1.000000e+00 : f32
    %cst_290 = arith.constant 0.000000e+00 : f32
    %852 = vector.broadcast %cst_289 : f32 to vector<16x8xf32>
    %853 = vector.broadcast %cst_290 : f32 to vector<16x8xf32>
    %854 = arith.select %851, %852, %853 : vector<16x8xi1>, vector<16x8xf32>
    %855 = arith.addf %832, %854 : vector<16x8xf32>
    %856 = vector.extract_strided_slice %762 {offsets = [0, 4], sizes = [16, 1], strides = [1, 1]} : vector<16x8xf32> to vector<16x1xf32>
    %857 = vector.broadcast %856 : vector<16x1xf32> to vector<16x8xf32>
    %858 = arith.cmpf ogt, %762, %857 : vector<16x8xf32>
    %859 = vector.broadcast %856 : vector<16x1xf32> to vector<16x8xf32>
    %860 = arith.cmpf oeq, %762, %859 : vector<16x8xf32>
    %c4_i32_291 = arith.constant 4 : i32
    %861 = vector.broadcast %c4_i32_291 : i32 to vector<16x8xi32>
    %862 = arith.cmpi slt, %6, %861 : vector<16x8xi32>
    %863 = arith.andi %860, %862 : vector<16x8xi1>
    %864 = arith.ori %858, %863 : vector<16x8xi1>
    %865 = arith.extui %864 : vector<16x8xi1> to vector<16x8xi32>
    %866 = arith.sitofp %865 : vector<16x8xi32> to vector<16x8xf32>
    %cst_292 = arith.constant dense<0.000000e+00> : vector<16xf32>
    %867 = vector.multi_reduction <add>, %866, %cst_292 [1] : vector<16x8xf32> to vector<16xf32>
    %868 = vector.shape_cast %867 : vector<16xf32> to vector<16x1xf32>
    %c4_i32_293 = arith.constant 4 : i32
    %869 = vector.broadcast %c4_i32_293 : i32 to vector<16x8xi32>
    %870 = arith.cmpi eq, %6, %869 : vector<16x8xi32>
    %cst_294 = arith.constant 4.000000e+00 : f32
    %871 = vector.broadcast %cst_294 : f32 to vector<16x1xf32>
    %872 = arith.cmpf olt, %868, %871 : vector<16x1xf32>
    %873 = vector.broadcast %872 : vector<16x1xi1> to vector<16x8xi1>
    %874 = arith.andi %870, %873 : vector<16x8xi1>
    %cst_295 = arith.constant 1.000000e+00 : f32
    %cst_296 = arith.constant 0.000000e+00 : f32
    %875 = vector.broadcast %cst_295 : f32 to vector<16x8xf32>
    %876 = vector.broadcast %cst_296 : f32 to vector<16x8xf32>
    %877 = arith.select %874, %875, %876 : vector<16x8xi1>, vector<16x8xf32>
    %878 = arith.addf %855, %877 : vector<16x8xf32>
    %879 = vector.extract_strided_slice %762 {offsets = [0, 5], sizes = [16, 1], strides = [1, 1]} : vector<16x8xf32> to vector<16x1xf32>
    %880 = vector.broadcast %879 : vector<16x1xf32> to vector<16x8xf32>
    %881 = arith.cmpf ogt, %762, %880 : vector<16x8xf32>
    %882 = vector.broadcast %879 : vector<16x1xf32> to vector<16x8xf32>
    %883 = arith.cmpf oeq, %762, %882 : vector<16x8xf32>
    %c5_i32_297 = arith.constant 5 : i32
    %884 = vector.broadcast %c5_i32_297 : i32 to vector<16x8xi32>
    %885 = arith.cmpi slt, %6, %884 : vector<16x8xi32>
    %886 = arith.andi %883, %885 : vector<16x8xi1>
    %887 = arith.ori %881, %886 : vector<16x8xi1>
    %888 = arith.extui %887 : vector<16x8xi1> to vector<16x8xi32>
    %889 = arith.sitofp %888 : vector<16x8xi32> to vector<16x8xf32>
    %cst_298 = arith.constant dense<0.000000e+00> : vector<16xf32>
    %890 = vector.multi_reduction <add>, %889, %cst_298 [1] : vector<16x8xf32> to vector<16xf32>
    %891 = vector.shape_cast %890 : vector<16xf32> to vector<16x1xf32>
    %c5_i32_299 = arith.constant 5 : i32
    %892 = vector.broadcast %c5_i32_299 : i32 to vector<16x8xi32>
    %893 = arith.cmpi eq, %6, %892 : vector<16x8xi32>
    %cst_300 = arith.constant 4.000000e+00 : f32
    %894 = vector.broadcast %cst_300 : f32 to vector<16x1xf32>
    %895 = arith.cmpf olt, %891, %894 : vector<16x1xf32>
    %896 = vector.broadcast %895 : vector<16x1xi1> to vector<16x8xi1>
    %897 = arith.andi %893, %896 : vector<16x8xi1>
    %cst_301 = arith.constant 1.000000e+00 : f32
    %cst_302 = arith.constant 0.000000e+00 : f32
    %898 = vector.broadcast %cst_301 : f32 to vector<16x8xf32>
    %899 = vector.broadcast %cst_302 : f32 to vector<16x8xf32>
    %900 = arith.select %897, %898, %899 : vector<16x8xi1>, vector<16x8xf32>
    %901 = arith.addf %878, %900 : vector<16x8xf32>
    %902 = vector.extract_strided_slice %762 {offsets = [0, 6], sizes = [16, 1], strides = [1, 1]} : vector<16x8xf32> to vector<16x1xf32>
    %903 = vector.broadcast %902 : vector<16x1xf32> to vector<16x8xf32>
    %904 = arith.cmpf ogt, %762, %903 : vector<16x8xf32>
    %905 = vector.broadcast %902 : vector<16x1xf32> to vector<16x8xf32>
    %906 = arith.cmpf oeq, %762, %905 : vector<16x8xf32>
    %c6_i32_303 = arith.constant 6 : i32
    %907 = vector.broadcast %c6_i32_303 : i32 to vector<16x8xi32>
    %908 = arith.cmpi slt, %6, %907 : vector<16x8xi32>
    %909 = arith.andi %906, %908 : vector<16x8xi1>
    %910 = arith.ori %904, %909 : vector<16x8xi1>
    %911 = arith.extui %910 : vector<16x8xi1> to vector<16x8xi32>
    %912 = arith.sitofp %911 : vector<16x8xi32> to vector<16x8xf32>
    %cst_304 = arith.constant dense<0.000000e+00> : vector<16xf32>
    %913 = vector.multi_reduction <add>, %912, %cst_304 [1] : vector<16x8xf32> to vector<16xf32>
    %914 = vector.shape_cast %913 : vector<16xf32> to vector<16x1xf32>
    %c6_i32_305 = arith.constant 6 : i32
    %915 = vector.broadcast %c6_i32_305 : i32 to vector<16x8xi32>
    %916 = arith.cmpi eq, %6, %915 : vector<16x8xi32>
    %cst_306 = arith.constant 4.000000e+00 : f32
    %917 = vector.broadcast %cst_306 : f32 to vector<16x1xf32>
    %918 = arith.cmpf olt, %914, %917 : vector<16x1xf32>
    %919 = vector.broadcast %918 : vector<16x1xi1> to vector<16x8xi1>
    %920 = arith.andi %916, %919 : vector<16x8xi1>
    %cst_307 = arith.constant 1.000000e+00 : f32
    %cst_308 = arith.constant 0.000000e+00 : f32
    %921 = vector.broadcast %cst_307 : f32 to vector<16x8xf32>
    %922 = vector.broadcast %cst_308 : f32 to vector<16x8xf32>
    %923 = arith.select %920, %921, %922 : vector<16x8xi1>, vector<16x8xf32>
    %924 = arith.addf %901, %923 : vector<16x8xf32>
    %925 = vector.extract_strided_slice %762 {offsets = [0, 7], sizes = [16, 1], strides = [1, 1]} : vector<16x8xf32> to vector<16x1xf32>
    %926 = vector.broadcast %925 : vector<16x1xf32> to vector<16x8xf32>
    %927 = arith.cmpf ogt, %762, %926 : vector<16x8xf32>
    %928 = vector.broadcast %925 : vector<16x1xf32> to vector<16x8xf32>
    %929 = arith.cmpf oeq, %762, %928 : vector<16x8xf32>
    %c7_i32_309 = arith.constant 7 : i32
    %930 = vector.broadcast %c7_i32_309 : i32 to vector<16x8xi32>
    %931 = arith.cmpi slt, %6, %930 : vector<16x8xi32>
    %932 = arith.andi %929, %931 : vector<16x8xi1>
    %933 = arith.ori %927, %932 : vector<16x8xi1>
    %934 = arith.extui %933 : vector<16x8xi1> to vector<16x8xi32>
    %935 = arith.sitofp %934 : vector<16x8xi32> to vector<16x8xf32>
    %cst_310 = arith.constant dense<0.000000e+00> : vector<16xf32>
    %936 = vector.multi_reduction <add>, %935, %cst_310 [1] : vector<16x8xf32> to vector<16xf32>
    %937 = vector.shape_cast %936 : vector<16xf32> to vector<16x1xf32>
    %c7_i32_311 = arith.constant 7 : i32
    %938 = vector.broadcast %c7_i32_311 : i32 to vector<16x8xi32>
    %939 = arith.cmpi eq, %6, %938 : vector<16x8xi32>
    %cst_312 = arith.constant 4.000000e+00 : f32
    %940 = vector.broadcast %cst_312 : f32 to vector<16x1xf32>
    %941 = arith.cmpf olt, %937, %940 : vector<16x1xf32>
    %942 = vector.broadcast %941 : vector<16x1xi1> to vector<16x8xi1>
    %943 = arith.andi %939, %942 : vector<16x8xi1>
    %cst_313 = arith.constant 1.000000e+00 : f32
    %cst_314 = arith.constant 0.000000e+00 : f32
    %944 = vector.broadcast %cst_313 : f32 to vector<16x8xf32>
    %945 = vector.broadcast %cst_314 : f32 to vector<16x8xf32>
    %946 = arith.select %943, %944, %945 : vector<16x8xi1>, vector<16x8xf32>
    %947 = arith.addf %924, %946 : vector<16x8xf32>
    %948 = vector.extract_strided_slice %671 {offsets = [16, 0], sizes = [16, 128], strides = [1, 1]} : vector<32x128xf32> to vector<16x128xf32>
    %949 = vector.extract_strided_slice %120 {offsets = [8, 0], sizes = [8, 128], strides = [1, 1]} : vector<16x128xf32> to vector<8x128xf32>
    %cst_315 = arith.constant dense<0.000000e+00> : vector<16x8xf32>
    %950 = tpu.matmul %948, %949, %cst_315 {dimension_numbers = #tpu.dot_dimension_numbers<[1], [1], [0], [0], [0, 0, 1, 0], [], []>} : vector<16x128xf32>, vector<8x128xf32>, vector<16x8xf32> -> vector<16x8xf32>
    %cst_316 = arith.constant 2.000000e+00 : f32
    %951 = vector.broadcast %cst_316 : f32 to vector<16x8xf32>
    %952 = arith.mulf %951, %950 : vector<16x8xf32>
    %953 = vector.extract_strided_slice %124 {offsets = [0, 8], sizes = [1, 8], strides = [1, 1]} : vector<1x16xf32> to vector<1x8xf32>
    %954 = vector.broadcast %953 : vector<1x8xf32> to vector<16x8xf32>
    %955 = arith.subf %952, %954 : vector<16x8xf32>
    %cst_317 = arith.constant 0.000000e+00 : f32
    %956 = vector.broadcast %cst_317 : f32 to vector<16x8xf32>
    %957 = vector.extract_strided_slice %955 {offsets = [0, 0], sizes = [16, 1], strides = [1, 1]} : vector<16x8xf32> to vector<16x1xf32>
    %958 = vector.broadcast %957 : vector<16x1xf32> to vector<16x8xf32>
    %959 = arith.cmpf ogt, %955, %958 : vector<16x8xf32>
    %960 = vector.broadcast %957 : vector<16x1xf32> to vector<16x8xf32>
    %961 = arith.cmpf oeq, %955, %960 : vector<16x8xf32>
    %c0_i32_318 = arith.constant 0 : i32
    %962 = vector.broadcast %c0_i32_318 : i32 to vector<16x8xi32>
    %963 = arith.cmpi slt, %6, %962 : vector<16x8xi32>
    %964 = arith.andi %961, %963 : vector<16x8xi1>
    %965 = arith.ori %959, %964 : vector<16x8xi1>
    %966 = arith.extui %965 : vector<16x8xi1> to vector<16x8xi32>
    %967 = arith.sitofp %966 : vector<16x8xi32> to vector<16x8xf32>
    %cst_319 = arith.constant dense<0.000000e+00> : vector<16xf32>
    %968 = vector.multi_reduction <add>, %967, %cst_319 [1] : vector<16x8xf32> to vector<16xf32>
    %969 = vector.shape_cast %968 : vector<16xf32> to vector<16x1xf32>
    %c0_i32_320 = arith.constant 0 : i32
    %970 = vector.broadcast %c0_i32_320 : i32 to vector<16x8xi32>
    %971 = arith.cmpi eq, %6, %970 : vector<16x8xi32>
    %cst_321 = arith.constant 4.000000e+00 : f32
    %972 = vector.broadcast %cst_321 : f32 to vector<16x1xf32>
    %973 = arith.cmpf olt, %969, %972 : vector<16x1xf32>
    %974 = vector.broadcast %973 : vector<16x1xi1> to vector<16x8xi1>
    %975 = arith.andi %971, %974 : vector<16x8xi1>
    %cst_322 = arith.constant 1.000000e+00 : f32
    %cst_323 = arith.constant 0.000000e+00 : f32
    %976 = vector.broadcast %cst_322 : f32 to vector<16x8xf32>
    %977 = vector.broadcast %cst_323 : f32 to vector<16x8xf32>
    %978 = arith.select %975, %976, %977 : vector<16x8xi1>, vector<16x8xf32>
    %979 = arith.addf %956, %978 : vector<16x8xf32>
    %980 = vector.extract_strided_slice %955 {offsets = [0, 1], sizes = [16, 1], strides = [1, 1]} : vector<16x8xf32> to vector<16x1xf32>
    %981 = vector.broadcast %980 : vector<16x1xf32> to vector<16x8xf32>
    %982 = arith.cmpf ogt, %955, %981 : vector<16x8xf32>
    %983 = vector.broadcast %980 : vector<16x1xf32> to vector<16x8xf32>
    %984 = arith.cmpf oeq, %955, %983 : vector<16x8xf32>
    %c1_i32_324 = arith.constant 1 : i32
    %985 = vector.broadcast %c1_i32_324 : i32 to vector<16x8xi32>
    %986 = arith.cmpi slt, %6, %985 : vector<16x8xi32>
    %987 = arith.andi %984, %986 : vector<16x8xi1>
    %988 = arith.ori %982, %987 : vector<16x8xi1>
    %989 = arith.extui %988 : vector<16x8xi1> to vector<16x8xi32>
    %990 = arith.sitofp %989 : vector<16x8xi32> to vector<16x8xf32>
    %cst_325 = arith.constant dense<0.000000e+00> : vector<16xf32>
    %991 = vector.multi_reduction <add>, %990, %cst_325 [1] : vector<16x8xf32> to vector<16xf32>
    %992 = vector.shape_cast %991 : vector<16xf32> to vector<16x1xf32>
    %c1_i32_326 = arith.constant 1 : i32
    %993 = vector.broadcast %c1_i32_326 : i32 to vector<16x8xi32>
    %994 = arith.cmpi eq, %6, %993 : vector<16x8xi32>
    %cst_327 = arith.constant 4.000000e+00 : f32
    %995 = vector.broadcast %cst_327 : f32 to vector<16x1xf32>
    %996 = arith.cmpf olt, %992, %995 : vector<16x1xf32>
    %997 = vector.broadcast %996 : vector<16x1xi1> to vector<16x8xi1>
    %998 = arith.andi %994, %997 : vector<16x8xi1>
    %cst_328 = arith.constant 1.000000e+00 : f32
    %cst_329 = arith.constant 0.000000e+00 : f32
    %999 = vector.broadcast %cst_328 : f32 to vector<16x8xf32>
    %1000 = vector.broadcast %cst_329 : f32 to vector<16x8xf32>
    %1001 = arith.select %998, %999, %1000 : vector<16x8xi1>, vector<16x8xf32>
    %1002 = arith.addf %979, %1001 : vector<16x8xf32>
    %1003 = vector.extract_strided_slice %955 {offsets = [0, 2], sizes = [16, 1], strides = [1, 1]} : vector<16x8xf32> to vector<16x1xf32>
    %1004 = vector.broadcast %1003 : vector<16x1xf32> to vector<16x8xf32>
    %1005 = arith.cmpf ogt, %955, %1004 : vector<16x8xf32>
    %1006 = vector.broadcast %1003 : vector<16x1xf32> to vector<16x8xf32>
    %1007 = arith.cmpf oeq, %955, %1006 : vector<16x8xf32>
    %c2_i32_330 = arith.constant 2 : i32
    %1008 = vector.broadcast %c2_i32_330 : i32 to vector<16x8xi32>
    %1009 = arith.cmpi slt, %6, %1008 : vector<16x8xi32>
    %1010 = arith.andi %1007, %1009 : vector<16x8xi1>
    %1011 = arith.ori %1005, %1010 : vector<16x8xi1>
    %1012 = arith.extui %1011 : vector<16x8xi1> to vector<16x8xi32>
    %1013 = arith.sitofp %1012 : vector<16x8xi32> to vector<16x8xf32>
    %cst_331 = arith.constant dense<0.000000e+00> : vector<16xf32>
    %1014 = vector.multi_reduction <add>, %1013, %cst_331 [1] : vector<16x8xf32> to vector<16xf32>
    %1015 = vector.shape_cast %1014 : vector<16xf32> to vector<16x1xf32>
    %c2_i32_332 = arith.constant 2 : i32
    %1016 = vector.broadcast %c2_i32_332 : i32 to vector<16x8xi32>
    %1017 = arith.cmpi eq, %6, %1016 : vector<16x8xi32>
    %cst_333 = arith.constant 4.000000e+00 : f32
    %1018 = vector.broadcast %cst_333 : f32 to vector<16x1xf32>
    %1019 = arith.cmpf olt, %1015, %1018 : vector<16x1xf32>
    %1020 = vector.broadcast %1019 : vector<16x1xi1> to vector<16x8xi1>
    %1021 = arith.andi %1017, %1020 : vector<16x8xi1>
    %cst_334 = arith.constant 1.000000e+00 : f32
    %cst_335 = arith.constant 0.000000e+00 : f32
    %1022 = vector.broadcast %cst_334 : f32 to vector<16x8xf32>
    %1023 = vector.broadcast %cst_335 : f32 to vector<16x8xf32>
    %1024 = arith.select %1021, %1022, %1023 : vector<16x8xi1>, vector<16x8xf32>
    %1025 = arith.addf %1002, %1024 : vector<16x8xf32>
    %1026 = vector.extract_strided_slice %955 {offsets = [0, 3], sizes = [16, 1], strides = [1, 1]} : vector<16x8xf32> to vector<16x1xf32>
    %1027 = vector.broadcast %1026 : vector<16x1xf32> to vector<16x8xf32>
    %1028 = arith.cmpf ogt, %955, %1027 : vector<16x8xf32>
    %1029 = vector.broadcast %1026 : vector<16x1xf32> to vector<16x8xf32>
    %1030 = arith.cmpf oeq, %955, %1029 : vector<16x8xf32>
    %c3_i32_336 = arith.constant 3 : i32
    %1031 = vector.broadcast %c3_i32_336 : i32 to vector<16x8xi32>
    %1032 = arith.cmpi slt, %6, %1031 : vector<16x8xi32>
    %1033 = arith.andi %1030, %1032 : vector<16x8xi1>
    %1034 = arith.ori %1028, %1033 : vector<16x8xi1>
    %1035 = arith.extui %1034 : vector<16x8xi1> to vector<16x8xi32>
    %1036 = arith.sitofp %1035 : vector<16x8xi32> to vector<16x8xf32>
    %cst_337 = arith.constant dense<0.000000e+00> : vector<16xf32>
    %1037 = vector.multi_reduction <add>, %1036, %cst_337 [1] : vector<16x8xf32> to vector<16xf32>
    %1038 = vector.shape_cast %1037 : vector<16xf32> to vector<16x1xf32>
    %c3_i32_338 = arith.constant 3 : i32
    %1039 = vector.broadcast %c3_i32_338 : i32 to vector<16x8xi32>
    %1040 = arith.cmpi eq, %6, %1039 : vector<16x8xi32>
    %cst_339 = arith.constant 4.000000e+00 : f32
    %1041 = vector.broadcast %cst_339 : f32 to vector<16x1xf32>
    %1042 = arith.cmpf olt, %1038, %1041 : vector<16x1xf32>
    %1043 = vector.broadcast %1042 : vector<16x1xi1> to vector<16x8xi1>
    %1044 = arith.andi %1040, %1043 : vector<16x8xi1>
    %cst_340 = arith.constant 1.000000e+00 : f32
    %cst_341 = arith.constant 0.000000e+00 : f32
    %1045 = vector.broadcast %cst_340 : f32 to vector<16x8xf32>
    %1046 = vector.broadcast %cst_341 : f32 to vector<16x8xf32>
    %1047 = arith.select %1044, %1045, %1046 : vector<16x8xi1>, vector<16x8xf32>
    %1048 = arith.addf %1025, %1047 : vector<16x8xf32>
    %1049 = vector.extract_strided_slice %955 {offsets = [0, 4], sizes = [16, 1], strides = [1, 1]} : vector<16x8xf32> to vector<16x1xf32>
    %1050 = vector.broadcast %1049 : vector<16x1xf32> to vector<16x8xf32>
    %1051 = arith.cmpf ogt, %955, %1050 : vector<16x8xf32>
    %1052 = vector.broadcast %1049 : vector<16x1xf32> to vector<16x8xf32>
    %1053 = arith.cmpf oeq, %955, %1052 : vector<16x8xf32>
    %c4_i32_342 = arith.constant 4 : i32
    %1054 = vector.broadcast %c4_i32_342 : i32 to vector<16x8xi32>
    %1055 = arith.cmpi slt, %6, %1054 : vector<16x8xi32>
    %1056 = arith.andi %1053, %1055 : vector<16x8xi1>
    %1057 = arith.ori %1051, %1056 : vector<16x8xi1>
    %1058 = arith.extui %1057 : vector<16x8xi1> to vector<16x8xi32>
    %1059 = arith.sitofp %1058 : vector<16x8xi32> to vector<16x8xf32>
    %cst_343 = arith.constant dense<0.000000e+00> : vector<16xf32>
    %1060 = vector.multi_reduction <add>, %1059, %cst_343 [1] : vector<16x8xf32> to vector<16xf32>
    %1061 = vector.shape_cast %1060 : vector<16xf32> to vector<16x1xf32>
    %c4_i32_344 = arith.constant 4 : i32
    %1062 = vector.broadcast %c4_i32_344 : i32 to vector<16x8xi32>
    %1063 = arith.cmpi eq, %6, %1062 : vector<16x8xi32>
    %cst_345 = arith.constant 4.000000e+00 : f32
    %1064 = vector.broadcast %cst_345 : f32 to vector<16x1xf32>
    %1065 = arith.cmpf olt, %1061, %1064 : vector<16x1xf32>
    %1066 = vector.broadcast %1065 : vector<16x1xi1> to vector<16x8xi1>
    %1067 = arith.andi %1063, %1066 : vector<16x8xi1>
    %cst_346 = arith.constant 1.000000e+00 : f32
    %cst_347 = arith.constant 0.000000e+00 : f32
    %1068 = vector.broadcast %cst_346 : f32 to vector<16x8xf32>
    %1069 = vector.broadcast %cst_347 : f32 to vector<16x8xf32>
    %1070 = arith.select %1067, %1068, %1069 : vector<16x8xi1>, vector<16x8xf32>
    %1071 = arith.addf %1048, %1070 : vector<16x8xf32>
    %1072 = vector.extract_strided_slice %955 {offsets = [0, 5], sizes = [16, 1], strides = [1, 1]} : vector<16x8xf32> to vector<16x1xf32>
    %1073 = vector.broadcast %1072 : vector<16x1xf32> to vector<16x8xf32>
    %1074 = arith.cmpf ogt, %955, %1073 : vector<16x8xf32>
    %1075 = vector.broadcast %1072 : vector<16x1xf32> to vector<16x8xf32>
    %1076 = arith.cmpf oeq, %955, %1075 : vector<16x8xf32>
    %c5_i32_348 = arith.constant 5 : i32
    %1077 = vector.broadcast %c5_i32_348 : i32 to vector<16x8xi32>
    %1078 = arith.cmpi slt, %6, %1077 : vector<16x8xi32>
    %1079 = arith.andi %1076, %1078 : vector<16x8xi1>
    %1080 = arith.ori %1074, %1079 : vector<16x8xi1>
    %1081 = arith.extui %1080 : vector<16x8xi1> to vector<16x8xi32>
    %1082 = arith.sitofp %1081 : vector<16x8xi32> to vector<16x8xf32>
    %cst_349 = arith.constant dense<0.000000e+00> : vector<16xf32>
    %1083 = vector.multi_reduction <add>, %1082, %cst_349 [1] : vector<16x8xf32> to vector<16xf32>
    %1084 = vector.shape_cast %1083 : vector<16xf32> to vector<16x1xf32>
    %c5_i32_350 = arith.constant 5 : i32
    %1085 = vector.broadcast %c5_i32_350 : i32 to vector<16x8xi32>
    %1086 = arith.cmpi eq, %6, %1085 : vector<16x8xi32>
    %cst_351 = arith.constant 4.000000e+00 : f32
    %1087 = vector.broadcast %cst_351 : f32 to vector<16x1xf32>
    %1088 = arith.cmpf olt, %1084, %1087 : vector<16x1xf32>
    %1089 = vector.broadcast %1088 : vector<16x1xi1> to vector<16x8xi1>
    %1090 = arith.andi %1086, %1089 : vector<16x8xi1>
    %cst_352 = arith.constant 1.000000e+00 : f32
    %cst_353 = arith.constant 0.000000e+00 : f32
    %1091 = vector.broadcast %cst_352 : f32 to vector<16x8xf32>
    %1092 = vector.broadcast %cst_353 : f32 to vector<16x8xf32>
    %1093 = arith.select %1090, %1091, %1092 : vector<16x8xi1>, vector<16x8xf32>
    %1094 = arith.addf %1071, %1093 : vector<16x8xf32>
    %1095 = vector.extract_strided_slice %955 {offsets = [0, 6], sizes = [16, 1], strides = [1, 1]} : vector<16x8xf32> to vector<16x1xf32>
    %1096 = vector.broadcast %1095 : vector<16x1xf32> to vector<16x8xf32>
    %1097 = arith.cmpf ogt, %955, %1096 : vector<16x8xf32>
    %1098 = vector.broadcast %1095 : vector<16x1xf32> to vector<16x8xf32>
    %1099 = arith.cmpf oeq, %955, %1098 : vector<16x8xf32>
    %c6_i32_354 = arith.constant 6 : i32
    %1100 = vector.broadcast %c6_i32_354 : i32 to vector<16x8xi32>
    %1101 = arith.cmpi slt, %6, %1100 : vector<16x8xi32>
    %1102 = arith.andi %1099, %1101 : vector<16x8xi1>
    %1103 = arith.ori %1097, %1102 : vector<16x8xi1>
    %1104 = arith.extui %1103 : vector<16x8xi1> to vector<16x8xi32>
    %1105 = arith.sitofp %1104 : vector<16x8xi32> to vector<16x8xf32>
    %cst_355 = arith.constant dense<0.000000e+00> : vector<16xf32>
    %1106 = vector.multi_reduction <add>, %1105, %cst_355 [1] : vector<16x8xf32> to vector<16xf32>
    %1107 = vector.shape_cast %1106 : vector<16xf32> to vector<16x1xf32>
    %c6_i32_356 = arith.constant 6 : i32
    %1108 = vector.broadcast %c6_i32_356 : i32 to vector<16x8xi32>
    %1109 = arith.cmpi eq, %6, %1108 : vector<16x8xi32>
    %cst_357 = arith.constant 4.000000e+00 : f32
    %1110 = vector.broadcast %cst_357 : f32 to vector<16x1xf32>
    %1111 = arith.cmpf olt, %1107, %1110 : vector<16x1xf32>
    %1112 = vector.broadcast %1111 : vector<16x1xi1> to vector<16x8xi1>
    %1113 = arith.andi %1109, %1112 : vector<16x8xi1>
    %cst_358 = arith.constant 1.000000e+00 : f32
    %cst_359 = arith.constant 0.000000e+00 : f32
    %1114 = vector.broadcast %cst_358 : f32 to vector<16x8xf32>
    %1115 = vector.broadcast %cst_359 : f32 to vector<16x8xf32>
    %1116 = arith.select %1113, %1114, %1115 : vector<16x8xi1>, vector<16x8xf32>
    %1117 = arith.addf %1094, %1116 : vector<16x8xf32>
    %1118 = vector.extract_strided_slice %955 {offsets = [0, 7], sizes = [16, 1], strides = [1, 1]} : vector<16x8xf32> to vector<16x1xf32>
    %1119 = vector.broadcast %1118 : vector<16x1xf32> to vector<16x8xf32>
    %1120 = arith.cmpf ogt, %955, %1119 : vector<16x8xf32>
    %1121 = vector.broadcast %1118 : vector<16x1xf32> to vector<16x8xf32>
    %1122 = arith.cmpf oeq, %955, %1121 : vector<16x8xf32>
    %c7_i32_360 = arith.constant 7 : i32
    %1123 = vector.broadcast %c7_i32_360 : i32 to vector<16x8xi32>
    %1124 = arith.cmpi slt, %6, %1123 : vector<16x8xi32>
    %1125 = arith.andi %1122, %1124 : vector<16x8xi1>
    %1126 = arith.ori %1120, %1125 : vector<16x8xi1>
    %1127 = arith.extui %1126 : vector<16x8xi1> to vector<16x8xi32>
    %1128 = arith.sitofp %1127 : vector<16x8xi32> to vector<16x8xf32>
    %cst_361 = arith.constant dense<0.000000e+00> : vector<16xf32>
    %1129 = vector.multi_reduction <add>, %1128, %cst_361 [1] : vector<16x8xf32> to vector<16xf32>
    %1130 = vector.shape_cast %1129 : vector<16xf32> to vector<16x1xf32>
    %c7_i32_362 = arith.constant 7 : i32
    %1131 = vector.broadcast %c7_i32_362 : i32 to vector<16x8xi32>
    %1132 = arith.cmpi eq, %6, %1131 : vector<16x8xi32>
    %cst_363 = arith.constant 4.000000e+00 : f32
    %1133 = vector.broadcast %cst_363 : f32 to vector<16x1xf32>
    %1134 = arith.cmpf olt, %1130, %1133 : vector<16x1xf32>
    %1135 = vector.broadcast %1134 : vector<16x1xi1> to vector<16x8xi1>
    %1136 = arith.andi %1132, %1135 : vector<16x8xi1>
    %cst_364 = arith.constant 1.000000e+00 : f32
    %cst_365 = arith.constant 0.000000e+00 : f32
    %1137 = vector.broadcast %cst_364 : f32 to vector<16x8xf32>
    %1138 = vector.broadcast %cst_365 : f32 to vector<16x8xf32>
    %1139 = arith.select %1136, %1137, %1138 : vector<16x8xi1>, vector<16x8xf32>
    %1140 = arith.addf %1117, %1139 : vector<16x8xf32>
    %1141 = tpu.concatenate %947, %1140 in 0 : vector<16x8xf32>, vector<16x8xf32> -> vector<32x8xf32>
    %cst_366 = arith.constant -1.000000e+30 : f32
    %1142 = vector.broadcast %cst_366 : f32 to vector<32x128xf32>
    %1143 = vector.extract_strided_slice %754 {offsets = [0, 0], sizes = [32, 128], strides = [1, 1]} : vector<256x128xf32> to vector<32x128xf32>
    %1144 = vector.extract_strided_slice %1141 {offsets = [0, 0], sizes = [32, 1], strides = [1, 1]} : vector<32x8xf32> to vector<32x1xf32>
    %cst_367 = arith.constant 5.000000e-01 : f32
    %1145 = vector.broadcast %cst_367 : f32 to vector<32x1xf32>
    %1146 = arith.cmpf ogt, %1144, %1145 : vector<32x1xf32>
    %cst_368 = arith.constant -1.000000e+30 : f32
    %1147 = vector.shape_cast %1146 : vector<32x1xi1> to vector<32x1xi1>
    %1148 = vector.broadcast %1147 : vector<32x1xi1> to vector<32x128xi1>
    %1149 = vector.broadcast %cst_368 : f32 to vector<32x128xf32>
    %1150 = arith.select %1148, %1143, %1149 : vector<32x128xi1>, vector<32x128xf32>
    %1151 = arith.maximumf %1142, %1150 : vector<32x128xf32>
    %1152 = vector.extract_strided_slice %754 {offsets = [32, 0], sizes = [32, 128], strides = [1, 1]} : vector<256x128xf32> to vector<32x128xf32>
    %1153 = vector.extract_strided_slice %1141 {offsets = [0, 1], sizes = [32, 1], strides = [1, 1]} : vector<32x8xf32> to vector<32x1xf32>
    %cst_369 = arith.constant 5.000000e-01 : f32
    %1154 = vector.broadcast %cst_369 : f32 to vector<32x1xf32>
    %1155 = arith.cmpf ogt, %1153, %1154 : vector<32x1xf32>
    %cst_370 = arith.constant -1.000000e+30 : f32
    %1156 = vector.shape_cast %1155 : vector<32x1xi1> to vector<32x1xi1>
    %1157 = vector.broadcast %1156 : vector<32x1xi1> to vector<32x128xi1>
    %1158 = vector.broadcast %cst_370 : f32 to vector<32x128xf32>
    %1159 = arith.select %1157, %1152, %1158 : vector<32x128xi1>, vector<32x128xf32>
    %1160 = arith.maximumf %1151, %1159 : vector<32x128xf32>
    %1161 = vector.extract_strided_slice %754 {offsets = [64, 0], sizes = [32, 128], strides = [1, 1]} : vector<256x128xf32> to vector<32x128xf32>
    %1162 = vector.extract_strided_slice %1141 {offsets = [0, 2], sizes = [32, 1], strides = [1, 1]} : vector<32x8xf32> to vector<32x1xf32>
    %cst_371 = arith.constant 5.000000e-01 : f32
    %1163 = vector.broadcast %cst_371 : f32 to vector<32x1xf32>
    %1164 = arith.cmpf ogt, %1162, %1163 : vector<32x1xf32>
    %cst_372 = arith.constant -1.000000e+30 : f32
    %1165 = vector.shape_cast %1164 : vector<32x1xi1> to vector<32x1xi1>
    %1166 = vector.broadcast %1165 : vector<32x1xi1> to vector<32x128xi1>
    %1167 = vector.broadcast %cst_372 : f32 to vector<32x128xf32>
    %1168 = arith.select %1166, %1161, %1167 : vector<32x128xi1>, vector<32x128xf32>
    %1169 = arith.maximumf %1160, %1168 : vector<32x128xf32>
    %1170 = vector.extract_strided_slice %754 {offsets = [96, 0], sizes = [32, 128], strides = [1, 1]} : vector<256x128xf32> to vector<32x128xf32>
    %1171 = vector.extract_strided_slice %1141 {offsets = [0, 3], sizes = [32, 1], strides = [1, 1]} : vector<32x8xf32> to vector<32x1xf32>
    %cst_373 = arith.constant 5.000000e-01 : f32
    %1172 = vector.broadcast %cst_373 : f32 to vector<32x1xf32>
    %1173 = arith.cmpf ogt, %1171, %1172 : vector<32x1xf32>
    %cst_374 = arith.constant -1.000000e+30 : f32
    %1174 = vector.shape_cast %1173 : vector<32x1xi1> to vector<32x1xi1>
    %1175 = vector.broadcast %1174 : vector<32x1xi1> to vector<32x128xi1>
    %1176 = vector.broadcast %cst_374 : f32 to vector<32x128xf32>
    %1177 = arith.select %1175, %1170, %1176 : vector<32x128xi1>, vector<32x128xf32>
    %1178 = arith.maximumf %1169, %1177 : vector<32x128xf32>
    %1179 = vector.extract_strided_slice %754 {offsets = [128, 0], sizes = [32, 128], strides = [1, 1]} : vector<256x128xf32> to vector<32x128xf32>
    %1180 = vector.extract_strided_slice %1141 {offsets = [0, 4], sizes = [32, 1], strides = [1, 1]} : vector<32x8xf32> to vector<32x1xf32>
    %cst_375 = arith.constant 5.000000e-01 : f32
    %1181 = vector.broadcast %cst_375 : f32 to vector<32x1xf32>
    %1182 = arith.cmpf ogt, %1180, %1181 : vector<32x1xf32>
    %cst_376 = arith.constant -1.000000e+30 : f32
    %1183 = vector.shape_cast %1182 : vector<32x1xi1> to vector<32x1xi1>
    %1184 = vector.broadcast %1183 : vector<32x1xi1> to vector<32x128xi1>
    %1185 = vector.broadcast %cst_376 : f32 to vector<32x128xf32>
    %1186 = arith.select %1184, %1179, %1185 : vector<32x128xi1>, vector<32x128xf32>
    %1187 = arith.maximumf %1178, %1186 : vector<32x128xf32>
    %1188 = vector.extract_strided_slice %754 {offsets = [160, 0], sizes = [32, 128], strides = [1, 1]} : vector<256x128xf32> to vector<32x128xf32>
    %1189 = vector.extract_strided_slice %1141 {offsets = [0, 5], sizes = [32, 1], strides = [1, 1]} : vector<32x8xf32> to vector<32x1xf32>
    %cst_377 = arith.constant 5.000000e-01 : f32
    %1190 = vector.broadcast %cst_377 : f32 to vector<32x1xf32>
    %1191 = arith.cmpf ogt, %1189, %1190 : vector<32x1xf32>
    %cst_378 = arith.constant -1.000000e+30 : f32
    %1192 = vector.shape_cast %1191 : vector<32x1xi1> to vector<32x1xi1>
    %1193 = vector.broadcast %1192 : vector<32x1xi1> to vector<32x128xi1>
    %1194 = vector.broadcast %cst_378 : f32 to vector<32x128xf32>
    %1195 = arith.select %1193, %1188, %1194 : vector<32x128xi1>, vector<32x128xf32>
    %1196 = arith.maximumf %1187, %1195 : vector<32x128xf32>
    %1197 = vector.extract_strided_slice %754 {offsets = [192, 0], sizes = [32, 128], strides = [1, 1]} : vector<256x128xf32> to vector<32x128xf32>
    %1198 = vector.extract_strided_slice %1141 {offsets = [0, 6], sizes = [32, 1], strides = [1, 1]} : vector<32x8xf32> to vector<32x1xf32>
    %cst_379 = arith.constant 5.000000e-01 : f32
    %1199 = vector.broadcast %cst_379 : f32 to vector<32x1xf32>
    %1200 = arith.cmpf ogt, %1198, %1199 : vector<32x1xf32>
    %cst_380 = arith.constant -1.000000e+30 : f32
    %1201 = vector.shape_cast %1200 : vector<32x1xi1> to vector<32x1xi1>
    %1202 = vector.broadcast %1201 : vector<32x1xi1> to vector<32x128xi1>
    %1203 = vector.broadcast %cst_380 : f32 to vector<32x128xf32>
    %1204 = arith.select %1202, %1197, %1203 : vector<32x128xi1>, vector<32x128xf32>
    %1205 = arith.maximumf %1196, %1204 : vector<32x128xf32>
    %1206 = vector.extract_strided_slice %754 {offsets = [224, 0], sizes = [32, 128], strides = [1, 1]} : vector<256x128xf32> to vector<32x128xf32>
    %1207 = vector.extract_strided_slice %1141 {offsets = [0, 7], sizes = [32, 1], strides = [1, 1]} : vector<32x8xf32> to vector<32x1xf32>
    %cst_381 = arith.constant 5.000000e-01 : f32
    %1208 = vector.broadcast %cst_381 : f32 to vector<32x1xf32>
    %1209 = arith.cmpf ogt, %1207, %1208 : vector<32x1xf32>
    %cst_382 = arith.constant -1.000000e+30 : f32
    %1210 = vector.shape_cast %1209 : vector<32x1xi1> to vector<32x1xi1>
    %1211 = vector.broadcast %1210 : vector<32x1xi1> to vector<32x128xi1>
    %1212 = vector.broadcast %cst_382 : f32 to vector<32x128xf32>
    %1213 = arith.select %1211, %1206, %1212 : vector<32x128xi1>, vector<32x128xf32>
    %1214 = arith.maximumf %1205, %1213 : vector<32x128xf32>
    %1215 = arith.addf %718, %671 : vector<32x128xf32>
    %1216 = arith.addf %1215, %1214 : vector<32x128xf32>
    %cst_383 = arith.constant 0.000000e+00 : f32
    %1217 = vector.broadcast %cst_383 : f32 to vector<32x128xf32>
    %1218 = arith.maximumf %1216, %1217 : vector<32x128xf32>
    %1219 = arith.addf %1218, %84 : vector<32x128xf32>
    %c0_384 = arith.constant 0 : index
    %c0_385 = arith.constant 0 : index
    %1220 = vector.load %arg20[%c0_384, %c0_385] : memref<32x128xf32, #tpu.memory_space<vmem>>, vector<32x128xf32>
    tpu.vector_store %arg20[%c0_384, %c0_385], %1219 {strides = array<i32>} : memref<32x128xf32, #tpu.memory_space<vmem>>, vector<32x128xf32>,
    return
  }
  func.func @transform_0(%arg0: i32) -> (i32, i32) {
    %c0_i32 = arith.constant 0 : i32
    %c0_i32_0 = arith.constant 0 : i32
    return %arg0, %c0_i32 : i32, i32
  }
  func.func @transform_1(%arg0: i32) -> (i32, i32) {
    %c0_i32 = arith.constant 0 : i32
    %c0_i32_0 = arith.constant 0 : i32
    return %arg0, %c0_i32 : i32, i32
  }
  func.func @transform_2(%arg0: i32) -> (i32, i32) {
    %c0_i32 = arith.constant 0 : i32
    %c0_i32_0 = arith.constant 0 : i32
    %c0_i32_1 = arith.constant 0 : i32
    return %c0_i32, %c0_i32_0 : i32, i32
  }
  func.func @transform_3(%arg0: i32) -> (i32, i32) {
    %c0_i32 = arith.constant 0 : i32
    %c0_i32_0 = arith.constant 0 : i32
    %c0_i32_1 = arith.constant 0 : i32
    return %c0_i32, %c0_i32_0 : i32, i32
  }
  func.func @transform_4(%arg0: i32) -> (i32, i32) {
    %c0_i32 = arith.constant 0 : i32
    %c0_i32_0 = arith.constant 0 : i32
    %c0_i32_1 = arith.constant 0 : i32
    return %c0_i32, %c0_i32_0 : i32, i32
  }
  func.func @transform_5(%arg0: i32) -> (i32, i32) {
    %c0_i32 = arith.constant 0 : i32
    %c0_i32_0 = arith.constant 0 : i32
    %c0_i32_1 = arith.constant 0 : i32
    return %c0_i32, %c0_i32_0 : i32, i32
  }
  func.func @transform_6(%arg0: i32) -> (i32, i32, i32) {
    %c0_i32 = arith.constant 0 : i32
    %c0_i32_0 = arith.constant 0 : i32
    %c0_i32_1 = arith.constant 0 : i32
    %c0_i32_2 = arith.constant 0 : i32
    return %c0_i32, %c0_i32_0, %c0_i32_1 : i32, i32, i32
  }
  func.func @transform_7(%arg0: i32) -> (i32, i32, i32) {
    %c0_i32 = arith.constant 0 : i32
    %c0_i32_0 = arith.constant 0 : i32
    %c0_i32_1 = arith.constant 0 : i32
    %c0_i32_2 = arith.constant 0 : i32
    return %c0_i32, %c0_i32_0, %c0_i32_1 : i32, i32, i32
  }
  func.func @transform_8(%arg0: i32) -> (i32, i32, i32) {
    %c0_i32 = arith.constant 0 : i32
    %c0_i32_0 = arith.constant 0 : i32
    %c0_i32_1 = arith.constant 0 : i32
    %c0_i32_2 = arith.constant 0 : i32
    return %c0_i32, %c0_i32_0, %c0_i32_1 : i32, i32, i32
  }
  func.func @transform_9(%arg0: i32) -> (i32, i32, i32) {
    %c0_i32 = arith.constant 0 : i32
    %c0_i32_0 = arith.constant 0 : i32
    %c0_i32_1 = arith.constant 0 : i32
    %c0_i32_2 = arith.constant 0 : i32
    return %c0_i32, %c0_i32_0, %c0_i32_1 : i32, i32, i32
  }
  func.func @transform_10(%arg0: i32) -> (i32, i32, i32) {
    %c0_i32 = arith.constant 0 : i32
    %c0_i32_0 = arith.constant 0 : i32
    %c0_i32_1 = arith.constant 0 : i32
    %c0_i32_2 = arith.constant 0 : i32
    return %c0_i32, %c0_i32_0, %c0_i32_1 : i32, i32, i32
  }
  func.func @transform_11(%arg0: i32) -> (i32, i32, i32) {
    %c0_i32 = arith.constant 0 : i32
    %c0_i32_0 = arith.constant 0 : i32
    %c0_i32_1 = arith.constant 0 : i32
    %c0_i32_2 = arith.constant 0 : i32
    return %c0_i32, %c0_i32_0, %c0_i32_1 : i32, i32, i32
  }
  func.func @transform_12(%arg0: i32) -> (i32, i32, i32) {
    %c0_i32 = arith.constant 0 : i32
    %c0_i32_0 = arith.constant 0 : i32
    %c0_i32_1 = arith.constant 0 : i32
    %c0_i32_2 = arith.constant 0 : i32
    return %c0_i32, %c0_i32_0, %c0_i32_1 : i32, i32, i32
  }
  func.func @transform_13(%arg0: i32) -> (i32, i32, i32) {
    %c0_i32 = arith.constant 0 : i32
    %c0_i32_0 = arith.constant 0 : i32
    %c0_i32_1 = arith.constant 0 : i32
    %c0_i32_2 = arith.constant 0 : i32
    return %c0_i32, %c0_i32_0, %c0_i32_1 : i32, i32, i32
  }
  func.func @transform_14(%arg0: i32) -> (i32, i32, i32) {
    %c0_i32 = arith.constant 0 : i32
    %c0_i32_0 = arith.constant 0 : i32
    %c0_i32_1 = arith.constant 0 : i32
    %c0_i32_2 = arith.constant 0 : i32
    return %c0_i32, %c0_i32_0, %c0_i32_1 : i32, i32, i32
  }
  func.func @transform_15(%arg0: i32) -> (i32, i32, i32) {
    %c0_i32 = arith.constant 0 : i32
    %c0_i32_0 = arith.constant 0 : i32
    %c0_i32_1 = arith.constant 0 : i32
    %c0_i32_2 = arith.constant 0 : i32
    return %c0_i32, %c0_i32_0, %c0_i32_1 : i32, i32, i32
  }
  func.func @transform_16(%arg0: i32) -> (i32, i32, i32) {
    %c0_i32 = arith.constant 0 : i32
    %c0_i32_0 = arith.constant 0 : i32
    %c0_i32_1 = arith.constant 0 : i32
    %c0_i32_2 = arith.constant 0 : i32
    return %c0_i32, %c0_i32_0, %c0_i32_1 : i32, i32, i32
  }
  func.func @transform_17(%arg0: i32) -> (i32, i32, i32) {
    %c0_i32 = arith.constant 0 : i32
    %c0_i32_0 = arith.constant 0 : i32
    %c0_i32_1 = arith.constant 0 : i32
    %c0_i32_2 = arith.constant 0 : i32
    return %c0_i32, %c0_i32_0, %c0_i32_1 : i32, i32, i32
  }
  func.func @transform_18(%arg0: i32) -> (i32, i32, i32) {
    %c0_i32 = arith.constant 0 : i32
    %c0_i32_0 = arith.constant 0 : i32
    %c0_i32_1 = arith.constant 0 : i32
    %c0_i32_2 = arith.constant 0 : i32
    return %c0_i32, %c0_i32_0, %c0_i32_1 : i32, i32, i32
  }
  func.func @transform_19(%arg0: i32) -> (i32, i32) {
    %c0_i32 = arith.constant 0 : i32
    %c0_i32_0 = arith.constant 0 : i32
    return %arg0, %c0_i32 : i32, i32
  }
}

</mosaic_0001>

<bundles_post_ra>
// kernel: snippet_shot_query_gcn.1
= control target key start
LH: loop header
LB: loop body
LE: loop exit
PB: predicated region body
PF: predicated region fallthrough
CT: control target
= control target key end

     0   :  { %s11467_s0 = inlined_call_operand.hbm [shape: f32[64,128], index: 0, kind: input, shape index: {}]   ;;  %s11468_s1 = inlined_call_operand.hbm [shape: f32[32,16], index: 1, kind: input, shape index: {}]   ;;  %s11469_s2 = inlined_call_operand.hbm [shape: bf16[384,128], index: 2, kind: input, shape index: {}]   ;;  %s11470_s3 = inlined_call_operand.hbm [shape: f32[1,128], index: 3, kind: input, shape index: {}]   ;;  %s11471_s4 = inlined_call_operand.vmem [shape: bf16[16,128], index: 4, kind: input, shape index: {}]   ;;  %s11472_s5 = inlined_call_operand.hbm [shape: f32[1,128], index: 5, kind: input, shape index: {}]   ;;  %s11473_s6 = inlined_call_operand.hbm [shape: bf16[2,128,128], index: 6, kind: input, shape index: {}]   ;;  %s11474_s7 = inlined_call_operand.hbm [shape: f32[2,1,128], index: 7, kind: input, shape index: {}]   ;;  %s11475_s8 = inlined_call_operand.hbm [shape: bf16[2,384,128], index: 8, kind: input, shape index: {}]   ;;  %s11476_s9 = inlined_call_operand.vmem [shape: f32[2,1,128], index: 9, kind: input, shape index: {}]   ;;  %s11477_s10 = inlined_call_operand.hbm [shape: bf16[2,128,128], index: 10, kind: input, shape index: {}]   ;;  %s11478_s11 = inlined_call_operand.vmem [shape: f32[2,1,128], index: 11, kind: input, shape index: {}]   ;;  %s11479_s12 = inlined_call_operand.hbm [shape: bf16[2,128,128], index: 12, kind: input, shape index: {}]   ;;  %s11480_s13 = inlined_call_operand.hbm [shape: bf16[2,128,128], index: 13, kind: input, shape index: {}]   ;;  %s11481_s14 = inlined_call_operand.vmem [shape: f32[2,1,128], index: 14, kind: input, shape index: {}]   ;;  %s11482_s15 = inlined_call_operand.hbm [shape: bf16[2,128,128], index: 15, kind: input, shape index: {}]   ;;  %s11483_s16 = inlined_call_operand.vmem [shape: f32[2,1,128], index: 16, kind: input, shape index: {}]   ;;  %s11484_s17 = inlined_call_operand.hbm [shape: bf16[2,128,128], index: 17, kind: input, shape index: {}]   ;;  %s11485_s18 = inlined_call_operand.vmem [shape: f32[2,1,128], index: 18, kind: input, shape index: {}]   ;;  %s11486_s19 = inlined_call_operand.hbm [shape: f32[64,128], index: 19, kind: output, shape index: {}]  }
   0x1   :  { %11571 = sst [smem:[#allocation55_spill]] %s11467_s0 }
   0x2   :  { %11572 = sst [smem:[#allocation56_spill]] %s11468_s1 }
   0x3   :  { %11573 = sst [smem:[#allocation57_spill]] %s11469_s2 }
   0x4   :  { %11574 = sst [smem:[#allocation58_spill]] %s11470_s3 }
   0x5   :  { %11575 = sst [smem:[#allocation59_spill]] %s11472_s5 }
   0x6   :  { %11576 = sst [smem:[#allocation60_spill]] %s11473_s6 }
   0x7   :  { %11577 = sst [smem:[#allocation61_spill]] %s11474_s7 }
   0x8   :  { %11578 = sst [smem:[#allocation62_spill]] %s11475_s8 }
   0x9   :  { %11579 = sst [smem:[#allocation63_spill]] %s11476_s9 }
   0xa   :  { %11580 = sst [smem:[#allocation64_spill]] %s11477_s10 }
   0xb   :  { %11581 = sst [smem:[#allocation65_spill]] %s11478_s11 }
   0xc   :  { %11582 = sst [smem:[#allocation66_spill]] %s11479_s12 }
   0xd   :  { %11583 = sst [smem:[#allocation67_spill]] %s11480_s13 }
   0xe   :  { %11584 = sst [smem:[#allocation68_spill]] %s11481_s14 }
   0xf   :  { %11585 = sst [smem:[#allocation69_spill]] %s11482_s15 }
  0x10   :  { %11586 = sst [smem:[#allocation70_spill]] %s11483_s16 }
  0x11   :  { %11587 = sst [smem:[#allocation71_spill]] %s11485_s18 }
  0x12   :  { %11588 = sst [smem:[#allocation72_spill]] %s11486_s19 }
  0x13   :  { %24 = vsyncpa [#allocation3], 0 }
  0x14   :  { %26 = vsyncpa [#allocation3 + $0x1], 0 }
  0x15   :  { %27 = vsyncpa [#allocation6], 0 }
  0x16   :  { %29 = vsyncpa [#allocation6 + $0x1], 0 }
  0x17   :  { %30 = vsyncpa [#allocation9], 0 }
  0x18   :  { %31 = vsyncpa [#allocation12], 0 }
  0x19   :  { %32 = vsyncpa [#allocation15], 0 }
  0x1a   :  { %33 = vsyncpa [#allocation18], 0 }
  0x1b   :  { %34 = vsyncpa [#allocation21], 0 }
  0x1c   :  { %35 = vsyncpa [#allocation4], 0 }
  0x1d   :  { %37 = vsyncpa [#allocation4 + $0x1], 0  ;;  %s9312_s0 = smov 0   ;;  %s9314_s30 = smov 0  }
  0x1e   :  { %s9316_s20 = smov 0   ;;  %s9318_s21 = smov 0  }
  0x1f LB: > { %s9178_s1 = smov [#allocation7]   ;;  %s9333_s2 = sadd.s32 4294967295, %s9176_s21   ;;  %s9176_s21 = sphi %s9318_s21, %s11879_s21   ;;  %s9172_s20 = sphi %s9316_s20, %s11878_s20   ;;  %s9168_s30 = sphi %s9314_s30, %s11877_s30   ;;  %s9164_s0 = sphi %s9312_s0, %s11876_s0  }
  0x20   : > { %s495_s22 = sshll.u32 %s9178_s1, 4  ;;  %p6932_p0 = scmp.ge.s32.totalorder %s9176_s21, 1  ;;  %s496_s22 = int_to_ptr.vmem [resolvable:$true] %s495_s22 }
  0x21   : > { %p11495_p1 = scmp.eq.s32.totalorder %s9333_s2, 0  ;;  %p483_p2 = scmp.lt.s32.totalorder %s9176_s21, 3 }
  0x22   : > { %s9179_s24 = smov [#allocation8]   ;;  %s9180_s26 = smov [#allocation11]  }
  0x23   : > { %p9338_p3 = pnand %p6932_p0, %p483_p2  ;;  %s509_s25 = sshll.u32 %s9179_s24, 4  ;;  %s510_s25 = int_to_ptr.vmem [resolvable:$true] %s509_s25 }
  0x24   : > { %s533_s27 = sshll.u32 %s9180_s26, 4  ;;  %s8753_s29 = scalar_lea.vmem %s496_s22, 3072  ;;  %s9351_s27 = int_to_ptr.vmem [resolvable:$true] %s533_s27 }
  0x25   : > { %p8309_p5 = pneg %p9338_p3  ;;  %p8754_p8 = scmp.ne.s32.totalorder %s496_s22, %s8753_s29 }
  0x26   : > { %p8761_p11 = scmp.lt.s32.totalorder %s496_s22, %s496_s22  ;;  %p8762_p12 = scmp.lt.s32.totalorder %s8753_s29, %s8753_s29 }
  0x27   : > { %p9347_p6 = pnand %p8309_p5, %p11495_p1 }
  0x28   : > { %p8763_p13 = por %p8762_p12, %p8761_p11 }
  0x29   : > { %p9355_p7 = pneg %p9347_p6 }
  0x2b   : > { %p8756_p9 = pnand %p8754_p8, %p9355_p7 }
  0x2d   : > { %p8757_p10 = pneg %p8756_p9 }
  0x2f   : > { %p8764_p0 = pnand %p8763_p13, %p8757_p10 }
  0x31   : > { %8767 = shalt.err (!%p8764_p0)
}
  0x32   : > { %s9181_s1 = smov 64   ;;  %s9182_s24 = smov 4  }
  0x33   : > { %s11592_s11 = sld [smem:[#allocation57_spill]]  ;;  %s8779_s18 = scalar_lea.vmem %s510_s25, 16 }
  0x34   : > { %p8780_p2 = scmp.ne.s32.totalorder %s510_s25, %s8779_s18  ;;  %s8786_s29 = scalar_lea.vmem %s510_s25, 32 }
  0x35   : > { %p8787_p9 = scmp.lt.s32.totalorder %s510_s25, %s510_s25  ;;  %p8788_p10 = scmp.lt.s32.totalorder %s8786_s29, %s8779_s18 }
  0x36   : > { %p8782_p5 = pnand %p8780_p2, %p9355_p7 }
  0x37   : > { %p8789_p11 = por %p8788_p10, %p8787_p9 }
  0x38   : > { %p8783_p8 = pneg %p8782_p5 }
  0x39   : > { %8312 = dma.hbm_to_vmem [thread:$0]  (!%p9347_p6), %s11592_s11, 3072, %s496_s22, [#allocation6], %s9181_s1, %s9181_s1, %s9182_s24  }
  0x3a   : > { %p8790_p12 = pnand %p8789_p11, %p8783_p8 }
  0x3c   : > { %8793 = shalt.err (!%p8790_p12)
}
  0x3d   : > { %s11593_s9 = sld [smem:[#allocation58_spill]]  ;;  %s8805_s11 = scalar_lea.vmem %s9351_s27, 2048 }
  0x3e   : > { %p8806_p13 = scmp.ne.s32.totalorder %s9351_s27, %s8805_s11  ;;  %p8813_p5 = scmp.lt.s32.totalorder %s9351_s27, %s9351_s27 }
  0x3f   : > { %p8814_p9 = scmp.lt.s32.totalorder %s8805_s11, %s8805_s11 }
  0x40   : > { %p8808_p0 = pnand %p8806_p13, %p9355_p7 }
  0x41   : > { %p8815_p8 = por %p8814_p9, %p8813_p5 }
  0x42   : > { %p8809_p2 = pneg %p8808_p0 }
  0x43   : > { %8315 = dma.hbm_to_vmem [thread:$0]  (!%p9347_p6), %s11593_s9, 16, %s510_s25, [#allocation9]  }
  0x44   : > { %p8816_p10 = pnand %p8815_p8, %p8809_p2 }
  0x46   : > { %8819 = shalt.err (!%p8816_p10)
}
  0x47   : > { %s11594_s6 = sld [smem:[#allocation60_spill]]  ;;  %s9183_s9 = smov [#allocation14]  }
  0x48   : > { %s559_s18 = sshll.u32 %s9183_s9, 4  ;;  %s9184_s19 = smov [#allocation17]   ;;  %s560_s18 = int_to_ptr.vmem [resolvable:$true] %s559_s18 }
  0x49   : > { %s591_s22 = sshll.u32 %s9184_s19, 4  ;;  %s8831_s25 = scalar_lea.vmem %s560_s18, 6144  ;;  %s592_s22 = int_to_ptr.vmem [resolvable:$true] %s591_s22 }
  0x4a   : > { %p8832_p11 = scmp.ne.s32.totalorder %s560_s18, %s8831_s25  ;;  %p8839_p0 = scmp.lt.s32.totalorder %s560_s18, %s560_s18 }
  0x4b   : > { %p8840_p2 = scmp.lt.s32.totalorder %s8831_s25, %s8831_s25 }
  0x4c   : > { %p8834_p12 = pnand %p8832_p11, %p9355_p7 }
  0x4d   : > { %8321 = dma.hbm_to_vmem [thread:$0]  (!%p9347_p6), %s11594_s6, 2048, %s9351_s27, [#allocation12], %s9181_s1, %s9181_s1, %s9182_s24  }
  0x4e   : > { %p8835_p13 = pneg %p8834_p12  ;;  %p8841_p5 = por %p8840_p2, %p8839_p0 }
  0x50   : > { %p8842_p9 = pnand %p8841_p5, %p8835_p13 }
  0x52   : > { %8845 = shalt.err (!%p8842_p9)
}
  0x53   : > { %s11595_s8 = sld [smem:[#allocation62_spill]]  ;;  %s8857_s29 = scalar_lea.vmem %s592_s22, 2048 }
  0x54   : > { %p8858_p8 = scmp.ne.s32.totalorder %s592_s22, %s8857_s29  ;;  %p8865_p12 = scmp.lt.s32.totalorder %s592_s22, %s592_s22 }
  0x55   : > { %p8866_p0 = scmp.lt.s32.totalorder %s8857_s29, %s8857_s29 }
  0x56   : > { %p8860_p10 = pnand %p8858_p8, %p9355_p7 }
  0x57   : > { %p8867_p13 = por %p8866_p0, %p8865_p12 }
  0x58   : > { %p8861_p11 = pneg %p8860_p10 }
  0x59   : > { %8327 = dma.hbm_to_vmem [thread:$0]  (!%p9347_p6), %s11595_s8, 6144, %s560_s18, [#allocation15], %s9181_s1, %s9181_s1, %s9182_s24  }
  0x5a   : > { %p8868_p2 = pnand %p8867_p13, %p8861_p11 }
  0x5c   : > { %8871 = shalt.err (!%p8868_p2)
}
  0x5d   : > { %s11596_s12 = sld [smem:[#allocation66_spill]]  ;;  %s9185_s16 = smov [#allocation20]  }
  0x5e   : > { %s620_s9 = sshll.u32 %s9185_s16, 4  ;;  %s9186_s18 = smov [#allocation10]   ;;  %s621_s9 = int_to_ptr.vmem [resolvable:$true] %s620_s9 }
  0x5f   : > { %s523_s19 = sshll.u32 %s9186_s18, 4  ;;  %s8883_s25 = scalar_lea.vmem %s621_s9, 2048  ;;  %s524_s19 = int_to_ptr.vmem [resolvable:$true] %s523_s19 }
  0x60   : > { %p8884_p5 = scmp.ne.s32.totalorder %s621_s9, %s8883_s25  ;;  %p8891_p10 = scmp.lt.s32.totalorder %s621_s9, %s621_s9 }
  0x61   : > { %p8892_p11 = scmp.lt.s32.totalorder %s8883_s25, %s8883_s25 }
  0x62   : > { %p8886_p9 = pnand %p8884_p5, %p9355_p7 }
  0x63   : > { %8333 = dma.hbm_to_vmem [thread:$0]  (!%p9347_p6), %s11596_s12, 2048, %s592_s22, [#allocation18], %s9181_s1, %s9181_s1, %s9182_s24  }
  0x64   : > { %p8887_p8 = pneg %p8886_p9  ;;  %p8893_p12 = por %p8892_p11, %p8891_p10 }
  0x66   : > { %p8894_p0 = pnand %p8893_p12, %p8887_p8 }
  0x68   : > { %8897 = shalt.err (!%p8894_p0)
}
  0x69   : > { %s11597_s15 = sld [smem:[#allocation69_spill]]  ;;  %s8909_s26 = scalar_lea.vmem %s524_s19, 16 }
  0x6a   : > { %p8910_p13 = scmp.ne.s32.totalorder %s524_s19, %s8909_s26  ;;  %s8916_s29 = scalar_lea.vmem %s524_s19, 32 }
  0x6b   : > { %p8917_p9 = scmp.lt.s32.totalorder %s524_s19, %s524_s19  ;;  %p8918_p8 = scmp.lt.s32.totalorder %s8916_s29, %s8909_s26 }
  0x6c   : > { %p8912_p2 = pnand %p8910_p13, %p9355_p7 }
  0x6d   : > { %p8919_p10 = por %p8918_p8, %p8917_p9 }
  0x6e   : > { %p8913_p5 = pneg %p8912_p2 }
  0x6f   : > { %8339 = dma.hbm_to_vmem [thread:$0]  (!%p9347_p6), %s11597_s15, 2048, %s621_s9, [#allocation21], %s9181_s1, %s9181_s1, %s9182_s24  }
  0x70   : > { %p8920_p11 = pnand %p8919_p10, %p8913_p5 }
  0x72   : > { %8923 = shalt.err (!%p8920_p11)
}
  0x73   : > { %s11598_s5 = sld [smem:[#allocation59_spill]]  ;;  %s9187_s16 = smov [#allocation13]  }
  0x74   : > { %s546_s9 = sshll.u32 %s9187_s16, 4  ;;  %s547_s9 = int_to_ptr.vmem [resolvable:$true] %s546_s9 }
  0x75   : > { %s8935_s18 = scalar_lea.vmem %s547_s9, 32  ;;  %p8943_p2 = scmp.lt.s32.totalorder %s547_s9, %s547_s9 }
  0x76   : > { %p8936_p12 = scmp.ne.s32.totalorder %s547_s9, %s8935_s18  ;;  %p8944_p4 = scmp.lt.s32.totalorder %s8935_s18, %s8935_s18 }
  0x78   : > { %p8938_p0 = pnand %p8936_p12, %p9355_p7  ;;  %p8945_p9 = por %p8944_p4, %p8943_p2 }
  0x79   : > { %8318 = dma.hbm_to_vmem [thread:$0]  (!%p9347_p6), %s11598_s5, 16, %s524_s19, [#allocation9]  }
  0x7a   : > { %p8939_p13 = pneg %p8938_p0 }
  0x7c   : > { %p8946_p5 = pnand %p8945_p9, %p8939_p13 }
  0x7e   : > { %8949 = shalt.err (!%p8946_p5)
}
  0x7f   : > { %s9188_s25 = smov 16   ;;  %s9189_s22 = smov 1  }
  0x80   : > { %s11599_s7 = sld [smem:[#allocation61_spill]]  ;;  %s9190_s26 = smov [#allocation16]  }
  0x81   : > { %s575_s29 = sshll.u32 %s9190_s26, 4  ;;  %s9191_s11 = smov [#allocation19]   ;;  %s576_s29 = int_to_ptr.vmem [resolvable:$true] %s575_s29 }
  0x82   : > { %s604_s14 = sshll.u32 %s9191_s11, 4  ;;  %s8961_s16 = scalar_lea.vmem %s576_s29, 2048  ;;  %s605_s14 = int_to_ptr.vmem [resolvable:$true] %s604_s14 }
  0x83   : > { %p8962_p8 = scmp.ne.s32.totalorder %s576_s29, %s8961_s16  ;;  %p8969_p11 = scmp.lt.s32.totalorder %s576_s29, %s576_s29 }
  0x84   : > { %p8970_p12 = scmp.lt.s32.totalorder %s8961_s16, %s8961_s16 }
  0x85   : > { %p8964_p4 = pnand %p8962_p8, %p9355_p7 }
  0x86   : > { %8324 = dma.hbm_to_vmem [thread:$0]  (!%p9347_p6), %s11599_s7, 32, %s547_s9, [#allocation12], %s9188_s25, %s9188_s25, %s9189_s22  }
  0x87   : > { %p8965_p10 = pneg %p8964_p4  ;;  %p8971_p0 = por %p8970_p12, %p8969_p11 }
  0x89   : > { %p8972_p13 = pnand %p8971_p0, %p8965_p10 }
  0x8b   : > { %8975 = shalt.err (!%p8972_p13)
}
  0x8c   : > { %s11600_s10 = sld [smem:[#allocation64_spill]]  ;;  %s8987_s25 = scalar_lea.vmem %s605_s14, 2048 }
  0x8d   : > { %p8988_p2 = scmp.ne.s32.totalorder %s605_s14, %s8987_s25  ;;  %p8995_p8 = scmp.lt.s32.totalorder %s605_s14, %s605_s14 }
  0x8e   : > { %p8996_p4 = scmp.lt.s32.totalorder %s8987_s25, %s8987_s25 }
  0x8f   : > { %p8990_p9 = pnand %p8988_p2, %p9355_p7 }
  0x90   : > { %p8997_p11 = por %p8996_p4, %p8995_p8 }
  0x91   : > { %p8991_p5 = pneg %p8990_p9 }
  0x92   : > { %8330 = dma.hbm_to_vmem [thread:$0]  (!%p9347_p6), %s11600_s10, 2048, %s576_s29, [#allocation15], %s9181_s1, %s9181_s1, %s9182_s24  }
  0x93   : > { %p8998_p10 = pnand %p8997_p11, %p8991_p5 }
  0x95   : > { %9001 = shalt.err (!%p8998_p10)
}
  0x96   : > { %s11601_s13 = sld [smem:[#allocation67_spill]]  ;;  %s9192_s19 = smov [#allocation22]  }
  0x97   : > { %s636_s26 = sshll.u32 %s9192_s19, 4  ;;  %s637_s26 = int_to_ptr.vmem [resolvable:$true] %s636_s26 }
  0x98   : > { %s9013_s29 = scalar_lea.vmem %s637_s26, 2048  ;;  %p9021_p2 = scmp.lt.s32.totalorder %s637_s26, %s637_s26 }
  0x99   : > { %p9014_p12 = scmp.ne.s32.totalorder %s637_s26, %s9013_s29  ;;  %p9022_p9 = scmp.lt.s32.totalorder %s9013_s29, %s9013_s29 }
  0x9b   : > { %p9016_p0 = pnand %p9014_p12, %p9355_p7  ;;  %p9023_p5 = por %p9022_p9, %p9021_p2 }
  0x9c   : > { %8336 = dma.hbm_to_vmem [thread:$0]  (!%p9347_p6), %s11601_s13, 2048, %s605_s14, [#allocation18], %s9181_s1, %s9181_s1, %s9182_s24  }
  0x9d   : > { %p9017_p13 = pneg %p9016_p0 }
  0x9f   : > { %p9024_p8 = pnand %p9023_p5, %p9017_p13 }
  0xa1   : > { %9027 = shalt.err (!%p9024_p8)
}
  0xa2   : > { %8342 = dma.hbm_to_vmem [thread:$0]  (!%p9347_p6), %s11484_s17, 2048, %s637_s26, [#allocation21], %s9181_s1, %s9181_s1, %s9182_s24  }
  0xa3   : > { %s6931_s3 = sadd.s32 4294967294, %s9176_s21   ;;  %s9467_s28 = sadd.s32 1, %s9176_s21  }
  0xa4   : > { %s50_s16 = sadd.s32 1, %s9172_s20  ;;  %s47_s9 = ssub.s32 %s9176_s21, %s9467_s28 }
  0xa5   : > { %p57_p7 = scmp.ne.s32.totalorder %s9172_s20, %s9168_s30  ;;  %p48_p4 = scmp.eq.s32.totalorder %s47_s9, 0 }
  0xa6   : > { %p58_p11 = scmp.eq.s32.totalorder %s9176_s21, 0  ;;  %p63_p10 = scmp.ne.s32.totalorder %s9168_s30, %s9164_s0 }
  0xa7   : > { %p470_p12 = scmp.eq.s32.totalorder %s9333_s2, 1  ;;  %p476_p2 = scmp.eq.s32.totalorder %s6931_s3, 1 }
  0xa8   : > { %s9479_s18 = scalar_select %p48_p4, %s9172_s20, %s50_s16  }
  0xa9   : > { %p59_p0 = por %p58_p11, %p57_p7  ;;  %p9483_p13 = por %p11495_p1, %p63_p10 }
  0xaa   : > { %p9487_p6 = por %p470_p12, %p57_p7  ;;  %p8365_p9 = scmp.lt.s32.totalorder %s9176_s21, 2 }
  0xab   : > { %s11602_s25 = scalar_select %p9483_p13, 1, 0 }
  0xac   : > { %s11603_s1 = scalar_select %p9487_p6, 1, 0 }
  0xad   : > { %s9493_s24 = sand.u32 1, %s9172_s20   ;;  %p9495_p5 = por %p476_p2, %p63_p10 }
  0xae   : > { %s6945_s27 = sshll.u32 %s9493_s24, 5  ;;  %s7308_s19 = sshll.u32 %s9176_s21, 9 }
  0xaf   : > { %s11604_s22 = scalar_select %p9495_p5, 1, 0 }
  0xb0   : > { %s11605_s11 = sld [smem:[#allocation55_spill]]  ;;  %s657_s3 = scalar_lea.vmem [#allocation2], %s6945_s27 }
  0xb1   : > { %s664_s16 = sshll.u32 %s657_s3, 4  ;;  %p9506_p8 = pnand %p8365_p9, %p59_p0  ;;  %s9510_s16 = int_to_ptr.vmem [resolvable:$true] %s664_s16 }
  0xb3   : > { %p9030_p4 = pneg %p9506_p8 }
  0xb6   : > { %s9504_s14 = scalar_lea.hbm %s11605_s11, %s7308_s19  ;;  %s9033_s26 = scalar_lea.hbm %s11605_s11, 1024 }
  0xb7   : > { %s9028_s6 = scalar_lea.hbm %s9504_s14, 512  ;;  %p9034_p12 = scmp.lt.s32.totalorder %s9504_s14, %s11605_s11 }
  0xb8   : > { %p9029_p7 = scmp.ne.s32.totalorder %s9504_s14, %s9028_s6  ;;  %p9035_p0 = scmp.lt.s32.totalorder %s9033_s26, %s9028_s6 }
  0xba   : > { %p9031_p11 = pnand %p9030_p4, %p9029_p7  ;;  %p9036_p2 = por %p9035_p0, %p9034_p12 }
  0xbc   : > { %p9032_p10 = pneg %p9031_p11 }
  0xbe   : > { %p9037_p9 = pnand %p9036_p2, %p9032_p10 }
  0xc0   : > { %9040 = shalt.err (!%p9037_p9)
}
  0xc1   : > { %s9041_s5 = scalar_lea.vmem %s9510_s16, 512  ;;  %s9193_s19 = smov [#allocation2]  }
  0xc2   : > { %p9042_p1 = scmp.ne.s32.totalorder %s9510_s16, %s9041_s5  ;;  %s9046_s27 = sshll.u32 %s9193_s19, 4  ;;  %s9047_s27 = int_to_ptr.vmem [resolvable:$false] %s9046_s27 }
  0xc3   : > { %s9048_s7 = scalar_lea.vmem %s9047_s27, 1024  ;;  %p9049_p5 = scmp.lt.s32.totalorder %s9510_s16, %s9047_s27 }
  0xc4   : > { %p9044_p7 = pnand %p9042_p1, %p9030_p4  ;;  %p9050_p6 = scmp.lt.s32.totalorder %s9048_s7, %s9041_s5 }
  0xc6   : > { %p9045_p11 = pneg %p9044_p7  ;;  %p9051_p13 = por %p9050_p6, %p9049_p5 }
  0xc8   : > { %p9052_p12 = pnand %p9051_p13, %p9045_p11 }
  0xca   : > { %9055 = shalt.err (!%p9052_p12)
}
  0xcb   : > { %s9194_s6 = smov 128   ;;  %s9195_s26 = smov 8  }
  0xcc   : > { %s11607_s29 = scalar_lea.sflag [#allocation3], %s9493_s24  ;;  %s674_s5 = sand.u32 1, %s9176_s21  }
  0xcd   : > { %8346 = dma.hbm_to_vmem [thread:$0]  (!%p9506_p8), %s9504_s14, 512, %s9510_s16, %s11607_s29, %s9194_s6, %s9194_s6, %s9195_s26  }
  0xce   : > { %s6948_s7 = sshll.u32 %s9493_s24, 4  ;;  %s7309_s3 = sshll.u32 %s9176_s21, 8 }
  0xcf   : > { %s678_s19 = scalar_lea.vmem [#allocation5], %s6948_s7  ;;  %s11608_s11 = sld [smem:[#allocation56_spill]] }
  0xd0   : > { %s685_s27 = sshll.u32 %s678_s19, 4  ;;  %s675_s13 = scalar_lea.sflag [#allocation6], %s674_s5  ;;  %s9550_s27 = int_to_ptr.vmem [resolvable:$true] %s685_s27 }
  0xd5   : > { %s9548_s12 = scalar_lea.hbm %s11608_s11, %s7309_s3  ;;  %s9061_s16 = scalar_lea.hbm %s11608_s11, 512 }
  0xd6   : > { %s9056_s15 = scalar_lea.hbm %s9548_s12, 256  ;;  %p9062_p5 = scmp.lt.s32.totalorder %s9548_s12, %s11608_s11 }
  0xd7   : > { %p9057_p1 = scmp.ne.s32.totalorder %s9548_s12, %s9056_s15  ;;  %p9063_p10 = scmp.lt.s32.totalorder %s9061_s16, %s9056_s15 }
  0xd9   : > { %p9059_p13 = pnand %p9057_p1, %p9030_p4  ;;  %p9064_p0 = por %p9063_p10, %p9062_p5 }
  0xdb   : > { %p9060_p6 = pneg %p9059_p13 }
  0xdd   : > { %p9065_p2 = pnand %p9064_p0, %p9060_p6 }
  0xdf   : > { %9068 = shalt.err (!%p9065_p2)
}
  0xe0   : > { %s9069_s10 = scalar_lea.vmem %s9550_s27, 256  ;;  %s9196_s5 = smov [#allocation5]  }
  0xe1   : > { %p9070_p9 = scmp.ne.s32.totalorder %s9550_s27, %s9069_s10  ;;  %s9074_s7 = sshll.u32 %s9196_s5, 4  ;;  %s9075_s7 = int_to_ptr.vmem [resolvable:$false] %s9074_s7 }
  0xe2   : > { %s9076_s3 = scalar_lea.vmem %s9075_s7, 512  ;;  %p9077_p12 = scmp.lt.s32.totalorder %s9550_s27, %s9075_s7 }
  0xe3   : > { %p9072_p7 = pnand %p9070_p9, %p9030_p4  ;;  %p9078_p1 = scmp.lt.s32.totalorder %s9076_s3, %s9069_s10 }
  0xe5   : > { %p9073_p11 = pneg %p9072_p7  ;;  %p9079_p13 = por %p9078_p1, %p9077_p12 }
  0xe7   : > { %p9080_p5 = pnand %p9079_p13, %p9073_p11 }
  0xe9   : > { %9083 = shalt.err (!%p9080_p5)
}
  0xea   : > { %8349 = dma.hbm_to_vmem [thread:$0]  (!%p9506_p8), %s9548_s12, 256, %s9550_s27, %s675_s13, %s9194_s6, %s9194_s6, %s9195_s26  }
  0xeb   : > { %697 = sbr.rel (%p9338_p3) target bundleno = 4048 (0xfd0), region = 96 }
  0xf0   : > { %s9580_s15 = sand.u32 1, %s9168_s30   ;;  %p11609_p4 = scmp.ne.s32.totalorder %s11602_s25, 0 }
  0xf1   : > { %s6952_s19 = sshll.u32 %s9580_s15, 5  ;;  %s700_s24 = scalar_lea.sflag [#allocation3], %s9580_s15 }
  0xf2   : > { %s9586_s9 = scalar_lea.vmem [#allocation2], %s6952_s19 }
  0xf3   : > { %9127 = dma.done.wait (%p11609_p4), %s700_s24, 512  }
  0xf4   : > { %9129 = vsyncadd (%p11609_p4), %s700_s24, 4294966784  ;;  %s708_s12 = sand.u32 1, %s9333_s2   ;;  %s6953_s13 = sshll.u32 %s9580_s15, 4 }
  0xf5   : > { %s709_s23 = scalar_lea.sflag [#allocation6], %s708_s12  ;;  %s9594_s6 = scalar_lea.vmem [#allocation5], %s6953_s13 }
  0xf6   : > { %9131 = dma.done.wait (%p11609_p4), %s709_s23, 256  }
  0xf7   : > { %9133 = vsyncadd (%p11609_p4), %s709_s23, 4294967040  ;;  %p11610_p3 = scmp.eq.s32.totalorder %s9333_s2, 0 }
  0xf9   : > { %9135 = dma.done.wait (%p11610_p3), [#allocation6], 3072   ;;  %p11611_p8 = pmov %p11610_p3 }
  0xfa   : > { %p11612_p6 = pmov %p11610_p3 }
  0xfb   : > { %9137 = vsyncadd (%p11611_p8), [#allocation6], 4294964224 }
  0xfc   : > { %9139 = dma.done.wait (%p11612_p6), [#allocation9], 32   ;;  %p11613_p10 = pmov %p11610_p3 }
  0xfd   : > { %p11614_p0 = pmov %p11610_p3 }
  0xfe   : > { %9141 = vsyncadd (%p11613_p10), [#allocation9], 4294967264 }
  0xff   : > { %9143 = dma.done.wait (%p11614_p0), [#allocation12], 2080   ;;  %p11615_p2 = pmov %p11614_p0 }
 0x100   : > { %p11616_p9 = pmov %p11614_p0 }
 0x101   : > { %9145 = vsyncadd (%p11615_p2), [#allocation12], 4294965216 }
 0x102   : > { %9147 = dma.done.wait (%p11616_p9), [#allocation15], 8192   ;;  %p11617_p7 = pmov %p11614_p0 }
 0x103   : > { %p11618_p11 = pmov %p11614_p0 }
 0x104   : > { %9149 = vsyncadd (%p11617_p7), [#allocation15], 4294959104 }
 0x105   : > { %9151 = dma.done.wait (%p11618_p11), [#allocation18], 4096   ;;  %p11619_p12 = pmov %p11614_p0 }
 0x106   : > { %p11620_p1 = pmov %p11614_p0 }
 0x107   : > { %9153 = vsyncadd (%p11619_p12), [#allocation18], 4294963200 }
 0x108   : > { %9155 = dma.done.wait (%p11620_p1), [#allocation21], 4096   ;;  %p11621_p13 = pmov %p11614_p0 }
 0x109   : > { %v820_v0 = vlaneseq  ;;  %v11530_v1 = vmov 0   ;;  %v11526_v2 = vmov 1   ;;  %v8568_v7 = vld [vmem:[#allocation7 + $0x78] sm:$0xff]   ;;  %v8569_v8 = vld [vmem:[#allocation7 + $0x70] sm:$0xff]   ;;  %v8570_v9 = vld [vmem:[#allocation7 + $0x68] sm:$0xff]   ;;  %v11536_v41 = vmov 0.0  }
 0x10a   : > { %9157 = vsyncadd (%p11621_p13), [#allocation21], 4294963200  ;;  %8441 = vset.pattern.permute.xlu0 %v11530_v1  ;;  %8442 = vset.pattern.permute.xlu1 %v11530_v1  ;;  %v8571_v10 = vld [vmem:[#allocation7 + $0x60] sm:$0xff]   ;;  %v9639_v12 = vld [vmem:[%s9586_s9 + $0x8] sm:$0xff]  ;;  %v11622_v61 = vmov 0  ;;  %vm11499_vm10 = vmmov 0  }
 0x10b   : > { %1227 = vperm.xlu0 %8441, %v11526_v2   ;;  %v9628_v3 = vshrl.u32 %v820_v0, 7  ;;  %7626 = vmatprep.subr.bf16.mxu0 %v8568_v7  ;;  %v9636_v11 = vld [vmem:[%s9586_s9] sm:$0xff]  ;;  %v8577_v14 = vld [vmem:[#allocation7 + $0x38] sm:$0xff]   ;;  %v8579_v16 = vld [vmem:[#allocation7 + $0x30] sm:$0xff]   ;;  %v1216_v25 = vrot.slane %v9639_v12, 1  ;;  %v995_v32 = vrot.slane %v9639_v12, 7 }
 0x10c   : > { %7627 = vmatpush3.bf16.msra.mxu0 %v8568_v7  ;;  %v1019_v13 = vpack.c.bf16 %v9639_v12, %v9636_v11  ;;  %v8572_v15 = vld [vmem:[#allocation7 + $0x58] sm:$0xff]   ;;  %7646 = vmatprep.subr.bf16.mxu1 %v8577_v14  ;;  %v8581_v17 = vld [vmem:[#allocation7 + $0x28] sm:$0xff]   ;;  %v8573_v18 = vld [vmem:[#allocation7 + $0x50] sm:$0xff]   ;;  %v1215_v24 = vrot.slane %v9636_v11, 1  ;;  %v994_v31 = vrot.slane %v9636_v11, 7  ;;  %vm11500_vm11 = vcmask 130048  }
 0x10d   : > { %vm823_vm0 = vcmp.ne.s32.totalorder %v9628_v3, 0  ;;  %v822_v4 = vadd.s32 8, %v9628_v3  ;;  %7628 = vmatprep.subr.bf16.mxu0 %v8569_v8  ;;  %7647 = vmatpush3.bf16.msra.mxu1 %v8577_v14  ;;  %v8583_v19 = vld [vmem:[#allocation7 + $0x20] sm:$0xff]   ;;  %v8574_v20 = vld [vmem:[#allocation7 + $0x48] sm:$0xff]   ;;  %v8585_v22 = vld [vmem:[#allocation7 + $0x18] sm:$0xff]   ;;  %vm11501_vm2 = vcmp.lt.s32.totalorder %v9628_v3, 7 }
 0x10e   : > { %v1003_v5 = vsel %vm823_vm0, 1, %v11530_v1  ;;  %7642 = vmatprep.mubr.bf16.mxu0 %v1019_v13  ;;  %7648 = vmatprep.subr.bf16.mxu1 %v8579_v16  ;;  %v8575_v21 = vld [vmem:[#allocation7 + $0x40] sm:$0xff]   ;;  %v9644_v23 = vld [vmem:[%s9586_s9 + $0x10] sm:$0xff]  ;;  %v9649_v26 = vld [vmem:[%s9586_s9 + $0x18] sm:$0xff]  ;;  %vm11502_vm3 = vcmp.lt.s32.totalorder %v9628_v3, 1  ;;  %v1222_v48 = vsel %vm11501_vm2, %v1215_v24, %v1216_v25  ;;  %s9202_s27 = smov 120  }
 0x10f   : > { %1006 = vperm.xlu1 %8442, %v1003_v5   ;;  %vm826_vm1 = vcmp.ne.s32.totalorder %v822_v4, 15  ;;  %v1217_v27 = vrot.slane %v9644_v23, 1  ;;  %v1218_v28 = vrot.slane %v9649_v26, 1  ;;  %v8576_v29 = vld [vmem:[#allocation7 + $0xb8] sm:$0xff]   ;;  %v8587_v30 = vld [vmem:[#allocation7 + $0x10] sm:$0xff]   ;;  %v997_v33 = vrot.slane %v9649_v26, 7 }
 0x110   : > { %v1225_v6 = vsel %vm826_vm1, 1, %v11530_v1  ;;  %7629 = vmatpush3.bf16.msra.mxu0 %v8569_v8  ;;  %v8589_v34 = vld [vmem:[#allocation7 + $0x8] sm:$0xff]   ;;  %v1020_v35 = vpack.c.bf16 %v9649_v26, %v9644_v23  ;;  %v8578_v36 = vld [vmem:[#allocation7 + $0xb0] sm:$0xff]   ;;  %v8591_v37 = vld [vmem:[#allocation7] sm:$0xff]   ;;  %v996_v46 = vrot.slane %v9644_v23, 7  ;;  %v1001_v52 = vsel %vm11502_vm3, %v994_v31, %v995_v32  ;;  %s11629_s29 = sld [smem:[#allocation63_spill]] }
 0x111   : > { %1230 = vperm.xlu0 %8441, %v1225_v6   ;;  %7630 = vmatprep.subr.bf16.mxu0 %v8570_v9  ;;  %v8580_v38 = vld [vmem:[#allocation7 + $0xa8] sm:$0xff]   ;;  %v8582_v39 = vld [vmem:[#allocation7 + $0xa0] sm:$0xff]   ;;  %v8584_v40 = vld [vmem:[#allocation7 + $0x98] sm:$0xff]   ;;  %v1221_v47 = vsel %vm11501_vm2, %v1216_v25, %v1217_v27  ;;  %v1220_v49 = vsel %vm11501_vm2, %v1217_v27, %v1218_v28  ;;  %v1223_v50 = vsel %vm11501_vm2, %v1218_v28, %v1215_v24  ;;  %s11648_s5 = sld [smem:[#allocation68_spill]]  ;;  %s6718_s12 = scalar_lea.sflag [#allocation4], %s9580_s15 }
 0x112   : > { %7649 = vmatpush3.bf16.msra.mxu1 %v8579_v16  ;;  %v8586_v42 = vld [vmem:[#allocation7 + $0x90] sm:$0xff]   ;;  %v8588_v43 = vld [vmem:[#allocation7 + $0x88] sm:$0xff]   ;;  %v8590_v44 = vld [vmem:[#allocation7 + $0x80] sm:$0xff]   ;;  %v1002_v53 = vsel %vm11502_vm3, %v997_v33, %v994_v31  ;;  %v7013_v54 = vpack.c.bf16 %v1221_v47, %v1222_v48  ;;  %v999_v55 = vsel %vm11502_vm3, %v996_v46, %v997_v33  ;;  %v1000_v56 = vsel %vm11502_vm3, %v995_v32, %v996_v46  ;;  %s11649_s24 = sld [smem:[#allocation70_spill]]  ;;  %p11873_p4 = scmp.ne.s32.totalorder %s11603_s1, 0 }
 0x113   : > { %1009 = vperm.xlu1 %8442, %v11526_v2   ;;  %7650 = vmatprep.subr.bf16.mxu1 %v8581_v17  ;;  %v7016_v58 = vpack.c.bf16 %v1223_v50, %v1220_v49  ;;  %v6999_v59 = vpack.c.bf16 %v1001_v52, %v1002_v53  ;;  %v8592_v60 = vld [vmem:[%s11471_s4] sm:$0xff]   ;;  %v7002_v63 = vpack.c.bf16 %v999_v55, %v1000_v56  ;;  %v1356_v6 = vld [vmem:[%s9594_s6 + $0x8] sm:$0xff]  ;;  %s11651_s23 = sld [smem:[#allocation71_spill]] }
 0x114   : > { %7631 = vmatpush3.bf16.msra.mxu0 %v8570_v9  ;;  %v1355_v5 = vld [vmem:[%s9594_s6] sm:$0xff]  ;;  %s11720_s14 = sld [smem:[#allocation65_spill]] }
 0x115   : > { %7632 = vmatprep.subr.bf16.mxu0 %v8571_v10  ;;  %v1360_v7 = vpack.c.bf16 %v1356_v6, %v1355_v5  ;;  %v7018_v32 = vld [vmem:[#allocation8] ss:$0 sm:$0xff]  ;;  %v8596_v46 = vld [vmem:[#allocation11 + $0x20] sm:$0xff]   ;;  %v8598_v49 = vld [vmem:[#allocation11 + $0x10] sm:$0xff]   ;;  %s11872_s7 = sld [smem:[#allocation72_spill]] }
 0x116   : > { %7651 = vmatpush3.bf16.msra.mxu1 %v8581_v17  ;;  %v8597_v47 = vld [vmem:[#allocation11 + $0x18] sm:$0xff]   ;;  %v8599_v52 = vld [vmem:[#allocation11 + $0x8] sm:$0xff]   ;;  %v8600_v55 = vld [vmem:[#allocation11] sm:$0xff]  }
 0x117   : > { %7652 = vmatprep.subr.bf16.mxu1 %v8583_v19  ;;  %v8605_v5 = vld [vmem:[#allocation14 + $0x30] sm:$0xff]   ;;  %v8604_v6 = vld [vmem:[#allocation14 + $0x68] sm:$0xff]   ;;  %v8697_v4 = vld [vmem:[#allocation19 + $0x78] sm:$0xff]  }
 0x118   : > { %7633 = vmatpush3.bf16.msra.mxu0 %v8571_v10 }
 0x119   : > { %7634 = vmatprep.subr.bf16.mxu0 %v8572_v15 }
 0x11a   : > { %7653 = vmatpush3.bf16.msra.mxu1 %v8583_v19 }
 0x11b   : > { %7654 = vmatprep.subr.bf16.mxu1 %v8585_v22 }
 0x11c   : > { %7635 = vmatpush3.bf16.msra.mxu0 %v8572_v15 }
 0x11d   : > { %7636 = vmatprep.subr.bf16.mxu0 %v8573_v18 }
 0x11e   : > { %7655 = vmatpush3.bf16.msra.mxu1 %v8585_v22  ;;  %v7019_v22 = vld [vmem:[#allocation10] ss:$0 sm:$0xff] }
 0x11f   : > { %7656 = vmatprep.subr.bf16.mxu1 %v8587_v30 }
 0x120   : > { %7637 = vmatpush3.bf16.msra.mxu0 %v8573_v18 }
 0x121   : > { %7638 = vmatprep.subr.bf16.mxu0 %v8574_v20 }
 0x122   : > { %7657 = vmatpush3.bf16.msra.mxu1 %v8587_v30 }
 0x123   : > { %7658 = vmatprep.subr.bf16.mxu1 %v8589_v34 }
 0x124   : > { %7639 = vmatpush3.bf16.msra.mxu0 %v8574_v20 }
 0x125   : > { %7640 = vmatprep.subr.bf16.mxu0 %v8575_v21 }
 0x126   : > { %7659 = vmatpush3.bf16.msra.mxu1 %v8589_v34 }
 0x127   : > { %7660 = vmatprep.subr.bf16.mxu1 %v8591_v37 }
 0x128   : > { %7641 = vmatpush3.bf16.msra.mxu0 %v8575_v21 }
 0x129   : > { %7666 = vmatprep.subr.bf16.mxu0 %v8576_v29 }
 0x12a   : > { %7661 = vmatpush3.bf16.msra.mxu1 %v8591_v37  ;;  %v8593_v37 = vld [vmem:[#allocation11 + $0x38] sm:$0xff]  }
 0x12b   : > { %7643 = vmatmul.mubr.bf16.vlgmr.msra.gmra.mxu0 %v1020_v35  ;;  %7692 = vmatprep.subr.mxu1 %v11536_v41 }
 0x12c   : > { %7667 = vmatpush3.bf16.msra.mxu0 %v8576_v29 }
 0x12d   : > { %7668 = vmatprep.subr.bf16.mxu0 %v8578_v36 }
 0x130   : > { %7669 = vmatpush3.bf16.msra.mxu0 %v8578_v36 }
 0x131   : > { %7670 = vmatprep.subr.bf16.mxu0 %v8580_v38 }
 0x134   : > { %7671 = vmatpush3.bf16.msra.mxu0 %v8580_v38 }
 0x135   : > { %7672 = vmatprep.subr.bf16.mxu0 %v8582_v39 }
 0x138   : > { %7673 = vmatpush3.bf16.msra.mxu0 %v8582_v39 }
 0x139   : > { %7674 = vmatprep.subr.bf16.mxu0 %v8584_v40 }
 0x13c   : > { %7675 = vmatpush3.bf16.msra.mxu0 %v8584_v40 }
 0x13d   : > { %7676 = vmatprep.subr.bf16.mxu0 %v8586_v42 }
 0x140   : > { %7677 = vmatpush3.bf16.msra.mxu0 %v8586_v42  ;;  %v8594_v42 = vld [vmem:[#allocation11 + $0x30] sm:$0xff]  }
 0x141   : > { %7678 = vmatprep.subr.bf16.mxu0 %v8588_v43 }
 0x144   : > { %7679 = vmatpush3.bf16.msra.mxu0 %v8588_v43 }
 0x145   : > { %7680 = vmatprep.subr.bf16.mxu0 %v8590_v44 }
 0x148   : > { %7681 = vmatpush3.bf16.msra.mxu0 %v8590_v44  ;;  %v9201_v44 = vmov 1.0  }
 0x149   : > { %7686 = vmatprep.subr.bf16.mxu0 %v11536_v41 }
 0x186   : > { %v1228_v45 = vpop.permute.xlu0 %1227 }
 0x187   : > { %vm1232_vm4 = vcmp.eq.s32.totalorder %v1228_v45, 1  ;;  %v8595_v45 = vld [vmem:[#allocation11 + $0x28] sm:$0xff]  }
 0x18a   : > { %v1007_v51 = vpop.permute.xlu1 %1006 }
 0x18b   : > { %vm1011_vm5 = vcmp.eq.s32.totalorder %v1007_v51, 1 }
 0x18c   : > { %v1231_v57 = vpop.permute.xlu0 %1230 }
 0x18d   : > { %vm1233_vm6 = vcmp.eq.s32.totalorder %v1231_v57, 1 }
 0x18e   : > { %vm9682_vm7 = vmpackc.low %vm1233_vm6, %vm1232_vm4  ;;  %v1010_v62 = vpop.permute.xlu1 %1009 }
 0x18f   : > { %v11623_v61 = vsel %vm9682_vm7, 4294967295, %v11622_v61  ;;  %vm1012_vm8 = vcmp.eq.s32.totalorder %v1010_v62, 1  ;;  %7682 = vmatprep.mubr.msk.bf16.mxu0 %vm9682_vm7, %v7013_v54  ;;  %v8602_v62 = vld [vmem:[#allocation14 + $0x70] sm:$0xff]  }
 0x190   : > { %vm9688_vm9 = vmpackc.low %vm1012_vm8, %vm1011_vm5  ;;  %7683 = vmatmul.mubr.msk.bf16.vlgmr.msra.gmra.mxu0 %vm9682_vm7, %v7016_v58 }
 0x191   : > { %7662 = vmatprep.mubr.msk.bf16.mxu1 %vm9688_vm9, %v6999_v59  ;;  %7687 = vmatpush3.bf16.msra.mxu0 %v8592_v60  ;;  %v8601_v60 = vld [vmem:[#allocation14 + $0x78] sm:$0xff]  }
 0x192   : > { %7663 = vmatmul.mubr.msk.bf16.vlgmr.msra.gmra.mxu1 %vm9688_vm9, %v7002_v63  ;;  %7688 = vmatprep.mubr.msk.bf16.mxu0 %vm11499_vm10, %v11536_v41  ;;  %v8603_v63 = vld [vmem:[#allocation14 + $0x38] sm:$0xff]  }
 0x193   : > { %7696 = vmatprep.mubr.msk.f32.mxu1 %vm11499_vm10, %v11536_v41  ;;  %7719 = vmatprep.subr.bf16.mxu0 %v8601_v60 }
 0x198   : > { %7689 = vmatmul.mubr.msk.bf16.vlgmr.msra.gmra.mxu0 %vm11500_vm11, %v1360_v7  ;;  %v8607_v7 = vld [vmem:[#allocation14 + $0x28] sm:$0xff]  }
 0x199   : > { %7720 = vmatpush3.bf16.msra.mxu0 %v8601_v60 }
 0x19a   : > { %7721 = vmatprep.subr.bf16.mxu0 %v8602_v62 }
 0x19d   : > { %7722 = vmatpush3.bf16.msra.mxu0 %v8602_v62 }
 0x19e   : > { %7723 = vmatprep.subr.bf16.mxu0 %v8604_v6 }
 0x1a1   : > { %7724 = vmatpush3.bf16.msra.mxu0 %v8604_v6  ;;  %v8619_v6 = vld [vmem:[#allocation14 + $0xa8] sm:$0xff]  }
 0x1eb   : > { %v7644_v8 = vpop.f32.mrf.mxu0 }
 0x1ed   : > { %v1103_v9 = vpop.f32.mrf.mxu0 }
 0x1ef   : > { %v7645_v10 = vpop.f32.mrf.mxu0 }
 0x1f1   : > { %v1106_v11 = vpop.f32.mrf.mxu0 }
 0x250   : > { %v7684_v12 = vpop.f32.mrf.mxu0 }
 0x252   : > { %v7664_v13 = vpop.f32.mrf.mxu1  ;;  %v1322_v14 = vpop.f32.mrf.mxu0 }
 0x253   : > { %v1209_v50 = vadd.f32 %v7664_v13, %v7644_v8  ;;  %v8606_v8 = vld [vmem:[#allocation14 + $0x60] sm:$0xff]   ;;  %v8612_v13 = vld [vmem:[#allocation14 + $0x48] sm:$0xff]  }
 0x254   : > { %v1200_v15 = vpop.f32.mrf.mxu1  ;;  %v7685_v16 = vpop.f32.mrf.mxu0  ;;  %7725 = vmatprep.subr.bf16.mxu0 %v8606_v8 }
 0x255   : > { %v1201_v24 = vadd.f32 %v1200_v15, %v1103_v9  ;;  %v1339_v53 = vadd.f32 %v7684_v12, %v1209_v50  ;;  %v8609_v9 = vld [vmem:[#allocation14 + $0x20] sm:$0xff]   ;;  %7726 = vmatpush3.bf16.msra.mxu0 %v8606_v8  ;;  %v8611_v12 = vld [vmem:[#allocation14 + $0x18] sm:$0xff]  }
 0x256   : > { %v7665_v17 = vpop.f32.mrf.mxu1  ;;  %v1325_v18 = vpop.f32.mrf.mxu0  ;;  %v8614_v15 = vld [vmem:[#allocation14 + $0x40] sm:$0xff]   ;;  %v8621_v8 = vld [vmem:[#allocation14 + $0x98] sm:$0xff]  }
 0x257   : > { %v1337_v30 = vadd.f32 %v1322_v14, %v1201_v24  ;;  %v1212_v48 = vadd.f32 %v7665_v17, %v7645_v10  ;;  %v1349_v56 = vadd.f32 %v7018_v32, %v1339_v53  ;;  %v8608_v10 = vld [vmem:[#allocation14 + $0x58] sm:$0xff]   ;;  %v8613_v14 = vld [vmem:[#allocation14 + $0x10] sm:$0xff]   ;;  %v8616_v17 = vld [vmem:[#allocation14] sm:$0xff]  }
 0x258   : > { %v1203_v19 = vpop.f32.mrf.mxu1  ;;  %v1411_v20 = vpop.f32.mrf.mxu0  ;;  %7727 = vmatprep.subr.bf16.mxu0 %v8608_v10  ;;  %v7022_v24 = vld [vmem:[#allocation13] ss:$0 sm:$0xff] }
 0x259   : > { %v1204_v21 = vadd.f32 %v1203_v19, %v1106_v11  ;;  %v1412_v27 = vadd.f32 %v7019_v22, %v1411_v20  ;;  %v1347_v36 = vadd.f32 %v7018_v32, %v1337_v30  ;;  %v1340_v51 = vadd.f32 %v7685_v16, %v1212_v48  ;;  %7728 = vmatpush3.bf16.msra.mxu0 %v8608_v10  ;;  %v8610_v11 = vld [vmem:[#allocation14 + $0x50] sm:$0xff]   ;;  %v8615_v16 = vld [vmem:[#allocation14 + $0x8] sm:$0xff]  }
 0x25a   : > { %v7690_v23 = vpop.f32.mrf.mxu0  ;;  %v9725_v58 = vmax.f32 %v1349_v56, 0.0  ;;  %7729 = vmatprep.subr.bf16.mxu0 %v8610_v11  ;;  %v3203_v19 = vsub.s32 0, %v9628_v3  ;;  %v8623_v10 = vld [vmem:[#allocation14 + $0x88] sm:$0xff]  }
 0x25b   : > { %v1338_v26 = vadd.f32 %v1325_v18, %v1204_v21  ;;  %v9707_v34 = vmax.f32 %v1412_v27, 0.0  ;;  %v9716_v40 = vmax.f32 %v1347_v36, 0.0  ;;  %v1350_v54 = vadd.f32 %v7018_v32, %v1340_v51  ;;  %v8617_v18 = vld [vmem:[#allocation14 + $0xb8] sm:$0xff]  }
 0x25c   : > { %v1414_v25 = vpop.f32.mrf.mxu0 }
 0x25d   : > { %v1415_v28 = vadd.f32 %v7019_v22, %v1414_v25  ;;  %v1348_v33 = vadd.f32 %v7018_v32, %v1338_v26  ;;  %11627 = vst [vmem:[#allocation34_spill] sm:$0xff] %v9707_v34  ;;  %v1420_v39 = vmul.f32 %v9707_v34, %v9707_v34  ;;  %v9723_v57 = vmax.f32 %v1350_v54, 0.0  ;;  %7730 = vmatpush3.bf16.msra.mxu0 %v8610_v11  ;;  %v8624_v11 = vld [vmem:[#allocation14 + $0x80] sm:$0xff]  }
 0x25e   : > { %v7691_v29 = vpop.f32.mrf.mxu0  ;;  %7731 = vmatprep.subr.bf16.mxu0 %v8612_v13 }
 0x25f   : > { %v9705_v31 = vmax.f32 %v1415_v28, 0.0  ;;  %v9712_v38 = vmax.f32 %v1348_v33, 0.0  ;;  %v9729_v59 = vpack.c.bf16 %v9723_v57, %v9725_v58 }
 0x261   : > { %11626 = vst [vmem:[#allocation33_spill] sm:$0xff] %v9705_v31  ;;  %v1421_v35 = vmul.f32 %v9705_v31, %v9705_v31  ;;  %v9720_v43 = vpack.c.bf16 %v9712_v38, %v9716_v40  ;;  %7732 = vmatpush3.bf16.msra.mxu0 %v8612_v13  ;;  %v8625_v13 = vld [vmem:[#allocation19 + $0x38] sm:$0xff]  }
 0x262   : > { %7733 = vmatprep.subr.bf16.mxu0 %v8614_v15 }
 0x263   : > { %7693 = vmatpush3.xpose.msra.mxu1 %v1421_v35 }
 0x264   : > { %7694 = vmatprep.subr.mxu1 %v11536_v41 }
 0x265   : > { %7734 = vmatpush3.bf16.msra.mxu0 %v8614_v15 }
 0x266   : > { %7759 = vmatprep.subr.bf16.mxu0 %v8617_v18 }
 0x267   : > { %7695 = vmatpush3.xpose.msra.mxu1 %v1420_v39 }
 0x268   : > { %7699 = vmatprep.subr.bf16.mxu1 %v8593_v37 }
 0x26a   : > { %7697 = vmatmul.mubr.f32.vlgmr.msra.gmra.mxu1 %v9201_v44 }
 0x26b   : > { %7700 = vmatpush3.bf16.msra.mxu1 %v8593_v37  ;;  %7715 = vmatprep.mubr.bf16.mxu1 %v9720_v43 }
 0x26c   : > { %7701 = vmatprep.subr.bf16.mxu1 %v8594_v42 }
 0x26f   : > { %7702 = vmatpush3.bf16.msra.mxu1 %v8594_v42 }
 0x270   : > { %7703 = vmatprep.subr.bf16.mxu1 %v8595_v45 }
 0x273   : > { %7704 = vmatpush3.bf16.msra.mxu1 %v8595_v45 }
 0x274   : > { %7705 = vmatprep.subr.bf16.mxu1 %v8596_v46 }
 0x277   : > { %7706 = vmatpush3.bf16.msra.mxu1 %v8596_v46 }
 0x278   : > { %7707 = vmatprep.subr.bf16.mxu1 %v8597_v47 }
 0x27b   : > { %7708 = vmatpush3.bf16.msra.mxu1 %v8597_v47 }
 0x27c   : > { %7709 = vmatprep.subr.bf16.mxu1 %v8598_v49 }
 0x27f   : > { %7710 = vmatpush3.bf16.msra.mxu1 %v8598_v49 }
 0x280   : > { %7711 = vmatprep.subr.bf16.mxu1 %v8599_v52 }
 0x283   : > { %7712 = vmatpush3.bf16.msra.mxu1 %v8599_v52 }
 0x284   : > { %7713 = vmatprep.subr.bf16.mxu1 %v8600_v55 }
 0x287   : > { %7714 = vmatpush3.bf16.msra.mxu1 %v8600_v55 }
 0x288   : > { %7739 = vmatprep.subr.bf16.mxu1 %v8603_v63 }
 0x28a   : > { %7716 = vmatmul.mubr.bf16.vlgmr.msra.gmra.mxu1 %v9729_v59 }
 0x28b   : > { %7740 = vmatpush3.bf16.msra.mxu1 %v8603_v63  ;;  %v8618_v63 = vld [vmem:[#allocation14 + $0xb0] sm:$0xff]  }
 0x28c   : > { %7741 = vmatprep.subr.bf16.mxu1 %v8605_v5 }
 0x28f   : > { %7742 = vmatpush3.bf16.msra.mxu1 %v8605_v5 }
 0x290   : > { %7743 = vmatprep.subr.bf16.mxu1 %v8607_v7 }
 0x293   : > { %7744 = vmatpush3.bf16.msra.mxu1 %v8607_v7  ;;  %v8620_v7 = vld [vmem:[#allocation14 + $0xa0] sm:$0xff]  }
 0x294   : > { %7745 = vmatprep.subr.bf16.mxu1 %v8609_v9 }
 0x297   : > { %7746 = vmatpush3.bf16.msra.mxu1 %v8609_v9  ;;  %v8622_v9 = vld [vmem:[#allocation14 + $0x90] sm:$0xff]  }
 0x298   : > { %7747 = vmatprep.subr.bf16.mxu1 %v8611_v12 }
 0x29b   : > { %7748 = vmatpush3.bf16.msra.mxu1 %v8611_v12 }
 0x29c   : > { %7749 = vmatprep.subr.bf16.mxu1 %v8613_v14 }
 0x29f   : > { %7750 = vmatpush3.bf16.msra.mxu1 %v8613_v14 }
 0x2a0   : > { %7751 = vmatprep.subr.bf16.mxu1 %v8615_v16 }
 0x2a3   : > { %7752 = vmatpush3.bf16.msra.mxu1 %v8615_v16 }
 0x2a4   : > { %7753 = vmatprep.subr.bf16.mxu1 %v8616_v17 }
 0x2a7   : > { %7754 = vmatpush3.bf16.msra.mxu1 %v8616_v17  ;;  %v8626_v17 = vld [vmem:[#allocation19 + $0x30] sm:$0xff]  }
 0x32a   : > { %v1488_v20 = vpop.f32.mrf.mxu1 }
 0x32b   : > { %v9733_v21 = vrot.slane %v1488_v20, %v3203_v19  ;;  %v8628_v19 = vld [vmem:[#allocation19 + $0x20] sm:$0xff]   ;;  %v8629_v20 = vld [vmem:[#allocation19 + $0x18] sm:$0xff]  }
 0x32c   : > { %v7698_v22 = vpop.f32.mrf.mxu1 }
 0x32d   : > { %11628 = vst [vmem:[#allocation35_spill] sm:$0xff] %v9733_v21  ;;  %3608 = vrot.lane.b32.xlu0 %v9733_v21, %s9202_s27  ;;  %v8630_v22 = vld [vmem:[#allocation19 + $0x10] sm:$0xff]   ;;  %s11394_s27 = scalar_lea.vmem [#allocation23], %s6952_s19  ;;  %s7310_s19 = sshll.u32 %s9333_s2, 9 }
 0x32e   : > { %s6731_s16 = sshll.u32 %s11394_s27, 4  ;;  %s11420_s3 = scalar_lea.hbm %s11872_s7, %s7310_s19  ;;  %s11422_s16 = int_to_ptr.vmem [resolvable:$true] %s6731_s16 }
 0x32f   : > { %s9084_s13 = scalar_lea.vmem %s11422_s16, 512  ;;  %s9209_s2 = smov [#allocation23]  }
 0x330   : > { %p9085_p5 = scmp.ne.s32.totalorder %s11422_s16, %s9084_s13  ;;  %s9088_s6 = sshll.u32 %s9209_s2, 4  ;;  %s9089_s6 = int_to_ptr.vmem [resolvable:$false] %s9088_s6 }
 0x331   : > { %s9090_s25 = scalar_lea.vmem %s9089_s6, 1024  ;;  %p9091_p6 = scmp.lt.s32.totalorder %s11422_s16, %s9089_s6 }
 0x332   : > { %p9086_p3 = pnand %p9085_p5, %p11873_p4  ;;  %p9092_p10 = scmp.lt.s32.totalorder %s9090_s25, %s9084_s13 }
 0x334   : > { %p9087_p8 = pneg %p9086_p3  ;;  %p9093_p0 = por %p9092_p10, %p9091_p6 }
 0x336   : > { %p9094_p2 = pnand %p9093_p0, %p9087_p8 }
 0x34a   : > { %v7717_v23 = vpop.f32.mrf.mxu1 }
 0x34b   : > { %v1608_v26 = vadd.f32 %v7717_v23, %v7022_v24  ;;  %v8631_v23 = vld [vmem:[#allocation19 + $0x8] sm:$0xff]  }
 0x34c   : > { %v1599_v25 = vpop.f32.mrf.mxu1 }
 0x34d   : > { %v1600_v27 = vadd.f32 %v7022_v24, %v1599_v25  ;;  %v1616_v32 = vmax.f32 %v1608_v26, 0.0  ;;  %v8634_v25 = vld [vmem:[#allocation16 + $0x30] sm:$0xff]   ;;  %v8635_v26 = vld [vmem:[#allocation16 + $0x28] sm:$0xff]  }
 0x34e   : > { %v7718_v28 = vpop.f32.mrf.mxu1 }
 0x34f   : > { %v1611_v29 = vadd.f32 %v7718_v28, %v7022_v24  ;;  %v1614_v33 = vmax.f32 %v1600_v27, 0.0  ;;  %v1669_v42 = vrot.slane %v1616_v32, 7  ;;  %v1879_v44 = vrot.slane %v1616_v32, 1  ;;  %v8636_v27 = vld [vmem:[#allocation16 + $0x20] sm:$0xff]   ;;  %v8637_v28 = vld [vmem:[#allocation16 + $0x18] sm:$0xff]  }
 0x350   : > { %v1602_v30 = vpop.f32.mrf.mxu1 }
 0x351   : > { %v1617_v35 = vmax.f32 %v1611_v29, 0.0  ;;  %v1603_v36 = vadd.f32 %v7022_v24, %v1602_v30  ;;  %v1667_v45 = vrot.slane %v1614_v33, 7  ;;  %v1877_v47 = vrot.slane %v1614_v33, 1  ;;  %v8632_v24 = vld [vmem:[#allocation19] sm:$0xff]   ;;  %v8638_v29 = vld [vmem:[#allocation16 + $0x10] sm:$0xff]   ;;  %v8639_v30 = vld [vmem:[#allocation16 + $0x8] sm:$0xff]  }
 0x353   : > { %v1670_v37 = vrot.slane %v1617_v35, 7  ;;  %v1615_v39 = vmax.f32 %v1603_v36, 0.0  ;;  %v1682_v48 = vpack.c.bf16 %v1617_v35, %v1616_v32  ;;  %v1880_v12 = vrot.slane %v1617_v35, 1 }
 0x355   : > { %v1668_v46 = vrot.slane %v1615_v39, 7  ;;  %v1878_v49 = vrot.slane %v1615_v39, 1  ;;  %v1681_v50 = vpack.c.bf16 %v1615_v39, %v1614_v33  ;;  %v1671_v51 = vsel %vm11502_vm3, %v1669_v42, %v1670_v37 }
 0x356   : > { %v1674_v54 = vsel %vm11502_vm3, %v1670_v37, %v1667_v45  ;;  %v1881_v14 = vsel %vm11501_vm2, %v1879_v44, %v1880_v12  ;;  %v1884_v15 = vsel %vm11501_vm2, %v1880_v12, %v1877_v47  ;;  %v8641_v12 = vld [vmem:[#allocation17 + $0x38] sm:$0xff]  }
 0x357   : > { %v1672_v52 = vsel %vm11502_vm3, %v1668_v46, %v1669_v42  ;;  %v1673_v53 = vsel %vm11502_vm3, %v1667_v45, %v1668_v46  ;;  %7735 = vmatprep.mubr.bf16.mxu0 %v1681_v50  ;;  %v1882_v56 = vsel %vm11501_vm2, %v1878_v49, %v1879_v44  ;;  %v1883_v60 = vsel %vm11501_vm2, %v1877_v47, %v1878_v49 }
 0x358   : > { %v7048_v55 = vpack.c.bf16 %v1673_v53, %v1674_v54  ;;  %v7051_v62 = vpack.c.bf16 %v1671_v51, %v1672_v52  ;;  %7736 = vmatmul.mubr.bf16.vlgmr.msra.gmra.mxu0 %v1682_v48  ;;  %v7062_v5 = vpack.c.bf16 %v1882_v56, %v1883_v60  ;;  %v7065_v16 = vpack.c.bf16 %v1884_v15, %v1881_v14  ;;  %v7067_v54 = vld [vmem:[%s11629_s29] ss:$0 sm:$0xff]  ;;  %v8642_v14 = vld [vmem:[#allocation17 + $0x30] sm:$0xff]   ;;  %v8643_v15 = vld [vmem:[#allocation17 + $0x28] sm:$0xff]  }
 0x359   : > { %7760 = vmatpush3.bf16.msra.mxu0 %v8617_v18  ;;  %v8627_v18 = vld [vmem:[#allocation19 + $0x28] sm:$0xff]  }
 0x35a   : > { %7755 = vmatprep.mubr.msk.bf16.mxu1 %vm9688_vm9, %v7048_v55  ;;  %7775 = vmatprep.mubr.msk.bf16.mxu0 %vm9682_vm7, %v7062_v5 }
 0x35b   : > { %7756 = vmatmul.mubr.msk.bf16.vlgmr.msra.gmra.mxu1 %vm9688_vm9, %v7051_v62  ;;  %7761 = vmatprep.subr.bf16.mxu0 %v8618_v63 }
 0x35d   : > { %7762 = vmatpush3.bf16.msra.mxu0 %v8618_v63 }
 0x35e   : > { %7763 = vmatprep.subr.bf16.mxu0 %v8619_v6 }
 0x361   : > { %7764 = vmatpush3.bf16.msra.mxu0 %v8619_v6 }
 0x362   : > { %7765 = vmatprep.subr.bf16.mxu0 %v8620_v7 }
 0x365   : > { %7766 = vmatpush3.bf16.msra.mxu0 %v8620_v7 }
 0x366   : > { %7767 = vmatprep.subr.bf16.mxu0 %v8621_v8 }
 0x369   : > { %7768 = vmatpush3.bf16.msra.mxu0 %v8621_v8 }
 0x36a   : > { %7769 = vmatprep.subr.bf16.mxu0 %v8622_v9 }
 0x36d   : > { %7770 = vmatpush3.bf16.msra.mxu0 %v8622_v9 }
 0x36e   : > { %7771 = vmatprep.subr.bf16.mxu0 %v8623_v10 }
 0x371   : > { %7772 = vmatpush3.bf16.msra.mxu0 %v8623_v10 }
 0x372   : > { %7773 = vmatprep.subr.bf16.mxu0 %v8624_v11 }
 0x375   : > { %7774 = vmatpush3.bf16.msra.mxu0 %v8624_v11 }
 0x376   : > { %7799 = vmatprep.subr.bf16.mxu0 %v8625_v13 }
 0x378   : > { %7776 = vmatmul.mubr.msk.bf16.vlgmr.msra.gmra.mxu0 %vm9682_vm7, %v7065_v16  ;;  %v8644_v16 = vld [vmem:[#allocation17 + $0x20] sm:$0xff]  }
 0x379   : > { %7800 = vmatpush3.bf16.msra.mxu0 %v8625_v13  ;;  %7815 = vmatprep.mubr.bf16.mxu0 %v9720_v43  ;;  %v8633_v43 = vld [vmem:[#allocation16 + $0x38] sm:$0xff]  }
 0x37a   : > { %7801 = vmatprep.subr.bf16.mxu0 %v8626_v17  ;;  %7779 = vmatprep.subr.bf16.mxu1 %v8633_v43 }
 0x37b   : > { %7780 = vmatpush3.bf16.msra.mxu1 %v8633_v43  ;;  %v8651_v43 = vld [vmem:[#allocation20 + $0x28] sm:$0xff]  }
 0x37c   : > { %7781 = vmatprep.subr.bf16.mxu1 %v8634_v25 }
 0x37d   : > { %7802 = vmatpush3.bf16.msra.mxu0 %v8626_v17  ;;  %v8645_v17 = vld [vmem:[#allocation17 + $0x18] sm:$0xff]  }
 0x37e   : > { %7803 = vmatprep.subr.bf16.mxu0 %v8627_v18 }
 0x37f   : > { %7782 = vmatpush3.bf16.msra.mxu1 %v8634_v25  ;;  %v8652_v25 = vld [vmem:[#allocation20 + $0x20] sm:$0xff]  }
 0x380   : > { %7783 = vmatprep.subr.bf16.mxu1 %v8635_v26 }
 0x381   : > { %7804 = vmatpush3.bf16.msra.mxu0 %v8627_v18  ;;  %v8646_v18 = vld [vmem:[#allocation17 + $0x10] sm:$0xff]  }
 0x382   : > { %7805 = vmatprep.subr.bf16.mxu0 %v8628_v19 }
 0x383   : > { %7784 = vmatpush3.bf16.msra.mxu1 %v8635_v26  ;;  %v8653_v26 = vld [vmem:[#allocation20 + $0x18] sm:$0xff]  }
 0x384   : > { %7785 = vmatprep.subr.bf16.mxu1 %v8636_v27 }
 0x385   : > { %7806 = vmatpush3.bf16.msra.mxu0 %v8628_v19  ;;  %v8647_v19 = vld [vmem:[#allocation17 + $0x8] sm:$0xff]  }
 0x386   : > { %7807 = vmatprep.subr.bf16.mxu0 %v8629_v20 }
 0x387   : > { %7786 = vmatpush3.bf16.msra.mxu1 %v8636_v27  ;;  %v8654_v27 = vld [vmem:[#allocation20 + $0x10] sm:$0xff]  }
 0x388   : > { %7787 = vmatprep.subr.bf16.mxu1 %v8637_v28 }
 0x389   : > { %7808 = vmatpush3.bf16.msra.mxu0 %v8629_v20  ;;  %v8648_v20 = vld [vmem:[#allocation17] sm:$0xff]  }
 0x38a   : > { %7809 = vmatprep.subr.bf16.mxu0 %v8630_v22 }
 0x38b   : > { %7788 = vmatpush3.bf16.msra.mxu1 %v8637_v28  ;;  %v8655_v28 = vld [vmem:[#allocation20 + $0x8] sm:$0xff]  }
 0x38c   : > { %7789 = vmatprep.subr.bf16.mxu1 %v8638_v29 }
 0x38d   : > { %7810 = vmatpush3.bf16.msra.mxu0 %v8630_v22  ;;  %v8649_v22 = vld [vmem:[#allocation20 + $0x38] sm:$0xff]  }
 0x38e   : > { %7811 = vmatprep.subr.bf16.mxu0 %v8631_v23 }
 0x38f   : > { %7790 = vmatpush3.bf16.msra.mxu1 %v8638_v29  ;;  %v8656_v29 = vld [vmem:[#allocation20] sm:$0xff]  }
 0x390   : > { %7791 = vmatprep.subr.bf16.mxu1 %v8639_v30 }
 0x391   : > { %7812 = vmatpush3.bf16.msra.mxu0 %v8631_v23  ;;  %v9777_v23 = vpack.c.bf16 %v9705_v31, %v9707_v34 }
 0x392   : > { %7813 = vmatprep.subr.bf16.mxu0 %v8632_v24 }
 0x393   : > { %7792 = vmatpush3.bf16.msra.mxu1 %v8639_v30  ;;  %11630 = vst [vmem:[#allocation36_spill] sm:$0xff] %v9777_v23  ;;  %v9782_v30 = vand.u32 127, %v820_v0 }
 0x395   : > { %7814 = vmatpush3.bf16.msra.mxu0 %v8632_v24  ;;  %v8650_v24 = vld [vmem:[#allocation20 + $0x30] sm:$0xff]   ;;  %11631 = vst [vmem:[#allocation37_spill] sm:$0xff] %v9782_v30  ;;  %vm11509_vm12 = vcmp.eq.s32.totalorder %v9782_v30, 0  ;;  %vm836_vm13 = vcmp.eq.s32.totalorder %v9782_v30, 8  ;;  %vm11510_vm14 = vcmp.eq.s32.totalorder %v9782_v30, 1  ;;  %vm850_vm15 = vcmp.eq.s32.totalorder %v9782_v30, 9 }
 0x396   : > { %vm11508_vm0 = vcmp.eq.s32.totalorder %v9782_v30, 2  ;;  %vm864_vm1 = vcmp.eq.s32.totalorder %v9782_v30, 10  ;;  %vm11507_vm4 = vcmp.eq.s32.totalorder %v9782_v30, 3  ;;  %vm878_vm5 = vcmp.eq.s32.totalorder %v9782_v30, 11 }
 0x397   : > { %vm11506_vm6 = vcmp.eq.s32.totalorder %v9782_v30, 4  ;;  %vm892_vm8 = vcmp.eq.s32.totalorder %v9782_v30, 12 }
 0x398   : > { %7816 = vmatmul.mubr.bf16.vlgmr.msra.gmra.mxu0 %v9729_v59  ;;  %v8640_v59 = vld [vmem:[#allocation16] sm:$0xff]  }
 0x399   : > { %7793 = vmatprep.subr.bf16.mxu1 %v8640_v59 }
 0x39a   : > { %7794 = vmatpush3.bf16.msra.mxu1 %v8640_v59  ;;  %v6966_v59 = vsel %vm11509_vm12, 1.0, %v11536_v41 }
 0x39b   : > { %7819 = vmatprep.subr.bf16.mxu1 %v11536_v41 }
 0x418   : > { %v7737_v32 = vpop.f32.mrf.mxu0 }
 0x41a   : > { %v1765_v33 = vpop.f32.mrf.mxu0 }
 0x41b   : > { %v7757_v35 = vpop.f32.mrf.mxu1 }
 0x41c   : > { %v7738_v36 = vpop.f32.mrf.mxu0  ;;  %v1871_v46 = vadd.f32 %v7757_v35, %v7737_v32  ;;  %v9788_v32 = vpack.c.bf16 %v6966_v59, %v6966_v59 }
 0x41d   : > { %v1862_v37 = vpop.f32.mrf.mxu1 }
 0x41e   : > { %v1768_v39 = vpop.f32.mrf.mxu0  ;;  %v1863_v45 = vadd.f32 %v1862_v37, %v1765_v33  ;;  %11632 = vst [vmem:[#allocation38_spill] sm:$0xff] %v9788_v32  ;;  %7841 = vmatprep.mubr.msk.bf16.mxu0 %vm11500_vm11, %v9788_v32 }
 0x41f   : > { %v7758_v42 = vpop.f32.mrf.mxu1 }
 0x420   : > { %v1874_v49 = vadd.f32 %v7758_v42, %v7738_v36 }
 0x421   : > { %v1865_v47 = vpop.f32.mrf.mxu1 }
 0x422   : > { %v1866_v53 = vadd.f32 %v1865_v47, %v1768_v39 }
 0x438   : > { %v7777_v44 = vpop.f32.mrf.mxu0 }
 0x439   : > { %v1990_v51 = vadd.f32 %v7777_v44, %v1871_v46  ;;  %v6967_v44 = vsel %vm836_vm13, 1.0, %v11536_v41  ;;  %v6968_v46 = vsel %vm11510_vm14, 1.0, %v11536_v41  ;;  %vm11505_vm13 = vcmp.eq.s32.totalorder %v9782_v30, 5 }
 0x43a   : > { %v1973_v48 = vpop.f32.mrf.mxu0  ;;  %vm11535_vm14 = vcmp.lt.s32.totalorder %v9782_v30, 5 }
 0x43b   : > { %v1988_v50 = vadd.f32 %v1973_v48, %v1863_v45  ;;  %v2000_v5 = vadd.f32 %v7067_v54, %v1990_v51  ;;  %v9806_v48 = vpack.c.bf16 %v6967_v44, %v6967_v44  ;;  %v6970_v51 = vsel %vm11508_vm0, 1.0, %v11536_v41 }
 0x43c   : > { %v7778_v52 = vpop.f32.mrf.mxu0 }
 0x43d   : > { %v1991_v55 = vadd.f32 %v7778_v52, %v1874_v49  ;;  %v1998_v60 = vadd.f32 %v7067_v54, %v1988_v50  ;;  %v2004_v10 = vmax.f32 %v2000_v5, 0.0  ;;  %11633 = vst [vmem:[#allocation39_spill] sm:$0xff] %v9806_v48  ;;  %v9808_v49 = vpack.c.bf16 %v6968_v46, %v6968_v46 }
 0x43e   : > { %v1976_v56 = vpop.f32.mrf.mxu0  ;;  %v6969_v50 = vsel %vm850_vm15, 1.0, %v11536_v41  ;;  %vm906_vm15 = vcmp.eq.s32.totalorder %v9782_v30, 13 }
 0x43f   : > { %v2001_v62 = vadd.f32 %v7067_v54, %v1991_v55  ;;  %v1989_v63 = vadd.f32 %v1976_v56, %v1866_v53  ;;  %v2002_v8 = vmax.f32 %v1998_v60, 0.0  ;;  %11634 = vst [vmem:[#allocation40_spill] sm:$0xff] %v9808_v49  ;;  %v9820_v52 = vpack.c.bf16 %v6969_v50, %v6969_v50 }
 0x440   : > { %v9822_v53 = vpack.c.bf16 %v6970_v51, %v6970_v51  ;;  %v6972_v55 = vsel %vm11507_vm4, 1.0, %v11536_v41  ;;  %vm11519_vm4 = vcmp.lt.s32.totalorder %v9782_v30, 3 }
 0x441   : > { %v1999_v6 = vadd.f32 %v7067_v54, %v1989_v63  ;;  %v2005_v7 = vmax.f32 %v2001_v62, 0.0  ;;  %11635 = vst [vmem:[#allocation41_spill] sm:$0xff] %v9820_v52  ;;  %v6971_v54 = vsel %vm864_vm1, 1.0, %v11536_v41  ;;  %v9836_v60 = vpack.c.bf16 %v6972_v55, %v6972_v55 }
 0x442   : > { %11636 = vst [vmem:[#allocation42_spill] sm:$0xff] %v9822_v53  ;;  %v9834_v56 = vpack.c.bf16 %v6971_v54, %v6971_v54  ;;  %v6973_v62 = vsel %vm878_vm5, 1.0, %v11536_v41  ;;  %v6974_v63 = vsel %vm11506_vm6, 1.0, %v11536_v41  ;;  %vm11504_vm1 = vcmp.eq.s32.totalorder %v9782_v30, 6 }
 0x443   : > { %v2003_v9 = vmax.f32 %v1999_v6, 0.0  ;;  %v2024_v13 = vpack.c.bf16 %v2005_v7, %v2004_v10  ;;  %11638 = vst [vmem:[#allocation44_spill] sm:$0xff] %v9836_v60  ;;  %v9848_v5 = vpack.c.bf16 %v6973_v62, %v6973_v62  ;;  %v9850_v6 = vpack.c.bf16 %v6974_v63, %v6974_v63 }
 0x444   : > { %11637 = vst [vmem:[#allocation43_spill] sm:$0xff] %v9834_v56  ;;  %v6975_v7 = vsel %vm892_vm8, 1.0, %v11536_v41  ;;  %vm920_vm5 = vcmp.eq.s32.totalorder %v9782_v30, 14  ;;  %vm11503_vm8 = vcmp.eq.s32.totalorder %v9782_v30, 7 }
 0x445   : > { %v2023_v11 = vpack.c.bf16 %v2003_v9, %v2002_v8  ;;  %11639 = vst [vmem:[#allocation45_spill] sm:$0xff] %v9848_v5  ;;  %11640 = vst [vmem:[#allocation46_spill] sm:$0xff] %v9850_v6  ;;  %v6976_v8 = vsel %vm11505_vm13, 1.0, %v11536_v41  ;;  %v9862_v9 = vpack.c.bf16 %v6975_v7, %v6975_v7 }
 0x446   : > { %v9864_v10 = vpack.c.bf16 %v6976_v8, %v6976_v8 }
 0x447   : > { %7795 = vmatprep.mubr.bf16.mxu1 %v2023_v11  ;;  %11641 = vst [vmem:[#allocation47_spill] sm:$0xff] %v9862_v9  ;;  %v6977_v11 = vsel %vm906_vm15, 1.0, %v11536_v41  ;;  %vm934_vm15 = vcmp.eq.s32.totalorder %v9782_v30, 15 }
 0x448   : > { %7796 = vmatmul.mubr.bf16.vlgmr.msra.gmra.mxu1 %v2024_v13  ;;  %11642 = vst [vmem:[#allocation48_spill] sm:$0xff] %v9864_v10  ;;  %v9876_v13 = vpack.c.bf16 %v6977_v11, %v6977_v11 }
 0x449   : > { %7820 = vmatpush3.bf16.msra.mxu1 %v8641_v12  ;;  %7835 = vmatprep.mubr.msk.bf16.mxu1 %vm11499_vm10, %v11536_v41  ;;  %v6978_v12 = vsel %vm11504_vm1, 1.0, %v11536_v41  ;;  %vm11518_vm10 = vcmp.lt.s32.totalorder %v9782_v30, 1 }
 0x44a   : > { %7821 = vmatprep.subr.bf16.mxu1 %v11536_v41  ;;  %11643 = vst [vmem:[#allocation49_spill] sm:$0xff] %v9876_v13 }
 0x44d   : > { %7822 = vmatpush3.bf16.msra.mxu1 %v8642_v14  ;;  %v9878_v14 = vpack.c.bf16 %v6978_v12, %v6978_v12 }
 0x44e   : > { %7823 = vmatprep.subr.bf16.mxu1 %v11536_v41 }
 0x44f   : > { %11644 = vst [vmem:[#allocation50_spill] sm:$0xff] %v9878_v14 }
 0x451   : > { %7824 = vmatpush3.bf16.msra.mxu1 %v8643_v15  ;;  %v6979_v15 = vsel %vm920_vm5, 1.0, %v11536_v41  ;;  %vm11570_vm5 = vcmask 64512  }
 0x452   : > { %7825 = vmatprep.subr.bf16.mxu1 %v11536_v41 }
 0x455   : > { %7826 = vmatpush3.bf16.msra.mxu1 %v8644_v16  ;;  %v6980_v16 = vsel %vm11503_vm8, 1.0, %v11536_v41 }
 0x456   : > { %7827 = vmatprep.subr.bf16.mxu1 %v11536_v41 }
 0x459   : > { %7828 = vmatpush3.bf16.msra.mxu1 %v8645_v17  ;;  %v9890_v17 = vpack.c.bf16 %v6979_v15, %v6979_v15 }
 0x45a   : > { %7829 = vmatprep.subr.bf16.mxu1 %v11536_v41 }
 0x45b   : > { %11645 = vst [vmem:[#allocation51_spill] sm:$0xff] %v9890_v17 }
 0x45d   : > { %7830 = vmatpush3.bf16.msra.mxu1 %v8646_v18  ;;  %v9892_v18 = vpack.c.bf16 %v6980_v16, %v6980_v16 }
 0x45e   : > { %7831 = vmatprep.subr.bf16.mxu1 %v11536_v41 }
 0x45f   : > { %11646 = vst [vmem:[#allocation52_spill] sm:$0xff] %v9892_v18 }
 0x461   : > { %7832 = vmatpush3.bf16.msra.mxu1 %v8647_v19  ;;  %v6981_v19 = vsel %vm934_vm15, 1.0, %v11536_v41 }
 0x462   : > { %7833 = vmatprep.subr.bf16.mxu1 %v11536_v41 }
 0x465   : > { %7834 = vmatpush3.bf16.msra.mxu1 %v8648_v20  ;;  %v9900_v20 = vpack.c.bf16 %v6981_v19, %v6981_v19 }
 0x466   : > { %7873 = vmatprep.subr.bf16.mxu1 %v8649_v22 }
 0x467   : > { %11647 = vst [vmem:[#allocation53_spill] sm:$0xff] %v9900_v20 }
 0x468   : > { %7836 = vmatmul.mubr.bf16.vlgmr.msra.gmra.mxu1 %v9777_v23 }
 0x469   : > { %7874 = vmatpush3.bf16.msra.mxu1 %v8649_v22  ;;  %v8657_v22 = vld [vmem:[#allocation22 + $0x38] sm:$0xff]  }
 0x46a   : > { %7875 = vmatprep.subr.bf16.mxu1 %v8650_v24 }
 0x46d   : > { %7876 = vmatpush3.bf16.msra.mxu1 %v8650_v24  ;;  %v8658_v24 = vld [vmem:[#allocation22 + $0x30] sm:$0xff]  }
 0x46e   : > { %7877 = vmatprep.subr.bf16.mxu1 %v8651_v43 }
 0x471   : > { %7878 = vmatpush3.bf16.msra.mxu1 %v8651_v43  ;;  %v8659_v43 = vld [vmem:[#allocation22 + $0x28] sm:$0xff]  }
 0x472   : > { %7879 = vmatprep.subr.bf16.mxu1 %v8652_v25 }
 0x475   : > { %7880 = vmatpush3.bf16.msra.mxu1 %v8652_v25  ;;  %v8660_v25 = vld [vmem:[#allocation22 + $0x20] sm:$0xff]  }
 0x476   : > { %7881 = vmatprep.subr.bf16.mxu1 %v8653_v26 }
 0x479   : > { %7882 = vmatpush3.bf16.msra.mxu1 %v8653_v26  ;;  %v8661_v26 = vld [vmem:[#allocation22 + $0x18] sm:$0xff]  }
 0x47a   : > { %7883 = vmatprep.subr.bf16.mxu1 %v8654_v27 }
 0x47d   : > { %7884 = vmatpush3.bf16.msra.mxu1 %v8654_v27  ;;  %v7817_v27 = vpop.f32.mrf.mxu0 }
 0x47e   : > { %7885 = vmatprep.subr.bf16.mxu1 %v8655_v28 }
 0x481   : > { %7886 = vmatpush3.bf16.msra.mxu1 %v8655_v28  ;;  %v2233_v28 = vpop.f32.mrf.mxu0 }
 0x482   : > { %7887 = vmatprep.subr.bf16.mxu1 %v8656_v29 }
 0x485   : > { %7888 = vmatpush3.bf16.msra.mxu1 %v8656_v29  ;;  %v7818_v29 = vpop.f32.mrf.mxu0 }
 0x486   : > { %7969 = vmatprep.subr.mxu1 %v9707_v34 }
 0x487   : > { %v2236_v59 = vpop.f32.mrf.mxu0 }
 0x508   : > { %v9792_v33 = vpop.f32.mrf.mxu1 }
 0x50a   : > { %v9794_v35 = vpop.f32.mrf.mxu1 }
 0x50c   : > { %v9796_v36 = vpop.f32.mrf.mxu1 }
 0x50e   : > { %v9798_v37 = vpop.f32.mrf.mxu1 }
 0x528   : > { %v2347_v0 = vpop.f32.mrf.mxu1 }
 0x52a   : > { %v7837_v39 = vpop.f32.mrf.mxu1 }
 0x52b   : > { %v7077_v39 = vld [vmem:[%s11648_s5] ss:$0 sm:$0xff] }
 0x52c   : > { %v2350_v42 = vpop.f32.mrf.mxu1  ;;  %v9907_v44 = vadd.f32 %v7077_v39, %v2233_v28  ;;  %v9911_v46 = vadd.f32 %v7817_v27, %v7077_v39  ;;  %v9913_v50 = vadd.f32 %v7077_v39, %v2236_v59 }
 0x52d   : > { %v2354_v45 = vpack.c.bf16 %v2350_v42, %v2347_v0 }
 0x52e   : > { %v7838_v47 = vpop.f32.mrf.mxu1 }
 0x52f   : > { %7839 = vmatprep.subr.bf16.mxu0 %v2354_v45 }
 0x530   : > { %7840 = vmatpush3.bf16.msra.mxu0 %v2354_v45  ;;  %v9909_v45 = vadd.f32 %v7818_v29, %v7077_v39 }
 0x531   : > { %7921 = vmatprep.subr.bf16.mxu0 %v8657_v22 }
 0x533   : > { %7842 = vmatmul.mubr.msk.bf16.vlgmr.msra.gmra.mxu0 %vm11500_vm11, %v9806_v48 }
 0x534   : > { %7845 = vmatprep.mubr.msk.bf16.mxu0 %vm11500_vm11, %v9808_v49  ;;  %7922 = vmatpush3.bf16.msra.mxu0 %v8657_v22 }
 0x535   : > { %7923 = vmatprep.subr.bf16.mxu0 %v8658_v24 }
 0x538   : > { %7924 = vmatpush3.bf16.msra.mxu0 %v8658_v24 }
 0x539   : > { %7925 = vmatprep.subr.bf16.mxu0 %v8659_v43 }
 0x53b   : > { %7846 = vmatmul.mubr.msk.bf16.gmra.mxu0 %vm11500_vm11, %v9820_v52 }
 0x53c   : > { %7849 = vmatprep.mubr.msk.bf16.mxu0 %vm11500_vm11, %v9822_v53  ;;  %7926 = vmatpush3.bf16.msra.mxu0 %v8659_v43 }
 0x53d   : > { %7927 = vmatprep.subr.bf16.mxu0 %v8660_v25 }
 0x540   : > { %7928 = vmatpush3.bf16.msra.mxu0 %v8660_v25 }
 0x541   : > { %7929 = vmatprep.subr.bf16.mxu0 %v8661_v26 }
 0x543   : > { %7850 = vmatmul.mubr.msk.bf16.gmra.mxu0 %vm11500_vm11, %v9834_v56 }
 0x544   : > { %7853 = vmatprep.mubr.msk.bf16.mxu0 %vm11500_vm11, %v9836_v60  ;;  %7930 = vmatpush3.bf16.msra.mxu0 %v8661_v26 }
 0x54b   : > { %7854 = vmatmul.mubr.msk.bf16.gmra.mxu0 %vm11500_vm11, %v9848_v5 }
 0x54c   : > { %7857 = vmatprep.mubr.msk.bf16.mxu0 %vm11500_vm11, %v9850_v6 }
 0x553   : > { %7858 = vmatmul.mubr.msk.bf16.gmra.mxu0 %vm11500_vm11, %v9862_v9 }
 0x554   : > { %7861 = vmatprep.mubr.msk.bf16.mxu0 %vm11500_vm11, %v9864_v10 }
 0x55b   : > { %7862 = vmatmul.mubr.msk.bf16.gmra.mxu0 %vm11500_vm11, %v9876_v13 }
 0x55c   : > { %7865 = vmatprep.mubr.msk.bf16.mxu0 %vm11500_vm11, %v9878_v14 }
 0x563   : > { %7866 = vmatmul.mubr.msk.bf16.gmra.mxu0 %vm11500_vm11, %v9890_v17 }
 0x564   : > { %7869 = vmatprep.mubr.msk.bf16.mxu0 %vm11500_vm11, %v9892_v18 }
 0x56b   : > { %7870 = vmatmul.mubr.msk.bf16.gmra.mxu0 %vm11500_vm11, %v9900_v20 }
 0x5f3   : > { %v7843_v0 = vpop.f32.mrf.mxu0 }
 0x5f4   : > { %v2446_v55 = vadd.f32 %v7843_v0, %v9911_v46 }
 0x5f5   : > { %v2437_v42 = vpop.f32.mrf.mxu0 }
 0x5f6   : > { %v2438_v51 = vadd.f32 %v2437_v42, %v9907_v44  ;;  %v2566_v15 = vmax.f32 %v2446_v55, 0.0 }
 0x5f7   : > { %v7844_v47 = vpop.f32.mrf.mxu0 }
 0x5f8   : > { %v2449_v54 = vadd.f32 %v7844_v47, %v9909_v45  ;;  %v2564_v11 = vmax.f32 %v2438_v51, 0.0 }
 0x5f9   : > { %v2440_v62 = vpop.f32.mrf.mxu0 }
 0x5fa   : > { %v2441_v63 = vadd.f32 %v2440_v62, %v9913_v50  ;;  %v2567_v7 = vmax.f32 %v2449_v54, 0.0 }
 0x5fb   : > { %v7847_v8 = vpop.f32.mrf.mxu0 }
 0x5fc   : > { %v2565_v12 = vmax.f32 %v2441_v63, 0.0  ;;  %v2614_v22 = vpack.c.bf16 %v2567_v7, %v2566_v15  ;;  %v2462_v26 = vadd.f32 %v7847_v8, %v9911_v46 }
 0x5fd   : > { %v2453_v16 = vpop.f32.mrf.mxu0 }
 0x5fe   : > { %v2613_v19 = vpack.c.bf16 %v2565_v12, %v2564_v11  ;;  %v2454_v43 = vadd.f32 %v2453_v16, %v9907_v44  ;;  %v2570_v42 = vmax.f32 %v2462_v26, 0.0 }
 0x5ff   : > { %v7848_v24 = vpop.f32.mrf.mxu0 }
 0x600   : > { %v2465_v25 = vadd.f32 %v7848_v24, %v9909_v45  ;;  %7889 = vmatprep.mubr.bf16.mxu1 %v2613_v19  ;;  %v2568_v0 = vmax.f32 %v2454_v43, 0.0 }
 0x601   : > { %v2456_v27 = vpop.f32.mrf.mxu0  ;;  %7890 = vmatmul.mubr.bf16.vlgmr.msra.gmra.mxu1 %v2614_v22 }
 0x602   : > { %v2457_v28 = vadd.f32 %v2456_v27, %v9913_v50  ;;  %7970 = vmatpush3.xpose.msra.mxu1 %v9707_v34  ;;  %v2571_v29 = vmax.f32 %v2465_v25, 0.0 }
 0x603   : > { %7974 = vmatprep.subr.mxu1 %v9705_v31  ;;  %v7851_v59 = vpop.f32.mrf.mxu0 }
 0x604   : > { %v2569_v39 = vmax.f32 %v2457_v28, 0.0  ;;  %v2616_v54 = vpack.c.bf16 %v2571_v29, %v2570_v42  ;;  %v2478_v7 = vadd.f32 %v7851_v59, %v9911_v46 }
 0x605   : > { %v2469_v47 = vpop.f32.mrf.mxu0 }
 0x606   : > { %v2615_v51 = vpack.c.bf16 %v2569_v39, %v2568_v0  ;;  %v2470_v62 = vadd.f32 %v2469_v47, %v9907_v44  ;;  %v2574_v22 = vmax.f32 %v2478_v7, 0.0 }
 0x607   : > { %v7852_v55 = vpop.f32.mrf.mxu0 }
 0x608   : > { %v2481_v63 = vadd.f32 %v7852_v55, %v9909_v45  ;;  %7893 = vmatprep.mubr.bf16.mxu1 %v2615_v51  ;;  %v2572_v16 = vmax.f32 %v2470_v62, 0.0 }
 0x609   : > { %v2472_v8 = vpop.f32.mrf.mxu0  ;;  %7894 = vmatmul.mubr.bf16.gmra.mxu1 %v2616_v54 }
 0x60a   : > { %v2473_v11 = vadd.f32 %v2472_v8, %v9913_v50  ;;  %v2575_v12 = vmax.f32 %v2481_v63, 0.0 }
 0x60b   : > { %v7855_v15 = vpop.f32.mrf.mxu0 }
 0x60c   : > { %v2573_v19 = vmax.f32 %v2473_v11, 0.0  ;;  %v2618_v25 = vpack.c.bf16 %v2575_v12, %v2574_v22  ;;  %v2494_v29 = vadd.f32 %v7855_v15, %v9911_v46 }
 0x60d   : > { %v2485_v24 = vpop.f32.mrf.mxu0 }
 0x60e   : > { %v2617_v43 = vpack.c.bf16 %v2573_v19, %v2572_v16  ;;  %v2486_v27 = vadd.f32 %v2485_v24, %v9907_v44  ;;  %v2578_v54 = vmax.f32 %v2494_v29, 0.0 }
 0x60f   : > { %v7856_v26 = vpop.f32.mrf.mxu0 }
 0x610   : > { %v2497_v28 = vadd.f32 %v7856_v26, %v9909_v45  ;;  %7897 = vmatprep.mubr.bf16.mxu1 %v2617_v43  ;;  %v2576_v47 = vmax.f32 %v2486_v27, 0.0 }
 0x611   : > { %v2488_v59 = vpop.f32.mrf.mxu0  ;;  %7898 = vmatmul.mubr.bf16.gmra.mxu1 %v2618_v25 }
 0x612   : > { %v2489_v0 = vadd.f32 %v2488_v59, %v9913_v50  ;;  %v2579_v39 = vmax.f32 %v2497_v28, 0.0 }
 0x613   : > { %v7859_v42 = vpop.f32.mrf.mxu0 }
 0x614   : > { %v2577_v51 = vmax.f32 %v2489_v0, 0.0  ;;  %v2620_v63 = vpack.c.bf16 %v2579_v39, %v2578_v54  ;;  %v2510_v12 = vadd.f32 %v7859_v42, %v9911_v46 }
 0x615   : > { %v2501_v55 = vpop.f32.mrf.mxu0 }
 0x616   : > { %v2619_v62 = vpack.c.bf16 %v2577_v51, %v2576_v47  ;;  %v2502_v8 = vadd.f32 %v2501_v55, %v9907_v44  ;;  %v2582_v25 = vmax.f32 %v2510_v12, 0.0 }
 0x617   : > { %v7860_v7 = vpop.f32.mrf.mxu0 }
 0x618   : > { %v2513_v11 = vadd.f32 %v7860_v7, %v9909_v45  ;;  %7901 = vmatprep.mubr.bf16.mxu1 %v2619_v62  ;;  %v2580_v24 = vmax.f32 %v2502_v8, 0.0 }
 0x619   : > { %v2504_v15 = vpop.f32.mrf.mxu0  ;;  %7902 = vmatmul.mubr.bf16.gmra.mxu1 %v2620_v63 }
 0x61a   : > { %v2505_v16 = vadd.f32 %v2504_v15, %v9913_v50  ;;  %v2583_v19 = vmax.f32 %v2513_v11, 0.0 }
 0x61b   : > { %v7863_v22 = vpop.f32.mrf.mxu0 }
 0x61c   : > { %v2581_v43 = vmax.f32 %v2505_v16, 0.0  ;;  %v2622_v28 = vpack.c.bf16 %v2583_v19, %v2582_v25  ;;  %v2526_v39 = vadd.f32 %v7863_v22, %v9911_v46 }
 0x61d   : > { %v2517_v26 = vpop.f32.mrf.mxu0 }
 0x61e   : > { %v2621_v27 = vpack.c.bf16 %v2581_v43, %v2580_v24  ;;  %v2518_v59 = vadd.f32 %v2517_v26, %v9907_v44  ;;  %v2586_v63 = vmax.f32 %v2526_v39, 0.0 }
 0x61f   : > { %v7864_v29 = vpop.f32.mrf.mxu0 }
 0x620   : > { %v2529_v0 = vadd.f32 %v7864_v29, %v9909_v45  ;;  %7905 = vmatprep.mubr.bf16.mxu1 %v2621_v27  ;;  %v2584_v55 = vmax.f32 %v2518_v59, 0.0 }
 0x621   : > { %v2520_v42 = vpop.f32.mrf.mxu0  ;;  %7906 = vmatmul.mubr.bf16.gmra.mxu1 %v2622_v28 }
 0x622   : > { %v2521_v47 = vadd.f32 %v2520_v42, %v9913_v50  ;;  %v2587_v51 = vmax.f32 %v2529_v0, 0.0 }
 0x623   : > { %v7867_v54 = vpop.f32.mrf.mxu0 }
 0x624   : > { %v2585_v62 = vmax.f32 %v2521_v47, 0.0  ;;  %v2624_v11 = vpack.c.bf16 %v2587_v51, %v2586_v63  ;;  %v2542_v19 = vadd.f32 %v7867_v54, %v9911_v46 }
 0x625   : > { %v2533_v7 = vpop.f32.mrf.mxu0 }
 0x626   : > { %v2623_v8 = vpack.c.bf16 %v2585_v62, %v2584_v55  ;;  %v2534_v15 = vadd.f32 %v2533_v7, %v9907_v44  ;;  %v2590_v28 = vmax.f32 %v2542_v19, 0.0  ;;  %v9958_v19 = vld [vmem:[%s11649_s24] ss:$0 sm:$0xff] }
 0x627   : > { %v7868_v12 = vpop.f32.mrf.mxu0 }
 0x628   : > { %v2545_v16 = vadd.f32 %v7868_v12, %v9909_v45  ;;  %7909 = vmatprep.mubr.bf16.mxu1 %v2623_v8  ;;  %v2588_v26 = vmax.f32 %v2534_v15, 0.0 }
 0x629   : > { %v2536_v22 = vpop.f32.mrf.mxu0  ;;  %7910 = vmatmul.mubr.bf16.gmra.mxu1 %v2624_v11 }
 0x62a   : > { %v2537_v24 = vadd.f32 %v2536_v22, %v9913_v50  ;;  %v2591_v43 = vmax.f32 %v2545_v16, 0.0 }
 0x62b   : > { %v7871_v25 = vpop.f32.mrf.mxu0 }
 0x62c   : > { %v2589_v27 = vmax.f32 %v2537_v24, 0.0  ;;  %v2626_v0 = vpack.c.bf16 %v2591_v43, %v2590_v28  ;;  %v2558_v51 = vadd.f32 %v7871_v25, %v9911_v46  ;;  %v8664_v46 = vld [vmem:[#allocation22] sm:$0xff]  }
 0x62d   : > { %v2549_v29 = vpop.f32.mrf.mxu0 }
 0x62e   : > { %v2625_v59 = vpack.c.bf16 %v2589_v27, %v2588_v26  ;;  %v2550_v42 = vadd.f32 %v2549_v29, %v9907_v44  ;;  %v2594_v8 = vmax.f32 %v2558_v51, 0.0  ;;  %v8662_v44 = vld [vmem:[#allocation22 + $0x10] sm:$0xff]  }
 0x62f   : > { %v7872_v39 = vpop.f32.mrf.mxu0  ;;  %7931 = vmatprep.subr.bf16.mxu0 %v8662_v44 }
 0x630   : > { %v2561_v47 = vadd.f32 %v7872_v39, %v9909_v45  ;;  %7913 = vmatprep.mubr.bf16.mxu1 %v2625_v59  ;;  %v2592_v63 = vmax.f32 %v2550_v42, 0.0  ;;  %7932 = vmatpush3.bf16.msra.mxu0 %v8662_v44  ;;  %v8663_v45 = vld [vmem:[#allocation22 + $0x8] sm:$0xff]  }
 0x631   : > { %v2552_v54 = vpop.f32.mrf.mxu0  ;;  %7914 = vmatmul.mubr.bf16.gmra.mxu1 %v2626_v0  ;;  %7933 = vmatprep.subr.bf16.mxu0 %v8663_v45 }
 0x632   : > { %v2553_v55 = vadd.f32 %v2552_v54, %v9913_v50  ;;  %v2595_v62 = vmax.f32 %v2561_v47, 0.0  ;;  %v11528_v50 = vmov 4  }
 0x633   : > { %8446 = vset.pattern.permute.xlu1 %v11528_v50 }
 0x634   : > { %v2593_v7 = vmax.f32 %v2553_v55, 0.0  ;;  %v2628_v12 = vpack.c.bf16 %v2595_v62, %v2594_v8  ;;  %7934 = vmatpush3.bf16.msra.mxu0 %v8663_v45 }
 0x635   : > { %7935 = vmatprep.subr.bf16.mxu0 %v8664_v46 }
 0x636   : > { %v2627_v11 = vpack.c.bf16 %v2593_v7, %v2592_v63 }
 0x638   : > { %7917 = vmatprep.mubr.bf16.mxu1 %v2627_v11  ;;  %7936 = vmatpush3.bf16.msra.mxu0 %v8664_v46 }
 0x639   : > { %7918 = vmatmul.mubr.bf16.gmra.mxu1 %v2628_v12 }
 0x63a   : > { %7971 = vmatprep.mubr.f32.mxu1 %v9716_v40 }
 0x641   : > { %7972 = vmatmul.mubr.f32.vlgmr.msra.gmra.mxu1 %v9712_v38 }
 0x642   : > { %7975 = vmatpush3.xpose.msra.mxu1 %v9705_v31  ;;  %7976 = vmatprep.mubr.f32.mxu1 %v9725_v58 }
 0x645   : > { %7977 = vmatmul.mubr.f32.vlgmr.msra.gmra.mxu1 %v9723_v57 }
 0x6c1   : > { %v7891_v15 = vpop.f32.mrf.mxu1 }
 0x6c2   : > { %v2726_v25 = vadd.f32 %v7891_v15, %v9958_v19 }
 0x6c3   : > { %v2717_v16 = vpop.f32.mrf.mxu1 }
 0x6c4   : > { %v2718_v24 = vadd.f32 %v9958_v19, %v2717_v16  ;;  %v2846_v39 = vmax.f32 %v2726_v25, 0.0 }
 0x6c5   : > { %v7892_v22 = vpop.f32.mrf.mxu1 }
 0x6c6   : > { %v2729_v43 = vadd.f32 %v7892_v22, %v9958_v19  ;;  %v2844_v59 = vmax.f32 %v2718_v24, 0.0 }
 0x6c7   : > { %v2720_v26 = vpop.f32.mrf.mxu1 }
 0x6c8   : > { %v2721_v27 = vadd.f32 %v9958_v19, %v2720_v26  ;;  %v2847_v28 = vmax.f32 %v2729_v43, 0.0 }
 0x6c9   : > { %v7895_v29 = vpop.f32.mrf.mxu1 }
 0x6ca   : > { %v2845_v0 = vmax.f32 %v2721_v27, 0.0  ;;  %v2894_v51 = vpack.c.bf16 %v2847_v28, %v2846_v39  ;;  %v2742_v63 = vadd.f32 %v7895_v29, %v9958_v19 }
 0x6cb   : > { %v2733_v42 = vpop.f32.mrf.mxu1 }
 0x6cc   : > { %v2893_v47 = vpack.c.bf16 %v2845_v0, %v2844_v59  ;;  %v2734_v55 = vadd.f32 %v9958_v19, %v2733_v42  ;;  %v2850_v46 = vmax.f32 %v2742_v63, 0.0 }
 0x6cd   : > { %v7896_v54 = vpop.f32.mrf.mxu1 }
 0x6ce   : > { %v2745_v62 = vadd.f32 %v7896_v54, %v9958_v19  ;;  %7937 = vmatprep.mubr.bf16.mxu0 %v2893_v47  ;;  %v2848_v44 = vmax.f32 %v2734_v55, 0.0 }
 0x6cf   : > { %v2736_v7 = vpop.f32.mrf.mxu1  ;;  %7938 = vmatmul.mubr.bf16.vlgmr.msra.gmra.mxu0 %v2894_v51 }
 0x6d0   : > { %v2737_v8 = vadd.f32 %v9958_v19, %v2736_v7  ;;  %v2851_v11 = vmax.f32 %v2745_v62, 0.0 }
 0x6d1   : > { %v7899_v12 = vpop.f32.mrf.mxu1 }
 0x6d2   : > { %v2849_v45 = vmax.f32 %v2737_v8, 0.0  ;;  %v2896_v22 = vpack.c.bf16 %v2851_v11, %v2850_v46  ;;  %v2758_v26 = vadd.f32 %v7899_v12, %v9958_v19 }
 0x6d3   : > { %v2749_v15 = vpop.f32.mrf.mxu1 }
 0x6d4   : > { %v2895_v16 = vpack.c.bf16 %v2849_v45, %v2848_v44  ;;  %v2750_v43 = vadd.f32 %v9958_v19, %v2749_v15  ;;  %v2854_v42 = vmax.f32 %v2758_v26, 0.0 }
 0x6d5   : > { %v7900_v24 = vpop.f32.mrf.mxu1 }
 0x6d6   : > { %v2761_v25 = vadd.f32 %v7900_v24, %v9958_v19  ;;  %7941 = vmatprep.mubr.bf16.mxu0 %v2895_v16  ;;  %v2852_v0 = vmax.f32 %v2750_v43, 0.0 }
 0x6d7   : > { %v2752_v27 = vpop.f32.mrf.mxu1  ;;  %7942 = vmatmul.mubr.bf16.gmra.mxu0 %v2896_v22 }
 0x6d8   : > { %v2753_v28 = vadd.f32 %v9958_v19, %v2752_v27  ;;  %v2855_v29 = vmax.f32 %v2761_v25, 0.0 }
 0x6d9   : > { %v7903_v59 = vpop.f32.mrf.mxu1 }
 0x6da   : > { %v2853_v39 = vmax.f32 %v2753_v28, 0.0  ;;  %v2898_v54 = vpack.c.bf16 %v2855_v29, %v2854_v42  ;;  %v2774_v7 = vadd.f32 %v7903_v59, %v9958_v19 }
 0x6db   : > { %v2765_v47 = vpop.f32.mrf.mxu1 }
 0x6dc   : > { %v2897_v51 = vpack.c.bf16 %v2853_v39, %v2852_v0  ;;  %v2766_v62 = vadd.f32 %v9958_v19, %v2765_v47  ;;  %v2858_v15 = vmax.f32 %v2774_v7, 0.0 }
 0x6dd   : > { %v7904_v55 = vpop.f32.mrf.mxu1 }
 0x6de   : > { %v2777_v63 = vadd.f32 %v7904_v55, %v9958_v19  ;;  %7945 = vmatprep.mubr.bf16.mxu0 %v2897_v51  ;;  %v2856_v45 = vmax.f32 %v2766_v62, 0.0 }
 0x6df   : > { %v2768_v8 = vpop.f32.mrf.mxu1  ;;  %7946 = vmatmul.mubr.bf16.gmra.mxu0 %v2898_v54 }
 0x6e0   : > { %v2769_v11 = vadd.f32 %v9958_v19, %v2768_v8  ;;  %v2859_v12 = vmax.f32 %v2777_v63, 0.0 }
 0x6e1   : > { %v7907_v44 = vpop.f32.mrf.mxu1 }
 0x6e2   : > { %v2857_v46 = vmax.f32 %v2769_v11, 0.0  ;;  %v2900_v24 = vpack.c.bf16 %v2859_v12, %v2858_v15  ;;  %v2790_v27 = vadd.f32 %v7907_v44, %v9958_v19 }
 0x6e3   : > { %v2781_v16 = vpop.f32.mrf.mxu1 }
 0x6e4   : > { %v2899_v22 = vpack.c.bf16 %v2857_v46, %v2856_v45  ;;  %v2782_v25 = vadd.f32 %v9958_v19, %v2781_v16  ;;  %v2862_v47 = vmax.f32 %v2790_v27, 0.0 }
 0x6e5   : > { %v7908_v43 = vpop.f32.mrf.mxu1 }
 0x6e6   : > { %v2793_v26 = vadd.f32 %v7908_v43, %v9958_v19  ;;  %7949 = vmatprep.mubr.bf16.mxu0 %v2899_v22  ;;  %v2860_v39 = vmax.f32 %v2782_v25, 0.0 }
 0x6e7   : > { %v2784_v28 = vpop.f32.mrf.mxu1  ;;  %7950 = vmatmul.mubr.bf16.gmra.mxu0 %v2900_v24 }
 0x6e8   : > { %v2785_v29 = vadd.f32 %v9958_v19, %v2784_v28  ;;  %v2863_v59 = vmax.f32 %v2793_v26, 0.0 }
 0x6e9   : > { %v7911_v0 = vpop.f32.mrf.mxu1 }
 0x6ea   : > { %v2861_v42 = vmax.f32 %v2785_v29, 0.0  ;;  %v2902_v55 = vpack.c.bf16 %v2863_v59, %v2862_v47  ;;  %v2806_v8 = vadd.f32 %v7911_v0, %v9958_v19 }
 0x6eb   : > { %v2797_v51 = vpop.f32.mrf.mxu1 }
 0x6ec   : > { %v2901_v54 = vpack.c.bf16 %v2861_v42, %v2860_v39  ;;  %v2798_v63 = vadd.f32 %v9958_v19, %v2797_v51  ;;  %v2866_v16 = vmax.f32 %v2806_v8, 0.0 }
 0x6ed   : > { %v7912_v62 = vpop.f32.mrf.mxu1 }
 0x6ee   : > { %v2809_v7 = vadd.f32 %v7912_v62, %v9958_v19  ;;  %7953 = vmatprep.mubr.bf16.mxu0 %v2901_v54  ;;  %v2864_v46 = vmax.f32 %v2798_v63, 0.0 }
 0x6ef   : > { %v2800_v11 = vpop.f32.mrf.mxu1  ;;  %7954 = vmatmul.mubr.bf16.gmra.mxu0 %v2902_v55 }
 0x6f0   : > { %v2801_v12 = vadd.f32 %v9958_v19, %v2800_v11  ;;  %v2867_v44 = vmax.f32 %v2809_v7, 0.0 }
 0x6f1   : > { %v7915_v45 = vpop.f32.mrf.mxu1 }
 0x6f2   : > { %v2865_v15 = vmax.f32 %v2801_v12, 0.0  ;;  %v2904_v43 = vpack.c.bf16 %v2867_v44, %v2866_v16  ;;  %v2822_v28 = vadd.f32 %v7915_v45, %v9958_v19 }
 0x6f3   : > { %v2813_v22 = vpop.f32.mrf.mxu1 }
 0x6f4   : > { %v2903_v24 = vpack.c.bf16 %v2865_v15, %v2864_v46  ;;  %v2814_v26 = vadd.f32 %v9958_v19, %v2813_v22  ;;  %v2870_v51 = vmax.f32 %v2822_v28, 0.0 }
 0x6f5   : > { %v7916_v25 = vpop.f32.mrf.mxu1 }
 0x6f6   : > { %v2825_v27 = vadd.f32 %v7916_v25, %v9958_v19  ;;  %7957 = vmatprep.mubr.bf16.mxu0 %v2903_v24  ;;  %v2868_v42 = vmax.f32 %v2814_v26, 0.0 }
 0x6f7   : > { %v2816_v29 = vpop.f32.mrf.mxu1  ;;  %7958 = vmatmul.mubr.bf16.gmra.mxu0 %v2904_v43 }
 0x6f8   : > { %v2817_v59 = vadd.f32 %v9958_v19, %v2816_v29  ;;  %v2871_v0 = vmax.f32 %v2825_v27, 0.0 }
 0x6f9   : > { %v7919_v39 = vpop.f32.mrf.mxu1 }
 0x6fa   : > { %v2869_v47 = vmax.f32 %v2817_v59, 0.0  ;;  %v2906_v62 = vpack.c.bf16 %v2871_v0, %v2870_v51  ;;  %v2838_v12 = vadd.f32 %v7919_v39, %v9958_v19  ;;  %v11514_v59 = vmov 2  }
 0x6fb   : > { %v2829_v54 = vpop.f32.mrf.mxu1  ;;  %v11522_v0 = vmov 3   ;;  %v11520_v39 = vmov 5   ;;  %v11516_v51 = vmov 7  }
 0x6fc   : > { %v2905_v55 = vpack.c.bf16 %v2869_v47, %v2868_v42  ;;  %v2830_v7 = vadd.f32 %v9958_v19, %v2829_v54  ;;  %v2874_v24 = vmax.f32 %v2838_v12, 0.0  ;;  %v10020_v54 = vpop.permute.xlu0 %3608 }
 0x6fd   : > { %v7920_v63 = vpop.f32.mrf.mxu1  ;;  %11650 = vst [vmem:[#allocation54_spill] sm:$0xff] %v10020_v54 }
 0x6fe   : > { %v2841_v8 = vadd.f32 %v7920_v63, %v9958_v19  ;;  %7961 = vmatprep.mubr.bf16.mxu0 %v2905_v55  ;;  %v2872_v46 = vmax.f32 %v2830_v7, 0.0 }
 0x6ff   : > { %v2832_v11 = vpop.f32.mrf.mxu1  ;;  %7962 = vmatmul.mubr.bf16.gmra.mxu0 %v2906_v62 }
 0x700   : > { %v2833_v44 = vadd.f32 %v9958_v19, %v2832_v11  ;;  %v2875_v15 = vmax.f32 %v2841_v8, 0.0  ;;  %v11524_v19 = vmov 6  }
 0x701   : > { %v7973_v45 = vpop.f32.mrf.mxu1 }
 0x702   : > { %v2873_v16 = vmax.f32 %v2833_v44, 0.0  ;;  %v3200_v22 = vmul.f32 2.0, %v7973_v45  ;;  %v2908_v26 = vpack.c.bf16 %v2875_v15, %v2874_v24 }
 0x703   : > { %v3190_v27 = vpop.f32.mrf.mxu1 }
 0x704   : > { %v2907_v43 = vpack.c.bf16 %v2873_v16, %v2872_v46  ;;  %v9993_v25 = vsub.f32 %v3200_v22, %v9733_v21  ;;  %v3199_v28 = vmul.f32 2.0, %v3190_v27 }
 0x705   : > { %v7978_v42 = vpop.f32.mrf.mxu1 }
 0x706   : > { %3375 = vperm.xlu1 %8446, %v9993_v25   ;;  %3214 = vperm.xlu0 %8441, %v9993_v25   ;;  %v10002_v29 = vsub.f32 %v3199_v28, %v9733_v21  ;;  %v3606_v47 = vmul.f32 2.0, %v7978_v42 }
 0x707   : > { %7965 = vmatprep.mubr.bf16.mxu0 %v2907_v43  ;;  %v3596_v62 = vpop.f32.mrf.mxu1 }
 0x708   : > { %7966 = vmatmul.mubr.bf16.gmra.mxu0 %v2908_v26  ;;  %v10023_v55 = vsub.f32 %v3606_v47, %v10020_v54  ;;  %v3605_v63 = vmul.f32 2.0, %v3596_v62 }
 0x70a   : > { %8448 = vset.pattern.permute.xlu1 %v11524_v19  ;;  %8443 = vset.pattern.permute.xlu0 %v11526_v2  ;;  %v10042_v7 = vsub.f32 %v3605_v63, %v10020_v54 }
 0x70b   : > { %3455 = vperm.xlu1 %8448, %v9993_v25   ;;  %3255 = vperm.xlu0 %8443, %v9993_v25  }
 0x70f   : > { %8450 = vset.pattern.permute.xlu1 %v11530_v1  ;;  %8444 = vset.pattern.permute.xlu0 %v11514_v59 }
 0x710   : > { %3295 = vperm.xlu0 %8444, %v9993_v25   ;;  %3209 = vperm.xlu1 %8450, %v10002_v29  }
 0x714   : > { %8445 = vset.pattern.permute.xlu0 %v11522_v0  ;;  %8453 = vset.pattern.permute.xlu1 %v11522_v0 }
 0x715   : > { %3335 = vperm.xlu0 %8445, %v9993_v25   ;;  %3331 = vperm.xlu1 %8453, %v10002_v29  }
 0x719   : > { %8447 = vset.pattern.permute.xlu0 %v11520_v39  ;;  %8455 = vset.pattern.permute.xlu1 %v11520_v39 }
 0x71a   : > { %3415 = vperm.xlu0 %8447, %v9993_v25   ;;  %3411 = vperm.xlu1 %8455, %v10002_v29  }
 0x71e   : > { %8449 = vset.pattern.permute.xlu0 %v11516_v51  ;;  %8457 = vset.pattern.permute.xlu1 %v11516_v51 }
 0x71f   : > { %3495 = vperm.xlu0 %8449, %v9993_v25   ;;  %3491 = vperm.xlu1 %8457, %v10002_v29  }
 0x723   : > { %8451 = vset.pattern.permute.xlu0 %v11526_v2  ;;  %8459 = vset.pattern.permute.xlu1 %v11530_v1 }
 0x724   : > { %3251 = vperm.xlu0 %8451, %v10002_v29   ;;  %3620 = vperm.xlu1 %8459, %v10023_v55  }
 0x728   : > { %8452 = vset.pattern.permute.xlu0 %v11514_v59  ;;  %8461 = vset.pattern.permute.xlu1 %v11522_v0 }
 0x729   : > { %3291 = vperm.xlu0 %8452, %v10002_v29   ;;  %3734 = vperm.xlu1 %8461, %v10023_v55  }
 0x72d   : > { %8454 = vset.pattern.permute.xlu0 %v11528_v50  ;;  %8463 = vset.pattern.permute.xlu1 %v11520_v39 }
 0x72e   : > { %3371 = vperm.xlu0 %8454, %v10002_v29   ;;  %3810 = vperm.xlu1 %8463, %v10023_v55  }
 0x732   : > { %8456 = vset.pattern.permute.xlu0 %v11524_v19  ;;  %8465 = vset.pattern.permute.xlu1 %v11516_v51 }
 0x733   : > { %3451 = vperm.xlu0 %8456, %v10002_v29   ;;  %3886 = vperm.xlu1 %8465, %v10023_v55  }
 0x737   : > { %8458 = vset.pattern.permute.xlu0 %v11526_v2  ;;  %8469 = vset.pattern.permute.xlu1 %v11522_v0 }
 0x738   : > { %3658 = vperm.xlu0 %8458, %v10023_v55   ;;  %3730 = vperm.xlu1 %8469, %v10042_v7  }
 0x73c   : > { %8460 = vset.pattern.permute.xlu0 %v11514_v59  ;;  %8470 = vset.pattern.permute.xlu1 %v11528_v50 }
 0x73d   : > { %3696 = vperm.xlu0 %8460, %v10023_v55   ;;  %3768 = vperm.xlu1 %8470, %v10042_v7  }
 0x741   : > { %8462 = vset.pattern.permute.xlu0 %v11528_v50  ;;  %8471 = vset.pattern.permute.xlu1 %v11520_v39 }
 0x742   : > { %3772 = vperm.xlu0 %8462, %v10023_v55   ;;  %3806 = vperm.xlu1 %8471, %v10042_v7  }
 0x746   : > { %8464 = vset.pattern.permute.xlu0 %v11524_v19  ;;  %8472 = vset.pattern.permute.xlu1 %v11524_v19 }
 0x747   : > { %3848 = vperm.xlu0 %8464, %v10023_v55   ;;  %3844 = vperm.xlu1 %8472, %v10042_v7  }
 0x74b   : > { %8466 = vset.pattern.permute.xlu0 %v11526_v2  ;;  %8473 = vset.pattern.permute.xlu1 %v11516_v51 }
 0x74c   : > { %3654 = vperm.xlu0 %8466, %v10042_v7   ;;  %3882 = vperm.xlu1 %8473, %v10042_v7  }
 0x750   : > { %8467 = vset.pattern.permute.xlu0 %v11530_v1  ;;  %8474 = vset.pattern.permute.xlu1 %v11530_v1 }
 0x751   : > { %3615 = vperm.xlu0 %8467, %v10042_v7  }
 0x755   : > { %8468 = vset.pattern.permute.xlu0 %v11514_v59 }
 0x756   : > { %3692 = vperm.xlu0 %8468, %v10042_v7  }
 0x781   : > { %v3376_v8 = vpop.permute.xlu1 %3375  ;;  %v3215_v11 = vpop.permute.xlu0 %3214 }
 0x782   : > { %vm3218_vm15 = vcmp.gt.f32.partialorder %v9993_v25, %v3215_v11  ;;  %vm3379_vm0 = vcmp.gt.f32.partialorder %v9993_v25, %v3376_v8 }
 0x783   : > { %v7129_v12 = vsel %vm3218_vm15, 1.0, %v11536_v41  ;;  %vm11512_vm15 = vcmp.lt.s32.totalorder %v9782_v30, 2 }
 0x784   : > { %v3234_v44 = vsel %vm11570_vm5, %v7129_v12, 0.0 }
 0x785   : > { %3235 = vadd.xlane.f32.xlu0 %v3234_v44 }
 0x786   : > { %v10073_v45 = vpop.permute.xlu1 %3455  ;;  %v3256_v46 = vpop.permute.xlu0 %3255 }
 0x787   : > { %vm3261_vm11 = vcmp.eq.f32.partialorder %v9993_v25, %v3256_v46  ;;  %vm3259_vm2 = vcmp.gt.f32.partialorder %v9993_v25, %v3256_v46 }
 0x788   : > { %vm3264_vm3 = vmand %vm3261_vm11, %vm11518_vm10 }
 0x789   : > { %vm3266_vm8 = vmor %vm3259_vm2, %vm3264_vm3  ;;  %vm3381_vm3 = vcmp.eq.f32.partialorder %v9993_v25, %v3376_v8 }
 0x78a   : > { %v7131_v15 = vsel %vm3266_vm8, 1.0, %v11536_v41  ;;  %vm11511_vm8 = vcmp.lt.s32.totalorder %v9782_v30, 4 }
 0x78b   : > { %v3296_v16 = vpop.permute.xlu0 %3295  ;;  %v3210_v22 = vpop.permute.xlu1 %3209  ;;  %v3274_v24 = vsel %vm11570_vm5, %v7131_v15, 0.0 }
 0x78c   : > { %vm3301_vm1 = vcmp.eq.f32.partialorder %v9993_v25, %v3296_v16  ;;  %vm3217_vm13 = vcmp.gt.f32.partialorder %v10002_v29, %v3210_v22  ;;  %3275 = vadd.xlane.f32.xlu0 %v3274_v24  ;;  %vm3299_vm6 = vcmp.gt.f32.partialorder %v9993_v25, %v3296_v16  ;;  %v10123_v16 = vld [vmem:[%s11651_s23] ss:$0 sm:$0xff] }
 0x78d   : > { %v7128_v43 = vsel %vm3217_vm13, 1.0, %v11536_v41  ;;  %vm3304_vm2 = vmand %vm3301_vm1, %vm11512_vm15  ;;  %vm11534_vm15 = vcmp.lt.s32.totalorder %v9782_v30, 6 }
 0x78e   : > { %v3231_v26 = vsel %vm11570_vm5, %v7128_v43, 0.0  ;;  %vm3306_vm11 = vmor %vm3299_vm6, %vm3304_vm2 }
 0x78f   : > { %3232 = vadd.xlane.f32.xlu1 %v3231_v26  ;;  %v10091_v27 = vpop.f32.mrf.mxu0  ;;  %v7133_v28 = vsel %vm3306_vm11, 1.0, %v11536_v41  ;;  %vm3384_vm6 = vmand %vm3381_vm3, %vm11511_vm8  ;;  %vm3461_vm3 = vcmp.eq.f32.partialorder %v9993_v25, %v10073_v45 }
 0x790   : > { %v3336_v42 = vpop.permute.xlu0 %3335  ;;  %v3314_v62 = vsel %vm11570_vm5, %v7133_v28, 0.0  ;;  %v3332_v63 = vpop.permute.xlu1 %3331  ;;  %vm3386_vm12 = vmor %vm3379_vm0, %vm3384_vm6  ;;  %vm3459_vm6 = vcmp.gt.f32.partialorder %v9993_v25, %v10073_v45 }
 0x791   : > { %vm3341_vm13 = vcmp.eq.f32.partialorder %v9993_v25, %v3336_v42  ;;  %v10096_v47 = vpop.f32.mrf.mxu0  ;;  %vm3339_vm1 = vcmp.gt.f32.partialorder %v9993_v25, %v3336_v42  ;;  %v7137_v15 = vsel %vm3386_vm12, 1.0, %v11536_v41  ;;  %vm3464_vm12 = vmand %vm3461_vm3, %vm11534_vm15 }
 0x792   : > { %vm3344_vm2 = vmand %vm3341_vm13, %vm11519_vm4  ;;  %v3394_v42 = vsel %vm11570_vm5, %v7137_v15, 0.0 }
 0x793   : > { %3315 = vadd.xlane.f32.xlu1 %v3314_v62  ;;  %v10105_v11 = vpop.f32.mrf.mxu0  ;;  %vm3346_vm11 = vmor %vm3339_vm1, %vm3344_vm2 }
 0x794   : > { %v7135_v12 = vsel %vm3346_vm11, 1.0, %v11536_v41  ;;  %vm3466_vm11 = vmor %vm3459_vm6, %vm3464_vm12 }
 0x795   : > { %v3416_v44 = vpop.permute.xlu0 %3415  ;;  %v3354_v8 = vsel %vm11570_vm5, %v7135_v12, 0.0  ;;  %v10113_v46 = vpop.f32.mrf.mxu0 }
 0x796   : > { %vm3421_vm8 = vcmp.eq.f32.partialorder %v9993_v25, %v3416_v44  ;;  %vm3419_vm13 = vcmp.gt.f32.partialorder %v9993_v25, %v3416_v44  ;;  %v10125_v24 = vpop.permute.xlu1 %3411 }
 0x797   : > { %3355 = vadd.xlane.f32.xlu1 %v3354_v8  ;;  %vm3424_vm0 = vmand %vm3421_vm8, %vm11535_vm14  ;;  %v7943_v22 = vpop.f32.mrf.mxu0  ;;  %vm11513_vm8 = vcmp.lt.s32.totalorder %v9782_v30, 7 }
 0x798   : > { %vm3426_vm1 = vmor %vm3419_vm13, %vm3424_vm0  ;;  %v10128_v43 = vadd.f32 %v7943_v22, %v10123_v16  ;;  %vm3340_vm0 = vcmp.eq.f32.partialorder %v10002_v29, %v3332_v63 }
 0x799   : > { %v10134_v26 = vpop.f32.mrf.mxu0  ;;  %v7139_v62 = vsel %vm3426_vm1, 1.0, %v11536_v41 }
 0x79a   : > { %v3496_v28 = vpop.permute.xlu0 %3495  ;;  %v3434_v8 = vsel %vm11570_vm5, %v7139_v62, 0.0  ;;  %v10150_v15 = vpop.permute.xlu1 %3491 }
 0x79b   : > { %vm3501_vm2 = vcmp.eq.f32.partialorder %v9993_v25, %v3496_v28  ;;  %3395 = vadd.xlane.f32.xlu1 %v3394_v42  ;;  %v7944_v12 = vpop.f32.mrf.mxu0  ;;  %vm3499_vm13 = vcmp.gt.f32.partialorder %v9993_v25, %v3496_v28  ;;  %v7141_v42 = vsel %vm3466_vm11, 1.0, %v11536_v41  ;;  %vm3343_vm11 = vmand %vm3340_vm0, %vm11519_vm4  ;;  %vm11654_vm0 = vcmp.lt.s32.totalorder %v9782_v30, 2 }
 0x79c   : > { %v10141_v44 = vadd.f32 %v7944_v12, %v10123_v16  ;;  %vm3504_vm3 = vmand %vm3501_vm2, %vm11513_vm8  ;;  %v3474_v62 = vsel %vm11570_vm5, %v7141_v42, 0.0  ;;  %vm3338_vm8 = vcmp.gt.f32.partialorder %v10002_v29, %v3332_v63 }
 0x79d   : > { %v10146_v45 = vpop.f32.mrf.mxu0  ;;  %vm3506_vm6 = vmor %vm3499_vm13, %vm3504_vm3 }
 0x79f   : > { %v3252_v22 = vpop.permute.xlu0 %3251  ;;  %3435 = vadd.xlane.f32.xlu1 %v3434_v8  ;;  %v7947_v12 = vpop.f32.mrf.mxu0  ;;  %v7143_v8 = vsel %vm3506_vm6, 1.0, %v11536_v41 }
 0x7a0   : > { %vm3260_vm1 = vcmp.eq.f32.partialorder %v10002_v29, %v3252_v22  ;;  %v10155_v25 = vadd.f32 %v7947_v12, %v10123_v16  ;;  %vm3258_vm12 = vcmp.gt.f32.partialorder %v10002_v29, %v3252_v22  ;;  %v3621_v51 = vpop.permute.xlu1 %3620 }
 0x7a1   : > { %vm3263_vm2 = vmand %vm3260_vm1, %vm11518_vm10  ;;  %v10160_v28 = vpop.f32.mrf.mxu0  ;;  %vm3624_vm4 = vcmp.gt.f32.partialorder %v10023_v55, %v3621_v51 }
 0x7a2   : > { %vm3265_vm13 = vmor %vm3258_vm12, %vm3263_vm2  ;;  %vm3420_vm12 = vcmp.eq.f32.partialorder %v10002_v29, %v10125_v24 }
 0x7a3   : > { %3475 = vadd.xlane.f32.xlu1 %v3474_v62  ;;  %v7948_v59 = vpop.f32.mrf.mxu0  ;;  %vm10172_vm10 = vmor %vm3338_vm8, %vm3343_vm11  ;;  %v3514_v62 = vsel %vm11570_vm5, %v7143_v8, 0.0 }
 0x7a4   : > { %v3292_v12 = vpop.permute.xlu0 %3291  ;;  %v10168_v22 = vadd.f32 %v7948_v59, %v10123_v16  ;;  %v7130_v59 = vsel %vm3265_vm13, 1.0, %v11536_v41  ;;  %v7134_v51 = vsel %vm10172_vm10, 1.0, %v11536_v41  ;;  %vm10203_vm13 = vmand %vm3420_vm12, %vm11535_vm14  ;;  %vm3418_vm10 = vcmp.gt.f32.partialorder %v10002_v29, %v10125_v24 }
 0x7a5   : > { %vm3300_vm3 = vcmp.eq.f32.partialorder %v10002_v29, %v3292_v12  ;;  %vm3298_vm1 = vcmp.gt.f32.partialorder %v10002_v29, %v3292_v12  ;;  %v10176_v63 = vpop.f32.mrf.mxu0  ;;  %vm3425_vm12 = vmor %vm3418_vm10, %vm10203_vm13  ;;  %vm11658_vm13 = vcmp.lt.s32.totalorder %v9782_v30, 7 }
 0x7a6   : > { %vm3303_vm6 = vmand %vm3300_vm3, %vm11654_vm0  ;;  %vm11657_vm3 = vcmp.lt.s32.totalorder %v9782_v30, 4 }
 0x7a7   : > { %3515 = vadd.xlane.f32.xlu1 %v3514_v62  ;;  %vm3305_vm2 = vmor %vm3298_vm1, %vm3303_vm6  ;;  %v7951_v12 = vpop.f32.mrf.mxu0  ;;  %v3271_v62 = vsel %vm11570_vm5, %v7130_v59, 0.0 }
 0x7a8   : > { %v7132_v39 = vsel %vm3305_vm2, 1.0, %v11536_v41  ;;  %v10187_v0 = vadd.f32 %v7951_v12, %v10123_v16  ;;  %v7145_v12 = vsel %vm3624_vm4, 1.0, %v11536_v41  ;;  %vm3500_vm4 = vcmp.eq.f32.partialorder %v10002_v29, %v10150_v15 }
 0x7a9   : > { %v3372_v19 = vpop.permute.xlu0 %3371  ;;  %v3311_v8 = vsel %vm11570_vm5, %v7132_v39, 0.0  ;;  %v10191_v2 = vpop.f32.mrf.mxu0 }
 0x7aa   : > { %vm3380_vm8 = vcmp.eq.f32.partialorder %v10002_v29, %v3372_v19  ;;  %3312 = vadd.xlane.f32.xlu0 %v3311_v8  ;;  %vm3378_vm11 = vcmp.gt.f32.partialorder %v10002_v29, %v3372_v19  ;;  %v3735_v19 = vpop.permute.xlu1 %3734  ;;  %v3351_v8 = vsel %vm11570_vm5, %v7134_v51, 0.0 }
 0x7ab   : > { %3272 = vadd.xlane.f32.xlu1 %v3271_v62  ;;  %vm3383_vm1 = vmand %vm3380_vm8, %vm11657_vm3  ;;  %v7952_v59 = vpop.f32.mrf.mxu0  ;;  %v3638_v62 = vsel %vm11570_vm5, %v7145_v12, 0.0 }
 0x7ac   : > { %vm3385_vm0 = vmor %vm3378_vm11, %vm3383_vm1  ;;  %v10213_v42 = vadd.f32 %v7952_v59, %v10123_v16  ;;  %vm3740_vm11 = vcmp.eq.f32.partialorder %v10023_v55, %v3735_v19 }
 0x7ad   : > { %v10216_v50 = vpop.f32.mrf.mxu0  ;;  %v7136_v54 = vsel %vm3385_vm0, 1.0, %v11536_v41  ;;  %vm10238_vm3 = vmand %vm3500_vm4, %vm11658_vm13  ;;  %vm11664_vm4 = vcmp.lt.s32.totalorder %v9782_v30, 1 }
 0x7ae   : > { %v3452_v1 = vpop.permute.xlu0 %3451  ;;  %3352 = vadd.xlane.f32.xlu0 %v3351_v8  ;;  %v3391_v12 = vsel %vm11570_vm5, %v7136_v54, 0.0  ;;  %v7138_v8 = vsel %vm3425_vm12, 1.0, %v11536_v41 }
 0x7af   : > { %vm3460_vm6 = vcmp.eq.f32.partialorder %v10002_v29, %v3452_v1  ;;  %3639 = vadd.xlane.f32.xlu1 %v3638_v62  ;;  %v7955_v24 = vpop.f32.mrf.mxu0  ;;  %vm3458_vm2 = vcmp.gt.f32.partialorder %v10002_v29, %v3452_v1 }
 0x7b0   : > { %vm3463_vm8 = vmand %vm3460_vm6, %vm11534_vm15  ;;  %v10230_v51 = vadd.f32 %v7955_v24, %v10123_v16  ;;  %vm3498_vm6 = vcmp.gt.f32.partialorder %v10002_v29, %v10150_v15  ;;  %vm11661_vm15 = vcmp.lt.s32.totalorder %v9782_v30, 3  ;;  %v3811_v15 = vpop.permute.xlu1 %3810 }
 0x7b1   : > { %v10233_v59 = vpop.f32.mrf.mxu0  ;;  %vm3465_vm1 = vmor %vm3458_vm2, %vm3463_vm8  ;;  %vm3738_vm8 = vcmp.gt.f32.partialorder %v10023_v55, %v3735_v19 }
 0x7b2   : > { %3392 = vadd.xlane.f32.xlu0 %v3391_v12  ;;  %vm10248_vm14 = vmand %vm3740_vm11, %vm11661_vm15  ;;  %v3431_v12 = vsel %vm11570_vm5, %v7138_v8, 0.0 }
 0x7b3   : > { %v3659_v1 = vpop.permute.xlu0 %3658  ;;  %v7956_v62 = vpop.f32.mrf.mxu0  ;;  %vm3505_vm15 = vmor %vm3498_vm6, %vm10238_vm3  ;;  %vm11668_vm3 = vcmp.lt.s32.totalorder %v9782_v30, 2 }
 0x7b4   : > { %vm3664_vm0 = vcmp.eq.f32.partialorder %v10023_v55, %v3659_v1  ;;  %vm3662_vm10 = vcmp.gt.f32.partialorder %v10023_v55, %v3659_v1  ;;  %v10253_v24 = vadd.f32 %v7956_v62, %v10123_v16  ;;  %v11665_v1 = vmov 0.0  }
 0x7b5   : > { %vm3666_vm12 = vmand %vm3664_vm0, %vm11664_vm4  ;;  %v10258_v41 = vpop.f32.mrf.mxu0  ;;  %v7140_v29 = vsel %vm3465_vm1, 1.0, %v11665_v1 }
 0x7b6   : > { %3432 = vadd.xlane.f32.xlu0 %v3431_v12  ;;  %vm3668_vm2 = vmor %vm3662_vm10, %vm3666_vm12  ;;  %v3471_v12 = vsel %vm11570_vm5, %v7140_v29, 0.0  ;;  %vm3816_vm10 = vcmp.eq.f32.partialorder %v10023_v55, %v3811_v15  ;;  %vm11669_vm12 = vcmp.lt.s32.totalorder %v9782_v30, 5 }
 0x7b7   : > { %v7147_v21 = vsel %vm3668_vm2, 1.0, %v11665_v1  ;;  %v7959_v62 = vpop.f32.mrf.mxu0  ;;  %vm10274_vm1 = vmor %vm3738_vm8, %vm10248_vm14  ;;  %vm11670_vm8 = vcmp.lt.s32.totalorder %v9782_v30, 4 }
 0x7b8   : > { %v3697_v31 = vpop.permute.xlu0 %3696  ;;  %v3676_v8 = vsel %vm11570_vm5, %v7147_v21, 0.0  ;;  %v10267_v20 = vadd.f32 %v7959_v62, %v10123_v16  ;;  %v7142_v21 = vsel %vm3505_vm15, 1.0, %v11665_v1  ;;  %v7151_v14 = vsel %vm10274_vm1, 1.0, %v11665_v1  ;;  %vm3818_vm2 = vmand %vm3816_vm10, %vm11669_vm12 }
 0x7b9   : > { %vm3702_vm11 = vcmp.eq.f32.partialorder %v10023_v55, %v3697_v31  ;;  %3677 = vadd.xlane.f32.xlu1 %v3676_v8  ;;  %vm3700_vm13 = vcmp.gt.f32.partialorder %v10023_v55, %v3697_v31  ;;  %v10278_v39 = vpop.f32.mrf.mxu0  ;;  %v3511_v8 = vsel %vm11570_vm5, %v7142_v21, 0.0  ;;  %v3752_v19 = vsel %vm11570_vm5, %v7151_v14, 0.0 }
 0x7ba   : > { %3472 = vadd.xlane.f32.xlu0 %v3471_v12  ;;  %vm3704_vm0 = vmand %vm3702_vm11, %vm11668_vm3  ;;  %v3887_v12 = vpop.permute.xlu1 %3886  ;;  %vm11671_vm10 = vcmp.lt.s32.totalorder %v9782_v30, 6 }
 0x7bb   : > { %vm3706_vm6 = vmor %vm3700_vm13, %vm3704_vm0  ;;  %v7960_v29 = vpop.f32.mrf.mxu0  ;;  %vm3814_vm13 = vcmp.gt.f32.partialorder %v10023_v55, %v3811_v15 }
 0x7bc   : > { %v7149_v31 = vsel %vm3706_vm6, 1.0, %v11665_v1  ;;  %v10286_v54 = vadd.f32 %v7960_v29, %v10123_v16  ;;  %vm3820_vm3 = vmor %vm3814_vm13, %vm3818_vm2  ;;  %vm3890_vm2 = vcmp.gt.f32.partialorder %v10023_v55, %v3887_v12  ;;  %vm11673_vm13 = vcmp.lt.s32.totalorder %v9782_v30, 1 }
 0x7bd   : > { %v3773_v62 = vpop.permute.xlu0 %3772  ;;  %v3714_v18 = vsel %vm11570_vm5, %v7149_v31, 0.0  ;;  %v10291_v17 = vpop.f32.mrf.mxu0 }
 0x7be   : > { %vm3778_vm14 = vcmp.eq.f32.partialorder %v10023_v55, %v3773_v62  ;;  %3512 = vadd.xlane.f32.xlu0 %v3511_v8  ;;  %3715 = vadd.xlane.f32.xlu1 %v3714_v18  ;;  %vm3776_vm4 = vcmp.gt.f32.partialorder %v10023_v55, %v3773_v62  ;;  %v3731_v8 = vpop.permute.xlu1 %3730 }
 0x7bf   : > { %vm3780_vm15 = vmand %vm3778_vm14, %vm11670_vm8  ;;  %v7963_v21 = vpop.f32.mrf.mxu0  ;;  %vm3892_vm14 = vcmp.eq.f32.partialorder %v10023_v55, %v3887_v12  ;;  %vm11672_vm8 = vcmp.lt.s32.totalorder %v9782_v30, 7 }
 0x7c0   : > { %vm3782_vm11 = vmor %vm3776_vm4, %vm3780_vm15  ;;  %v10305_v18 = vadd.f32 %v7963_v21, %v10123_v16 }
 0x7c1   : > { %v10308_v29 = vpop.f32.mrf.mxu0  ;;  %v7153_v62 = vsel %vm3782_vm11, 1.0, %v11665_v1  ;;  %vm3894_vm15 = vmand %vm3892_vm14, %vm11672_vm8 }
 0x7c2   : > { %v3849_v31 = vpop.permute.xlu0 %3848  ;;  %3753 = vadd.xlane.f32.xlu1 %v3752_v19  ;;  %v3790_v15 = vsel %vm11570_vm5, %v7153_v62, 0.0  ;;  %v7155_v19 = vsel %vm3820_vm3, 1.0, %v11665_v1  ;;  %v3769_v9 = vpop.permute.xlu1 %3768  ;;  %vm3896_vm3 = vmor %vm3890_vm2, %vm3894_vm15  ;;  %vm11674_vm2 = vcmp.lt.s32.totalorder %v9782_v30, 3 }
 0x7c3   : > { %vm3854_vm1 = vcmp.eq.f32.partialorder %v10023_v55, %v3849_v31  ;;  %v7964_v13 = vpop.f32.mrf.mxu0  ;;  %vm3852_vm0 = vcmp.gt.f32.partialorder %v10023_v55, %v3849_v31  ;;  %v3828_v62 = vsel %vm11570_vm5, %v7155_v19, 0.0  ;;  %vm3777_vm15 = vcmp.eq.f32.partialorder %v10042_v7, %v3769_v9 }
 0x7c4   : > { %vm3856_vm6 = vmand %vm3854_vm1, %vm11671_vm10  ;;  %v10317_v14 = vadd.f32 %v7964_v13, %v10123_v16 }
 0x7c5   : > { %v10320_v21 = vpop.f32.mrf.mxu0  ;;  %vm3858_vm4 = vmor %vm3852_vm0, %vm3856_vm6  ;;  %vm3739_vm6 = vcmp.eq.f32.partialorder %v10042_v7, %v3731_v8 }
 0x7c6   : > { %3791 = vadd.xlane.f32.xlu1 %v3790_v15  ;;  %v7157_v15 = vsel %vm3858_vm4, 1.0, %v11665_v1  ;;  %v3807_v60 = vpop.permute.xlu1 %3806  ;;  %vm3741_vm8 = vmand %vm3739_vm6, %vm11674_vm2 }
 0x7c7   : > { %v3655_v10 = vpop.permute.xlu0 %3654  ;;  %v3866_v19 = vsel %vm11570_vm5, %v7157_v15, 0.0  ;;  %vm3815_vm2 = vcmp.eq.f32.partialorder %v10042_v7, %v3807_v60 }
 0x7c8   : > { %vm3663_vm12 = vcmp.eq.f32.partialorder %v10042_v7, %v3655_v10  ;;  %v7967_v31 = vpop.f32.mrf.mxu0  ;;  %vm3661_vm11 = vcmp.gt.f32.partialorder %v10042_v7, %v3655_v10 }
 0x7c9   : > { %v10328_v13 = vadd.f32 %v7967_v31, %v10123_v16  ;;  %vm3665_vm1 = vmand %vm3663_vm12, %vm11673_vm13  ;;  %vm3737_vm12 = vcmp.gt.f32.partialorder %v10042_v7, %v3731_v8 }
 0x7ca   : > { %v10331_v6 = vpop.f32.mrf.mxu0  ;;  %3829 = vadd.xlane.f32.xlu1 %v3828_v62  ;;  %vm3667_vm10 = vmor %vm3661_vm11, %vm3665_vm1  ;;  %v7159_v62 = vsel %vm3896_vm3, 1.0, %v11665_v1  ;;  %vm11675_vm11 = vcmp.lt.s32.totalorder %v9782_v30, 2 }
 0x7cb   : > { %v7146_v56 = vsel %vm3667_vm10, 1.0, %v11665_v1  ;;  %vm3743_vm3 = vmor %vm3737_vm12, %vm3741_vm8  ;;  %vm11676_vm10 = vcmp.lt.s32.totalorder %v9782_v30, 4 }
 0x7cc   : > { %v7968_v55 = vpop.f32.mrf.mxu0  ;;  %v3616_v12 = vpop.permute.xlu0 %3615  ;;  %v3673_v15 = vsel %vm11570_vm5, %v7146_v56, 0.0  ;;  %vm3779_vm6 = vmand %vm3777_vm15, %vm11676_vm10  ;;  %v7150_v56 = vsel %vm3743_vm3, 1.0, %v11665_v1 }
 0x7cd   : > { %v10338_v5 = vadd.f32 %v7968_v55, %v10123_v16  ;;  %vm3623_vm0 = vcmp.gt.f32.partialorder %v10042_v7, %v3616_v12  ;;  %v3904_v55 = vsel %vm11570_vm5, %v7159_v62, 0.0  ;;  %v3749_v8 = vsel %vm11570_vm5, %v7150_v56, 0.0 }
 0x7ce   : > { %3867 = vadd.xlane.f32.xlu1 %v3866_v19  ;;  %v7144_v31 = vsel %vm3623_vm0, 1.0, %v11665_v1  ;;  %v3845_v19 = vpop.permute.xlu1 %3844  ;;  %vm3775_vm0 = vcmp.gt.f32.partialorder %v10042_v7, %v3769_v9 }
 0x7cf   : > { %v3635_v10 = vsel %vm11570_vm5, %v7144_v31, 0.0  ;;  %vm3781_vm7 = vmor %vm3775_vm0, %vm3779_vm6  ;;  %vm3853_vm12 = vcmp.eq.f32.partialorder %v10042_v7, %v3845_v19  ;;  %vm3851_vm15 = vcmp.gt.f32.partialorder %v10042_v7, %v3845_v19  ;;  %vm11679_vm6 = vcmp.lt.s32.totalorder %v9782_v30, 7 }
 0x7d0   : > { %3636 = vadd.xlane.f32.xlu0 %v3635_v10  ;;  %v7152_v9 = vsel %vm3781_vm7, 1.0, %v11665_v1 }
 0x7d1   : > { %v3693_v16 = vpop.permute.xlu0 %3692 }
 0x7d2   : > { %vm3701_vm14 = vcmp.eq.f32.partialorder %v10042_v7, %v3693_v16  ;;  %3905 = vadd.xlane.f32.xlu1 %v3904_v55  ;;  %vm3699_vm4 = vcmp.gt.f32.partialorder %v10042_v7, %v3693_v16  ;;  %v3883_v62 = vpop.permute.xlu1 %3882 }
 0x7d3   : > { %vm3703_vm13 = vmand %vm3701_vm14, %vm11675_vm11  ;;  %vm3813_vm14 = vcmp.gt.f32.partialorder %v10042_v7, %v3807_v60  ;;  %vm3891_vm3 = vcmp.eq.f32.partialorder %v10042_v7, %v3883_v62  ;;  %v3787_v60 = vsel %vm11570_vm5, %v7152_v9, 0.0  ;;  %vm3889_vm10 = vcmp.gt.f32.partialorder %v10042_v7, %v3883_v62 }
 0x7d4   : > { %3674 = vadd.xlane.f32.xlu0 %v3673_v15  ;;  %vm3705_vm1 = vmor %vm3699_vm4, %vm3703_vm13  ;;  %vm11677_vm4 = vcmp.lt.s32.totalorder %v9782_v30, 5  ;;  %vm11678_vm13 = vcmp.lt.s32.totalorder %v9782_v30, 6 }
 0x7d5   : > { %v7148_v12 = vsel %vm3705_vm1, 1.0, %v11665_v1  ;;  %vm3817_vm11 = vmand %vm3815_vm2, %vm11677_vm4 }
 0x7d6   : > { %v3711_v31 = vsel %vm11570_vm5, %v7148_v12, 0.0  ;;  %vm3819_vm8 = vmor %vm3813_vm14, %vm3817_vm11 }
 0x7d7   : > { %vm3855_vm1 = vmand %vm3853_vm12, %vm11678_vm13  ;;  %v7154_v10 = vsel %vm3819_vm8, 1.0, %v11665_v1  ;;  %vm11680_vm12 = vcmp.eq.s32.totalorder %v9782_v30, 1 }
 0x7d8   : > { %3712 = vadd.xlane.f32.xlu0 %v3711_v31  ;;  %vm3857_vm0 = vmor %vm3851_vm15, %vm3855_vm1  ;;  %v3825_v16 = vsel %vm11570_vm5, %v7154_v10, 0.0  ;;  %vm11681_vm15 = vcmp.eq.s32.totalorder %v9782_v30, 0 }
 0x7d9   : > { %vm3893_vm2 = vmand %vm3891_vm3, %vm11679_vm6  ;;  %v7156_v55 = vsel %vm3857_vm0, 1.0, %v11665_v1  ;;  %vm11682_vm3 = vcmp.eq.s32.totalorder %v9782_v30, 2  ;;  %vm11683_vm6 = vcmp.eq.s32.totalorder %v9782_v30, 3 }
 0x7da   : > { %vm3895_vm7 = vmor %vm3889_vm10, %vm3893_vm2  ;;  %v3863_v15 = vsel %vm11570_vm5, %v7156_v55, 0.0 }
 0x7db   : > { %v7158_v12 = vsel %vm3895_vm7, 1.0, %v11665_v1  ;;  %vm11684_vm7 = vcmp.eq.s32.totalorder %v9782_v30, 4 }
 0x7dc   : > { %3750 = vadd.xlane.f32.xlu0 %v3749_v8  ;;  %v3901_v19 = vsel %vm11570_vm5, %v7158_v12, 0.0 }
 0x7e0   : > { %3788 = vadd.xlane.f32.xlu0 %v3787_v60 }
 0x7e4   : > { %3826 = vadd.xlane.f32.xlu0 %v3825_v16 }
 0x7e8   : > { %3864 = vadd.xlane.f32.xlu0 %v3863_v15 }
 0x7ec   : > { %3902 = vadd.xlane.f32.xlu0 %v3901_v19 }
 0x80e   : > { %v3236_v31 = vpop.xlane.xlu0 %3235 }
 0x80f   : > { %vm3239_vm4 = vcmp.lt.f32.partialorder %v3236_v31, 4.0 }
 0x810   : > { %vm3245_vm13 = vmand %vm11681_vm15, %vm3239_vm4  ;;  %vm11686_vm15 = vcmp.eq.s32.totalorder %v9782_v30, 6 }
 0x811   : > { %v3247_v10 = vsel %vm3245_vm13, 1.0, %v11665_v1 }
 0x815   : > { %v3276_v7 = vpop.xlane.xlu0 %3275 }
 0x816   : > { %vm3279_vm14 = vcmp.lt.f32.partialorder %v3276_v7, 4.0 }
 0x817   : > { %vm3285_vm8 = vmand %vm11680_vm12, %vm3279_vm14 }
 0x818   : > { %v3233_v56 = vpop.xlane.xlu1 %3232  ;;  %v3287_v60 = vsel %vm3285_vm8, 1.0, %v11665_v1 }
 0x819   : > { %v3289_v55 = vadd.f32 %v3287_v60, %v3247_v10 }
 0x81c   : > { %v3316_v8 = vpop.xlane.xlu1 %3315 }
 0x81d   : > { %vm3319_vm11 = vcmp.lt.f32.partialorder %v3316_v8, 4.0 }
 0x81e   : > { %vm3325_vm0 = vmand %vm11682_vm3, %vm3319_vm11  ;;  %vm11685_vm11 = vcmp.eq.s32.totalorder %v9782_v30, 5  ;;  %vm3238_vm3 = vcmp.lt.f32.partialorder %v3233_v56, 4.0 }
 0x81f   : > { %v3327_v16 = vsel %vm3325_vm0, 1.0, %v11665_v1  ;;  %vm11687_vm0 = vcmp.eq.s32.totalorder %v9782_v30, 7 }
 0x820   : > { %v3356_v62 = vpop.xlane.xlu1 %3355  ;;  %v3329_v19 = vadd.f32 %v3327_v16, %v3289_v55 }
 0x821   : > { %vm3359_vm1 = vcmp.lt.f32.partialorder %v3356_v62, 4.0 }
 0x822   : > { %vm3365_vm2 = vmand %vm11683_vm6, %vm3359_vm1  ;;  %vm11688_vm6 = vcmp.eq.s32.totalorder %v9782_v30, 0 }
 0x823   : > { %v3367_v12 = vsel %vm3365_vm2, 1.0, %v11665_v1  ;;  %vm3244_vm2 = vmand %vm11688_vm6, %vm3238_vm3 }
 0x824   : > { %v3396_v9 = vpop.xlane.xlu1 %3395  ;;  %v3369_v7 = vadd.f32 %v3367_v12, %v3329_v19 }
 0x825   : > { %vm3399_vm10 = vcmp.lt.f32.partialorder %v3396_v9, 4.0 }
 0x826   : > { %vm3405_vm14 = vmand %vm11684_vm7, %vm3399_vm10 }
 0x827   : > { %v3407_v31 = vsel %vm3405_vm14, 1.0, %v11665_v1 }
 0x828   : > { %v3436_v15 = vpop.xlane.xlu1 %3435  ;;  %v3409_v9 = vadd.f32 %v3407_v31, %v3369_v7 }
 0x829   : > { %vm3439_vm4 = vcmp.lt.f32.partialorder %v3436_v15, 4.0 }
 0x82a   : > { %vm3445_vm12 = vmand %vm11685_vm11, %vm3439_vm4  ;;  %vm11689_vm11 = vcmp.eq.s32.totalorder %v9782_v30, 1 }
 0x82b   : > { %v3447_v62 = vsel %vm3445_vm12, 1.0, %v11665_v1 }
 0x82c   : > { %v3476_v8 = vpop.xlane.xlu1 %3475  ;;  %v3449_v10 = vadd.f32 %v3447_v62, %v3409_v9 }
 0x82d   : > { %vm3479_vm8 = vcmp.lt.f32.partialorder %v3476_v8, 4.0  ;;  %v3246_v8 = vsel %vm3244_vm2, 1.0, %v11665_v1 }
 0x82e   : > { %vm3485_vm13 = vmand %vm11686_vm15, %vm3479_vm8  ;;  %vm11691_vm15 = vcmp.eq.s32.totalorder %v9782_v30, 2 }
 0x82f   : > { %v3487_v60 = vsel %vm3485_vm13, 1.0, %v11665_v1 }
 0x830   : > { %v3516_v53 = vpop.xlane.xlu1 %3515  ;;  %v3489_v16 = vadd.f32 %v3487_v60, %v3449_v10  ;;  %v11693_v10 = vmov 4  }
 0x831   : > { %vm3519_vm1 = vcmp.lt.f32.partialorder %v3516_v53, 4.0  ;;  %v11690_v53 = vmov 0  }
 0x832   : > { %vm3525_vm10 = vmand %vm11687_vm0, %vm3519_vm1  ;;  %vm11692_vm1 = vcmp.eq.s32.totalorder %v9782_v30, 3 }
 0x833   : > { %v3527_v55 = vsel %vm3525_vm10, 1.0, %v11665_v1  ;;  %v3313_v15 = vpop.xlane.xlu0 %3312  ;;  %vm11695_vm10 = vcmp.eq.s32.totalorder %v9782_v30, 4 }
 0x834   : > { %v3529_v12 = vadd.f32 %v3527_v55, %v3489_v16  ;;  %v3273_v19 = vpop.xlane.xlu1 %3272  ;;  %vm3318_vm4 = vcmp.lt.f32.partialorder %v3313_v15, 4.0  ;;  %v11694_v16 = vmov 1  }
 0x835   : > { %vm3278_vm7 = vcmp.lt.f32.partialorder %v3273_v19, 4.0  ;;  %vm3324_vm13 = vmand %vm11691_vm15, %vm3318_vm4  ;;  %vm11701_vm15 = vcmp.eq.s32.totalorder %v9782_v30, 7 }
 0x836   : > { %vm3920_vm14 = vcmp.gt.f32.partialorder %v3529_v12, 0.5  ;;  %vm3284_vm12 = vmand %vm11689_vm11, %vm3278_vm7  ;;  %v3326_v60 = vsel %vm3324_vm13, 1.0, %v11665_v1  ;;  %vm11696_vm7 = vcmp.eq.s32.totalorder %v9782_v30, 5  ;;  %vm11699_vm11 = vcmp.eq.s32.totalorder %v9782_v30, 6 }
 0x837   : > { %v3924_v56 = vsel %vm3920_vm14, 1, %v11690_v53  ;;  %v3286_v31 = vsel %vm3284_vm12, 1.0, %v11665_v1  ;;  %v3353_v7 = vpop.xlane.xlu0 %3352 }
 0x838   : > { %vm3358_vm8 = vcmp.lt.f32.partialorder %v3353_v7, 4.0  ;;  %3979 = vperm.xlu0 %8468, %v3924_v56   ;;  %3931 = vperm.xlu1 %8474, %v3924_v56   ;;  %v3288_v62 = vadd.f32 %v3286_v31, %v3246_v8  ;;  %v3640_v12 = vpop.xlane.xlu1 %3639  ;;  %v11697_v7 = vmov 6   ;;  %v11698_v8 = vmov 3  }
 0x839   : > { %vm3364_vm3 = vmand %vm11692_vm1, %vm3358_vm8 }
 0x83a   : > { %v3328_v55 = vadd.f32 %v3326_v60, %v3288_v62  ;;  %v3366_v15 = vsel %vm3364_vm3, 1.0, %v11665_v1  ;;  %vm3642_vm3 = vcmp.lt.f32.partialorder %v3640_v12, 4.0 }
 0x83b   : > { %v3393_v9 = vpop.xlane.xlu0 %3392 }
 0x83c   : > { %vm3398_vm0 = vcmp.lt.f32.partialorder %v3393_v9, 4.0  ;;  %8477 = vset.pattern.permute.xlu0 %v11693_v10  ;;  %8475 = vset.pattern.permute.xlu1 %v11694_v16  ;;  %v3368_v31 = vadd.f32 %v3366_v15, %v3328_v55  ;;  %v11700_v15 = vmov 5  }
 0x83d   : > { %4027 = vperm.xlu0 %8477, %v3924_v56   ;;  %3955 = vperm.xlu1 %8475, %v3924_v56   ;;  %vm3404_vm6 = vmand %vm11695_vm10, %vm3398_vm0  ;;  %vm11703_vm10 = vcmp.eq.s32.totalorder %v9782_v30, 1 }
 0x83e   : > { %v3406_v62 = vsel %vm3404_vm6, 1.0, %v11665_v1 }
 0x83f   : > { %v3433_v19 = vpop.xlane.xlu0 %3432  ;;  %v3408_v49 = vadd.f32 %v3406_v62, %v3368_v31 }
 0x840   : > { %vm3438_vm2 = vcmp.lt.f32.partialorder %v3433_v19, 4.0 }
 0x841   : > { %vm3444_vm14 = vmand %vm11696_vm7, %vm3438_vm2  ;;  %8479 = vset.pattern.permute.xlu0 %v11697_v7  ;;  %8476 = vset.pattern.permute.xlu1 %v11698_v8  ;;  %vm11704_vm7 = vcmp.eq.s32.totalorder %v9782_v30, 0 }
 0x842   : > { %4075 = vperm.xlu0 %8479, %v3924_v56   ;;  %4003 = vperm.xlu1 %8476, %v3924_v56   ;;  %v3678_v9 = vpop.xlane.xlu1 %3677  ;;  %v3446_v52 = vsel %vm3444_vm14, 1.0, %v11665_v1  ;;  %vm3648_vm14 = vmand %vm11704_vm7, %vm3642_vm3  ;;  %vm11710_vm7 = vcmp.eq.s32.totalorder %v9782_v30, 6 }
 0x843   : > { %v3473_v60 = vpop.xlane.xlu0 %3472  ;;  %v3448_v19 = vadd.f32 %v3446_v52, %v3408_v49  ;;  %vm3680_vm1 = vcmp.lt.f32.partialorder %v3678_v9, 4.0 }
 0x844   : > { %vm3478_vm4 = vcmp.lt.f32.partialorder %v3473_v60, 4.0  ;;  %v11702_v60 = vmov 7   ;;  %vm3686_vm6 = vmand %vm11703_vm10, %vm3680_vm1  ;;  %vm11707_vm1 = vcmp.eq.s32.totalorder %v9782_v30, 4  ;;  %vm11708_vm10 = vcmp.eq.s32.totalorder %v9782_v30, 5 }
 0x845   : > { %vm3484_vm12 = vmand %vm11699_vm11, %vm3478_vm4  ;;  %vm11705_vm11 = vcmp.eq.s32.totalorder %v9782_v30, 2  ;;  %v3688_v49 = vsel %vm3686_vm6, 1.0, %v11665_v1 }
 0x846   : > { %v3486_v55 = vsel %vm3484_vm12, 1.0, %v11665_v1  ;;  %8478 = vset.pattern.permute.xlu1 %v11700_v15  ;;  %8481 = vset.pattern.permute.xlu0 %v11690_v53 }
 0x847   : > { %v3513_v48 = vpop.xlane.xlu0 %3512  ;;  %4051 = vperm.xlu1 %8478, %v3924_v56   ;;  %v3716_v34 = vpop.xlane.xlu1 %3715  ;;  %v3488_v23 = vadd.f32 %v3486_v55, %v3448_v19  ;;  %v11709_v55 = vmov 2  }
 0x848   : > { %vm3518_vm8 = vcmp.lt.f32.partialorder %v3513_v48, 4.0  ;;  %vm3718_vm0 = vcmp.lt.f32.partialorder %v3716_v34, 4.0  ;;  %v3650_v34 = vsel %vm3648_vm14, 1.0, %v11665_v1 }
 0x849   : > { %vm3524_vm13 = vmand %vm11701_vm15, %vm3518_vm8  ;;  %vm11706_vm15 = vcmp.eq.s32.totalorder %v9782_v30, 3 }
 0x84a   : > { %v3526_v31 = vsel %vm3524_vm13, 1.0, %v11665_v1  ;;  %vm3724_vm12 = vmand %vm11705_vm11, %vm3718_vm0  ;;  %vm11711_vm11 = vcmp.eq.s32.totalorder %v9782_v30, 7 }
 0x84b   : > { %v3528_v62 = vadd.f32 %v3526_v31, %v3488_v23  ;;  %8480 = vset.pattern.permute.xlu1 %v11702_v60  ;;  %v3754_v32 = vpop.xlane.xlu1 %3753  ;;  %v3726_v52 = vsel %vm3724_vm12, 1.0, %v11665_v1 }
 0x84c   : > { %4099 = vperm.xlu1 %8480, %v3924_v56   ;;  %vm3756_vm4 = vcmp.lt.f32.partialorder %v3754_v32, 4.0  ;;  %v3690_v56 = vadd.f32 %v3688_v49, %v3650_v34 }
 0x84d   : > { %vm3919_vm2 = vcmp.gt.f32.partialorder %v3528_v62, 0.5  ;;  %vm3762_vm13 = vmand %vm11706_vm15, %vm3756_vm4 }
 0x84e   : > { %v3923_v48 = vsel %vm3919_vm2, 1, %v11690_v53  ;;  %v3764_v12 = vsel %vm3762_vm13, 1.0, %v11665_v1  ;;  %v3728_v9 = vadd.f32 %v3726_v52, %v3690_v56 }
 0x84f   : > { %3928 = vperm.xlu0 %8481, %v3923_v48   ;;  %v3792_v23 = vpop.xlane.xlu1 %3791 }
 0x850   : > { %vm3794_vm8 = vcmp.lt.f32.partialorder %v3792_v23, 4.0  ;;  %8482 = vset.pattern.permute.xlu1 %v11694_v16  ;;  %v3766_v31 = vadd.f32 %v3764_v12, %v3728_v9 }
 0x851   : > { %3952 = vperm.xlu1 %8482, %v3923_v48   ;;  %vm3800_vm3 = vmand %vm11707_vm1, %vm3794_vm8 }
 0x852   : > { %v3802_v19 = vsel %vm3800_vm3, 1.0, %v11665_v1  ;;  %vm11712_vm3 = vcmp.eq.s32.totalorder %v9782_v30, 1 }
 0x853   : > { %8484 = vset.pattern.permute.xlu0 %v11698_v8  ;;  %v3830_v32 = vpop.xlane.xlu1 %3829  ;;  %v3804_v49 = vadd.f32 %v3802_v19, %v3766_v31 }
 0x854   : > { %vm3832_vm0 = vcmp.lt.f32.partialorder %v3830_v32, 4.0  ;;  %4000 = vperm.xlu0 %8484, %v3923_v48  }
 0x855   : > { %vm3838_vm6 = vmand %vm11708_vm10, %vm3832_vm0  ;;  %8483 = vset.pattern.permute.xlu1 %v11709_v55  ;;  %vm11713_vm10 = vcmp.eq.s32.totalorder %v9782_v30, 0 }
 0x856   : > { %3976 = vperm.xlu1 %8483, %v3923_v48   ;;  %v3840_v23 = vsel %vm3838_vm6, 1.0, %v11665_v1 }
 0x857   : > { %v3868_v62 = vpop.xlane.xlu1 %3867  ;;  %v3842_v56 = vadd.f32 %v3840_v23, %v3804_v49 }
 0x858   : > { %vm3870_vm2 = vcmp.lt.f32.partialorder %v3868_v62, 4.0  ;;  %8486 = vset.pattern.permute.xlu0 %v11700_v15 }
 0x859   : > { %vm3876_vm14 = vmand %vm11710_vm7, %vm3870_vm2  ;;  %v3637_v34 = vpop.xlane.xlu0 %3636  ;;  %4048 = vperm.xlu0 %8486, %v3923_v48   ;;  %vm11714_vm7 = vcmp.eq.s32.totalorder %v9782_v30, 2 }
 0x85a   : > { %v3878_v52 = vsel %vm3876_vm14, 1.0, %v11665_v1  ;;  %8485 = vset.pattern.permute.xlu1 %v11693_v10  ;;  %vm3641_vm13 = vcmp.lt.f32.partialorder %v3637_v34, 4.0 }
 0x85b   : > { %4024 = vperm.xlu1 %8485, %v3923_v48   ;;  %v3906_v32 = vpop.xlane.xlu1 %3905  ;;  %v3880_v12 = vadd.f32 %v3878_v52, %v3842_v56  ;;  %vm3647_vm6 = vmand %vm11713_vm10, %vm3641_vm13  ;;  %vm11718_vm10 = vcmp.eq.s32.totalorder %v9782_v30, 6 }
 0x85c   : > { %vm3908_vm4 = vcmp.lt.f32.partialorder %v3906_v32, 4.0  ;;  %v3649_v52 = vsel %vm3647_vm6, 1.0, %v11665_v1 }
 0x85d   : > { %vm3914_vm12 = vmand %vm11711_vm11, %vm3908_vm4  ;;  %v3675_v9 = vpop.xlane.xlu0 %3674  ;;  %8488 = vset.pattern.permute.xlu0 %v11702_v60  ;;  %vm11715_vm11 = vcmp.eq.s32.totalorder %v9782_v30, 3 }
 0x85e   : > { %v3916_v19 = vsel %vm3914_vm12, 1.0, %v11665_v1  ;;  %4096 = vperm.xlu0 %8488, %v3923_v48   ;;  %vm3679_vm15 = vcmp.lt.f32.partialorder %v3675_v9, 4.0  ;;  %v8665_v9 = vld [vmem:[#allocation11 + $0x78] sm:$0xff]  }
 0x85f   : > { %v3918_v31 = vadd.f32 %v3916_v19, %v3880_v12  ;;  %8487 = vset.pattern.permute.xlu1 %v11697_v7  ;;  %vm3685_vm0 = vmand %vm11712_vm3, %vm3679_vm15  ;;  %7979 = vmatprep.subr.bf16.mxu0 %v8665_v9 }
 0x860   : > { %4072 = vperm.xlu1 %8487, %v3923_v48   ;;  %v3687_v34 = vsel %vm3685_vm0, 1.0, %v11665_v1  ;;  %7980 = vmatpush3.bf16.msra.mxu0 %v8665_v9 }
 0x861   : > { %vm3922_vm8 = vcmp.gt.f32.partialorder %v3918_v31, 0.5  ;;  %v3713_v62 = vpop.xlane.xlu0 %3712  ;;  %v3689_v32 = vadd.f32 %v3687_v34, %v3649_v52  ;;  %v8666_v52 = vld [vmem:[#allocation11 + $0x70] sm:$0xff]  }
 0x862   : > { %v3926_v23 = vsel %vm3922_vm8, 1, %v11690_v53  ;;  %8492 = vset.pattern.permute.xlu0 %v11698_v8  ;;  %vm3717_vm1 = vcmp.lt.f32.partialorder %v3713_v62, 4.0  ;;  %vm11716_vm8 = vcmp.eq.s32.totalorder %v9782_v30, 4  ;;  %7981 = vmatprep.subr.bf16.mxu0 %v8666_v52 }
 0x863   : > { %4009 = vperm.xlu0 %8492, %v3926_v23   ;;  %vm3723_vm14 = vmand %vm11714_vm7, %vm3717_vm1  ;;  %vm11717_vm1 = vcmp.eq.s32.totalorder %v9782_v30, 5  ;;  %vm11719_vm7 = vcmp.eq.s32.totalorder %v9782_v30, 7 }
 0x864   : > { %8489 = vset.pattern.permute.xlu1 %v11690_v53  ;;  %v3725_v56 = vsel %vm3723_vm14, 1.0, %v11665_v1  ;;  %7982 = vmatpush3.bf16.msra.mxu0 %v8666_v52  ;;  %v8669_v52 = vld [vmem:[#allocation11 + $0x58] sm:$0xff]  }
 0x865   : > { %v3751_v49 = vpop.xlane.xlu0 %3750  ;;  %3937 = vperm.xlu1 %8489, %v3926_v23   ;;  %v3727_v31 = vadd.f32 %v3725_v56, %v3689_v32 }
 0x866   : > { %vm3755_vm2 = vcmp.lt.f32.partialorder %v3751_v49, 4.0 }
 0x867   : > { %8494 = vset.pattern.permute.xlu0 %v11700_v15  ;;  %vm3761_vm12 = vmand %vm11715_vm11, %vm3755_vm2 }
 0x868   : > { %4057 = vperm.xlu0 %8494, %v3926_v23   ;;  %v3763_v19 = vsel %vm3761_vm12, 1.0, %v11665_v1 }
 0x869   : > { %v3789_v48 = vpop.xlane.xlu0 %3788  ;;  %8490 = vset.pattern.permute.xlu1 %v11694_v16  ;;  %v3765_v49 = vadd.f32 %v3763_v19, %v3727_v31 }
 0x86a   : > { %vm3793_vm4 = vcmp.lt.f32.partialorder %v3789_v48, 4.0  ;;  %3961 = vperm.xlu1 %8490, %v3926_v23  }
 0x86b   : > { %vm3799_vm15 = vmand %vm11716_vm8, %vm3793_vm4 }
 0x86c   : > { %8504 = vset.pattern.permute.xlu0 %v11702_v60  ;;  %v3801_v62 = vsel %vm3799_vm15, 1.0, %v11665_v1 }
 0x86d   : > { %v3827_v12 = vpop.xlane.xlu0 %3826  ;;  %4105 = vperm.xlu0 %8504, %v3926_v23  }
 0x86e   : > { %vm3831_vm13 = vcmp.lt.f32.partialorder %v3827_v12, 4.0  ;;  %8491 = vset.pattern.permute.xlu1 %v11709_v55  ;;  %v3803_v12 = vadd.f32 %v3801_v62, %v3765_v49 }
 0x86f   : > { %vm3837_vm3 = vmand %vm11717_vm1, %vm3831_vm13  ;;  %3985 = vperm.xlu1 %8491, %v3926_v23  }
 0x870   : > { %v3839_v34 = vsel %vm3837_vm3, 1.0, %v11665_v1 }
 0x871   : > { %v3865_v48 = vpop.xlane.xlu0 %3864  ;;  %8505 = vset.pattern.permute.xlu0 %v11690_v53  ;;  %v3841_v32 = vadd.f32 %v3839_v34, %v3803_v12  ;;  %v8668_v34 = vld [vmem:[#allocation11 + $0x60] sm:$0xff]   ;;  %v8671_v12 = vld [vmem:[#allocation11 + $0x48] sm:$0xff]  }
 0x872   : > { %vm3869_vm0 = vcmp.lt.f32.partialorder %v3865_v48, 4.0  ;;  %v8667_v48 = vld [vmem:[#allocation11 + $0x68] sm:$0xff]  }
 0x873   : > { %vm3875_vm6 = vmand %vm11718_vm10, %vm3869_vm0  ;;  %8493 = vset.pattern.permute.xlu1 %v11693_v10  ;;  %7983 = vmatprep.subr.bf16.mxu0 %v8667_v48 }
 0x874   : > { %v3877_v56 = vsel %vm3875_vm6, 1.0, %v11665_v1  ;;  %4033 = vperm.xlu1 %8493, %v3926_v23   ;;  %7984 = vmatpush3.bf16.msra.mxu0 %v8667_v48  ;;  %v8680_v48 = vld [vmem:[#allocation14 + $0x118] sm:$0xff]  }
 0x875   : > { %v3903_v9 = vpop.xlane.xlu0 %3902  ;;  %v3879_v19 = vadd.f32 %v3877_v56, %v3841_v32  ;;  %7985 = vmatprep.subr.bf16.mxu0 %v8668_v34  ;;  %v8672_v56 = vld [vmem:[#allocation11 + $0x40] sm:$0xff]  }
 0x876   : > { %vm3907_vm2 = vcmp.lt.f32.partialorder %v3903_v9, 4.0  ;;  %v8673_v32 = vld [vmem:[#allocation14 + $0x138] sm:$0xff]   ;;  %v8674_v9 = vld [vmem:[#allocation14 + $0x130] sm:$0xff]  }
 0x877   : > { %vm3913_vm14 = vmand %vm11719_vm7, %vm3907_vm2  ;;  %7999 = vmatprep.subr.bf16.mxu1 %v8673_v32 }
 0x878   : > { %v3915_v31 = vsel %vm3913_vm14, 1.0, %v11665_v1  ;;  %8495 = vset.pattern.permute.xlu1 %v11697_v7  ;;  %7986 = vmatpush3.bf16.msra.mxu0 %v8668_v34 }
 0x879   : > { %v3917_v62 = vadd.f32 %v3915_v31, %v3879_v19  ;;  %4081 = vperm.xlu1 %8495, %v3926_v23   ;;  %7987 = vmatprep.subr.bf16.mxu0 %v8669_v52  ;;  %v8670_v23 = vld [vmem:[#allocation11 + $0x50] sm:$0xff]   ;;  %v10516_v19 = vld [vmem:[#allocation14 + $0xf8] sm:$0xff]  }
 0x87a   : > { %8000 = vmatpush3.bf16.msra.mxu1 %v8673_v32  ;;  %v8676_v31 = vld [vmem:[#allocation14 + $0x128] sm:$0xff]  }
 0x87b   : > { %vm3921_vm4 = vcmp.gt.f32.partialorder %v3917_v62, 0.5  ;;  %8001 = vmatprep.subr.bf16.mxu1 %v8674_v9  ;;  %v8678_v62 = vld [vmem:[#allocation14 + $0x120] sm:$0xff]  }
 0x87c   : > { %v3925_v49 = vsel %vm3921_vm4, 1, %v11690_v53  ;;  %7988 = vmatpush3.bf16.msra.mxu0 %v8669_v52 }
 0x87d   : > { %8496 = vset.pattern.permute.xlu1 %v11690_v53  ;;  %7989 = vmatprep.subr.bf16.mxu0 %v8670_v23 }
 0x87e   : > { %3934 = vperm.xlu1 %8496, %v3925_v49   ;;  %8002 = vmatpush3.bf16.msra.mxu1 %v8674_v9 }
 0x87f   : > { %8003 = vmatprep.subr.bf16.mxu1 %v8676_v31 }
 0x880   : > { %7990 = vmatpush3.bf16.msra.mxu0 %v8670_v23  ;;  %v10522_v23 = vld [vmem:[%s11651_s23] ss:$0 sm:$0xff] }
 0x881   : > { %7991 = vmatprep.subr.bf16.mxu0 %v8671_v12  ;;  %v3017_v32 = vadd.f32 %v10522_v23, %v10146_v45  ;;  %v2998_v45 = vadd.f32 %v10522_v23, %v10096_v47 }
 0x882   : > { %8497 = vset.pattern.permute.xlu1 %v11694_v16  ;;  %8004 = vmatpush3.bf16.msra.mxu1 %v8676_v31 }
 0x883   : > { %3958 = vperm.xlu1 %8497, %v3925_v49   ;;  %8005 = vmatprep.subr.bf16.mxu1 %v8678_v62 }
 0x884   : > { %7992 = vmatpush3.bf16.msra.mxu0 %v8671_v12  ;;  %v3001_v12 = vadd.f32 %v10522_v23, %v10113_v46  ;;  %v3049_v46 = vadd.f32 %v10522_v23, %v10216_v50 }
 0x885   : > { %7993 = vmatprep.subr.bf16.mxu0 %v8672_v56 }
 0x886   : > { %8006 = vmatpush3.bf16.msra.mxu1 %v8678_v62 }
 0x887   : > { %8498 = vset.pattern.permute.xlu1 %v11709_v55  ;;  %8007 = vmatprep.subr.bf16.mxu1 %v8680_v48 }
 0x888   : > { %3982 = vperm.xlu1 %8498, %v3925_v49   ;;  %7994 = vmatpush3.bf16.msra.mxu0 %v8672_v56 }
 0x889   : > { %8019 = vmatprep.subr.bf16.mxu0 %v10516_v19 }
 0x88a   : > { %8008 = vmatpush3.bf16.msra.mxu1 %v8680_v48  ;;  %v3033_v48 = vadd.f32 %v10522_v23, %v10176_v63  ;;  %v3014_v63 = vadd.f32 %v10522_v23, %v10134_v26 }
 0x88c   : > { %8499 = vset.pattern.permute.xlu1 %v11698_v8 }
 0x88d   : > { %4006 = vperm.xlu1 %8499, %v3925_v49  }
 0x891   : > { %8500 = vset.pattern.permute.xlu1 %v11693_v10 }
 0x892   : > { %4030 = vperm.xlu1 %8500, %v3925_v49  }
 0x896   : > { %8501 = vset.pattern.permute.xlu1 %v11700_v15 }
 0x897   : > { %4054 = vperm.xlu1 %8501, %v3925_v49  }
 0x89b   : > { %8502 = vset.pattern.permute.xlu1 %v11697_v7 }
 0x89c   : > { %4078 = vperm.xlu1 %8502, %v3925_v49  }
 0x8a0   : > { %8503 = vset.pattern.permute.xlu1 %v11702_v60 }
 0x8a1   : > { %4102 = vperm.xlu1 %8503, %v3925_v49  }
 0x8a5   : > { %8506 = vset.pattern.permute.xlu1 %v11694_v16 }
 0x8b3   : > { %v3932_v49 = vpop.permute.xlu1 %3931  ;;  %v3980_v52 = vpop.permute.xlu0 %3979 }
 0x8b4   : > { %vm3940_vm11 = vcmp.eq.s32.totalorder %v3932_v49, 1  ;;  %vm3988_vm8 = vcmp.eq.s32.totalorder %v3980_v52, 1 }
 0x8b5   : > { %v3944_v9 = vsel %vm3940_vm11, %v3001_v12, -1e+30  ;;  %v3992_v7 = vsel %vm3988_vm8, %v3033_v48, -1e+30 }
 0x8b6   : > { %v3948_v30 = vmax.f32 %v3944_v9, -1e+30 }
 0x8b8   : > { %v3956_v34 = vpop.permute.xlu1 %3955  ;;  %v4028_v31 = vpop.permute.xlu0 %4027 }
 0x8b9   : > { %vm3964_vm12 = vcmp.eq.s32.totalorder %v3956_v34, 1  ;;  %vm4036_vm1 = vcmp.eq.s32.totalorder %v4028_v31, 1 }
 0x8ba   : > { %v3968_v62 = vsel %vm3964_vm12, %v3017_v32, -1e+30 }
 0x8bb   : > { %v3972_v49 = vmax.f32 %v3948_v30, %v3968_v62 }
 0x8bd   : > { %v4004_v56 = vpop.permute.xlu1 %4003  ;;  %v4076_v60 = vpop.permute.xlu0 %4075  ;;  %v3996_v10 = vmax.f32 %v3972_v49, %v3992_v7  ;;  %v3081_v7 = vadd.f32 %v10522_v23, %v10291_v17 }
 0x8be   : > { %vm4012_vm15 = vcmp.eq.s32.totalorder %v4004_v56, 1  ;;  %v3065_v56 = vadd.f32 %v10522_v23, %v10258_v41  ;;  %v3046_v41 = vadd.f32 %v10522_v23, %v10191_v2  ;;  %vm4084_vm2 = vcmp.eq.s32.totalorder %v4076_v60, 1 }
 0x8bf   : > { %v4016_v16 = vsel %vm4012_vm15, %v3049_v46, -1e+30  ;;  %v3078_v2 = vadd.f32 %v10522_v23, %v10278_v39 }
 0x8c0   : > { %v4020_v52 = vmax.f32 %v3996_v10, %v4016_v16  ;;  %v4040_v9 = vsel %vm4036_vm1, %v3065_v56, -1e+30  ;;  %v3030_v10 = vadd.f32 %v10522_v23, %v10160_v28  ;;  %v3062_v28 = vadd.f32 %v10522_v23, %v10233_v59 }
 0x8c2   : > { %v4052_v53 = vpop.permute.xlu1 %4051  ;;  %v4044_v49 = vmax.f32 %v4020_v52, %v4040_v9 }
 0x8c3   : > { %vm4060_vm0 = vcmp.eq.s32.totalorder %v4052_v53, 1  ;;  %v3112_v53 = vpop.f32.mrf.mxu0 }
 0x8c4   : > { %v4064_v16 = vsel %vm4060_vm0, %v3081_v7, -1e+30 }
 0x8c5   : > { %v4068_v46 = vmax.f32 %v4044_v49, %v4064_v16 }
 0x8c7   : > { %v4100_v34 = vpop.permute.xlu1 %4099 }
 0x8c8   : > { %vm4108_vm7 = vcmp.eq.s32.totalorder %v4100_v34, 1 }
 0x8ca   : > { %v3929_v12 = vpop.permute.xlu0 %3928 }
 0x8cb   : > { %vm3939_vm13 = vcmp.eq.s32.totalorder %v3929_v12, 1  ;;  %v3097_v12 = vadd.f32 %v10522_v23, %v10320_v21  ;;  %v10554_v21 = vld [vmem:[%s11720_s14] ss:$0 sm:$0xff] }
 0x8cc   : > { %v3943_v30 = vsel %vm3939_vm13, %v2998_v45, -1e+30  ;;  %v3953_v32 = vpop.permute.xlu1 %3952  ;;  %v2117_v9 = vadd.f32 %v10554_v21, %v9798_v37  ;;  %v2114_v39 = vadd.f32 %v10554_v21, %v9794_v35 }
 0x8cd   : > { %vm3963_vm3 = vcmp.eq.s32.totalorder %v3953_v32, 1  ;;  %v3947_v50 = vmax.f32 %v3943_v30, -1e+30  ;;  %v4088_v56 = vsel %vm4084_vm2, %v3097_v12, -1e+30 }
 0x8ce   : > { %v3967_v47 = vsel %vm3963_vm3, %v3014_v63, -1e+30  ;;  %v3113_v63 = vadd.f32 %v10522_v23, %v3112_v53  ;;  %v4092_v60 = vmax.f32 %v4068_v46, %v4088_v56  ;;  %v4119_v53 = vadd.f32 %v2114_v39, %v9716_v40 }
 0x8cf   : > { %v4001_v62 = vpop.permute.xlu0 %4000  ;;  %v3971_v48 = vmax.f32 %v3947_v50, %v3967_v47 }
 0x8d0   : > { %vm4011_vm10 = vcmp.eq.s32.totalorder %v4001_v62, 1  ;;  %v4112_v7 = vsel %vm4108_vm7, %v3113_v63, -1e+30  ;;  %v3094_v62 = vadd.f32 %v10522_v23, %v10308_v29 }
 0x8d1   : > { %v3977_v31 = vpop.permute.xlu1 %3976  ;;  %v4015_v52 = vsel %vm4011_vm10, %v3046_v41, -1e+30  ;;  %v4116_v16 = vmax.f32 %v4092_v60, %v4112_v7  ;;  %v4120_v41 = vadd.f32 %v2117_v9, %v9712_v38 }
 0x8d2   : > { %vm3987_vm6 = vcmp.eq.s32.totalorder %v3977_v31, 1  ;;  %v3110_v31 = vadd.f32 %v10522_v23, %v10331_v6 }
 0x8d3   : > { %v3991_v26 = vsel %vm3987_vm6, %v3030_v10, -1e+30  ;;  %v4124_v46 = vadd.f32 %v4120_v41, %v4116_v16 }
 0x8d4   : > { %v3995_v17 = vmax.f32 %v3971_v48, %v3991_v26  ;;  %v4049_v45 = vpop.permute.xlu0 %4048 }
 0x8d5   : > { %vm4059_vm14 = vcmp.eq.s32.totalorder %v4049_v45, 1  ;;  %v3009_v45 = vadd.f32 %v10522_v23, %v10105_v11 }
 0x8d6   : > { %v4025_v30 = vpop.permute.xlu1 %4024  ;;  %v4019_v32 = vmax.f32 %v3995_v17, %v4015_v52  ;;  %v4063_v47 = vsel %vm4059_vm14, %v3078_v2, -1e+30  ;;  %v10568_v52 = vmax.f32 %v4124_v46, 0.0 }
 0x8d7   : > { %vm4035_vm4 = vcmp.eq.s32.totalorder %v4025_v30, 1 }
 0x8d8   : > { %v4039_v50 = vsel %vm4035_vm4, %v3062_v28, -1e+30 }
 0x8d9   : > { %v4043_v59 = vmax.f32 %v4019_v32, %v4039_v50  ;;  %v4097_v34 = vpop.permute.xlu0 %4096 }
 0x8da   : > { %vm4107_vm11 = vcmp.eq.s32.totalorder %v4097_v34, 1 }
 0x8db   : > { %v4073_v49 = vpop.permute.xlu1 %4072  ;;  %v4067_v10 = vmax.f32 %v4043_v59, %v4063_v47  ;;  %v4111_v37 = vsel %vm4107_vm11, %v3110_v31, -1e+30 }
 0x8dc   : > { %vm4083_vm12 = vcmp.eq.s32.totalorder %v4073_v49, 1 }
 0x8dd   : > { %v4087_v48 = vsel %vm4083_vm12, %v3094_v62, -1e+30 }
 0x8de   : > { %v4091_v26 = vmax.f32 %v4067_v10, %v4087_v48  ;;  %v4010_v30 = vpop.permute.xlu0 %4009  ;;  %v2125_v10 = vadd.f32 %v9796_v36, %v10554_v21  ;;  %v3006_v48 = vadd.f32 %v10522_v23, %v10091_v27 }
 0x8df   : > { %vm4014_vm13 = vcmp.eq.s32.totalorder %v4010_v30, 1 }
 0x8e0   : > { %v4115_v29 = vmax.f32 %v4091_v26, %v4111_v37  ;;  %v3938_v17 = vpop.permute.xlu1 %3937  ;;  %v4018_v50 = vsel %vm4014_vm13, %v10213_v42, -1e+30  ;;  %v4122_v16 = vadd.f32 %v2125_v10, %v9723_v57  ;;  %vm11721_vm13 = vcmp.lt.s32.totalorder %v9628_v3, 1 }
 0x8e1   : > { %vm3942_vm8 = vcmp.eq.s32.totalorder %v3938_v17, 1 }
 0x8e2   : > { %v4123_v35 = vadd.f32 %v4119_v53, %v4115_v29  ;;  %v3946_v12 = vsel %vm3942_vm8, %v3009_v45, -1e+30 }
 0x8e3   : > { %v3950_v38 = vmax.f32 %v3946_v12, -1e+30  ;;  %v4058_v56 = vpop.permute.xlu0 %4057 }
 0x8e4   : > { %v10570_v28 = vmax.f32 %v4123_v35, 0.0  ;;  %vm4062_vm3 = vcmp.eq.s32.totalorder %v4058_v56, 1 }
 0x8e5   : > { %v3962_v6 = vpop.permute.xlu1 %3961  ;;  %v4066_v47 = vsel %vm4062_vm3, %v10286_v54, -1e+30 }
 0x8e6   : > { %vm3966_vm15 = vcmp.eq.s32.totalorder %v3962_v6, 1  ;;  %v10574_v40 = vpack.c.bf16 %v10568_v52, %v10570_v28 }
 0x8e7   : > { %v3970_v32 = vsel %vm3966_vm15, %v10141_v44, -1e+30 }
 0x8e8   : > { %v3974_v63 = vmax.f32 %v3950_v38, %v3970_v32  ;;  %7995 = vmatprep.mubr.bf16.mxu0 %v10574_v40  ;;  %v4106_v9 = vpop.permute.xlu0 %4105  ;;  %v2122_v38 = vadd.f32 %v9792_v33, %v10554_v21  ;;  %v8679_v33 = vld [vmem:[#allocation14 + $0xe8] sm:$0xff]   ;;  %v8683_v21 = vld [vmem:[#allocation14 + $0xd8] sm:$0xff]  }
 0x8e9   : > { %vm4110_vm10 = vcmp.eq.s32.totalorder %v4106_v9, 1 }
 0x8ea   : > { %v3986_v11 = vpop.permute.xlu1 %3985  ;;  %v4114_v39 = vsel %vm4110_vm10, %v10338_v5, -1e+30  ;;  %vm11725_vm10 = vcmp.lt.s32.totalorder %v9628_v3, 7  ;;  %v8702_v3 = vld [vmem:[#allocation19 + $0x50] sm:$0xff]  }
 0x8eb   : > { %vm3990_vm1 = vcmp.eq.s32.totalorder %v3986_v11, 1 }
 0x8ec   : > { %v3994_v2 = vsel %vm3990_vm1, %v10168_v22, -1e+30  ;;  %vm11722_vm1 = vmmov %vm11721_vm13 }
 0x8ed   : > { %v3998_v60 = vmax.f32 %v3974_v63, %v3994_v2  ;;  %vm11723_vm3 = vmmov %vm11722_vm1 }
 0x8ef   : > { %v4034_v7 = vpop.permute.xlu1 %4033  ;;  %v4022_v59 = vmax.f32 %v3998_v60, %v4018_v50  ;;  %v8684_v60 = vld [vmem:[#allocation14 + $0x108] sm:$0xff]   ;;  %v8685_v50 = vld [vmem:[#allocation14 + $0xd0] sm:$0xff]  }
 0x8f0   : > { %vm4038_vm0 = vcmp.eq.s32.totalorder %v4034_v7, 1  ;;  %v8687_v7 = vld [vmem:[#allocation14 + $0xc8] sm:$0xff]  }
 0x8f1   : > { %v4042_v34 = vsel %vm4038_vm0, %v10253_v24, -1e+30  ;;  %vm11724_vm0 = vmmov %vm11722_vm1 }
 0x8f2   : > { %v4046_v44 = vmax.f32 %v4022_v59, %v4042_v34  ;;  %v8688_v59 = vld [vmem:[#allocation14 + $0xc0] sm:$0xff]   ;;  %v8689_v34 = vld [vmem:[#allocation14 + $0x178] sm:$0xff]  }
 0x8f4   : > { %v4082_v62 = vpop.permute.xlu1 %4081  ;;  %v4070_v49 = vmax.f32 %v4046_v44, %v4066_v47  ;;  %v7160_v44 = vld [vmem:[#allocation13 + $0x1] ss:$0 sm:$0xff] }
 0x8f5   : > { %vm4086_vm6 = vcmp.eq.s32.totalorder %v4082_v62, 1 }
 0x8f6   : > { %v4090_v22 = vsel %vm4086_vm6, %v10317_v14, -1e+30  ;;  %vm11726_vm6 = vmmov %vm11725_vm10 }
 0x8f7   : > { %v4094_v42 = vmax.f32 %v4070_v49, %v4090_v22 }
 0x8f9   : > { %v4118_v31 = vmax.f32 %v4094_v42, %v4114_v39  ;;  %v3935_v24 = vpop.permute.xlu1 %3934 }
 0x8fa   : > { %vm3941_vm2 = vcmp.eq.s32.totalorder %v3935_v24, 1 }
 0x8fb   : > { %v4126_v54 = vadd.f32 %v4122_v16, %v4118_v31  ;;  %v3945_v41 = vsel %vm3941_vm2, %v3006_v48, -1e+30  ;;  %vm11727_vm2 = vnez %v11623_v61  ;;  %v8704_v61 = vld [vmem:[#allocation19 + $0x40] sm:$0xff]  }
 0x8fc   : > { %v3949_v37 = vmax.f32 %v3945_v41, -1e+30 }
 0x8fd   : > { %v10599_v56 = vmax.f32 %v4126_v54, 0.0 }
 0x8fe   : > { %v3959_v26 = vpop.permute.xlu1 %3958 }
 0x8ff   : > { %vm3965_vm7 = vcmp.eq.s32.totalorder %v3959_v26, 1 }
 0x900   : > { %v3969_v36 = vsel %vm3965_vm7, %v10128_v43, -1e+30  ;;  %vm11729_vm7 = vmmov %vm11726_vm6 }
 0x901   : > { %v3973_v53 = vmax.f32 %v3949_v37, %v3969_v36 }
 0x903   : > { %v3983_v14 = vpop.permute.xlu1 %3982 }
 0x904   : > { %vm3989_vm14 = vcmp.eq.s32.totalorder %v3983_v14, 1 }
 0x905   : > { %v3993_v5 = vsel %vm3989_vm14, %v10155_v25, -1e+30  ;;  %vm11731_vm14 = vcmask 130048  }
 0x906   : > { %v3997_v46 = vmax.f32 %v3973_v53, %v3993_v5 }
 0x908   : > { %v4007_v57 = vpop.permute.xlu1 %4006 }
 0x909   : > { %vm4013_vm4 = vcmp.eq.s32.totalorder %v4007_v57, 1 }
 0x90a   : > { %v4017_v29 = vsel %vm4013_vm4, %v10187_v0, -1e+30  ;;  %vm11732_vm4 = vmmov 0  }
 0x90b   : > { %v4021_v17 = vmax.f32 %v3997_v46, %v4017_v29 }
 0x90d   : > { %v4031_v27 = vpop.permute.xlu1 %4030 }
 0x90e   : > { %vm4037_vm11 = vcmp.eq.s32.totalorder %v4031_v27, 1 }
 0x90f   : > { %v4041_v23 = vsel %vm4037_vm11, %v10230_v51, -1e+30  ;;  %v4121_v51 = vadd.f32 %v2122_v38, %v9725_v58  ;;  %v8681_v58 = vld [vmem:[#allocation14 + $0xe0] sm:$0xff]   ;;  %v8693_v38 = vld [vmem:[#allocation14 + $0x158] sm:$0xff]   ;;  %vm11736_vm11 = vmmov %vm11731_vm14 }
 0x910   : > { %v4045_v45 = vmax.f32 %v4021_v17, %v4041_v23 }
 0x912   : > { %v4055_v35 = vpop.permute.xlu1 %4054 }
 0x913   : > { %vm4061_vm12 = vcmp.eq.s32.totalorder %v4055_v35, 1 }
 0x914   : > { %v4065_v43 = vsel %vm4061_vm12, %v10267_v20, -1e+30  ;;  %vm11738_vm12 = vmmov %vm11736_vm11 }
 0x915   : > { %v4069_v12 = vmax.f32 %v4045_v45, %v4065_v43 }
 0x917   : > { %v4079_v6 = vpop.permute.xlu1 %4078 }
 0x918   : > { %vm4085_vm8 = vcmp.eq.s32.totalorder %v4079_v6, 1 }
 0x919   : > { %v4089_v25 = vsel %vm4085_vm8, %v10305_v18, -1e+30  ;;  %v8677_v18 = vld [vmem:[#allocation14 + $0xf0] sm:$0xff]   ;;  %vm11740_vm8 = vmmov %vm11736_vm11 }
 0x91a   : > { %v4093_v30 = vmax.f32 %v4069_v12, %v4089_v25  ;;  %v8690_v12 = vld [vmem:[#allocation14 + $0x170] sm:$0xff]   ;;  %v8691_v25 = vld [vmem:[#allocation14 + $0x168] sm:$0xff]  }
 0x91c   : > { %v4103_v0 = vpop.permute.xlu1 %4102 }
 0x91d   : > { %vm4109_vm15 = vcmp.eq.s32.totalorder %v4103_v0, 1  ;;  %v8694_v0 = vld [vmem:[#allocation14 + $0x150] sm:$0xff]  }
 0x91e   : > { %v4113_v32 = vsel %vm4109_vm15, %v10328_v13, -1e+30  ;;  %v8682_v13 = vld [vmem:[#allocation14 + $0x110] sm:$0xff]   ;;  %vm11742_vm15 = vmmov %vm11740_vm8 }
 0x91f   : > { %v4117_v63 = vmax.f32 %v4093_v30, %v4113_v32  ;;  %8009 = vmatprep.subr.bf16.mxu1 %v8682_v13  ;;  %v8692_v30 = vld [vmem:[#allocation14 + $0x160] sm:$0xff]   ;;  %v8695_v32 = vld [vmem:[#allocation14 + $0x148] sm:$0xff]  }
 0x920   : > { %8010 = vmatpush3.bf16.msra.mxu1 %v8682_v13  ;;  %v8699_v13 = vld [vmem:[#allocation19 + $0x68] sm:$0xff]  }
 0x921   : > { %v4125_v11 = vadd.f32 %v4121_v51, %v4117_v63  ;;  %8011 = vmatprep.subr.bf16.mxu1 %v8684_v60  ;;  %v8696_v51 = vld [vmem:[#allocation14 + $0x140] sm:$0xff]  }
 0x923   : > { %v10601_v20 = vmax.f32 %v4125_v11, 0.0 }
 0x924   : > { %8012 = vmatpush3.bf16.msra.mxu1 %v8684_v60  ;;  %v8701_v60 = vld [vmem:[#allocation19 + $0x58] sm:$0xff]  }
 0x925   : > { %v10605_v2 = vpack.c.bf16 %v10599_v56, %v10601_v20 }
 0x927   : > { %7996 = vmatmul.mubr.bf16.vlgmr.msra.gmra.mxu0 %v10605_v2 }
 0x928   : > { %8020 = vmatpush3.bf16.msra.mxu0 %v10516_v19  ;;  %v8686_v19 = vld [vmem:[#allocation14 + $0x100] sm:$0xff]  }
 0x929   : > { %8021 = vmatprep.subr.bf16.mxu0 %v8677_v18  ;;  %8013 = vmatprep.subr.bf16.mxu1 %v8686_v19 }
 0x92a   : > { %8014 = vmatpush3.bf16.msra.mxu1 %v8686_v19  ;;  %v8705_v19 = vld [vmem:[#allocation16 + $0x78] sm:$0xff]  }
 0x92b   : > { %8039 = vmatprep.subr.bf16.mxu1 %v8689_v34 }
 0x92c   : > { %8022 = vmatpush3.bf16.msra.mxu0 %v8677_v18 }
 0x92d   : > { %8023 = vmatprep.subr.bf16.mxu0 %v8679_v33 }
 0x930   : > { %8024 = vmatpush3.bf16.msra.mxu0 %v8679_v33 }
 0x931   : > { %8025 = vmatprep.subr.bf16.mxu0 %v8681_v58 }
 0x934   : > { %8026 = vmatpush3.bf16.msra.mxu0 %v8681_v58  ;;  %v8698_v58 = vld [vmem:[#allocation19 + $0x70] sm:$0xff]  }
 0x935   : > { %8027 = vmatprep.subr.bf16.mxu0 %v8683_v21 }
 0x938   : > { %8028 = vmatpush3.bf16.msra.mxu0 %v8683_v21  ;;  %v8700_v21 = vld [vmem:[#allocation19 + $0x60] sm:$0xff]  }
 0x939   : > { %8029 = vmatprep.subr.bf16.mxu0 %v8685_v50 }
 0x93c   : > { %8030 = vmatpush3.bf16.msra.mxu0 %v8685_v50  ;;  %v8703_v50 = vld [vmem:[#allocation19 + $0x48] sm:$0xff]  }
 0x93d   : > { %8031 = vmatprep.subr.bf16.mxu0 %v8687_v7 }
 0x940   : > { %8032 = vmatpush3.bf16.msra.mxu0 %v8687_v7  ;;  %v8706_v7 = vld [vmem:[#allocation16 + $0x70] sm:$0xff]  }
 0x941   : > { %8033 = vmatprep.subr.bf16.mxu0 %v8688_v59 }
 0x944   : > { %8034 = vmatpush3.bf16.msra.mxu0 %v8688_v59  ;;  %v8707_v59 = vld [vmem:[#allocation16 + $0x68] sm:$0xff]  }
 0x945   : > { %8059 = vmatprep.subr.bf16.mxu0 %v8705_v19 }
 0x9e7   : > { %v7997_v9 = vpop.f32.mrf.mxu0 }
 0x9e8   : > { %v4249_v62 = vadd.f32 %v7997_v9, %v7160_v44  ;;  %v8709_v9 = vld [vmem:[#allocation16 + $0x58] sm:$0xff]  }
 0x9e9   : > { %v4240_v47 = vpop.f32.mrf.mxu0 }
 0x9ea   : > { %v4241_v49 = vadd.f32 %v7160_v44, %v4240_v47  ;;  %v4257_v39 = vmax.f32 %v4249_v62, 0.0  ;;  %v8712_v47 = vld [vmem:[#allocation16 + $0x40] sm:$0xff]  }
 0x9eb   : > { %v7998_v10 = vpop.f32.mrf.mxu0 }
 0x9ec   : > { %v4252_v22 = vadd.f32 %v7998_v10, %v7160_v44  ;;  %v4255_v16 = vmax.f32 %v4241_v49, 0.0  ;;  %v4312_v41 = vrot.slane %v4257_v39, 7  ;;  %v4522_v26 = vrot.slane %v4257_v39, 1 }
 0x9ed   : > { %v4243_v42 = vpop.f32.mrf.mxu0 }
 0x9ee   : > { %v4258_v31 = vmax.f32 %v4252_v22, 0.0  ;;  %v4244_v24 = vadd.f32 %v7160_v44, %v4243_v42  ;;  %v4310_v37 = vrot.slane %v4255_v16, 7  ;;  %v4520_v53 = vrot.slane %v4255_v16, 1  ;;  %v8710_v44 = vld [vmem:[#allocation16 + $0x50] sm:$0xff]  }
 0x9f0   : > { %v4313_v48 = vrot.slane %v4258_v31, 7  ;;  %v4256_v54 = vmax.f32 %v4244_v24, 0.0  ;;  %v4325_v14 = vpack.c.bf16 %v4258_v31, %v4257_v39  ;;  %v4523_v63 = vrot.slane %v4258_v31, 1 }
 0x9f2   : > { %v4311_v36 = vrot.slane %v4256_v54, 7  ;;  %v4521_v5 = vrot.slane %v4256_v54, 1  ;;  %v4324_v46 = vpack.c.bf16 %v4256_v54, %v4255_v16  ;;  %v4314_v57 = vsel %vm11721_vm13, %v4312_v41, %v4313_v48  ;;  %vm11744_vm13 = vmmov %vm11740_vm8 }
 0x9f3   : > { %v4317_v27 = vsel %vm11724_vm0, %v4313_v48, %v4310_v37  ;;  %v4527_v18 = vsel %vm11729_vm7, %v4523_v63, %v4520_v53 }
 0x9f4   : > { %v4315_v29 = vsel %vm11722_vm1, %v4311_v36, %v4312_v41  ;;  %v4316_v17 = vsel %vm11723_vm3, %v4310_v37, %v4311_v36  ;;  %8015 = vmatprep.mubr.bf16.mxu1 %v4324_v46  ;;  %v4525_v35 = vsel %vm11725_vm10, %v4521_v5, %v4522_v26  ;;  %v4526_v43 = vsel %vm11726_vm6, %v4520_v53, %v4521_v5  ;;  %v7206_v5 = vld [vmem:[%s11629_s29 + $0x1] ss:$0 sm:$0xff]  ;;  %vm11746_vm1 = vmmov %vm11740_vm8 }
 0x9f5   : > { %v7190_v23 = vpack.c.bf16 %v4314_v57, %v4315_v29  ;;  %v7187_v45 = vpack.c.bf16 %v4316_v17, %v4317_v27  ;;  %8016 = vmatmul.mubr.bf16.vlgmr.msra.gmra.mxu1 %v4325_v14  ;;  %v7201_v6 = vpack.c.bf16 %v4525_v35, %v4526_v43  ;;  %vm11748_vm3 = vmmov %vm11746_vm1 }
 0x9f6   : > { %8040 = vmatpush3.bf16.msra.mxu1 %v8689_v34  ;;  %v8708_v34 = vld [vmem:[#allocation16 + $0x60] sm:$0xff]   ;;  %vm11750_vm0 = vmmov %vm11746_vm1 }
 0x9f7   : > { %8035 = vmatprep.mubr.msk.bf16.mxu0 %vm9688_vm9, %v7187_v45  ;;  %8055 = vmatprep.mubr.msk.bf16.mxu1 %vm11727_vm2, %v7201_v6  ;;  %vm11752_vm10 = vmmov %vm11750_vm0 }
 0x9f8   : > { %8036 = vmatmul.mubr.msk.bf16.vlgmr.msra.gmra.mxu0 %vm9688_vm9, %v7190_v23  ;;  %8041 = vmatprep.subr.bf16.mxu1 %v8690_v12  ;;  %vm11728_vm9 = vmmov %vm11726_vm6 }
 0x9f9   : > { %v4524_v11 = vsel %vm11728_vm9, %v4522_v26, %v4523_v63  ;;  %8060 = vmatpush3.bf16.msra.mxu0 %v8705_v19  ;;  %v8717_v63 = vld [vmem:[#allocation17 + $0x58] sm:$0xff]   ;;  %v11734_v19 = vld [vmem:[#allocation34_spill] sm:$0xff]  ;;  %vm11754_vm6 = vmmov %vm11750_vm0 }
 0x9fa   : > { %8042 = vmatpush3.bf16.msra.mxu1 %v8690_v12  ;;  %v7204_v33 = vpack.c.bf16 %v4527_v18, %v4524_v11  ;;  %8061 = vmatprep.subr.bf16.mxu0 %v8706_v7  ;;  %v8719_v11 = vld [vmem:[#allocation17 + $0x48] sm:$0xff]   ;;  %v8720_v18 = vld [vmem:[#allocation17 + $0x40] sm:$0xff]   ;;  %vm11758_vm9 = vmmov %vm11750_vm0 }
 0x9fb   : > { %8043 = vmatprep.subr.bf16.mxu1 %v8691_v25  ;;  %vm11760_vm7 = vmmov %vm11750_vm0 }
 0x9fd   : > { %8062 = vmatpush3.bf16.msra.mxu0 %v8706_v7 }
 0x9fe   : > { %8044 = vmatpush3.bf16.msra.mxu1 %v8691_v25  ;;  %8063 = vmatprep.subr.bf16.mxu0 %v8707_v59 }
 0x9ff   : > { %8045 = vmatprep.subr.bf16.mxu1 %v8692_v30 }
 0xa01   : > { %8064 = vmatpush3.bf16.msra.mxu0 %v8707_v59 }
 0xa02   : > { %8046 = vmatpush3.bf16.msra.mxu1 %v8692_v30  ;;  %8065 = vmatprep.subr.bf16.mxu0 %v8708_v34  ;;  %v8713_v30 = vld [vmem:[#allocation17 + $0x78] sm:$0xff]  }
 0xa03   : > { %8047 = vmatprep.subr.bf16.mxu1 %v8693_v38 }
 0xa05   : > { %8066 = vmatpush3.bf16.msra.mxu0 %v8708_v34 }
 0xa06   : > { %8048 = vmatpush3.bf16.msra.mxu1 %v8693_v38  ;;  %8067 = vmatprep.subr.bf16.mxu0 %v8709_v9 }
 0xa07   : > { %8049 = vmatprep.subr.bf16.mxu1 %v8694_v0 }
 0xa09   : > { %8068 = vmatpush3.bf16.msra.mxu0 %v8709_v9 }
 0xa0a   : > { %8050 = vmatpush3.bf16.msra.mxu1 %v8694_v0  ;;  %8069 = vmatprep.subr.bf16.mxu0 %v8710_v44  ;;  %v8714_v0 = vld [vmem:[#allocation17 + $0x70] sm:$0xff]  }
 0xa0b   : > { %8051 = vmatprep.subr.bf16.mxu1 %v8695_v32 }
 0xa0d   : > { %8070 = vmatpush3.bf16.msra.mxu0 %v8710_v44 }
 0xa0e   : > { %8052 = vmatpush3.bf16.msra.mxu1 %v8695_v32  ;;  %v8715_v32 = vld [vmem:[#allocation17 + $0x68] sm:$0xff]  }
 0xa0f   : > { %8053 = vmatprep.subr.bf16.mxu1 %v8696_v51 }
 0xa12   : > { %8054 = vmatpush3.bf16.msra.mxu1 %v8696_v51  ;;  %v8716_v51 = vld [vmem:[#allocation17 + $0x60] sm:$0xff]  }
 0xa13   : > { %8079 = vmatprep.subr.bf16.mxu1 %v8697_v4 }
 0xa15   : > { %8056 = vmatmul.mubr.msk.bf16.vlgmr.msra.gmra.mxu1 %vm11727_vm2, %v7204_v33  ;;  %v8721_v33 = vld [vmem:[#allocation20 + $0x78] sm:$0xff]   ;;  %vm11756_vm2 = vmmov %vm11750_vm0 }
 0xa16   : > { %8080 = vmatpush3.bf16.msra.mxu1 %v8697_v4  ;;  %8095 = vmatprep.mubr.bf16.mxu1 %v10574_v40  ;;  %v11730_v40 = vld [vmem:[#allocation38_spill] sm:$0xff]  ;;  %v8718_v4 = vld [vmem:[#allocation17 + $0x50] sm:$0xff]  }
 0xa17   : > { %8081 = vmatprep.subr.bf16.mxu1 %v8698_v58 }
 0xa1a   : > { %8082 = vmatpush3.bf16.msra.mxu1 %v8698_v58  ;;  %v8722_v58 = vld [vmem:[#allocation20 + $0x70] sm:$0xff]  }
 0xa1b   : > { %8083 = vmatprep.subr.bf16.mxu1 %v8699_v13 }
 0xa1e   : > { %8084 = vmatpush3.bf16.msra.mxu1 %v8699_v13  ;;  %v11733_v13 = vld [vmem:[#allocation36_spill] sm:$0xff] }
 0xa1f   : > { %8085 = vmatprep.subr.bf16.mxu1 %v8700_v21 }
 0xa22   : > { %8086 = vmatpush3.bf16.msra.mxu1 %v8700_v21  ;;  %v8723_v21 = vld [vmem:[#allocation20 + $0x68] sm:$0xff]  }
 0xa23   : > { %8087 = vmatprep.subr.bf16.mxu1 %v8701_v60 }
 0xa26   : > { %8088 = vmatpush3.bf16.msra.mxu1 %v8701_v60  ;;  %v8724_v60 = vld [vmem:[#allocation20 + $0x60] sm:$0xff]  }
 0xa27   : > { %8089 = vmatprep.subr.bf16.mxu1 %v8702_v3 }
 0xa2a   : > { %8090 = vmatpush3.bf16.msra.mxu1 %v8702_v3  ;;  %v8725_v3 = vld [vmem:[#allocation20 + $0x58] sm:$0xff]  }
 0xa2b   : > { %8091 = vmatprep.subr.bf16.mxu1 %v8703_v50 }
 0xa2e   : > { %8092 = vmatpush3.bf16.msra.mxu1 %v8703_v50  ;;  %v8726_v50 = vld [vmem:[#allocation20 + $0x50] sm:$0xff]  }
 0xa2f   : > { %8093 = vmatprep.subr.bf16.mxu1 %v8704_v61 }
 0xa32   : > { %8094 = vmatpush3.bf16.msra.mxu1 %v8704_v61  ;;  %v8727_v61 = vld [vmem:[#allocation20 + $0x48] sm:$0xff]  }
 0xa35   : > { %8096 = vmatmul.mubr.bf16.vlgmr.msra.gmra.mxu1 %v10605_v2  ;;  %v8711_v2 = vld [vmem:[#allocation16 + $0x48] sm:$0xff]  }
 0xa36   : > { %8121 = vmatprep.mubr.msk.bf16.mxu1 %vm11731_vm14, %v11730_v40  ;;  %8071 = vmatprep.subr.bf16.mxu0 %v8711_v2  ;;  %v8728_v40 = vld [vmem:[#allocation20 + $0x40] sm:$0xff]   ;;  %vm11762_vm14 = vmmov %vm11750_vm0 }
 0xa37   : > { %8072 = vmatpush3.bf16.msra.mxu0 %v8711_v2 }
 0xa38   : > { %8073 = vmatprep.subr.bf16.mxu0 %v8712_v47 }
 0xa3b   : > { %8074 = vmatpush3.bf16.msra.mxu0 %v8712_v47 }
 0xa3c   : > { %8099 = vmatprep.subr.bf16.mxu0 %v11665_v1 }
 0xab5   : > { %v8017_v62 = vpop.f32.mrf.mxu1 }
 0xab7   : > { %v4408_v49 = vpop.f32.mrf.mxu1 }
 0xab8   : > { %v8037_v10 = vpop.f32.mrf.mxu0 }
 0xab9   : > { %v8018_v22 = vpop.f32.mrf.mxu1  ;;  %v4514_v48 = vadd.f32 %v8037_v10, %v8017_v62  ;;  %v11735_v10 = vld [vmem:[#allocation39_spill] sm:$0xff] }
 0xaba   : > { %v4505_v42 = vpop.f32.mrf.mxu0 }
 0xabb   : > { %v4411_v39 = vpop.f32.mrf.mxu1  ;;  %v4506_v24 = vadd.f32 %v4505_v42, %v4408_v49  ;;  %v11739_v42 = vld [vmem:[#allocation41_spill] sm:$0xff] }
 0xabc   : > { %v8038_v16 = vpop.f32.mrf.mxu0 }
 0xabd   : > { %v4517_v26 = vadd.f32 %v8038_v16, %v8018_v22  ;;  %v11737_v22 = vld [vmem:[#allocation40_spill] sm:$0xff]  ;;  %v11743_v16 = vld [vmem:[#allocation43_spill] sm:$0xff] }
 0xabe   : > { %v4508_v54 = vpop.f32.mrf.mxu0 }
 0xabf   : > { %v4509_v14 = vadd.f32 %v4508_v54, %v4411_v39  ;;  %v11741_v39 = vld [vmem:[#allocation42_spill] sm:$0xff]  ;;  %v11751_v54 = vld [vmem:[#allocation47_spill] sm:$0xff] }
 0xad5   : > { %v8057_v31 = vpop.f32.mrf.mxu1 }
 0xad6   : > { %v4633_v36 = vadd.f32 %v8057_v31, %v4514_v48  ;;  %v11745_v31 = vld [vmem:[#allocation44_spill] sm:$0xff]  ;;  %v11749_v48 = vld [vmem:[#allocation46_spill] sm:$0xff] }
 0xad7   : > { %v4616_v41 = vpop.f32.mrf.mxu1 }
 0xad8   : > { %v4631_v37 = vadd.f32 %v4616_v41, %v4506_v24  ;;  %v4643_v23 = vadd.f32 %v7206_v5, %v4633_v36  ;;  %v11747_v24 = vld [vmem:[#allocation45_spill] sm:$0xff]  ;;  %v11753_v41 = vld [vmem:[#allocation48_spill] sm:$0xff]  ;;  %v11759_v36 = vld [vmem:[#allocation51_spill] sm:$0xff] }
 0xad9   : > { %v8058_v53 = vpop.f32.mrf.mxu1 }
 0xada   : > { %v4634_v46 = vadd.f32 %v8058_v53, %v4517_v26  ;;  %v4641_v29 = vadd.f32 %v7206_v5, %v4631_v37  ;;  %v4647_v6 = vmax.f32 %v4643_v23, 0.0  ;;  %v11755_v26 = vld [vmem:[#allocation49_spill] sm:$0xff]  ;;  %v11757_v37 = vld [vmem:[#allocation50_spill] sm:$0xff]  ;;  %v11761_v53 = vld [vmem:[#allocation52_spill] sm:$0xff] }
 0xadb   : > { %v4619_v57 = vpop.f32.mrf.mxu1 }
 0xadc   : > { %v4644_v17 = vadd.f32 %v7206_v5, %v4634_v46  ;;  %v4632_v27 = vadd.f32 %v4619_v57, %v4509_v14  ;;  %v4645_v43 = vmax.f32 %v4641_v29, 0.0  ;;  %v11763_v14 = vld [vmem:[#allocation53_spill] sm:$0xff]  ;;  %v8730_v46 = vld [vmem:[#allocation22 + $0x70] sm:$0xff]   ;;  %v8731_v57 = vld [vmem:[#allocation22 + $0x68] sm:$0xff]  }
 0xadd   : > { %v8732_v29 = vld [vmem:[#allocation22 + $0x60] sm:$0xff]  }
 0xade   : > { %v4642_v45 = vadd.f32 %v7206_v5, %v4632_v27  ;;  %v4648_v35 = vmax.f32 %v4644_v17, 0.0  ;;  %v8729_v5 = vld [vmem:[#allocation22 + $0x78] sm:$0xff]  }
 0xadf   : > { %v8733_v17 = vld [vmem:[#allocation22 + $0x58] sm:$0xff]  }
 0xae0   : > { %v4646_v12 = vmax.f32 %v4642_v45, 0.0  ;;  %v4669_v38 = vpack.c.bf16 %v4648_v35, %v4647_v6 }
 0xae2   : > { %v4668_v25 = vpack.c.bf16 %v4646_v12, %v4645_v43  ;;  %v7218_v12 = vld [vmem:[%s11648_s5 + $0x1] ss:$0 sm:$0xff] }
 0xae4   : > { %8075 = vmatprep.mubr.bf16.mxu0 %v4668_v25 }
 0xae5   : > { %8076 = vmatmul.mubr.bf16.vlgmr.msra.gmra.mxu0 %v4669_v38 }
 0xae6   : > { %8100 = vmatpush3.bf16.msra.mxu0 %v8713_v30  ;;  %8115 = vmatprep.mubr.msk.bf16.mxu0 %vm11732_vm4, %v11665_v1  ;;  %vm11764_vm4 = vmmov %vm11750_vm0 }
 0xae7   : > { %8101 = vmatprep.subr.bf16.mxu0 %v11665_v1 }
 0xaea   : > { %8102 = vmatpush3.bf16.msra.mxu0 %v8714_v0 }
 0xaeb   : > { %8103 = vmatprep.subr.bf16.mxu0 %v11665_v1 }
 0xaee   : > { %8104 = vmatpush3.bf16.msra.mxu0 %v8715_v32 }
 0xaef   : > { %8105 = vmatprep.subr.bf16.mxu0 %v11665_v1 }
 0xaf2   : > { %8106 = vmatpush3.bf16.msra.mxu0 %v8716_v51 }
 0xaf3   : > { %8107 = vmatprep.subr.bf16.mxu0 %v11665_v1 }
 0xaf5   : > { %v8097_v27 = vpop.f32.mrf.mxu1 }
 0xaf6   : > { %8108 = vmatpush3.bf16.msra.mxu0 %v8717_v63  ;;  %v10697_v38 = vadd.f32 %v8097_v27, %v7218_v12 }
 0xaf7   : > { %8109 = vmatprep.subr.bf16.mxu0 %v11665_v1  ;;  %v4880_v23 = vpop.f32.mrf.mxu1 }
 0xaf8   : > { %v10693_v25 = vadd.f32 %v7218_v12, %v4880_v23 }
 0xaf9   : > { %v8098_v45 = vpop.f32.mrf.mxu1 }
 0xafa   : > { %8110 = vmatpush3.bf16.msra.mxu0 %v8718_v4  ;;  %v10695_v30 = vadd.f32 %v8098_v45, %v7218_v12 }
 0xafb   : > { %8111 = vmatprep.subr.bf16.mxu0 %v11665_v1  ;;  %v4883_v35 = vpop.f32.mrf.mxu1 }
 0xafc   : > { %v10699_v32 = vadd.f32 %v7218_v12, %v4883_v35 }
 0xafe   : > { %8112 = vmatpush3.bf16.msra.mxu0 %v8719_v11 }
 0xaff   : > { %8113 = vmatprep.subr.bf16.mxu0 %v11665_v1 }
 0xb02   : > { %8114 = vmatpush3.bf16.msra.mxu0 %v8720_v18 }
 0xb03   : > { %8153 = vmatprep.subr.bf16.mxu0 %v8721_v33 }
 0xb05   : > { %8116 = vmatmul.mubr.bf16.vlgmr.msra.gmra.mxu0 %v11733_v13 }
 0xb06   : > { %8154 = vmatpush3.bf16.msra.mxu0 %v8721_v33 }
 0xb07   : > { %8155 = vmatprep.subr.bf16.mxu0 %v8722_v58 }
 0xb0a   : > { %8156 = vmatpush3.bf16.msra.mxu0 %v8722_v58 }
 0xb0b   : > { %8157 = vmatprep.subr.bf16.mxu0 %v8723_v21 }
 0xb0e   : > { %8158 = vmatpush3.bf16.msra.mxu0 %v8723_v21 }
 0xb0f   : > { %8159 = vmatprep.subr.bf16.mxu0 %v8724_v60 }
 0xb12   : > { %8160 = vmatpush3.bf16.msra.mxu0 %v8724_v60 }
 0xb13   : > { %8161 = vmatprep.subr.bf16.mxu0 %v8725_v3 }
 0xb16   : > { %8162 = vmatpush3.bf16.msra.mxu0 %v8725_v3 }
 0xb17   : > { %8163 = vmatprep.subr.bf16.mxu0 %v8726_v50 }
 0xb1a   : > { %8164 = vmatpush3.bf16.msra.mxu0 %v8726_v50 }
 0xb1b   : > { %8165 = vmatprep.subr.bf16.mxu0 %v8727_v61 }
 0xb1e   : > { %8166 = vmatpush3.bf16.msra.mxu0 %v8727_v61 }
 0xb1f   : > { %8167 = vmatprep.subr.bf16.mxu0 %v8728_v40 }
 0xb22   : > { %8168 = vmatpush3.bf16.msra.mxu0 %v8728_v40 }
 0xb23   : > { %8249 = vmatprep.subr.mxu0 %v11734_v19 }
 0xba5   : > { %v10652_v7 = vpop.f32.mrf.mxu0 }
 0xba7   : > { %v10654_v59 = vpop.f32.mrf.mxu0 }
 0xba9   : > { %v10656_v34 = vpop.f32.mrf.mxu0 }
 0xbab   : > { %v10658_v9 = vpop.f32.mrf.mxu0 }
 0xbc5   : > { %v4994_v44 = vpop.f32.mrf.mxu0 }
 0xbc7   : > { %v8117_v2 = vpop.f32.mrf.mxu0 }
 0xbc9   : > { %v4997_v47 = vpop.f32.mrf.mxu0 }
 0xbca   : > { %v5001_v62 = vpack.c.bf16 %v4997_v47, %v4994_v44 }
 0xbcb   : > { %v8118_v49 = vpop.f32.mrf.mxu0 }
 0xbcc   : > { %8119 = vmatprep.subr.bf16.mxu1 %v5001_v62 }
 0xbcd   : > { %8120 = vmatpush3.bf16.msra.mxu1 %v5001_v62 }
 0xbce   : > { %8201 = vmatprep.subr.bf16.mxu1 %v8729_v5 }
 0xbd0   : > { %8122 = vmatmul.mubr.msk.bf16.vlgmr.msra.gmra.mxu1 %vm11736_vm11, %v11735_v10 }
 0xbd1   : > { %8125 = vmatprep.mubr.msk.bf16.mxu1 %vm11738_vm12, %v11737_v22  ;;  %8202 = vmatpush3.bf16.msra.mxu1 %v8729_v5  ;;  %v11765_v22 = vld [vmem:[#allocation33_spill] sm:$0xff] }
 0xbd2   : > { %8203 = vmatprep.subr.bf16.mxu1 %v8730_v46 }
 0xbd5   : > { %8204 = vmatpush3.bf16.msra.mxu1 %v8730_v46 }
 0xbd6   : > { %8205 = vmatprep.subr.bf16.mxu1 %v8731_v57 }
 0xbd8   : > { %8126 = vmatmul.mubr.msk.bf16.gmra.mxu1 %vm11740_vm8, %v11739_v42 }
 0xbd9   : > { %8129 = vmatprep.mubr.msk.bf16.mxu1 %vm11742_vm15, %v11741_v39  ;;  %8206 = vmatpush3.bf16.msra.mxu1 %v8731_v57 }
 0xbda   : > { %8207 = vmatprep.subr.bf16.mxu1 %v8732_v29 }
 0xbdd   : > { %8208 = vmatpush3.bf16.msra.mxu1 %v8732_v29 }
 0xbde   : > { %8209 = vmatprep.subr.bf16.mxu1 %v8733_v17 }
 0xbe0   : > { %8130 = vmatmul.mubr.msk.bf16.gmra.mxu1 %vm11744_vm13, %v11743_v16 }
 0xbe1   : > { %8133 = vmatprep.mubr.msk.bf16.mxu1 %vm11746_vm1, %v11745_v31  ;;  %8210 = vmatpush3.bf16.msra.mxu1 %v8733_v17 }
 0xbe8   : > { %8134 = vmatmul.mubr.msk.bf16.gmra.mxu1 %vm11748_vm3, %v11747_v24 }
 0xbe9   : > { %8137 = vmatprep.mubr.msk.bf16.mxu1 %vm11750_vm0, %v11749_v48 }
 0xbf0   : > { %8138 = vmatmul.mubr.msk.bf16.gmra.mxu1 %vm11752_vm10, %v11751_v54 }
 0xbf1   : > { %8141 = vmatprep.mubr.msk.bf16.mxu1 %vm11754_vm6, %v11753_v41 }
 0xbf8   : > { %8142 = vmatmul.mubr.msk.bf16.gmra.mxu1 %vm11756_vm2, %v11755_v26 }
 0xbf9   : > { %8145 = vmatprep.mubr.msk.bf16.mxu1 %vm11758_vm9, %v11757_v37 }
 0xc00   : > { %8146 = vmatmul.mubr.msk.bf16.gmra.mxu1 %vm11760_vm7, %v11759_v36 }
 0xc01   : > { %8149 = vmatprep.mubr.msk.bf16.mxu1 %vm11762_vm14, %v11761_v53 }
 0xc08   : > { %8150 = vmatmul.mubr.msk.bf16.gmra.mxu1 %vm11764_vm4, %v11763_v14 }
 0xc90   : > { %v8123_v43 = vpop.f32.mrf.mxu1 }
 0xc91   : > { %v5045_v4 = vadd.f32 %v8123_v43, %v10697_v38 }
 0xc92   : > { %v5036_v6 = vpop.f32.mrf.mxu1 }
 0xc93   : > { %v5037_v51 = vadd.f32 %v5036_v6, %v10693_v25  ;;  %v5165_v60 = vmax.f32 %v5045_v4, 0.0 }
 0xc94   : > { %v8124_v0 = vpop.f32.mrf.mxu1 }
 0xc95   : > { %v5048_v63 = vadd.f32 %v8124_v0, %v10695_v30  ;;  %v5163_v13 = vmax.f32 %v5037_v51, 0.0 }
 0xc96   : > { %v5039_v11 = vpop.f32.mrf.mxu1 }
 0xc97   : > { %v5040_v18 = vadd.f32 %v5039_v11, %v10699_v32  ;;  %v5166_v33 = vmax.f32 %v5048_v63, 0.0 }
 0xc98   : > { %v8127_v58 = vpop.f32.mrf.mxu1 }
 0xc99   : > { %v5164_v21 = vmax.f32 %v5040_v18, 0.0  ;;  %v5215_v61 = vpack.c.bf16 %v5166_v33, %v5165_v60  ;;  %v5061_v47 = vadd.f32 %v8127_v58, %v10697_v38 }
 0xc9a   : > { %v5052_v3 = vpop.f32.mrf.mxu1 }
 0xc9b   : > { %v5214_v50 = vpack.c.bf16 %v5164_v21, %v5163_v13  ;;  %v5053_v44 = vadd.f32 %v5052_v3, %v10693_v25  ;;  %v5169_v31 = vmax.f32 %v5061_v47, 0.0 }
 0xc9c   : > { %v8128_v40 = vpop.f32.mrf.mxu1 }
 0xc9d   : > { %v5064_v2 = vadd.f32 %v8128_v40, %v10695_v30  ;;  %8169 = vmatprep.mubr.bf16.mxu0 %v5214_v50  ;;  %v5167_v39 = vmax.f32 %v5053_v44, 0.0 }
 0xc9e   : > { %v5055_v62 = vpop.f32.mrf.mxu1  ;;  %8170 = vmatmul.mubr.bf16.vlgmr.msra.gmra.mxu0 %v5215_v61 }
 0xc9f   : > { %v5056_v49 = vadd.f32 %v5055_v62, %v10699_v32  ;;  %8250 = vmatpush3.xpose.msra.mxu0 %v11734_v19  ;;  %v5170_v10 = vmax.f32 %v5064_v2, 0.0 }
 0xca0   : > { %8254 = vmatprep.subr.mxu0 %v11765_v22  ;;  %v8131_v42 = vpop.f32.mrf.mxu1 }
 0xca1   : > { %v5168_v16 = vmax.f32 %v5056_v49, 0.0  ;;  %v5217_v54 = vpack.c.bf16 %v5170_v10, %v5169_v31  ;;  %v5077_v36 = vadd.f32 %v8131_v42, %v10697_v38 }
 0xca2   : > { %v5068_v24 = vpop.f32.mrf.mxu1 }
 0xca3   : > { %v5216_v48 = vpack.c.bf16 %v5168_v16, %v5167_v39  ;;  %v5069_v26 = vadd.f32 %v5068_v24, %v10693_v25  ;;  %v5173_v29 = vmax.f32 %v5077_v36, 0.0 }
 0xca4   : > { %v8132_v41 = vpop.f32.mrf.mxu1 }
 0xca5   : > { %v5080_v37 = vadd.f32 %v8132_v41, %v10695_v30  ;;  %8173 = vmatprep.mubr.bf16.mxu0 %v5216_v48  ;;  %v5171_v46 = vmax.f32 %v5069_v26, 0.0 }
 0xca6   : > { %v5071_v53 = vpop.f32.mrf.mxu1  ;;  %8174 = vmatmul.mubr.bf16.gmra.mxu0 %v5217_v54 }
 0xca7   : > { %v5072_v19 = vadd.f32 %v5071_v53, %v10699_v32  ;;  %v5174_v14 = vmax.f32 %v5080_v37, 0.0 }
 0xca8   : > { %v8135_v5 = vpop.f32.mrf.mxu1 }
 0xca9   : > { %v5172_v57 = vmax.f32 %v5072_v19, 0.0  ;;  %v5219_v23 = vpack.c.bf16 %v5174_v14, %v5173_v29  ;;  %v5093_v12 = vadd.f32 %v8135_v5, %v10697_v38 }
 0xcaa   : > { %v5084_v17 = vpop.f32.mrf.mxu1 }
 0xcab   : > { %v5218_v27 = vpack.c.bf16 %v5172_v57, %v5171_v46  ;;  %v5085_v35 = vadd.f32 %v5084_v17, %v10693_v25  ;;  %v5177_v18 = vmax.f32 %v5093_v12, 0.0 }
 0xcac   : > { %v8136_v45 = vpop.f32.mrf.mxu1 }
 0xcad   : > { %v5096_v43 = vadd.f32 %v8136_v45, %v10695_v30  ;;  %8177 = vmatprep.mubr.bf16.mxu0 %v5218_v27  ;;  %v5175_v4 = vmax.f32 %v5085_v35, 0.0 }
 0xcae   : > { %v5087_v6 = vpop.f32.mrf.mxu1  ;;  %8178 = vmatmul.mubr.bf16.gmra.mxu0 %v5219_v23 }
 0xcaf   : > { %v5088_v0 = vadd.f32 %v5087_v6, %v10699_v32  ;;  %v5178_v51 = vmax.f32 %v5096_v43, 0.0 }
 0xcb0   : > { %v8139_v63 = vpop.f32.mrf.mxu1 }
 0xcb1   : > { %v5176_v11 = vmax.f32 %v5088_v0, 0.0  ;;  %v5221_v13 = vpack.c.bf16 %v5178_v51, %v5177_v18  ;;  %v5109_v50 = vadd.f32 %v8139_v63, %v10697_v38 }
 0xcb2   : > { %v5100_v33 = vpop.f32.mrf.mxu1 }
 0xcb3   : > { %v5220_v58 = vpack.c.bf16 %v5176_v11, %v5175_v4  ;;  %v5101_v60 = vadd.f32 %v5100_v33, %v10693_v25  ;;  %v5181_v49 = vmax.f32 %v5109_v50, 0.0 }
 0xcb4   : > { %v8140_v21 = vpop.f32.mrf.mxu1 }
 0xcb5   : > { %v5112_v3 = vadd.f32 %v8140_v21, %v10695_v30  ;;  %8181 = vmatprep.mubr.bf16.mxu0 %v5220_v58  ;;  %v5179_v47 = vmax.f32 %v5101_v60, 0.0 }
 0xcb6   : > { %v5103_v61 = vpop.f32.mrf.mxu1  ;;  %8182 = vmatmul.mubr.bf16.gmra.mxu0 %v5221_v13 }
 0xcb7   : > { %v5104_v40 = vadd.f32 %v5103_v61, %v10699_v32  ;;  %v5182_v44 = vmax.f32 %v5112_v3, 0.0 }
 0xcb8   : > { %v8143_v2 = vpop.f32.mrf.mxu1 }
 0xcb9   : > { %v5180_v62 = vmax.f32 %v5104_v40, 0.0  ;;  %v5223_v39 = vpack.c.bf16 %v5182_v44, %v5181_v49  ;;  %v5125_v48 = vadd.f32 %v8143_v2, %v10697_v38 }
 0xcba   : > { %v5116_v10 = vpop.f32.mrf.mxu1 }
 0xcbb   : > { %v5222_v42 = vpack.c.bf16 %v5180_v62, %v5179_v47  ;;  %v5117_v31 = vadd.f32 %v5116_v10, %v10693_v25  ;;  %v5185_v19 = vmax.f32 %v5125_v48, 0.0  ;;  %v10743_v47 = vld [vmem:[%s11649_s24 + $0x1] ss:$0 sm:$0xff] }
 0xcbc   : > { %v8144_v16 = vpop.f32.mrf.mxu1 }
 0xcbd   : > { %v5128_v24 = vadd.f32 %v8144_v16, %v10695_v30  ;;  %8185 = vmatprep.mubr.bf16.mxu0 %v5222_v42  ;;  %v5183_v36 = vmax.f32 %v5117_v31, 0.0 }
 0xcbe   : > { %v5119_v54 = vpop.f32.mrf.mxu1  ;;  %8186 = vmatmul.mubr.bf16.gmra.mxu0 %v5223_v39 }
 0xcbf   : > { %v5120_v41 = vadd.f32 %v5119_v54, %v10699_v32  ;;  %v5186_v26 = vmax.f32 %v5128_v24, 0.0 }
 0xcc0   : > { %v8147_v37 = vpop.f32.mrf.mxu1 }
 0xcc1   : > { %v5184_v53 = vmax.f32 %v5120_v41, 0.0  ;;  %v5225_v46 = vpack.c.bf16 %v5186_v26, %v5185_v19  ;;  %v5141_v27 = vadd.f32 %v8147_v37, %v10697_v38 }
 0xcc2   : > { %v5132_v14 = vpop.f32.mrf.mxu1 }
 0xcc3   : > { %v5224_v5 = vpack.c.bf16 %v5184_v53, %v5183_v36  ;;  %v5133_v29 = vadd.f32 %v5132_v14, %v10693_v25  ;;  %v5189_v0 = vmax.f32 %v5141_v27, 0.0 }
 0xcc4   : > { %v8148_v57 = vpop.f32.mrf.mxu1 }
 0xcc5   : > { %v5144_v17 = vadd.f32 %v8148_v57, %v10695_v30  ;;  %8189 = vmatprep.mubr.bf16.mxu0 %v5224_v5  ;;  %v5187_v12 = vmax.f32 %v5133_v29, 0.0 }
 0xcc6   : > { %v5135_v23 = vpop.f32.mrf.mxu1  ;;  %8190 = vmatmul.mubr.bf16.gmra.mxu0 %v5225_v46 }
 0xcc7   : > { %v5136_v45 = vadd.f32 %v5135_v23, %v10699_v32  ;;  %v5190_v35 = vmax.f32 %v5144_v17, 0.0 }
 0xcc8   : > { %v8151_v43 = vpop.f32.mrf.mxu1 }
 0xcc9   : > { %v5188_v6 = vmax.f32 %v5136_v45, 0.0  ;;  %v5227_v4 = vpack.c.bf16 %v5190_v35, %v5189_v0  ;;  %v5157_v58 = vadd.f32 %v8151_v43, %v10697_v38  ;;  %v8736_v38 = vld [vmem:[#allocation22 + $0x40] sm:$0xff]  }
 0xcca   : > { %v5148_v51 = vpop.f32.mrf.mxu1 }
 0xccb   : > { %v5226_v63 = vpack.c.bf16 %v5188_v6, %v5187_v12  ;;  %v5149_v18 = vadd.f32 %v5148_v51, %v10693_v25  ;;  %v5193_v61 = vmax.f32 %v5157_v58, 0.0  ;;  %v8734_v25 = vld [vmem:[#allocation22 + $0x50] sm:$0xff]  }
 0xccc   : > { %v8152_v11 = vpop.f32.mrf.mxu1  ;;  %8211 = vmatprep.subr.bf16.mxu1 %v8734_v25 }
 0xccd   : > { %v5160_v33 = vadd.f32 %v8152_v11, %v10695_v30  ;;  %8193 = vmatprep.mubr.bf16.mxu0 %v5226_v63  ;;  %v5191_v3 = vmax.f32 %v5149_v18, 0.0  ;;  %8212 = vmatpush3.bf16.msra.mxu1 %v8734_v25  ;;  %v8735_v30 = vld [vmem:[#allocation22 + $0x48] sm:$0xff]  }
 0xcce   : > { %v5151_v13 = vpop.f32.mrf.mxu1  ;;  %8194 = vmatmul.mubr.bf16.gmra.mxu0 %v5227_v4  ;;  %8213 = vmatprep.subr.bf16.mxu1 %v8735_v30 }
 0xccf   : > { %v5152_v21 = vadd.f32 %v5151_v13, %v10699_v32  ;;  %v5194_v60 = vmax.f32 %v5160_v33, 0.0 }
 0xcd1   : > { %v5192_v50 = vmax.f32 %v5152_v21, 0.0  ;;  %v5229_v44 = vpack.c.bf16 %v5194_v60, %v5193_v61  ;;  %8214 = vmatpush3.bf16.msra.mxu1 %v8735_v30 }
 0xcd2   : > { %8215 = vmatprep.subr.bf16.mxu1 %v8736_v38 }
 0xcd3   : > { %v5228_v40 = vpack.c.bf16 %v5192_v50, %v5191_v3 }
 0xcd5   : > { %8197 = vmatprep.mubr.bf16.mxu0 %v5228_v40  ;;  %8216 = vmatpush3.bf16.msra.mxu1 %v8736_v38 }
 0xcd6   : > { %8198 = vmatmul.mubr.bf16.gmra.mxu0 %v5229_v44 }
 0xcd7   : > { %8251 = vmatprep.mubr.f32.mxu0 %v10570_v28 }
 0xcde   : > { %8252 = vmatmul.mubr.f32.vlgmr.msra.gmra.mxu0 %v10568_v52 }
 0xcdf   : > { %8255 = vmatpush3.xpose.msra.mxu0 %v11765_v22  ;;  %8256 = vmatprep.mubr.f32.mxu0 %v10601_v20 }
 0xce2   : > { %8257 = vmatmul.mubr.f32.vlgmr.msra.gmra.mxu0 %v10599_v56 }
 0xd5e   : > { %v8171_v32 = vpop.f32.mrf.mxu0 }
 0xd5f   : > { %v5327_v10 = vadd.f32 %v8171_v32, %v10743_v47 }
 0xd60   : > { %v5318_v2 = vpop.f32.mrf.mxu0 }
 0xd61   : > { %v5319_v62 = vadd.f32 %v10743_v47, %v5318_v2  ;;  %v5447_v54 = vmax.f32 %v5327_v10, 0.0 }
 0xd62   : > { %v8172_v22 = vpop.f32.mrf.mxu0 }
 0xd63   : > { %v5330_v49 = vadd.f32 %v8172_v22, %v10743_v47  ;;  %v5445_v24 = vmax.f32 %v5319_v62, 0.0 }
 0xd64   : > { %v5321_v42 = vpop.f32.mrf.mxu0 }
 0xd65   : > { %v5322_v39 = vadd.f32 %v10743_v47, %v5321_v42  ;;  %v5448_v16 = vmax.f32 %v5330_v49, 0.0 }
 0xd66   : > { %v8175_v31 = vpop.f32.mrf.mxu0 }
 0xd67   : > { %v5446_v48 = vmax.f32 %v5322_v39, 0.0  ;;  %v5497_v37 = vpack.c.bf16 %v5448_v16, %v5447_v54  ;;  %v5343_v14 = vadd.f32 %v8175_v31, %v10743_v47 }
 0xd68   : > { %v5334_v41 = vpop.f32.mrf.mxu0 }
 0xd69   : > { %v5496_v26 = vpack.c.bf16 %v5446_v48, %v5445_v24  ;;  %v5335_v53 = vadd.f32 %v10743_v47, %v5334_v41  ;;  %v5451_v23 = vmax.f32 %v5343_v14, 0.0 }
 0xd6a   : > { %v8176_v36 = vpop.f32.mrf.mxu0 }
 0xd6b   : > { %v5346_v19 = vadd.f32 %v8176_v36, %v10743_v47  ;;  %8217 = vmatprep.mubr.bf16.mxu1 %v5496_v26  ;;  %v5449_v17 = vmax.f32 %v5335_v53, 0.0 }
 0xd6c   : > { %v5337_v5 = vpop.f32.mrf.mxu0  ;;  %8218 = vmatmul.mubr.bf16.vlgmr.msra.gmra.mxu1 %v5497_v37 }
 0xd6d   : > { %v5338_v46 = vadd.f32 %v10743_v47, %v5337_v5  ;;  %v5452_v57 = vmax.f32 %v5346_v19, 0.0 }
 0xd6e   : > { %v8179_v29 = vpop.f32.mrf.mxu0 }
 0xd6f   : > { %v5450_v27 = vmax.f32 %v5338_v46, 0.0  ;;  %v5499_v43 = vpack.c.bf16 %v5452_v57, %v5451_v23  ;;  %v5359_v51 = vadd.f32 %v8179_v29, %v10743_v47 }
 0xd70   : > { %v5350_v45 = vpop.f32.mrf.mxu0 }
 0xd71   : > { %v5498_v35 = vpack.c.bf16 %v5450_v27, %v5449_v17  ;;  %v5351_v6 = vadd.f32 %v10743_v47, %v5350_v45  ;;  %v5455_v13 = vmax.f32 %v5359_v51, 0.0 }
 0xd72   : > { %v8180_v12 = vpop.f32.mrf.mxu0 }
 0xd73   : > { %v5362_v0 = vadd.f32 %v8180_v12, %v10743_v47  ;;  %8221 = vmatprep.mubr.bf16.mxu1 %v5498_v35  ;;  %v5453_v33 = vmax.f32 %v5351_v6, 0.0 }
 0xd74   : > { %v5353_v63 = vpop.f32.mrf.mxu0  ;;  %8222 = vmatmul.mubr.bf16.gmra.mxu1 %v5499_v43 }
 0xd75   : > { %v5354_v4 = vadd.f32 %v10743_v47, %v5353_v63  ;;  %v5456_v11 = vmax.f32 %v5362_v0, 0.0 }
 0xd76   : > { %v8183_v18 = vpop.f32.mrf.mxu0 }
 0xd77   : > { %v5454_v58 = vmax.f32 %v5354_v4, 0.0  ;;  %v5501_v3 = vpack.c.bf16 %v5456_v11, %v5455_v13  ;;  %v5375_v44 = vadd.f32 %v8183_v18, %v10743_v47 }
 0xd78   : > { %v5366_v21 = vpop.f32.mrf.mxu0 }
 0xd79   : > { %v5500_v60 = vpack.c.bf16 %v5454_v58, %v5453_v33  ;;  %v5367_v61 = vadd.f32 %v10743_v47, %v5366_v21  ;;  %v5459_v62 = vmax.f32 %v5375_v44, 0.0 }
 0xd7a   : > { %v8184_v50 = vpop.f32.mrf.mxu0 }
 0xd7b   : > { %v5378_v40 = vadd.f32 %v8184_v50, %v10743_v47  ;;  %8225 = vmatprep.mubr.bf16.mxu1 %v5500_v60  ;;  %v5457_v2 = vmax.f32 %v5367_v61, 0.0 }
 0xd7c   : > { %v5369_v25 = vpop.f32.mrf.mxu0  ;;  %8226 = vmatmul.mubr.bf16.gmra.mxu1 %v5501_v3 }
 0xd7d   : > { %v5370_v30 = vadd.f32 %v10743_v47, %v5369_v25  ;;  %v5460_v38 = vmax.f32 %v5378_v40, 0.0 }
 0xd7e   : > { %v8187_v32 = vpop.f32.mrf.mxu0 }
 0xd7f   : > { %v5458_v22 = vmax.f32 %v5370_v30, 0.0  ;;  %v5503_v42 = vpack.c.bf16 %v5460_v38, %v5459_v62  ;;  %v5391_v24 = vadd.f32 %v8187_v32, %v10743_v47 }
 0xd80   : > { %v5382_v49 = vpop.f32.mrf.mxu0 }
 0xd81   : > { %v5502_v10 = vpack.c.bf16 %v5458_v22, %v5457_v2  ;;  %v5383_v16 = vadd.f32 %v10743_v47, %v5382_v49  ;;  %v5463_v53 = vmax.f32 %v5391_v24, 0.0 }
 0xd82   : > { %v8188_v39 = vpop.f32.mrf.mxu0 }
 0xd83   : > { %v5394_v31 = vadd.f32 %v8188_v39, %v10743_v47  ;;  %8229 = vmatprep.mubr.bf16.mxu1 %v5502_v10  ;;  %v5461_v37 = vmax.f32 %v5383_v16, 0.0 }
 0xd84   : > { %v5385_v48 = vpop.f32.mrf.mxu0  ;;  %8230 = vmatmul.mubr.bf16.gmra.mxu1 %v5503_v42 }
 0xd85   : > { %v5386_v54 = vadd.f32 %v10743_v47, %v5385_v48  ;;  %v5464_v41 = vmax.f32 %v5394_v31, 0.0  ;;  %v11766_v48 = vld [vmem:[#allocation35_spill] sm:$0xff] }
 0xd86   : > { %v8191_v26 = vpop.f32.mrf.mxu0 }
 0xd87   : > { %v5462_v36 = vmax.f32 %v5386_v54, 0.0  ;;  %v5505_v5 = vpack.c.bf16 %v5464_v41, %v5463_v53  ;;  %v5407_v17 = vadd.f32 %v8191_v26, %v10743_v47  ;;  %v11768_v53 = vmov 4  }
 0xd88   : > { %v5398_v19 = vpop.f32.mrf.mxu0 }
 0xd89   : > { %v5504_v14 = vpack.c.bf16 %v5462_v36, %v5461_v37  ;;  %v5399_v57 = vadd.f32 %v10743_v47, %v5398_v19  ;;  %v5467_v6 = vmax.f32 %v5407_v17, 0.0  ;;  %v11767_v36 = vmov 1  }
 0xd8a   : > { %v8192_v46 = vpop.f32.mrf.mxu0  ;;  %v11769_v19 = vmov 6  }
 0xd8b   : > { %v5410_v29 = vadd.f32 %v8192_v46, %v10743_v47  ;;  %8233 = vmatprep.mubr.bf16.mxu1 %v5504_v14  ;;  %v5465_v43 = vmax.f32 %v5399_v57, 0.0  ;;  %v11770_v14 = vmov 7   ;;  %v11771_v57 = vmov 0  }
 0xd8c   : > { %v5401_v27 = vpop.f32.mrf.mxu0  ;;  %8234 = vmatmul.mubr.bf16.gmra.mxu1 %v5505_v5 }
 0xd8d   : > { %v5402_v23 = vadd.f32 %v10743_v47, %v5401_v27  ;;  %v5468_v45 = vmax.f32 %v5410_v29, 0.0  ;;  %v11772_v29 = vld [vmem:[#allocation54_spill] sm:$0xff] }
 0xd8e   : > { %v8195_v35 = vpop.f32.mrf.mxu0 }
 0xd8f   : > { %v5466_v12 = vmax.f32 %v5402_v23, 0.0  ;;  %v5507_v63 = vpack.c.bf16 %v5468_v45, %v5467_v6  ;;  %v5423_v33 = vadd.f32 %v8195_v35, %v10743_v47 }
 0xd90   : > { %v5414_v0 = vpop.f32.mrf.mxu0 }
 0xd91   : > { %v5506_v51 = vpack.c.bf16 %v5466_v12, %v5465_v43  ;;  %v5415_v11 = vadd.f32 %v10743_v47, %v5414_v0  ;;  %v5471_v61 = vmax.f32 %v5423_v33, 0.0  ;;  %v11773_v12 = vld [vmem:[#allocation37_spill] sm:$0xff] }
 0xd92   : > { %v8196_v4 = vpop.f32.mrf.mxu0  ;;  %vm11774_vm15 = vcmp.lt.s32.totalorder %v11773_v12, 1  ;;  %vm11775_vm10 = vcmp.lt.s32.totalorder %v11773_v12, 2  ;;  %vm11776_vm14 = vcmp.lt.s32.totalorder %v11773_v12, 4 }
 0xd93   : > { %v5426_v18 = vadd.f32 %v8196_v4, %v10743_v47  ;;  %8237 = vmatprep.mubr.bf16.mxu1 %v5506_v51  ;;  %v5469_v3 = vmax.f32 %v5415_v11, 0.0 }
 0xd94   : > { %v5417_v58 = vpop.f32.mrf.mxu0  ;;  %8238 = vmatmul.mubr.bf16.gmra.mxu1 %v5507_v63 }
 0xd95   : > { %v5418_v13 = vadd.f32 %v10743_v47, %v5417_v58  ;;  %v5472_v21 = vmax.f32 %v5426_v18, 0.0 }
 0xd96   : > { %v8199_v60 = vpop.f32.mrf.mxu0 }
 0xd97   : > { %v5470_v50 = vmax.f32 %v5418_v13, 0.0  ;;  %v5509_v25 = vpack.c.bf16 %v5472_v21, %v5471_v61  ;;  %v5439_v22 = vadd.f32 %v8199_v60, %v10743_v47 }
 0xd98   : > { %v5430_v40 = vpop.f32.mrf.mxu0 }
 0xd99   : > { %v5508_v44 = vpack.c.bf16 %v5470_v50, %v5469_v3  ;;  %v5431_v38 = vadd.f32 %v10743_v47, %v5430_v40  ;;  %v5475_v31 = vmax.f32 %v5439_v22, 0.0 }
 0xd9a   : > { %v8200_v30 = vpop.f32.mrf.mxu0 }
 0xd9b   : > { %v5442_v32 = vadd.f32 %v8200_v30, %v10743_v47  ;;  %8241 = vmatprep.mubr.bf16.mxu1 %v5508_v44  ;;  %v5473_v10 = vmax.f32 %v5431_v38, 0.0 }
 0xd9c   : > { %v5433_v2 = vpop.f32.mrf.mxu0  ;;  %8242 = vmatmul.mubr.bf16.gmra.mxu1 %v5509_v25 }
 0xd9d   : > { %v5434_v62 = vadd.f32 %v10743_v47, %v5433_v2  ;;  %v5476_v42 = vmax.f32 %v5442_v32, 0.0 }
 0xd9e   : > { %v8253_v49 = vpop.f32.mrf.mxu0 }
 0xd9f   : > { %v5474_v39 = vmax.f32 %v5434_v62, 0.0  ;;  %v5803_v16 = vmul.f32 2.0, %v8253_v49  ;;  %v5511_v41 = vpack.c.bf16 %v5476_v42, %v5475_v31 }
 0xda0   : > { %v5793_v26 = vpop.f32.mrf.mxu0 }
 0xda1   : > { %v5510_v24 = vpack.c.bf16 %v5474_v39, %v5473_v10  ;;  %v10778_v54 = vsub.f32 %v5803_v16, %v11766_v48  ;;  %v5802_v37 = vmul.f32 2.0, %v5793_v26 }
 0xda2   : > { %v8258_v5 = vpop.f32.mrf.mxu0 }
 0xda3   : > { %5851 = vperm.xlu1 %8506, %v10778_v54   ;;  %5813 = vperm.xlu0 %8505, %v10778_v54   ;;  %v10787_v47 = vsub.f32 %v5802_v37, %v11766_v48  ;;  %v6188_v46 = vmul.f32 2.0, %v8258_v5 }
 0xda4   : > { %8245 = vmatprep.mubr.bf16.mxu1 %v5510_v24  ;;  %v6178_v27 = vpop.f32.mrf.mxu0 }
 0xda5   : > { %8246 = vmatmul.mubr.bf16.gmra.mxu1 %v5511_v41  ;;  %v10810_v17 = vsub.f32 %v6188_v46, %v11772_v29  ;;  %v6187_v23 = vmul.f32 2.0, %v6178_v27 }
 0xda7   : > { %8507 = vset.pattern.permute.xlu1 %v11709_v55  ;;  %8510 = vset.pattern.permute.xlu0 %v11700_v15  ;;  %v10821_v45 = vsub.f32 %v6187_v23, %v11772_v29 }
 0xda8   : > { %5889 = vperm.xlu1 %8507, %v10778_v54   ;;  %6003 = vperm.xlu0 %8510, %v10778_v54  }
 0xdac   : > { %8508 = vset.pattern.permute.xlu1 %v11698_v8  ;;  %8514 = vset.pattern.permute.xlu0 %v11767_v36 }
 0xdad   : > { %5927 = vperm.xlu1 %8508, %v10778_v54   ;;  %5847 = vperm.xlu0 %8514, %v10787_v47  }
 0xdb1   : > { %8509 = vset.pattern.permute.xlu1 %v11768_v53  ;;  %8516 = vset.pattern.permute.xlu0 %v11698_v8 }
 0xdb2   : > { %5965 = vperm.xlu1 %8509, %v10778_v54   ;;  %5923 = vperm.xlu0 %8516, %v10787_v47  }
 0xdb6   : > { %8511 = vset.pattern.permute.xlu1 %v11769_v19  ;;  %8517 = vset.pattern.permute.xlu0 %v11768_v53 }
 0xdb7   : > { %6041 = vperm.xlu1 %8511, %v10778_v54   ;;  %5961 = vperm.xlu0 %8517, %v10787_v47  }
 0xdbb   : > { %8512 = vset.pattern.permute.xlu1 %v11770_v14  ;;  %8519 = vset.pattern.permute.xlu0 %v11769_v19 }
 0xdbc   : > { %6079 = vperm.xlu1 %8512, %v10778_v54   ;;  %6037 = vperm.xlu0 %8519, %v10787_v47  }
 0xdc0   : > { %8513 = vset.pattern.permute.xlu1 %v11771_v57  ;;  %8520 = vset.pattern.permute.xlu0 %v11770_v14 }
 0xdc1   : > { %6075 = vperm.xlu0 %8520, %v10787_v47   ;;  %5808 = vperm.xlu1 %8513, %v10787_v47  }
 0xdc5   : > { %8521 = vset.pattern.permute.xlu0 %v11771_v57  ;;  %8515 = vset.pattern.permute.xlu1 %v11709_v55 }
 0xdc6   : > { %6198 = vperm.xlu0 %8521, %v10810_v17   ;;  %5885 = vperm.xlu1 %8515, %v10787_v47  }
 0xdca   : > { %8528 = vset.pattern.permute.xlu0 %v11770_v14  ;;  %8518 = vset.pattern.permute.xlu1 %v11700_v15 }
 0xdcb   : > { %6464 = vperm.xlu0 %8528, %v10810_v17   ;;  %5999 = vperm.xlu1 %8518, %v10787_v47  }
 0xdcf   : > { %8531 = vset.pattern.permute.xlu0 %v11709_v55  ;;  %8522 = vset.pattern.permute.xlu1 %v11767_v36 }
 0xdd0   : > { %6270 = vperm.xlu0 %8531, %v10821_v45   ;;  %6236 = vperm.xlu1 %8522, %v10810_v17  }
 0xdd4   : > { %8532 = vset.pattern.permute.xlu0 %v11698_v8  ;;  %8523 = vset.pattern.permute.xlu1 %v11709_v55 }
 0xdd5   : > { %6308 = vperm.xlu0 %8532, %v10821_v45   ;;  %6274 = vperm.xlu1 %8523, %v10810_v17  }
 0xdd9   : > { %8534 = vset.pattern.permute.xlu0 %v11700_v15  ;;  %8524 = vset.pattern.permute.xlu1 %v11698_v8 }
 0xdda   : > { %6384 = vperm.xlu0 %8534, %v10821_v45   ;;  %6312 = vperm.xlu1 %8524, %v10810_v17  }
 0xdde   : > { %8535 = vset.pattern.permute.xlu0 %v11769_v19  ;;  %8525 = vset.pattern.permute.xlu1 %v11768_v53 }
 0xddf   : > { %6422 = vperm.xlu0 %8535, %v10821_v45   ;;  %6350 = vperm.xlu1 %8525, %v10810_v17  }
 0xde3   : > { %8526 = vset.pattern.permute.xlu1 %v11700_v15  ;;  %8539 = vset.pattern.permute.xlu0 %v11709_v55 }
 0xde4   : > { %6388 = vperm.xlu1 %8526, %v10810_v17  }
 0xde8   : > { %8527 = vset.pattern.permute.xlu1 %v11769_v19 }
 0xde9   : > { %6426 = vperm.xlu1 %8527, %v10810_v17  }
 0xded   : > { %8529 = vset.pattern.permute.xlu1 %v11771_v57 }
 0xdee   : > { %6193 = vperm.xlu1 %8529, %v10821_v45  }
 0xdf2   : > { %8530 = vset.pattern.permute.xlu1 %v11767_v36 }
 0xdf3   : > { %6232 = vperm.xlu1 %8530, %v10821_v45  }
 0xdf7   : > { %8533 = vset.pattern.permute.xlu1 %v11768_v53 }
 0xdf8   : > { %6346 = vperm.xlu1 %8533, %v10821_v45  }
 0xdfc   : > { %8536 = vset.pattern.permute.xlu1 %v11770_v14 }
 0xdfd   : > { %6460 = vperm.xlu1 %8536, %v10821_v45  }
 0xe01   : > { %8537 = vset.pattern.permute.xlu1 %v11771_v57 }
 0xe1e   : > { %v5852_v35 = vpop.permute.xlu1 %5851  ;;  %v5814_v43 = vpop.permute.xlu0 %5813 }
 0xe1f   : > { %vm5855_vm11 = vcmp.gt.f32.partialorder %v10778_v54, %v5852_v35  ;;  %vm5857_vm12 = vcmp.eq.f32.partialorder %v10778_v54, %v5852_v35  ;;  %vm5817_vm8 = vcmp.gt.f32.partialorder %v10778_v54, %v5814_v43 }
 0xe20   : > { %vm5859_vm13 = vmand %vm5857_vm12, %vm11774_vm15  ;;  %v7272_v6 = vsel %vm5817_vm8, 1.0, %v11665_v1 }
 0xe21   : > { %v5831_v0 = vsel %vm11570_vm5, %v7272_v6, 0.0  ;;  %vm5861_vm1 = vmor %vm5855_vm11, %vm5859_vm13  ;;  %vm11777_vm13 = vcmp.lt.s32.totalorder %v11773_v12, 3 }
 0xe22   : > { %5832 = vadd.xlane.f32.xlu0 %v5831_v0  ;;  %v7274_v51 = vsel %vm5861_vm1, 1.0, %v11665_v1 }
 0xe23   : > { %v5890_v63 = vpop.permute.xlu1 %5889  ;;  %v6004_v4 = vpop.permute.xlu0 %6003  ;;  %v5869_v11 = vsel %vm11570_vm5, %v7274_v51, 0.0 }
 0xe24   : > { %vm5895_vm3 = vcmp.eq.f32.partialorder %v10778_v54, %v5890_v63  ;;  %vm5893_vm0 = vcmp.gt.f32.partialorder %v10778_v54, %v5890_v63 }
 0xe25   : > { %vm5897_vm6 = vmand %vm5895_vm3, %vm11775_vm10 }
 0xe26   : > { %5870 = vadd.xlane.f32.xlu0 %v5869_v11  ;;  %vm5899_vm2 = vmor %vm5893_vm0, %vm5897_vm6 }
 0xe27   : > { %v7276_v58 = vsel %vm5899_vm2, 1.0, %v11665_v1  ;;  %vm11778_vm0 = vmmov %vm11777_vm13 }
 0xe28   : > { %v5928_v18 = vpop.permute.xlu1 %5927  ;;  %v10866_v33 = vpop.permute.xlu0 %5847  ;;  %v5907_v13 = vsel %vm11570_vm5, %v7276_v58, 0.0 }
 0xe29   : > { %vm5933_vm12 = vcmp.eq.f32.partialorder %v10778_v54, %v5928_v18  ;;  %vm5931_vm15 = vcmp.gt.f32.partialorder %v10778_v54, %v5928_v18 }
 0xe2a   : > { %5908 = vadd.xlane.f32.xlu0 %v5907_v13  ;;  %vm5935_vm1 = vmand %vm5933_vm12, %vm11777_vm13 }
 0xe2d   : > { %v5966_v21 = vpop.permute.xlu1 %5965  ;;  %v5924_v60 = vpop.permute.xlu0 %5923 }
 0xe2e   : > { %vm5971_vm9 = vcmp.eq.f32.partialorder %v10778_v54, %v5966_v21  ;;  %vm5969_vm7 = vcmp.gt.f32.partialorder %v10778_v54, %v5966_v21  ;;  %vm5932_vm8 = vcmp.eq.f32.partialorder %v10787_v47, %v5924_v60  ;;  %vm5930_vm3 = vcmp.gt.f32.partialorder %v10787_v47, %v5924_v60 }
 0xe2f   : > { %vm5973_vm4 = vmand %vm5971_vm9, %vm11776_vm14  ;;  %vm11779_vm9 = vcmp.lt.s32.totalorder %v11773_v12, 7 }
 0xe30   : > { %vm5975_vm11 = vmor %vm5969_vm7, %vm5973_vm4 }
 0xe31   : > { %v7280_v61 = vsel %vm5975_vm11, 1.0, %v11665_v1  ;;  %vm5934_vm10 = vmand %vm5932_vm8, %vm11778_vm0  ;;  %vm6009_vm11 = vcmp.eq.f32.partialorder %v10778_v54, %v6004_v4  ;;  %vm11782_vm0 = vcmp.lt.s32.totalorder %v11773_v12, 6 }
 0xe32   : > { %v6042_v3 = vpop.permute.xlu1 %6041  ;;  %v10874_v50 = vpop.permute.xlu0 %5961  ;;  %v5983_v40 = vsel %vm11570_vm5, %v7280_v61, 0.0  ;;  %vm10891_vm4 = vmor %vm5931_vm15, %vm5935_vm1  ;;  %vm6007_vm15 = vcmp.gt.f32.partialorder %v10778_v54, %v6004_v4  ;;  %vm11783_vm1 = vcmp.lt.s32.totalorder %v11773_v12, 5 }
 0xe33   : > { %5984 = vadd.xlane.f32.xlu0 %v5983_v40  ;;  %vm5936_vm12 = vmor %vm5930_vm3, %vm5934_vm10  ;;  %vm11784_vm3 = vcmask 64512   ;;  %vm6047_vm10 = vcmp.eq.f32.partialorder %v10778_v54, %v6042_v3  ;;  %v7278_v42 = vsel %vm10891_vm4, 1.0, %v11665_v1 }
 0xe34   : > { %v7277_v10 = vsel %vm5936_vm12, 1.0, %v11665_v1 }
 0xe37   : > { %v6080_v44 = vpop.permute.xlu1 %6079  ;;  %v6038_v25 = vpop.permute.xlu0 %6037 }
 0xe38   : > { %vm6085_vm6 = vcmp.eq.f32.partialorder %v10778_v54, %v6080_v44  ;;  %vm6083_vm2 = vcmp.gt.f32.partialorder %v10778_v54, %v6080_v44  ;;  %vm6046_vm14 = vcmp.eq.f32.partialorder %v10787_v47, %v6038_v25  ;;  %vm6044_vm13 = vcmp.gt.f32.partialorder %v10787_v47, %v6038_v25 }
 0xe39   : > { %vm6087_vm7 = vmand %vm6085_vm6, %vm11779_vm9 }
 0xe3a   : > { %vm6089_vm8 = vmor %vm6083_vm2, %vm6087_vm7 }
 0xe3b   : > { %vm6048_vm5 = vmand %vm6046_vm14, %vm11782_vm0  ;;  %v7286_v2 = vsel %vm6089_vm8, 1.0, %v11665_v1 }
 0xe3c   : > { %v10896_v38 = vpop.permute.xlu0 %6075  ;;  %v5809_v32 = vpop.permute.xlu1 %5808  ;;  %vm6011_vm9 = vmand %vm6009_vm11, %vm11783_vm1  ;;  %v6097_v62 = vsel %vm11784_vm3, %v7286_v2, 0.0  ;;  %vm6045_vm11 = vcmp.gt.f32.partialorder %v10778_v54, %v6042_v3  ;;  %vm5856_vm1 = vcmp.eq.f32.partialorder %v10787_v47, %v10866_v33 }
 0xe3d   : > { %vm5816_vm6 = vcmp.gt.f32.partialorder %v10787_v47, %v5809_v32  ;;  %6098 = vadd.xlane.f32.xlu0 %v6097_v62  ;;  %vm11785_vm2 = vmmov %vm11784_vm3 }
 0xe3e   : > { %v7271_v22 = vsel %vm5816_vm6, 1.0, %v11665_v1  ;;  %vm6050_vm7 = vmor %vm6044_vm13, %vm6048_vm5  ;;  %vm5854_vm13 = vcmp.gt.f32.partialorder %v10787_v47, %v10866_v33 }
 0xe3f   : > { %v5828_v49 = vsel %vm11785_vm2, %v7271_v22, 0.0  ;;  %vm6013_vm14 = vmor %vm6007_vm15, %vm6011_vm9  ;;  %v7283_v48 = vsel %vm6050_vm7, 1.0, %v11665_v1  ;;  %vm11789_vm15 = vcmp.lt.s32.totalorder %v11773_v12, 1 }
 0xe40   : > { %5829 = vadd.xlane.f32.xlu1 %v5828_v49  ;;  %vm11786_vm8 = vmmov %vm11782_vm0  ;;  %v7282_v41 = vsel %vm6013_vm14, 1.0, %v11665_v1  ;;  %vm5970_vm14 = vcmp.eq.f32.partialorder %v10787_v47, %v10874_v50 }
 0xe41   : > { %v6199_v39 = vpop.permute.xlu0 %6198  ;;  %vm6049_vm0 = vmand %vm6047_vm10, %vm11786_vm8  ;;  %v5886_v31 = vpop.permute.xlu1 %5885  ;;  %v6021_v5 = vsel %vm11785_vm2, %v7282_v41, 0.0  ;;  %vm11791_vm8 = vcmp.lt.s32.totalorder %v11773_v12, 2 }
 0xe42   : > { %vm11787_vm6 = vmmov %vm11785_vm2  ;;  %vm6202_vm4 = vcmp.gt.f32.partialorder %v10810_v17, %v6199_v39  ;;  %vm5894_vm10 = vcmp.eq.f32.partialorder %v10787_v47, %v5886_v31 }
 0xe43   : > { %v5942_v16 = vsel %vm11787_vm6, %v7277_v10, 0.0  ;;  %vm11788_vm5 = vmmov %vm11785_vm2  ;;  %v7288_v37 = vsel %vm6202_vm4, 1.0, %v11665_v1  ;;  %vm11794_vm4 = vcmp.lt.s32.totalorder %v11773_v12, 4 }
 0xe44   : > { %5943 = vadd.xlane.f32.xlu0 %v5942_v16  ;;  %v5945_v24 = vsel %vm11788_vm5, %v7278_v42, 0.0  ;;  %vm6051_vm12 = vmor %vm6045_vm11, %vm6049_vm0  ;;  %vm5892_vm11 = vcmp.gt.f32.partialorder %v10787_v47, %v5886_v31 }
 0xe45   : > { %5946 = vadd.xlane.f32.xlu1 %v5945_v24  ;;  %vm5858_vm9 = vmand %vm5856_vm1, %vm11789_vm15  ;;  %v7284_v46 = vsel %vm6051_vm12, 1.0, %v11665_v1 }
 0xe46   : > { %vm11790_vm3 = vmmov %vm11785_vm2  ;;  %v6000_v26 = vpop.permute.xlu1 %5999 }
 0xe47   : > { %v6056_v54 = vsel %vm11790_vm3, %v7283_v48, 0.0  ;;  %vm5860_vm7 = vmor %vm5854_vm13, %vm5858_vm9  ;;  %vm6008_vm1 = vcmp.eq.f32.partialorder %v10787_v47, %v6000_v26  ;;  %vm5968_vm3 = vcmp.gt.f32.partialorder %v10787_v47, %v10874_v50  ;;  %v6465_v50 = vpop.permute.xlu0 %6464 }
 0xe48   : > { %6057 = vadd.xlane.f32.xlu0 %v6056_v54  ;;  %vm5896_vm0 = vmand %vm5894_vm10, %vm11791_vm8  ;;  %v7273_v43 = vsel %vm5860_vm7, 1.0, %v11665_v1  ;;  %vm11797_vm10 = vcmp.lt.s32.totalorder %v11773_v12, 5  ;;  %vm11798_vm8 = vcmp.lt.s32.totalorder %v11773_v12, 1  ;;  %vm6006_vm7 = vcmp.gt.f32.partialorder %v10787_v47, %v6000_v26 }
 0xe49   : > { %6022 = vadd.xlane.f32.xlu1 %v6021_v5  ;;  %vm11792_vm6 = vmmov %vm11785_vm2 }
 0xe4a   : > { %v6216_v29 = vsel %vm11792_vm6, %v7288_v37, 0.0  ;;  %vm11793_vm5 = vmmov %vm11785_vm2 }
 0xe4b   : > { %v6059_v27 = vsel %vm11793_vm5, %v7284_v46, 0.0  ;;  %vm10943_vm15 = vmand %vm5970_vm14, %vm11794_vm4  ;;  %v6237_v35 = vpop.permute.xlu1 %6236  ;;  %vm6084_vm14 = vcmp.eq.f32.partialorder %v10787_v47, %v10896_v38  ;;  %v5866_v6 = vsel %vm11793_vm5, %v7273_v43, 0.0  ;;  %vm11799_vm4 = vcmp.lt.s32.totalorder %v11773_v12, 7 }
 0xe4c   : > { %6217 = vadd.xlane.f32.xlu0 %v6216_v29  ;;  %vm5898_vm12 = vmor %vm5892_vm11, %vm5896_vm0  ;;  %vm6240_vm13 = vcmp.gt.f32.partialorder %v10810_v17, %v6237_v35  ;;  %vm6242_vm9 = vcmp.eq.f32.partialorder %v10810_v17, %v6237_v35 }
 0xe4d   : > { %6060 = vadd.xlane.f32.xlu1 %v6059_v27  ;;  %vm6010_vm2 = vmand %vm6008_vm1, %vm11797_vm10  ;;  %v7275_v51 = vsel %vm5898_vm12, 1.0, %v11665_v1 }
 0xe4e   : > { %vm6244_vm6 = vmand %vm6242_vm9, %vm11798_vm8 }
 0xe4f   : > { %vm6246_vm11 = vmor %vm6240_vm13, %vm6244_vm6 }
 0xe50   : > { %v6275_v0 = vpop.permute.xlu1 %6274  ;;  %vm5974_vm0 = vmor %vm5968_vm3, %vm10943_vm15  ;;  %v7290_v4 = vsel %vm6246_vm11, 1.0, %v11665_v1  ;;  %vm11806_vm15 = vcmp.lt.s32.totalorder %v11773_v12, 2 }
 0xe51   : > { %5867 = vadd.xlane.f32.xlu1 %v5866_v6  ;;  %vm6280_vm1 = vcmp.eq.f32.partialorder %v10810_v17, %v6275_v0  ;;  %vm10966_vm10 = vmand %vm6084_vm14, %vm11799_vm4  ;;  %vm6278_vm9 = vcmp.gt.f32.partialorder %v10810_v17, %v6275_v0  ;;  %v7279_v58 = vsel %vm5974_vm0, 1.0, %v11665_v1  ;;  %vm6082_vm14 = vcmp.gt.f32.partialorder %v10787_v47, %v10896_v38  ;;  %v10999_v38 = vpop.permute.xlu0 %6270 }
 0xe52   : > { %vm10972_vm13 = vmor %vm6006_vm7, %vm6010_vm2  ;;  %vm11809_vm0 = vcmp.lt.s32.totalorder %v11773_v12, 3 }
 0xe53   : > { %vm11804_vm12 = vmmov %vm11793_vm5  ;;  %v7281_v47 = vsel %vm10972_vm13, 1.0, %v11665_v1 }
 0xe54   : > { %v6254_v18 = vsel %vm11804_vm12, %v7290_v4, 0.0  ;;  %vm11805_vm8 = vmmov %vm11793_vm5 }
 0xe55   : > { %v5904_v33 = vsel %vm11805_vm8, %v7275_v51, 0.0  ;;  %vm6282_vm3 = vmand %vm6280_vm1, %vm11806_vm15  ;;  %6255 = vadd.xlane.f32.xlu0 %v6254_v18  ;;  %v6313_v13 = vpop.permute.xlu1 %6312  ;;  %v11003_v22 = vpop.permute.xlu0 %6308  ;;  %vm11813_vm15 = vcmp.lt.s32.totalorder %v11773_v12, 4 }
 0xe56   : > { %5905 = vadd.xlane.f32.xlu1 %v5904_v33  ;;  %vm6284_vm6 = vmor %vm6278_vm9, %vm6282_vm3  ;;  %vm6316_vm2 = vcmp.gt.f32.partialorder %v10810_v17, %v6313_v13  ;;  %vm6318_vm5 = vcmp.eq.f32.partialorder %v10810_v17, %v6313_v13 }
 0xe57   : > { %v7292_v21 = vsel %vm6284_vm6, 1.0, %v11665_v1  ;;  %vm11807_vm7 = vmmov %vm11805_vm8 }
 0xe58   : > { %v6292_v60 = vsel %vm11807_vm7, %v7292_v21, 0.0  ;;  %vm11808_vm11 = vmmov %vm11807_vm7 }
 0xe59   : > { %v5980_v3 = vsel %vm11808_vm11, %v7279_v58, 0.0  ;;  %vm6088_vm1 = vmor %vm6082_vm14, %vm10966_vm10  ;;  %6293 = vadd.xlane.f32.xlu0 %v6292_v60  ;;  %v6385_v39 = vpop.permute.xlu0 %6384 }
 0xe5a   : > { %5981 = vadd.xlane.f32.xlu1 %v5980_v3  ;;  %vm6320_vm4 = vmand %vm6318_vm5, %vm11809_vm0  ;;  %v6351_v61 = vpop.permute.xlu1 %6350  ;;  %v7285_v25 = vsel %vm6088_vm1, 1.0, %v11665_v1 }
 0xe5b   : > { %vm6322_vm9 = vmor %vm6316_vm2, %vm6320_vm4  ;;  %vm6356_vm13 = vcmp.eq.f32.partialorder %v10810_v17, %v6351_v61  ;;  %vm11814_vm2 = vcmp.lt.s32.totalorder %v11773_v12, 6 }
 0xe5c   : > { %vm11810_vm12 = vmmov %vm11807_vm7  ;;  %v7294_v44 = vsel %vm6322_vm9, 1.0, %v11665_v1 }
 0xe5d   : > { %v6018_v40 = vsel %vm11810_vm12, %v7281_v47, 0.0  ;;  %vm11811_vm10 = vmmov %vm11807_vm7  ;;  %v6423_v35 = vpop.permute.xlu0 %6422 }
 0xe5e   : > { %6019 = vadd.xlane.f32.xlu1 %v6018_v40  ;;  %v6330_v30 = vsel %vm11811_vm10, %v7294_v44, 0.0  ;;  %vm11812_vm8 = vmmov %vm11807_vm7  ;;  %vm6354_vm7 = vcmp.gt.f32.partialorder %v10810_v17, %v6351_v61  ;;  %vm11816_vm10 = vcmp.lt.s32.totalorder %v11773_v12, 5 }
 0xe5f   : > { %6331 = vadd.xlane.f32.xlu0 %v6330_v30  ;;  %v6389_v32 = vpop.permute.xlu1 %6388  ;;  %v6094_v2 = vsel %vm11812_vm8, %v7285_v25, 0.0  ;;  %vm6358_vm3 = vmand %vm6356_vm13, %vm11813_vm15  ;;  %vm6470_vm13 = vcmp.eq.f32.partialorder %v10810_v17, %v6465_v50 }
 0xe60   : > { %vm6394_vm1 = vcmp.eq.f32.partialorder %v10810_v17, %v6389_v32  ;;  %vm11815_vm0 = vmmov %vm11812_vm8  ;;  %vm6392_vm12 = vcmp.gt.f32.partialorder %v10810_v17, %v6389_v32 }
 0xe61   : > { %vm6360_vm4 = vmor %vm6354_vm7, %vm6358_vm3 }
 0xe62   : > { %6095 = vadd.xlane.f32.xlu1 %v6094_v2  ;;  %vm6396_vm8 = vmand %vm6394_vm1, %vm11816_vm10  ;;  %v7296_v24 = vsel %vm6360_vm4, 1.0, %v11665_v1  ;;  %vm11821_vm4 = vcmp.lt.s32.totalorder %v11773_v12, 1 }
 0xe63   : > { %vm11817_vm15 = vmmov %vm11815_vm0 }
 0xe64   : > { %v6427_v62 = vpop.permute.xlu1 %6426  ;;  %vm6398_vm3 = vmor %vm6392_vm12, %vm6396_vm8 }
 0xe65   : > { %vm6430_vm14 = vcmp.gt.f32.partialorder %v10810_v17, %v6427_v62  ;;  %vm6432_vm6 = vcmp.eq.f32.partialorder %v10810_v17, %v6427_v62  ;;  %vm11819_vm1 = vmmov %vm11816_vm10 }
 0xe66   : > { %vm6434_vm5 = vmand %vm6432_vm6, %vm11814_vm2  ;;  %vm6468_vm6 = vcmp.gt.f32.partialorder %v10810_v17, %v6465_v50  ;;  %vm11818_vm2 = vcmp.lt.s32.totalorder %v11773_v12, 7  ;;  %v7298_v17 = vsel %vm6398_vm3, 1.0, %v11665_v1  ;;  %vm11827_vm3 = vcmp.lt.s32.totalorder %v11773_v12, 4 }
 0xe67   : > { %vm6436_vm11 = vmor %vm6430_vm14, %vm6434_vm5  ;;  %vm6393_vm14 = vcmp.eq.f32.partialorder %v10821_v45, %v6385_v39 }
 0xe68   : > { %v7300_v49 = vsel %vm6436_vm11, 1.0, %v11665_v1  ;;  %vm6472_vm5 = vmand %vm6470_vm13, %vm11818_vm2  ;;  %vm6391_vm11 = vcmp.gt.f32.partialorder %v10821_v45, %v6385_v39  ;;  %vm6279_vm13 = vcmp.eq.f32.partialorder %v10821_v45, %v10999_v38 }
 0xe69   : > { %v6194_v10 = vpop.permute.xlu1 %6193  ;;  %v6444_v42 = vsel %vm11815_vm0, %v7300_v49, 0.0  ;;  %vm6395_vm0 = vmand %vm6393_vm14, %vm11819_vm1 }
 0xe6a   : > { %vm6201_vm9 = vcmp.gt.f32.partialorder %v10821_v45, %v6194_v10  ;;  %6445 = vadd.xlane.f32.xlu0 %v6444_v42  ;;  %vm6474_vm8 = vmor %vm6468_vm6, %vm6472_vm5 }
 0xe6b   : > { %v7287_v16 = vsel %vm6201_vm9, 1.0, %v11665_v1  ;;  %vm11820_vm9 = vmmov %vm11817_vm15  ;;  %v7302_v46 = vsel %vm6474_vm8, 1.0, %v11665_v1 }
 0xe6c   : > { %v6213_v31 = vsel %vm11817_vm15, %v7287_v16, 0.0  ;;  %v6368_v41 = vsel %vm11820_vm9, %v7296_v24, 0.0  ;;  %vm11036_vm15 = vmor %vm6391_vm11, %vm6395_vm0  ;;  %vm6277_vm11 = vcmp.gt.f32.partialorder %v10821_v45, %v10999_v38  ;;  %vm11828_vm0 = vcmp.lt.s32.totalorder %v11773_v12, 2 }
 0xe6d   : > { %6214 = vadd.xlane.f32.xlu1 %v6213_v31  ;;  %vm11826_vm1 = vmmov %vm11820_vm9  ;;  %v7297_v6 = vsel %vm11036_vm15, 1.0, %v11665_v1  ;;  %vm6429_vm15 = vcmp.gt.f32.partialorder %v10821_v45, %v6423_v35 }
 0xe6e   : > { %v6233_v48 = vpop.permute.xlu1 %6232  ;;  %v6406_v5 = vsel %vm11826_vm1, %v7298_v17, 0.0  ;;  %vm6281_vm9 = vmand %vm6279_vm13, %vm11828_vm0  ;;  %vm6315_vm13 = vcmp.gt.f32.partialorder %v10821_v45, %v11003_v22 }
 0xe6f   : > { %vm6241_vm7 = vcmp.eq.f32.partialorder %v10821_v45, %v6233_v48  ;;  %vm6239_vm10 = vcmp.gt.f32.partialorder %v10821_v45, %v6233_v48  ;;  %vm6283_vm8 = vmor %vm6277_vm11, %vm6281_vm9 }
 0xe70   : > { %vm6243_vm12 = vmand %vm6241_vm7, %vm11821_vm4  ;;  %v7291_v4 = vsel %vm6283_vm8, 1.0, %v11665_v1 }
 0xe71   : > { %6369 = vadd.xlane.f32.xlu1 %v6368_v41  ;;  %vm11042_vm14 = vmor %vm6239_vm10, %vm6243_vm12  ;;  %vm6317_vm10 = vcmp.eq.f32.partialorder %v10821_v45, %v11003_v22 }
 0xe72   : > { %vm11829_vm4 = vmmov %vm11826_vm1  ;;  %v7289_v43 = vsel %vm11042_vm14, 1.0, %v11665_v1 }
 0xe73   : > { %v6347_v26 = vpop.permute.xlu1 %6346  ;;  %v6482_v27 = vsel %vm11829_vm4, %v7302_v46, 0.0  ;;  %vm11830_vm12 = vmmov %vm11826_vm1  ;;  %vm6431_vm1 = vcmp.eq.f32.partialorder %v10821_v45, %v6423_v35 }
 0xe74   : > { %vm6353_vm2 = vcmp.gt.f32.partialorder %v10821_v45, %v6347_v26  ;;  %vm6355_vm7 = vcmp.eq.f32.partialorder %v10821_v45, %v6347_v26 }
 0xe75   : > { %vm6357_vm6 = vmand %vm6355_vm7, %vm11827_vm3  ;;  %6407 = vadd.xlane.f32.xlu1 %v6406_v5 }
 0xe76   : > { %vm6359_vm5 = vmor %vm6353_vm2, %vm6357_vm6  ;;  %vm11831_vm2 = vcmp.lt.s32.totalorder %v11773_v12, 3 }
 0xe77   : > { %v7295_v29 = vsel %vm6359_vm5, 1.0, %v11665_v1  ;;  %vm6319_vm7 = vmand %vm6317_vm10, %vm11831_vm2  ;;  %vm11834_vm5 = vcmp.lt.s32.totalorder %v11773_v12, 6 }
 0xe78   : > { %v6365_v23 = vsel %vm11830_vm12, %v7295_v29, 0.0  ;;  %vm11832_vm3 = vmmov %vm11829_vm4  ;;  %v6461_v63 = vpop.permute.xlu1 %6460  ;;  %vm11836_vm12 = vcmp.lt.s32.totalorder %v11773_v12, 7 }
 0xe79   : > { %6483 = vadd.xlane.f32.xlu1 %v6482_v27  ;;  %6366 = vadd.xlane.f32.xlu0 %v6365_v23  ;;  %v6251_v0 = vsel %vm11832_vm3, %v7289_v43, 0.0  ;;  %vm11833_vm6 = vmmov %vm11832_vm3  ;;  %vm6469_vm0 = vcmp.eq.f32.partialorder %v10821_v45, %v6461_v63  ;;  %vm6467_vm4 = vcmp.gt.f32.partialorder %v10821_v45, %v6461_v63 }
 0xe7a   : > { %v6403_v51 = vsel %vm11833_vm6, %v7297_v6, 0.0  ;;  %vm6321_vm14 = vmor %vm6315_vm13, %vm6319_vm7 }
 0xe7b   : > { %vm6433_vm11 = vmand %vm6431_vm1, %vm11834_vm5  ;;  %v7293_v18 = vsel %vm6321_vm14, 1.0, %v11665_v1 }
 0xe7c   : > { %vm11835_vm9 = vmmov %vm11832_vm3 }
 0xe7d   : > { %6252 = vadd.xlane.f32.xlu1 %v6251_v0  ;;  %6404 = vadd.xlane.f32.xlu0 %v6403_v51  ;;  %v6289_v11 = vsel %vm11835_vm9, %v7291_v4, 0.0  ;;  %vm6435_vm10 = vmor %vm6429_vm15, %vm6433_vm11  ;;  %vm11840_vm15 = vcmp.eq.s32.totalorder %v11773_v12, 1  ;;  %vm11841_vm11 = vcmp.eq.s32.totalorder %v11773_v12, 0  ;;  %vm11842_vm9 = vcmp.eq.s32.totalorder %v11773_v12, 2 }
 0xe7e   : > { %vm6471_vm2 = vmand %vm6469_vm0, %vm11836_vm12  ;;  %v7299_v58 = vsel %vm6435_vm10, 1.0, %v11665_v1  ;;  %vm11843_vm12 = vcmp.eq.s32.totalorder %v11773_v12, 4 }
 0xe7f   : > { %vm11837_vm8 = vmmov %vm11832_vm3 }
 0xe80   : > { %v6327_v33 = vsel %vm11837_vm8, %v7293_v18, 0.0  ;;  %vm6473_vm13 = vmor %vm6467_vm4, %vm6471_vm2 }
 0xe81   : > { %6290 = vadd.xlane.f32.xlu1 %v6289_v11  ;;  %vm11838_vm7 = vmmov %vm11832_vm3  ;;  %v7301_v21 = vsel %vm6473_vm13, 1.0, %v11665_v1  ;;  %vm11844_vm13 = vcmp.eq.s32.totalorder %v11773_v12, 3 }
 0xe82   : > { %v6441_v13 = vsel %vm11838_vm7, %v7299_v58, 0.0  ;;  %vm11839_vm1 = vmmov %vm11832_vm3 }
 0xe83   : > { %v6479_v60 = vsel %vm11839_vm1, %v7301_v21, 0.0 }
 0xe85   : > { %6328 = vadd.xlane.f32.xlu1 %v6327_v33 }
 0xe89   : > { %6442 = vadd.xlane.f32.xlu1 %v6441_v13 }
 0xe8d   : > { %6480 = vadd.xlane.f32.xlu1 %v6479_v60 }
 0xeab   : > { %v5833_v3 = vpop.xlane.xlu0 %5832 }
 0xeac   : > { %vm5835_vm6 = vcmp.lt.f32.partialorder %v5833_v3, 4.0 }
 0xead   : > { %vm5841_vm0 = vmand %vm11841_vm11, %vm5835_vm6  ;;  %vm11845_vm6 = vcmp.eq.s32.totalorder %v11773_v12, 5 }
 0xeae   : > { %v5843_v44 = vsel %vm5841_vm0, 1.0, %v11665_v1  ;;  %vm11847_vm0 = vcmp.eq.s32.totalorder %v11773_v12, 6 }
 0xeaf   : > { %v5871_v50 = vpop.xlane.xlu0 %5870 }
 0xeb0   : > { %vm5873_vm3 = vcmp.lt.f32.partialorder %v5871_v50, 4.0 }
 0xeb1   : > { %vm5879_vm5 = vmand %vm11840_vm15, %vm5873_vm3  ;;  %vm11846_vm15 = vcmp.eq.s32.totalorder %v11773_v12, 7 }
 0xeb2   : > { %v5881_v40 = vsel %vm5879_vm5, 1.0, %v11665_v1 }
 0xeb3   : > { %v5909_v45 = vpop.xlane.xlu0 %5908  ;;  %v5883_v30 = vadd.f32 %v5881_v40, %v5843_v44 }
 0xeb4   : > { %vm5911_vm14 = vcmp.lt.f32.partialorder %v5909_v45, 4.0 }
 0xeb5   : > { %vm5917_vm10 = vmand %vm11842_vm9, %vm5911_vm14 }
 0xeb6   : > { %v5919_v25 = vsel %vm5917_vm10, 1.0, %v11665_v1 }
 0xeb7   : > { %v5921_v32 = vadd.f32 %v5919_v25, %v5883_v30 }
 0xebc   : > { %v5985_v47 = vpop.xlane.xlu0 %5984 }
 0xebd   : > { %vm5987_vm4 = vcmp.lt.f32.partialorder %v5985_v47, 4.0 }
 0xebe   : > { %vm5993_vm2 = vmand %vm11843_vm12, %vm5987_vm4  ;;  %vm11848_vm12 = vcmp.eq.s32.totalorder %v11773_v12, 1 }
 0xebf   : > { %v5995_v10 = vsel %vm5993_vm2, 1.0, %v11665_v1 }
 0xec6   : > { %v6099_v2 = vpop.xlane.xlu0 %6098 }
 0xec7   : > { %vm6101_vm3 = vcmp.lt.f32.partialorder %v6099_v2, 4.0 }
 0xec8   : > { %vm6107_vm5 = vmand %vm11846_vm15, %vm6101_vm3  ;;  %vm11851_vm15 = vcmp.eq.s32.totalorder %v11773_v12, 2 }
 0xec9   : > { %v5830_v61 = vpop.xlane.xlu1 %5829  ;;  %v6109_v54 = vsel %vm6107_vm5, 1.0, %v11665_v1 }
 0xeca   : > { %vm5834_vm10 = vcmp.lt.f32.partialorder %v5830_v61, 4.0 }
 0xecd   : > { %v5944_v31 = vpop.xlane.xlu0 %5943 }
 0xece   : > { %v5947_v38 = vpop.xlane.xlu1 %5946 }
 0xecf   : > { %vm5949_vm8 = vcmp.lt.f32.partialorder %v5947_v38, 4.0 }
 0xed0   : > { %vm5955_vm7 = vmand %vm11844_vm13, %vm5949_vm8  ;;  %vm11849_vm8 = vcmp.eq.s32.totalorder %v11773_v12, 0 }
 0xed1   : > { %v5957_v22 = vsel %vm5955_vm7, 1.0, %v11665_v1  ;;  %vm5840_vm13 = vmand %vm11849_vm8, %vm5834_vm10  ;;  %vm5948_vm7 = vcmp.lt.f32.partialorder %v5944_v31, 4.0  ;;  %v6058_v37 = vpop.xlane.xlu0 %6057  ;;  %vm11854_vm8 = vcmp.eq.s32.totalorder %v11773_v12, 5 }
 0xed2   : > { %v5959_v62 = vadd.f32 %v5957_v22, %v5921_v32  ;;  %v6023_v49 = vpop.xlane.xlu1 %6022  ;;  %v5842_v27 = vsel %vm5840_vm13, 1.0, %v11665_v1 }
 0xed3   : > { %vm6025_vm1 = vcmp.lt.f32.partialorder %v6023_v49, 4.0 }
 0xed4   : > { %v5997_v42 = vadd.f32 %v5995_v10, %v5959_v62  ;;  %vm6031_vm14 = vmand %vm11845_vm6, %vm6025_vm1  ;;  %vm11850_vm6 = vcmp.eq.s32.totalorder %v11773_v12, 3 }
 0xed5   : > { %v6033_v39 = vsel %vm6031_vm14, 1.0, %v11665_v1  ;;  %vm5954_vm14 = vmand %vm11850_vm6, %vm5948_vm7  ;;  %v6218_v6 = vpop.xlane.xlu0 %6217 }
 0xed6   : > { %v6061_v16 = vpop.xlane.xlu1 %6060  ;;  %v6035_v24 = vadd.f32 %v6033_v39, %v5997_v42  ;;  %v5956_v51 = vsel %vm5954_vm14, 1.0, %v11665_v1 }
 0xed7   : > { %vm6063_vm11 = vcmp.lt.f32.partialorder %v6061_v16, 4.0 }
 0xed8   : > { %vm6069_vm9 = vmand %vm11847_vm0, %vm6063_vm11  ;;  %vm6062_vm0 = vcmp.lt.f32.partialorder %v6058_v37, 4.0 }
 0xed9   : > { %v6071_v48 = vsel %vm6069_vm9, 1.0, %v11665_v1  ;;  %vm11852_vm9 = vcmp.eq.s32.totalorder %v11773_v12, 4 }
 0xeda   : > { %v6073_v41 = vadd.f32 %v6071_v48, %v6035_v24  ;;  %v5868_v17 = vpop.xlane.xlu1 %5867 }
 0xedb   : > { %vm5872_vm4 = vcmp.lt.f32.partialorder %v5868_v17, 4.0 }
 0xedc   : > { %v6111_v26 = vadd.f32 %v6109_v54, %v6073_v41  ;;  %vm5878_vm2 = vmand %vm11848_vm12, %vm5872_vm4  ;;  %vm11853_vm4 = vcmp.eq.s32.totalorder %v11773_v12, 6 }
 0xedd   : > { %v5880_v5 = vsel %vm5878_vm2, 1.0, %v11665_v1  ;;  %vm6068_vm12 = vmand %vm11853_vm4, %vm6062_vm0 }
 0xede   : > { %vm6498_vm1 = vcmp.gt.f32.partialorder %v6111_v26, 0.5  ;;  %v5882_v23 = vadd.f32 %v5880_v5, %v5842_v27  ;;  %v6256_v18 = vpop.xlane.xlu0 %6255  ;;  %v6070_v60 = vsel %vm6068_vm12, 1.0, %v11665_v1  ;;  %vm11858_vm12 = vcmp.eq.s32.totalorder %v11773_v12, 2 }
 0xedf   : > { %v5906_v46 = vpop.xlane.xlu1 %5905  ;;  %v11119_v29 = vsel %vm6498_vm1, 1, %v11771_v57  ;;  %vm11855_vm1 = vcmp.eq.s32.totalorder %v11773_v12, 7  ;;  %vm6258_vm14 = vcmp.lt.f32.partialorder %v6256_v18, 4.0 }
 0xee0   : > { %vm5910_vm3 = vcmp.lt.f32.partialorder %v5906_v46, 4.0  ;;  %6557 = vperm.xlu0 %8539, %v11119_v29   ;;  %6509 = vperm.xlu1 %8537, %v11119_v29  }
 0xee1   : > { %vm5916_vm5 = vmand %vm11851_vm15, %vm5910_vm3  ;;  %vm6220_vm15 = vcmp.lt.f32.partialorder %v6218_v6, 4.0 }
 0xee2   : > { %v5918_v35 = vsel %vm5916_vm5, 1.0, %v11665_v1  ;;  %v6294_v50 = vpop.xlane.xlu0 %6293 }
 0xee3   : > { %v5982_v43 = vpop.xlane.xlu1 %5981  ;;  %v5920_v0 = vadd.f32 %v5918_v35, %v5882_v23  ;;  %vm6296_vm5 = vcmp.lt.f32.partialorder %v6294_v50, 4.0 }
 0xee4   : > { %vm5986_vm11 = vcmp.lt.f32.partialorder %v5982_v43, 4.0  ;;  %8541 = vset.pattern.permute.xlu0 %v11768_v53  ;;  %8538 = vset.pattern.permute.xlu1 %v11767_v36 }
 0xee5   : > { %v5958_v63 = vadd.f32 %v5956_v51, %v5920_v0  ;;  %vm5992_vm10 = vmand %vm11852_vm9, %vm5986_vm11  ;;  %6605 = vperm.xlu0 %8541, %v11119_v29   ;;  %6533 = vperm.xlu1 %8538, %v11119_v29   ;;  %vm11856_vm11 = vcmp.eq.s32.totalorder %v11773_v12, 1  ;;  %vm11857_vm9 = vcmp.eq.s32.totalorder %v11773_v12, 0 }
 0xee6   : > { %v5994_v4 = vsel %vm5992_vm10, 1.0, %v11665_v1  ;;  %vm6264_vm0 = vmand %vm11856_vm11, %vm6258_vm14  ;;  %vm11861_vm14 = vcmp.eq.s32.totalorder %v11773_v12, 6  ;;  %vm11862_vm11 = vcmp.eq.s32.totalorder %v11773_v12, 5 }
 0xee7   : > { %v6020_v11 = vpop.xlane.xlu1 %6019  ;;  %v5996_v33 = vadd.f32 %v5994_v4, %v5958_v63  ;;  %vm6226_vm10 = vmand %vm11857_vm9, %vm6220_vm15  ;;  %v6266_v25 = vsel %vm6264_vm0, 1.0, %v11665_v1 }
 0xee8   : > { %vm6024_vm2 = vcmp.lt.f32.partialorder %v6020_v11, 4.0  ;;  %v6332_v40 = vpop.xlane.xlu0 %6331  ;;  %v6228_v30 = vsel %vm6226_vm10, 1.0, %v11665_v1  ;;  %vm11863_vm10 = vcmp.eq.s32.totalorder %v11773_v12, 7 }
 0xee9   : > { %vm6030_vm13 = vmand %vm11854_vm8, %vm6024_vm2  ;;  %8540 = vset.pattern.permute.xlu1 %v11698_v8  ;;  %8543 = vset.pattern.permute.xlu0 %v11771_v57  ;;  %vm6334_vm4 = vcmp.lt.f32.partialorder %v6332_v40, 4.0  ;;  %vm11859_vm8 = vcmp.eq.s32.totalorder %v11773_v12, 3  ;;  %v6268_v2 = vadd.f32 %v6266_v25, %v6228_v30  ;;  %v11234_v40 = vpop.f32.mrf.mxu1 }
 0xeea   : > { %v6032_v58 = vsel %vm6030_vm13, 1.0, %v11665_v1  ;;  %6581 = vperm.xlu1 %8540, %v11119_v29   ;;  %vm6302_vm2 = vmand %vm11858_vm12, %vm6296_vm5 }
 0xeeb   : > { %v6034_v13 = vadd.f32 %v6032_v58, %v5996_v33  ;;  %v6096_v21 = vpop.xlane.xlu1 %6095  ;;  %vm6340_vm13 = vmand %vm11859_vm8, %vm6334_vm4  ;;  %v6304_v38 = vsel %vm6302_vm2, 1.0, %v11665_v1 }
 0xeec   : > { %vm6100_vm7 = vcmp.lt.f32.partialorder %v6096_v21, 4.0  ;;  %v6342_v62 = vsel %vm6340_vm13, 1.0, %v11665_v1  ;;  %v6306_v49 = vadd.f32 %v6304_v38, %v6268_v2  ;;  %vm11864_vm13 = vcmp.eq.s32.totalorder %v11773_v12, 1 }
 0xeed   : > { %v6072_v3 = vadd.f32 %v6070_v60, %v6034_v13  ;;  %vm6106_vm3 = vmand %vm11855_vm1, %vm6100_vm7 }
 0xeee   : > { %v6108_v45 = vsel %vm6106_vm3, 1.0, %v11665_v1  ;;  %8542 = vset.pattern.permute.xlu1 %v11700_v15  ;;  %vm11860_vm3 = vcmp.eq.s32.totalorder %v11773_v12, 4  ;;  %v6344_v42 = vadd.f32 %v6342_v62, %v6306_v49 }
 0xeef   : > { %v6110_v47 = vadd.f32 %v6108_v45, %v6072_v3  ;;  %6629 = vperm.xlu1 %8542, %v11119_v29  }
 0xef1   : > { %vm6497_vm6 = vcmp.gt.f32.partialorder %v6110_v47, 0.5 }
 0xef2   : > { %v11152_v61 = vsel %vm6497_vm6, 1, %v11771_v57 }
 0xef3   : > { %6506 = vperm.xlu0 %8543, %v11152_v61   ;;  %8545 = vset.pattern.permute.xlu1 %v11709_v55  ;;  %v6446_v32 = vpop.xlane.xlu0 %6445 }
 0xef4   : > { %6554 = vperm.xlu1 %8545, %v11152_v61   ;;  %vm6448_vm1 = vcmp.lt.f32.partialorder %v6446_v32, 4.0 }
 0xef5   : > { %vm6454_vm15 = vmand %vm11861_vm14, %vm6448_vm1  ;;  %vm11865_vm1 = vcmp.eq.s32.totalorder %v11773_v12, 0 }
 0xef6   : > { %v6215_v44 = vpop.xlane.xlu1 %6214  ;;  %v6456_v41 = vsel %vm6454_vm15, 1.0, %v11665_v1  ;;  %vm11866_vm15 = vcmp.eq.s32.totalorder %v11773_v12, 2 }
 0xef7   : > { %8544 = vset.pattern.permute.xlu0 %v11767_v36  ;;  %vm6219_vm12 = vcmp.lt.f32.partialorder %v6215_v44, 4.0 }
 0xef8   : > { %6530 = vperm.xlu0 %8544, %v11152_v61   ;;  %8547 = vset.pattern.permute.xlu1 %v11768_v53 }
 0xef9   : > { %6602 = vperm.xlu1 %8547, %v11152_v61  }
 0xefa   : > { %v6370_v22 = vpop.xlane.xlu1 %6369 }
 0xefb   : > { %vm6372_vm7 = vcmp.lt.f32.partialorder %v6370_v22, 4.0 }
 0xefc   : > { %8546 = vset.pattern.permute.xlu0 %v11698_v8  ;;  %vm6378_vm6 = vmand %vm11860_vm3, %vm6372_vm7 }
 0xefd   : > { %6578 = vperm.xlu0 %8546, %v11152_v61   ;;  %8549 = vset.pattern.permute.xlu1 %v11769_v19  ;;  %v6380_v10 = vsel %vm6378_vm6, 1.0, %v11665_v1  ;;  %vm6225_vm3 = vmand %vm11865_vm1, %vm6219_vm12 }
 0xefe   : > { %6650 = vperm.xlu1 %8549, %v11152_v61   ;;  %v6408_v39 = vpop.xlane.xlu1 %6407  ;;  %v6382_v16 = vadd.f32 %v6380_v10, %v6344_v42  ;;  %v6227_v43 = vsel %vm6225_vm3, 1.0, %v11665_v1 }
 0xeff   : > { %vm6410_vm5 = vcmp.lt.f32.partialorder %v6408_v39, 4.0 }
 0xf00   : > { %vm6416_vm0 = vmand %vm11862_vm11, %vm6410_vm5  ;;  %vm11867_vm11 = vcmp.eq.s32.totalorder %v11773_v12, 4 }
 0xf01   : > { %8548 = vset.pattern.permute.xlu0 %v11700_v15  ;;  %v6418_v31 = vsel %vm6416_vm0, 1.0, %v11665_v1 }
 0xf02   : > { %6626 = vperm.xlu0 %8548, %v11152_v61   ;;  %8552 = vset.pattern.permute.xlu1 %v11709_v55  ;;  %v6420_v24 = vadd.f32 %v6418_v31, %v6382_v16  ;;  %v6484_v48 = vpop.xlane.xlu1 %6483  ;;  %v6367_v54 = vpop.xlane.xlu0 %6366 }
 0xf03   : > { %vm6486_vm9 = vcmp.lt.f32.partialorder %v6484_v48, 4.0  ;;  %vm6371_vm14 = vcmp.lt.f32.partialorder %v6367_v54, 4.0 }
 0xf04   : > { %v6458_v17 = vadd.f32 %v6456_v41, %v6420_v24  ;;  %vm6492_vm4 = vmand %vm11863_vm10, %vm6486_vm9 }
 0xf05   : > { %v6494_v26 = vsel %vm6492_vm4, 1.0, %v11665_v1  ;;  %vm6377_vm0 = vmand %vm11867_vm11, %vm6371_vm14  ;;  %vm11868_vm4 = vcmp.eq.s32.totalorder %v11773_v12, 3 }
 0xf06   : > { %8550 = vset.pattern.permute.xlu0 %v11771_v57  ;;  %v6253_v37 = vpop.xlane.xlu1 %6252  ;;  %v6496_v5 = vadd.f32 %v6494_v26, %v6458_v17  ;;  %v6405_v35 = vpop.xlane.xlu0 %6404  ;;  %v6379_v33 = vsel %vm6377_vm0, 1.0, %v11665_v1 }
 0xf07   : > { %vm6257_vm2 = vcmp.lt.f32.partialorder %v6253_v37, 4.0  ;;  %vm6409_vm9 = vcmp.lt.f32.partialorder %v6405_v35, 4.0 }
 0xf08   : > { %vm6500_vm8 = vcmp.gt.f32.partialorder %v6496_v5, 0.5  ;;  %vm6263_vm7 = vmand %vm11864_vm13, %vm6257_vm2  ;;  %vm11869_vm2 = vcmp.eq.s32.totalorder %v11773_v12, 5 }
 0xf09   : > { %v11198_v46 = vsel %vm6500_vm8, 1, %v11771_v57  ;;  %v6265_v23 = vsel %vm6263_vm7, 1.0, %v11665_v1  ;;  %vm6415_vm8 = vmand %vm11869_vm2, %vm6409_vm9  ;;  %vm11870_vm7 = vcmp.eq.s32.totalorder %v11773_v12, 6 }
 0xf0a   : > { %v6291_v27 = vpop.xlane.xlu1 %6290  ;;  %6563 = vperm.xlu1 %8552, %v11198_v46   ;;  %6515 = vperm.xlu0 %8550, %v11198_v46   ;;  %v6267_v0 = vadd.f32 %v6265_v23, %v6227_v43  ;;  %v6417_v13 = vsel %vm6415_vm8, 1.0, %v11665_v1 }
 0xf0b   : > { %vm6295_vm6 = vcmp.lt.f32.partialorder %v6291_v27, 4.0 }
 0xf0c   : > { %vm6301_vm5 = vmand %vm11866_vm15, %vm6295_vm6  ;;  %vm11871_vm6 = vcmp.eq.s32.totalorder %v11773_v12, 7 }
 0xf0d   : > { %v6303_v6 = vsel %vm6301_vm5, 1.0, %v11665_v1 }
 0xf0e   : > { %v6329_v51 = vpop.xlane.xlu1 %6328  ;;  %8554 = vset.pattern.permute.xlu1 %v11768_v53  ;;  %8551 = vset.pattern.permute.xlu0 %v11767_v36  ;;  %v6305_v63 = vadd.f32 %v6303_v6, %v6267_v0 }
 0xf0f   : > { %vm6333_vm10 = vcmp.lt.f32.partialorder %v6329_v51, 4.0  ;;  %6611 = vperm.xlu1 %8554, %v11198_v46   ;;  %6539 = vperm.xlu0 %8551, %v11198_v46  }
 0xf10   : > { %vm6339_vm12 = vmand %vm11868_vm4, %vm6333_vm10 }
 0xf11   : > { %v6341_v4 = vsel %vm6339_vm12, 1.0, %v11665_v1 }
 0xf12   : > { %v6343_v11 = vadd.f32 %v6341_v4, %v6305_v63  ;;  %v6443_v18 = vpop.xlane.xlu1 %6442  ;;  %v11303_v63 = vld [vmem:[%s11651_s23 + $0x1] ss:$0 sm:$0xff] }
 0xf13   : > { %vm6447_vm13 = vcmp.lt.f32.partialorder %v6443_v18, 4.0  ;;  %8558 = vset.pattern.permute.xlu1 %v11769_v19  ;;  %8553 = vset.pattern.permute.xlu0 %v11698_v8 }
 0xf14   : > { %v6381_v58 = vadd.f32 %v6379_v33, %v6343_v11  ;;  %vm6453_vm1 = vmand %vm11870_vm7, %vm6447_vm13  ;;  %6659 = vperm.xlu1 %8558, %v11198_v46   ;;  %6587 = vperm.xlu0 %8553, %v11198_v46  }
 0xf15   : > { %v6455_v3 = vsel %vm6453_vm1, 1.0, %v11665_v1 }
 0xf16   : > { %v6419_v21 = vadd.f32 %v6417_v13, %v6381_v58  ;;  %v6481_v60 = vpop.xlane.xlu1 %6480 }
 0xf17   : > { %vm6485_vm3 = vcmp.lt.f32.partialorder %v6481_v60, 4.0 }
 0xf18   : > { %v6457_v50 = vadd.f32 %v6455_v3, %v6419_v21  ;;  %vm6491_vm14 = vmand %vm11871_vm6, %vm6485_vm3  ;;  %8560 = vset.pattern.permute.xlu1 %v11770_v14  ;;  %8555 = vset.pattern.permute.xlu0 %v11700_v15 }
 0xf19   : > { %v6493_v45 = vsel %vm6491_vm14, 1.0, %v11665_v1  ;;  %6677 = vperm.xlu1 %8560, %v11119_v29   ;;  %6635 = vperm.xlu0 %8555, %v11198_v46   ;;  %v5600_v1 = vpop.f32.mrf.mxu1 }
 0xf1a   : > { %v6495_v47 = vadd.f32 %v6493_v45, %v6457_v50  ;;  %v5601_v11 = vadd.f32 %v11303_v63, %v5600_v1 }
 0xf1b   : > { %v11242_v12 = vpop.f32.mrf.mxu1 }
 0xf1c   : > { %vm6499_vm15 = vcmp.gt.f32.partialorder %v6495_v47, 0.5  ;;  %v5612_v45 = vadd.f32 %v11242_v12, %v11303_v63 }
 0xf1d   : > { %v6503_v44 = vsel %vm6499_vm15, 1, %v11771_v57  ;;  %8561 = vset.pattern.permute.xlu1 %v11767_v36  ;;  %8556 = vset.pattern.permute.xlu0 %v11771_v57  ;;  %v5603_v25 = vpop.f32.mrf.mxu1 }
 0xf1e   : > { %6536 = vperm.xlu1 %8561, %v6503_v44   ;;  %6512 = vperm.xlu0 %8556, %v6503_v44   ;;  %v5604_v4 = vadd.f32 %v11303_v63, %v5603_v25 }
 0xf1f   : > { %v11247_v36 = vpop.f32.mrf.mxu1 }
 0xf22   : > { %8562 = vset.pattern.permute.xlu1 %v11709_v55  ;;  %8557 = vset.pattern.permute.xlu0 %v11769_v19  ;;  %v5616_v55 = vpop.f32.mrf.mxu1 }
 0xf23   : > { %6560 = vperm.xlu1 %8562, %v6503_v44   ;;  %6653 = vperm.xlu0 %8557, %v11119_v29   ;;  %v5617_v60 = vadd.f32 %v11303_v63, %v5616_v55 }
 0xf24   : > { %v8224_v57 = vpop.f32.mrf.mxu1 }
 0xf27   : > { %8563 = vset.pattern.permute.xlu1 %v11698_v8  ;;  %8559 = vset.pattern.permute.xlu0 %v11770_v14  ;;  %v5619_v8 = vpop.f32.mrf.mxu1 }
 0xf28   : > { %6584 = vperm.xlu1 %8563, %v6503_v44   ;;  %6674 = vperm.xlu0 %8559, %v11152_v61   ;;  %v5620_v33 = vadd.f32 %v11303_v63, %v5619_v8  ;;  %v5628_v8 = vadd.f32 %v8224_v57, %v11303_v63 }
 0xf29   : > { %v11254_v29 = vpop.f32.mrf.mxu1 }
 0xf2b   : > { %v11256_v61 = vpop.f32.mrf.mxu1 }
 0xf2c   : > { %8564 = vset.pattern.permute.xlu1 %v11768_v53  ;;  %6683 = vperm.xlu0 %8559, %v11198_v46   ;;  %v5633_v12 = vadd.f32 %v11303_v63, %v11256_v61 }
 0xf2d   : > { %6608 = vperm.xlu1 %8564, %v6503_v44   ;;  %v11258_v53 = vpop.f32.mrf.mxu1 }
 0xf2f   : > { %v5635_v30 = vpop.f32.mrf.mxu1 }
 0xf30   : > { %v5636_v55 = vadd.f32 %v11303_v63, %v5635_v30 }
 0xf31   : > { %8565 = vset.pattern.permute.xlu1 %v11700_v15  ;;  %v11260_v38 = vpop.f32.mrf.mxu1 }
 0xf32   : > { %6632 = vperm.xlu1 %8565, %v6503_v44  }
 0xf33   : > { %v11262_v32 = vpop.f32.mrf.mxu1 }
 0xf35   : > { %v11264_v15 = vpop.f32.mrf.mxu1 }
 0xf36   : > { %8566 = vset.pattern.permute.xlu1 %v11769_v19 }
 0xf37   : > { %6656 = vperm.xlu1 %8566, %v6503_v44   ;;  %v5651_v2 = vpop.f32.mrf.mxu1 }
 0xf39   : > { %v11266_v19 = vpop.f32.mrf.mxu1 }
 0xf3b   : > { %8567 = vset.pattern.permute.xlu1 %v11770_v14  ;;  %v11268_v62 = vpop.f32.mrf.mxu1 }
 0xf3c   : > { %6680 = vperm.xlu1 %8567, %v6503_v44  }
 0xf3d   : > { %v11270_v49 = vpop.f32.mrf.mxu1 }
 0xf3f   : > { %v11272_v42 = vpop.f32.mrf.mxu1 }
 0xf41   : > { %v11278_v31 = vpop.f32.mrf.mxu1 }
 0xf43   : > { %v11282_v41 = vpop.f32.mrf.mxu1 }
 0xf45   : > { %v11284_v17 = vpop.f32.mrf.mxu1 }
 0xf47   : > { %v11286_v37 = vpop.f32.mrf.mxu1 }
 0xf49   : > { %v11290_v27 = vpop.f32.mrf.mxu1 }
 0xf4b   : > { %v11292_v23 = vpop.f32.mrf.mxu1 }
 0xf4d   : > { %v11298_v6 = vpop.f32.mrf.mxu1 }
 0xf4f   : > { %v11307_v18 = vpop.f32.mrf.mxu1 }
 0xf51   : > { %v11315_v1 = vpop.f32.mrf.mxu1 }
 0xf5b   : > { %v6510_v22 = vpop.permute.xlu1 %6509  ;;  %v6558_v10 = vpop.permute.xlu0 %6557 }
 0xf5c   : > { %vm6518_vm5 = vcmp.eq.s32.totalorder %v6510_v22, 1  ;;  %vm6566_vm12 = vcmp.eq.s32.totalorder %v6558_v10, 1  ;;  %v5649_v10 = vadd.f32 %v11303_v63, %v11262_v32  ;;  %v5644_v32 = vadd.f32 %v11258_v53, %v11303_v63 }
 0xf5d   : > { %v6522_v58 = vsel %vm6518_vm5, %v5604_v4, -1e+30 }
 0xf5e   : > { %v6526_v47 = vmax.f32 %v6522_v58, -1e+30  ;;  %v11327_v58 = vpop.f32.mrf.mxu1 }
 0xf60   : > { %v6534_v14 = vpop.permute.xlu1 %6533  ;;  %v11276_v16 = vpop.permute.xlu0 %6605 }
 0xf61   : > { %vm6542_vm0 = vcmp.eq.s32.totalorder %v6534_v14, 1  ;;  %vm6614_vm3 = vcmp.eq.s32.totalorder %v11276_v16, 1 }
 0xf62   : > { %v6546_v50 = vsel %vm6542_vm0, %v5620_v33, -1e+30  ;;  %v6570_v33 = vsel %vm6566_vm12, %v5636_v55, -1e+30 }
 0xf63   : > { %v6550_v22 = vmax.f32 %v6526_v47, %v6546_v50  ;;  %v5625_v47 = vadd.f32 %v11247_v36, %v11303_v63  ;;  %v5665_v36 = vadd.f32 %v11303_v63, %v11268_v62 }
 0xf65   : > { %v11274_v39 = vpop.permute.xlu1 %6581 }
 0xf66   : > { %vm6590_vm8 = vcmp.eq.s32.totalorder %v11274_v39, 1 }
 0xf6a   : > { %v11280_v24 = vpop.permute.xlu1 %6629 }
 0xf6b   : > { %vm6638_vm6 = vcmp.eq.s32.totalorder %v11280_v24, 1  ;;  %v5700_v24 = vadd.f32 %v11303_v63, %v11307_v18 }
 0xf6e   : > { %v6507_v48 = vpop.permute.xlu0 %6506 }
 0xf6f   : > { %v6555_v54 = vpop.permute.xlu1 %6554  ;;  %vm6517_vm11 = vcmp.eq.s32.totalorder %v6507_v48, 1 }
 0xf70   : > { %v6521_v3 = vsel %vm6517_vm11, %v5601_v11, -1e+30  ;;  %vm6565_vm2 = vcmp.eq.s32.totalorder %v6555_v54, 1  ;;  %v5652_v11 = vadd.f32 %v11303_v63, %v5651_v2  ;;  %v11332_v54 = vld [vmem:[%s11720_s14 + $0x1] ss:$0 sm:$0xff] }
 0xf71   : > { %v6525_v25 = vmax.f32 %v6521_v3, -1e+30  ;;  %v6569_v30 = vsel %vm6565_vm2, %v5633_v12, -1e+30 }
 0xf72   : > { %v6594_v61 = vsel %vm6590_vm8, %v5652_v11, -1e+30 }
 0xf73   : > { %v6531_v26 = vpop.permute.xlu0 %6530 }
 0xf74   : > { %v11288_v5 = vpop.permute.xlu1 %6602  ;;  %vm6541_vm9 = vcmp.eq.s32.totalorder %v6531_v26, 1 }
 0xf75   : > { %v6545_v44 = vsel %vm6541_vm9, %v5617_v60, -1e+30  ;;  %vm6613_vm14 = vcmp.eq.s32.totalorder %v11288_v5, 1 }
 0xf76   : > { %v6617_v62 = vsel %vm6613_vm14, %v5665_v36, -1e+30 }
 0xf78   : > { %v6579_v46 = vpop.permute.xlu0 %6578 }
 0xf79   : > { %v11294_v35 = vpop.permute.xlu1 %6650  ;;  %vm6589_vm13 = vcmp.eq.s32.totalorder %v6579_v46, 1  ;;  %v4762_v46 = vadd.f32 %v11332_v54, %v10658_v9 }
 0xf7a   : > { %v6593_v50 = vsel %vm6589_vm13, %v5649_v10, -1e+30  ;;  %vm6661_vm12 = vcmp.eq.s32.totalorder %v11294_v35, 1 }
 0xf7d   : > { %v11296_v43 = vpop.permute.xlu0 %6626 }
 0xf7e   : > { %vm6637_vm15 = vcmp.eq.s32.totalorder %v11296_v43, 1  ;;  %v5692_v43 = vadd.f32 %v11284_v17, %v11303_v63 }
 0xf85   : > { %v6516_v0 = vpop.permute.xlu0 %6515  ;;  %v6564_v51 = vpop.permute.xlu1 %6563 }
 0xf86   : > { %vm6520_vm10 = vcmp.eq.s32.totalorder %v6516_v0, 1  ;;  %v6549_v0 = vmax.f32 %v6525_v25, %v6545_v44  ;;  %vm6568_vm7 = vcmp.eq.s32.totalorder %v6564_v51, 1  ;;  %v5660_v44 = vadd.f32 %v11264_v15, %v11303_v63  ;;  %v11346_v25 = vpop.f32.mrf.mxu1 }
 0xf87   : > { %v6524_v14 = vsel %vm6520_vm10, %v5612_v45, -1e+30  ;;  %v5609_v45 = vadd.f32 %v11234_v40, %v11303_v63  ;;  %v5668_v51 = vadd.f32 %v11303_v63, %v11272_v42  ;;  %v6572_v53 = vsel %vm6568_vm7, %v5644_v32, -1e+30 }
 0xf88   : > { %v6528_v57 = vmax.f32 %v6524_v14, -1e+30  ;;  %v6573_v39 = vmax.f32 %v6549_v0, %v6569_v30  ;;  %v5681_v15 = vadd.f32 %v11303_v63, %v11282_v41  ;;  %v5684_v42 = vadd.f32 %v11303_v63, %v11286_v37  ;;  %v5715_v55 = vpop.f32.mrf.mxu1 }
 0xf89   : > { %v5716_v5 = vadd.f32 %v11303_v63, %v5715_v55  ;;  %v5697_v32 = vadd.f32 %v11303_v63, %v11292_v23  ;;  %v5708_v23 = vadd.f32 %v11298_v6, %v11303_v63  ;;  %v5724_v36 = vadd.f32 %v11346_v25, %v11303_v63 }
 0xf8a   : > { %v6540_v13 = vpop.permute.xlu0 %6539  ;;  %v11310_v21 = vpop.permute.xlu1 %6611  ;;  %v6597_v40 = vmax.f32 %v6573_v39, %v6593_v50  ;;  %v6642_v12 = vsel %vm6638_vm6, %v5684_v42, -1e+30  ;;  %v5641_v25 = vadd.f32 %v11254_v29, %v11303_v63  ;;  %v5673_v29 = vadd.f32 %v11266_v19, %v11303_v63 }
 0xf8b   : > { %vm6544_vm4 = vcmp.eq.s32.totalorder %v6540_v13, 1  ;;  %v6574_v13 = vmax.f32 %v6550_v22, %v6570_v33  ;;  %vm6616_vm0 = vcmp.eq.s32.totalorder %v11310_v21, 1  ;;  %v5676_v33 = vadd.f32 %v11270_v49, %v11303_v63 }
 0xf8c   : > { %v6548_v4 = vsel %vm6544_vm4, %v5628_v8, -1e+30 }
 0xf8d   : > { %v6552_v60 = vmax.f32 %v6528_v57, %v6548_v4  ;;  %v6598_v9 = vmax.f32 %v6574_v13, %v6594_v61  ;;  %v6621_v4 = vmax.f32 %v6597_v40, %v6617_v62  ;;  %v6641_v57 = vsel %vm6637_vm15, %v5681_v15, -1e+30 }
 0xf8e   : > { %v6620_v39 = vsel %vm6616_vm0, %v5676_v33, -1e+30 }
 0xf8f   : > { %v6588_v48 = vpop.permute.xlu0 %6587  ;;  %v11318_v26 = vpop.permute.xlu1 %6659  ;;  %v6576_v8 = vmax.f32 %v6552_v60, %v6572_v53  ;;  %v6645_v49 = vmax.f32 %v6621_v4, %v6641_v57  ;;  %v8740_v57 = vld [vmem:[%s9586_s9 + $0x18] sm:$0xff] }
 0xf90   : > { %vm6592_vm1 = vcmp.eq.s32.totalorder %v6588_v48, 1  ;;  %v6618_v48 = vsel %vm6614_vm3, %v5668_v51, -1e+30  ;;  %vm6664_vm2 = vcmp.eq.s32.totalorder %v11318_v26, 1 }
 0xf91   : > { %v6596_v22 = vsel %vm6592_vm1, %v5660_v44, -1e+30  ;;  %v6622_v0 = vmax.f32 %v6598_v9, %v6618_v48  ;;  %v6665_v44 = vsel %vm6661_vm12, %v5697_v32, -1e+30  ;;  %v6668_v26 = vsel %vm6664_vm2, %v5708_v23, -1e+30 }
 0xf92   : > { %v6600_v37 = vmax.f32 %v6576_v8, %v6596_v22  ;;  %v6669_v40 = vmax.f32 %v6645_v49, %v6665_v44 }
 0xf93   : > { %v6646_v61 = vmax.f32 %v6622_v0, %v6642_v12  ;;  %v8739_v12 = vld [vmem:[%s9586_s9] sm:$0xff] }
 0xf94   : > { %v6636_v2 = vpop.permute.xlu0 %6635  ;;  %v6678_v3 = vpop.permute.xlu1 %6677  ;;  %v6624_v17 = vmax.f32 %v6600_v37, %v6620_v39 }
 0xf95   : > { %vm6640_vm9 = vcmp.eq.s32.totalorder %v6636_v2, 1  ;;  %vm6686_vm10 = vcmp.eq.s32.totalorder %v6678_v3, 1  ;;  %v4759_v2 = vadd.f32 %v11332_v54, %v10654_v59  ;;  %v5713_v3 = vadd.f32 %v11303_v63, %v11327_v58 }
 0xf96   : > { %v6644_v18 = vsel %vm6640_vm9, %v5692_v43, -1e+30  ;;  %v4770_v58 = vadd.f32 %v10656_v34, %v11332_v54 }
 0xf97   : > { %v6648_v53 = vmax.f32 %v6624_v17, %v6644_v18 }
 0xf99   : > { %v6513_v14 = vpop.permute.xlu0 %6512  ;;  %v6537_v16 = vpop.permute.xlu1 %6536 }
 0xf9a   : > { %vm6519_vm5 = vcmp.eq.s32.totalorder %v6513_v14, 1  ;;  %vm6543_vm11 = vcmp.eq.s32.totalorder %v6537_v16, 1  ;;  %v6672_v14 = vmax.f32 %v6648_v53, %v6668_v26  ;;  %v8738_v16 = vld [vmem:[%s9586_s9 + $0x8] sm:$0xff] }
 0xf9b   : > { %v6523_v41 = vsel %vm6519_vm5, %v5609_v45, -1e+30  ;;  %v6547_v10 = vsel %vm6543_vm11, %v5625_v47, -1e+30  ;;  %v6690_v45 = vsel %vm6686_vm10, %v5716_v5, -1e+30  ;;  %v6698_v47 = vadd.f32 %v4762_v46, %v10568_v52 }
 0xf9c   : > { %v6527_v11 = vmax.f32 %v6523_v41, -1e+30  ;;  %v6697_v52 = vadd.f32 %v4759_v2, %v10570_v28  ;;  %v6700_v28 = vadd.f32 %v4770_v58, %v10599_v56  ;;  %v5657_v56 = vadd.f32 %v11260_v38, %v11303_v63 }
 0xf9e   : > { %v11370_v13 = vmax.f32 %v6527_v11, %v6547_v10  ;;  %v6654_v30 = vpop.permute.xlu0 %6653  ;;  %v6561_v21 = vpop.permute.xlu1 %6560 }
 0xf9f   : > { %vm6662_vm4 = vcmp.eq.s32.totalorder %v6654_v30, 1  ;;  %vm6567_vm7 = vcmp.eq.s32.totalorder %v6561_v21, 1  ;;  %v5705_v21 = vadd.f32 %v11290_v27, %v11303_v63 }
 0xfa0   : > { %v6666_v60 = vsel %vm6662_vm4, %v5700_v24, -1e+30  ;;  %v6571_v4 = vsel %vm6567_vm7, %v5641_v25, -1e+30  ;;  %v5689_v24 = vadd.f32 %v11278_v31, %v11303_v63  ;;  %v5721_v31 = vadd.f32 %v11315_v1, %v11303_v63 }
 0xfa1   : > { %v6670_v50 = vmax.f32 %v6646_v61, %v6666_v60  ;;  %v6575_v43 = vmax.f32 %v11370_v13, %v6571_v4  ;;  %v4767_v13 = vadd.f32 %v10652_v7, %v11332_v54  ;;  %v8741_v7 = vld [vmem:[%s9586_s9 + $0x10] sm:$0xff] }
 0xfa3   : > { %v6694_v51 = vmax.f32 %v6670_v50, %v6690_v45  ;;  %v6675_v35 = vpop.permute.xlu0 %6674  ;;  %v6585_v9 = vpop.permute.xlu1 %6584  ;;  %v6699_v32 = vadd.f32 %v4767_v13, %v10601_v20 }
 0xfa4   : > { %vm6685_vm8 = vcmp.eq.s32.totalorder %v6675_v35, 1  ;;  %vm6591_vm1 = vcmp.eq.s32.totalorder %v6585_v9, 1 }
 0xfa5   : > { %v6702_v59 = vadd.f32 %v6698_v47, %v6694_v51  ;;  %v6689_v8 = vsel %vm6685_vm8, %v5713_v3, -1e+30  ;;  %v6595_v33 = vsel %vm6591_vm1, %v5657_v56, -1e+30 }
 0xfa6   : > { %v6693_v46 = vmax.f32 %v6669_v40, %v6689_v8  ;;  %v6599_v30 = vmax.f32 %v6575_v43, %v6595_v33 }
 0xfa7   : > { %v6706_v15 = vmax.f32 %v6702_v59, 0.0  ;;  %v6684_v42 = vpop.permute.xlu0 %6683 }
 0xfa8   : > { %v6701_v22 = vadd.f32 %v6697_v52, %v6693_v46  ;;  %vm6688_vm13 = vcmp.eq.s32.totalorder %v6684_v42, 1  ;;  %v6609_v6 = vpop.permute.xlu1 %6608 }
 0xfa9   : > { %v6710_v48 = vadd.f32 %v8738_v16, %v6706_v15  ;;  %v6692_v55 = vsel %vm6688_vm13, %v5724_v36, -1e+30  ;;  %vm6615_vm3 = vcmp.eq.s32.totalorder %v6609_v6, 1 }
 0xfaa   : > { %v6705_v34 = vmax.f32 %v6701_v22, 0.0  ;;  %v6696_v0 = vmax.f32 %v6672_v14, %v6692_v55  ;;  %v6619_v5 = vsel %vm6615_vm3, %v5673_v29, -1e+30 }
 0xfab   : > { %6714 = vst [vmem:[%s11394_s27 + $0x8] sm:$0xff] %v6710_v48  ;;  %v6623_v19 = vmax.f32 %v6599_v30, %v6619_v5 }
 0xfac   : > { %v6709_v62 = vadd.f32 %v8739_v12, %v6705_v34  ;;  %v6704_v41 = vadd.f32 %v6700_v28, %v6696_v0 }
 0xfad   : > { %v6633_v37 = vpop.permute.xlu1 %6632 }
 0xfae   : > { %6713 = vst [vmem:[%s11394_s27] sm:$0xff] %v6709_v62  ;;  %v6708_v11 = vmax.f32 %v6704_v41, 0.0  ;;  %vm6639_vm6 = vcmp.eq.s32.totalorder %v6633_v37, 1 }
 0xfaf   : > { %v6643_v61 = vsel %vm6639_vm6, %v5689_v24, -1e+30 }
 0xfb0   : > { %v6712_v10 = vadd.f32 %v8740_v57, %v6708_v11  ;;  %v6647_v49 = vmax.f32 %v6623_v19, %v6643_v61 }
 0xfb2   : > { %6716 = vst [vmem:[%s11394_s27 + $0x18] sm:$0xff] %v6712_v10  ;;  %v6657_v38 = vpop.permute.xlu1 %6656 }
 0xfb3   : > { %vm6663_vm14 = vcmp.eq.s32.totalorder %v6657_v38, 1 }
 0xfb4   : > { %v6667_v39 = vsel %vm6663_vm14, %v5705_v21, -1e+30 }
 0xfb5   : > { %v6671_v60 = vmax.f32 %v6647_v49, %v6667_v39 }
 0xfb7   : > { %v6681_v17 = vpop.permute.xlu1 %6680 }
 0xfb8   : > { %vm6687_vm15 = vcmp.eq.s32.totalorder %v6681_v17, 1 }
 0xfb9   : > { %v6691_v27 = vsel %vm6687_vm15, %v5721_v31, -1e+30 }
 0xfba   : > { %v6695_v18 = vmax.f32 %v6671_v60, %v6691_v27 }
 0xfbc   : > { %v6703_v50 = vadd.f32 %v6699_v32, %v6695_v18 }
 0xfbe   : > { %v6707_v2 = vmax.f32 %v6703_v50, 0.0 }
 0xfc0   : > { %v6711_v63 = vadd.f32 %v8741_v7, %v6707_v2 }
 0xfc2   : > { %6715 = vst [vmem:[%s11394_s27 + $0x10] sm:$0xff] %v6711_v63 }
 0xfc3   : > { %9097 = shalt.err (!%p9094_p2)
}
 0xfc4   : > { %s9098_s9 = scalar_lea.hbm %s11420_s3, 512  ;;  %s9102_s19 = scalar_lea.hbm %s11872_s7, 1024 }
 0xfc5   : > { %p9099_p9 = scmp.ne.s32.totalorder %s11420_s3, %s9098_s9  ;;  %p9103_p12 = scmp.lt.s32.totalorder %s11420_s3, %s11872_s7 }
 0xfc6   : > { %p9104_p1 = scmp.lt.s32.totalorder %s9102_s19, %s9098_s9 }
 0xfc7   : > { %p9100_p7 = pnand %p9099_p9, %p11873_p4 }
 0xfc8   : > { %p9105_p13 = por %p9104_p1, %p9103_p12 }
 0xfc9   : > { %p9101_p11 = pneg %p9100_p7 }
 0xfcb   : > { %p9106_p5 = pnand %p9105_p13, %p9101_p11 }
 0xfcd   : > { %9109 = shalt.err (!%p9106_p5)
}
 0xfce   : > { %s9210_s13 = smov 128   ;;  %s9211_s2 = smov 8  }
 0xfcf   : > { %8307 = dma.vmem_to_hbm [thread:$0]  (%p11873_p4), %s11422_s16, 512, %s11420_s3, %s6718_s12, %s9210_s13, %s9210_s13, %s9211_s2  }
 0xfd0 PF: > { %s6746_s6 = sand.u32 1, %s9164_s0   ;;  %p11874_p3 = scmp.ne.s32.totalorder %s11604_s22, 0 }
 0xfd1   : > { %p11875_p8 = scmp.ge.s32.totalorder %s9176_s21, 2  ;;  %s6747_s25 = scalar_lea.sflag [#allocation4], %s6746_s6 }
 0xfd3   : > { %p8351_p6 = pnand %p11875_p8, %p11874_p3 }
 0xfd5   : > { %p8352_p10 = pneg %p8351_p6 }
 0xfd7   : > { %9159 = dma.done.wait (%p8352_p10), %s6747_s25, 512  }
 0xfd8   : > { %9161 = vsyncadd (%p8352_p10), %s6747_s25, 4294966784  ;;  %p40_p0 = scmp.ge.s32.totalorder %s9467_s28, 4   ;;  %s11876_s0 = smov %s9168_s30 }
 0xfd9   : > { %s11877_s30 = smov %s9172_s20  ;;  %s11878_s20 = smov %s9479_s18 }
 0xfda   : > { %s11879_s21 = smov %s9467_s28  ;;  %42 = sbr.rel (!%p40_p0) target bundleno = 31 (0x1f), region = 211 }
 0xfdf   :  { %6752 = vsyncpa [#allocation3], 1 }
 0xfe0   :  { %6754 = vsyncpa [#allocation3 + $0x1], 1 }
 0xfe1   :  { %6755 = vsyncpa [#allocation6], 1 }
 0xfe2   :  { %6757 = vsyncpa [#allocation6 + $0x1], 1 }
 0xfe3   :  { %6758 = vsyncpa [#allocation9], 1 }
 0xfe4   :  { %6759 = vsyncpa [#allocation12], 1 }
 0xfe5   :  { %6760 = vsyncpa [#allocation15], 1 }
 0xfe6   :  { %6761 = vsyncpa [#allocation18], 1 }
 0xfe7   :  { %6762 = vsyncpa [#allocation21], 1 }
 0xfe8   :  { %6763 = vsyncpa [#allocation4], 1 }
 0xfe9   :  { %6765 = vsyncpa [#allocation4 + $0x1], 1 }

</bundles_post_ra>
